<compile_context>
chip_gen: v7x
topology: tpu7x:2x2x1
jax: 0.10.0
libtpu: 0.0.40
codegen_flags: <defaults>
</compile_context>

<pallas_src>
import functools

import jax
import jax.nn
import jax.numpy as jnp
from jax.experimental import pallas as pl
from jax.experimental.pallas import tpu as pltpu

# ---------------- model dimensions (small, lane-friendly) ----------------
B = 2          # batch
S = 8          # src sequence length
T = 8          # trg sequence length
E = 128        # embedding dim
H = 128        # hidden dim
SRC_VOCAB = 32
V = 128        # trg vocab (== decoder.fc_out.out_features)
# TODO(synk): if V grows to a realistic vocab (e.g. 32k), tile the V dimension
# of the merged fc_out weight and the logits with lane-dense blocks and set
# vmem_limit_bytes explicitly (mandatory on v7x's 64 MiB VMEM).
# TODO(synk): on v7x the two batch rows' decode recurrences could be split
# across the 2 TensorCores (core_parallel / pl.core_map); skipped at B=2 here.


# ============================ fused kernel ============================
def seq2seq_kernel(tf_ref,                     # SMEM (T-1,) int32 (prefetch)
                   xemb_ref,                   # (S, B, E)   bf16 src embeddings
                   tremb_ref,                  # (T-1, B, E) bf16 teacher embeddings
                   embtab_ref,                 # (V, E)      bf16 trg embedding table
                   enc_w_ref, enc_b_ref,       # (E+H, 4H) bf16, (1, 4H) f32
                   att_we_ref, att_wh_ref,     # (H, H) bf16 x2
                   att_b_ref, att_v_ref,       # (1, H) f32 x2
                   dec_w_ref, dec_b_ref,       # (E+2H, 4H) bf16, (1, 4H) f32
                   out_w_ref, out_b_ref,       # (2H+E, V) bf16, (1, V) f32
                   logits_ref,                 # (T-1, B, V) f32 output
                   enc_sc):                    # VMEM (S, B, H) f32 scratch
    f32 = jnp.float32
    bf16 = jnp.bfloat16

    # ---- hoisted resident weight / bias reads + broadcasts (once) ----
    enc_w = enc_w_ref[...]
    att_wh = att_wh_ref[...]
    dec_w = dec_w_ref[...]
    out_w = out_w_ref[...]
    embtab = embtab_ref[...]
    enc_b = jnp.broadcast_to(enc_b_ref[...], (B, 4 * H))
    dec_b = jnp.broadcast_to(dec_b_ref[...], (B, 4 * H))
    out_b = jnp.broadcast_to(out_b_ref[...], (B, V))
    v_bcast = jnp.broadcast_to(att_v_ref[...].reshape(1, 1, H), (S, B, H))
    col = jax.lax.broadcasted_iota(jnp.int32, (B, V), 1)

    # ================= encoder LSTM, unrolled over S =================
    h = jnp.zeros((B, H), f32)
    c = jnp.zeros((B, H), f32)
    for t in range(S):                                     # static unrolled
        xin = jnp.concatenate([xemb_ref[t], h.astype(bf16)], axis=-1)  # (B,E+H)
        gates = jnp.dot(xin, enc_w, preferred_element_type=f32) + enc_b
        i_g = jax.nn.sigmoid(gates[:, 0 * H:1 * H])
        f_g = jax.nn.sigmoid(gates[:, 1 * H:2 * H])
        g_g = jnp.tanh(gates[:, 2 * H:3 * H])
        o_g = jax.nn.sigmoid(gates[:, 3 * H:4 * H])
        c = f_g * c + i_g * g_g
        h = o_g * jnp.tanh(c)
        enc_sc[t] = h                                      # direct (B,H) store

    enc3 = enc_sc[...]                                     # (S, B, H) f32
    # hoisted attention key projection (+ bias): one (S*B,H)@(H,H) matmul
    enc2 = enc3.reshape(S * B, H)
    encp3 = (jnp.dot(enc2.astype(bf16), att_we_ref[...],
                     preferred_element_type=f32)
             + att_b_ref[...]).reshape(S, B, H)

    # ================= decoder, unrolled over steps t = 1 .. T-1 =================
    emb_prev = jnp.zeros((B, E), bf16)                     # previous greedy emb
    for idx in range(T - 1):                               # step t = idx + 1
        # ---- input embedding: teacher token vs previous-step greedy token ----
        if idx == 0:
            emb = tremb_ref[0]                             # trg[:,0] (always)
        else:
            # coin drawn at iteration idx gates the input of iteration idx+1
            emb = jnp.where(tf_ref[idx - 1] != 0, tremb_ref[idx], emb_prev)

        # ---- Bahdanau attention, batched over both batch rows ----
        h_proj = jnp.dot(h.astype(bf16), att_wh,
                         preferred_element_type=f32)       # (B, H)
        e = jnp.tanh(encp3 + h_proj[None, :, :])           # (S, B, H)
        sc = jnp.sum(e * v_bcast, axis=-1, keepdims=True)  # (S, B, 1)
        m = jnp.max(sc, axis=0, keepdims=True)
        ex = jnp.exp(sc - m)
        den = jnp.sum(ex, axis=0, keepdims=True)
        w = ex / den                                       # exact softmax
        ctx = jnp.sum(w * enc3, axis=0)                    # (B, H) f32

        # ---- decoder LSTM cell on [emb ; ctx ; h], merged weights ----
        din = jnp.concatenate([emb, ctx.astype(bf16), h.astype(bf16)], axis=-1)
        gates = jnp.dot(din, dec_w, preferred_element_type=f32) + dec_b
        i_g = jax.nn.sigmoid(gates[:, 0 * H:1 * H])
        f_g = jax.nn.sigmoid(gates[:, 1 * H:2 * H])
        g_g = jnp.tanh(gates[:, 2 * H:3 * H])
        o_g = jax.nn.sigmoid(gates[:, 3 * H:4 * H])
        c = f_g * c + i_g * g_g
        h = o_g * jnp.tanh(c)

        # ---- fc_out on [h_new ; ctx ; emb], merged weights ----
        oin = jnp.concatenate([h.astype(bf16), ctx.astype(bf16), emb], axis=-1)
        logits = jnp.dot(oin, out_w, preferred_element_type=f32) + out_b
        logits_ref[idx] = logits                           # (B, V) lane-dense

        # ---- greedy next-token embedding: one-hot(argmax) @ emb table ----
        max_v = jnp.max(logits, axis=-1, keepdims=True)
        first_idx = jnp.min(jnp.where(logits == max_v, col, V),
                            axis=-1, keepdims=True)        # first-tie argmax
        onehot = (col == first_idx).astype(bf16)           # (B, V)
        emb_prev = jnp.dot(onehot, embtab,
                           preferred_element_type=f32).astype(bf16)


def seq2seq_pallas(tf_flags, x_emb_t, emb_teacher, emb_tab,
                   enc_w, enc_b, att_we, att_wh, att_b, att_v,
                   dec_w, dec_b, out_w, out_b):
    def cf(shape):                           # constant, fully-resident block
        n = len(shape)
        return pl.BlockSpec(shape, lambda i, tf, _n=n: (0,) * _n)

    return pl.pallas_call(
        seq2seq_kernel,
        out_shape=jax.ShapeDtypeStruct((T - 1, B, V), jnp.float32),
        grid_spec=pltpu.PrefetchScalarGridSpec(
            num_scalar_prefetch=1,           # tf_flags -> SMEM
            grid=(1,),
            in_specs=[cf((S, B, E)),         # src embeddings
                      cf((T - 1, B, E)),     # teacher embeddings (resident)
                      cf((V, E)),            # trg embedding table
                      cf((E + H, 4 * H)), cf((1, 4 * H)),     # encoder LSTM
                      cf((H, H)), cf((H, H)),                 # att_We, att_Wh
                      cf((1, H)), cf((1, H)),                 # att_b, att_v
                      cf((E + 2 * H, 4 * H)), cf((1, 4 * H)),  # decoder LSTM
                      cf((2 * H + E, V)), cf((1, V))],         # fc_out
            out_specs=cf((T - 1, B, V)),
            scratch_shapes=[pltpu.VMEM((S, B, H), jnp.float32)]),
        compiler_params=pltpu.CompilerParams(
            dimension_semantics=("arbitrary",)),
    )(tf_flags, x_emb_t, emb_teacher, emb_tab,
      enc_w, enc_b, att_we, att_wh, att_b, att_v,
      dec_w, dec_b, out_w, out_b)


# ============================ parameter init ============================
def init_params(key):
    ks = jax.random.split(key, 16)
    sc = 0.08
    p = {}
    p["emb_src"] = sc * jax.random.normal(ks[0], (SRC_VOCAB, E), jnp.float32)
    p["emb_trg"] = sc * jax.random.normal(ks[1], (V, E), jnp.float32)
    # encoder LSTM
    p["enc_Wih"] = sc * jax.random.normal(ks[2], (E, 4 * H), jnp.float32)
    p["enc_Whh"] = sc * jax.random.normal(ks[3], (H, 4 * H), jnp.float32)
    p["enc_b"] = jnp.zeros((1, 4 * H), jnp.float32)
    # attention
    p["att_Wh"] = sc * jax.random.normal(ks[4], (H, H), jnp.float32)
    p["att_We"] = sc * jax.random.normal(ks[5], (H, H), jnp.float32)
    p["att_b"] = jnp.zeros((1, H), jnp.float32)
    p["att_v"] = sc * jax.random.normal(ks[6], (1, H), jnp.float32)
    # decoder LSTM (input = [emb ; ctx], plus hidden)
    p["dec_Wie"] = sc * jax.random.normal(ks[7], (E, 4 * H), jnp.float32)
    p["dec_Wic"] = sc * jax.random.normal(ks[8], (H, 4 * H), jnp.float32)
    p["dec_Whh"] = sc * jax.random.normal(ks[9], (H, 4 * H), jnp.float32)
    p["dec_b"] = jnp.zeros((1, 4 * H), jnp.float32)
    # fc_out on [h ; ctx ; emb]
    p["out_Wh"] = sc * jax.random.normal(ks[10], (H, V), jnp.float32)
    p["out_Wc"] = sc * jax.random.normal(ks[11], (H, V), jnp.float32)
    p["out_We"] = sc * jax.random.normal(ks[12], (E, V), jnp.float32)
    p["out_b"] = jnp.zeros((1, V), jnp.float32)
    return p


# ============================ full forward (jitted) ============================
@functools.partial(jax.jit, static_argnames=("teacher_forcing_ratio",))
def attn_seq2seq_forward(src, trg, params, key, teacher_forcing_ratio=0.5):
    bf16 = jnp.bfloat16

    # source embeddings, time-major (S, B, E)
    x_emb_t = jnp.transpose(params["emb_src"][src], (1, 0, 2)).astype(bf16)

    # teacher-forcing coins: one per decode iteration t = 1..T-1
    tf_flags = (jax.random.uniform(key, (T - 1,))
                < teacher_forcing_ratio).astype(jnp.int32)

    # teacher-token embeddings for steps t=1..T-1 (inputs trg[:, 0:T-1])
    emb_trg_bf = params["emb_trg"].astype(bf16)
    emb_teacher = jnp.transpose(emb_trg_bf[trg[:, :T - 1]], (1, 0, 2))  # (T-1,B,E)

    # pre-concatenated (merged) weights, MXU-native bf16
    enc_w = jnp.concatenate([params["enc_Wih"], params["enc_Whh"]],
                            axis=0).astype(bf16)                      # (E+H, 4H)
    dec_w = jnp.concatenate([params["dec_Wie"], params["dec_Wic"],
                             params["dec_Whh"]], axis=0).astype(bf16)  # (E+2H, 4H)
    out_w = jnp.concatenate([params["out_Wh"], params["out_Wc"],
                             params["out_We"]], axis=0).astype(bf16)   # (2H+E, V)

    logits_all = seq2seq_pallas(
        tf_flags, x_emb_t, emb_teacher, emb_trg_bf,
        enc_w, params["enc_b"],
        params["att_We"].astype(bf16), params["att_Wh"].astype(bf16),
        params["att_b"], params["att_v"],
        dec_w, params["dec_b"], out_w, params["out_b"])       # (T-1, B, V)

    # outputs[:, 0] stays zero, matching the PyTorch reference
    outputs = jnp.concatenate(
        [jnp.zeros((B, 1, V), jnp.float32),
         jnp.transpose(logits_all, (1, 0, 2))], axis=1)       # (B, T, V)
    return outputs


# ============================ main ============================
if __name__ == "__main__":
    root = jax.random.PRNGKey(0)
    kp, ks, kt, kr = jax.random.split(root, 4)

    params = init_params(kp)
    src = jax.random.randint(ks, (B, S), 0, SRC_VOCAB, dtype=jnp.int32)
    trg = jax.random.randint(kt, (B, T), 0, V, dtype=jnp.int32)

    outputs = attn_seq2seq_forward(src, trg, params, kr,
                                   teacher_forcing_ratio=0.5)
    outputs = jax.block_until_ready(outputs)

    assert outputs.shape == (B, T, V)
    assert bool(jnp.all(outputs[:, 0] == 0.0))
    assert bool(jnp.all(jnp.isfinite(outputs)))
    print("KERNEL_OK")
</pallas_src>

<mosaic_0001>
module attributes {stable_mosaic.version = 11 : i64} {
  func.func @seq2seq_kernel(%arg0: i32, %arg1: memref<7xi32, #tpu.memory_space<smem>>, %arg2: memref<8x2x128xbf16, #tpu.memory_space<vmem>>, %arg3: memref<7x2x128xbf16, #tpu.memory_space<vmem>>, %arg4: memref<128x128xbf16, #tpu.memory_space<vmem>>, %arg5: memref<256x512xbf16, #tpu.memory_space<vmem>>, %arg6: memref<1x512xf32, #tpu.memory_space<vmem>>, %arg7: memref<128x128xbf16, #tpu.memory_space<vmem>>, %arg8: memref<128x128xbf16, #tpu.memory_space<vmem>>, %arg9: memref<1x128xf32, #tpu.memory_space<vmem>>, %arg10: memref<1x128xf32, #tpu.memory_space<vmem>>, %arg11: memref<384x512xbf16, #tpu.memory_space<vmem>>, %arg12: memref<1x512xf32, #tpu.memory_space<vmem>>, %arg13: memref<384x128xbf16, #tpu.memory_space<vmem>>, %arg14: memref<1x128xf32, #tpu.memory_space<vmem>>, %arg15: memref<7x2x128xf32, #tpu.memory_space<vmem>>, %arg16: memref<8x2x128xf32, #tpu.memory_space<vmem>>) attributes {dimension_semantics = [#tpu.dimension_semantics<arbitrary>], iteration_bounds = array<i64: 1>, scalar_prefetch = 1 : i64, scratch_operands = 1 : i64, tpu.core_type = #tpu.core_type<tc>, window_params = [{pipeline_mode = #tpu.pipeline_mode<synchronous>, transform_indices = @transform_0, window_bounds = array<i64: 8, 2, 128>}, {pipeline_mode = #tpu.pipeline_mode<synchronous>, transform_indices = @transform_1, window_bounds = array<i64: 7, 2, 128>}, {pipeline_mode = #tpu.pipeline_mode<synchronous>, transform_indices = @transform_2, window_bounds = array<i64: 128, 128>}, {pipeline_mode = #tpu.pipeline_mode<synchronous>, transform_indices = @transform_3, window_bounds = array<i64: 256, 512>}, {pipeline_mode = #tpu.pipeline_mode<synchronous>, transform_indices = @transform_4, window_bounds = array<i64: 1, 512>}, {pipeline_mode = #tpu.pipeline_mode<synchronous>, transform_indices = @transform_5, window_bounds = array<i64: 128, 128>}, {pipeline_mode = #tpu.pipeline_mode<synchronous>, transform_indices = @transform_6, window_bounds = array<i64: 128, 128>}, {pipeline_mode = #tpu.pipeline_mode<synchronous>, transform_indices = @transform_7, window_bounds = array<i64: 1, 128>}, {pipeline_mode = #tpu.pipeline_mode<synchronous>, transform_indices = @transform_8, window_bounds = array<i64: 1, 128>}, {pipeline_mode = #tpu.pipeline_mode<synchronous>, transform_indices = @transform_9, window_bounds = array<i64: 384, 512>}, {pipeline_mode = #tpu.pipeline_mode<synchronous>, transform_indices = @transform_10, window_bounds = array<i64: 1, 512>}, {pipeline_mode = #tpu.pipeline_mode<synchronous>, transform_indices = @transform_11, window_bounds = array<i64: 384, 128>}, {pipeline_mode = #tpu.pipeline_mode<synchronous>, transform_indices = @transform_12, window_bounds = array<i64: 1, 128>}, {pipeline_mode = #tpu.pipeline_mode<synchronous>, transform_indices = @transform_13, window_bounds = array<i64: 7, 2, 128>}]} {
    %c0 = arith.constant 0 : index
    %c0_0 = arith.constant 0 : index
    %0 = vector.load %arg5[%c0, %c0_0] : memref<256x512xbf16, #tpu.memory_space<vmem>>, vector<256x512xbf16>
    %c0_1 = arith.constant 0 : index
    %c0_2 = arith.constant 0 : index
    %1 = vector.load %arg8[%c0_1, %c0_2] : memref<128x128xbf16, #tpu.memory_space<vmem>>, vector<128x128xbf16>
    %c0_3 = arith.constant 0 : index
    %c0_4 = arith.constant 0 : index
    %2 = vector.load %arg11[%c0_3, %c0_4] : memref<384x512xbf16, #tpu.memory_space<vmem>>, vector<384x512xbf16>
    %c0_5 = arith.constant 0 : index
    %c0_6 = arith.constant 0 : index
    %3 = vector.load %arg13[%c0_5, %c0_6] : memref<384x128xbf16, #tpu.memory_space<vmem>>, vector<384x128xbf16>
    %c0_7 = arith.constant 0 : index
    %c0_8 = arith.constant 0 : index
    %4 = vector.load %arg4[%c0_7, %c0_8] : memref<128x128xbf16, #tpu.memory_space<vmem>>, vector<128x128xbf16>
    %c0_9 = arith.constant 0 : index
    %c0_10 = arith.constant 0 : index
    %5 = vector.load %arg6[%c0_9, %c0_10] : memref<1x512xf32, #tpu.memory_space<vmem>>, vector<1x512xf32>
    %6 = vector.shape_cast %5 : vector<1x512xf32> to vector<1x512xf32>
    %7 = vector.broadcast %6 : vector<1x512xf32> to vector<2x512xf32>
    %c0_11 = arith.constant 0 : index
    %c0_12 = arith.constant 0 : index
    %8 = vector.load %arg12[%c0_11, %c0_12] : memref<1x512xf32, #tpu.memory_space<vmem>>, vector<1x512xf32>
    %9 = vector.shape_cast %8 : vector<1x512xf32> to vector<1x512xf32>
    %10 = vector.broadcast %9 : vector<1x512xf32> to vector<2x512xf32>
    %c0_13 = arith.constant 0 : index
    %c0_14 = arith.constant 0 : index
    %11 = vector.load %arg14[%c0_13, %c0_14] : memref<1x128xf32, #tpu.memory_space<vmem>>, vector<1x128xf32>
    %12 = vector.shape_cast %11 : vector<1x128xf32> to vector<1x128xf32>
    %13 = vector.broadcast %12 : vector<1x128xf32> to vector<2x128xf32>
    %c0_15 = arith.constant 0 : index
    %c0_16 = arith.constant 0 : index
    %14 = vector.load %arg10[%c0_15, %c0_16] : memref<1x128xf32, #tpu.memory_space<vmem>>, vector<1x128xf32>
    %15 = vector.shape_cast %14 : vector<1x128xf32> to vector<1x1x128xf32>
    %16 = vector.shape_cast %15 : vector<1x1x128xf32> to vector<1x1x128xf32>
    %17 = vector.broadcast %16 : vector<1x1x128xf32> to vector<8x2x128xf32>
    %18 = tpu.iota {dimensions = array<i32: 1>} : vector<2x128xi32>
    %cst = arith.constant 0.000000e+00 : f32
    %19 = vector.broadcast %cst : f32 to vector<2x128xf32>
    %cst_17 = arith.constant 0.000000e+00 : f32
    %20 = vector.broadcast %cst_17 : f32 to vector<2x128xf32>
    %c0_18 = arith.constant 0 : index
    %c0_19 = arith.constant 0 : index
    %c0_20 = arith.constant 0 : index
    %21 = vector.load %arg2[%c0_18, %c0_19, %c0_20] : memref<8x2x128xbf16, #tpu.memory_space<vmem>>, vector<1x2x128xbf16>
    %22 = vector.shape_cast %21 : vector<1x2x128xbf16> to vector<2x128xbf16>
    %23 = arith.truncf %19 : vector<2x128xf32> to vector<2x128xbf16>
    %24 = tpu.concatenate %22, %23 in 1 : vector<2x128xbf16>, vector<2x128xbf16> -> vector<2x256xbf16>
    %cst_21 = arith.constant dense<0.000000e+00> : vector<2x512xf32>
    %25 = tpu.matmul %24, %0, %cst_21 {dimension_numbers = #tpu.dot_dimension_numbers<[1], [0], [0], [1], [0, 0, 1, 1], [], []>} : vector<2x256xbf16>, vector<256x512xbf16>, vector<2x512xf32> -> vector<2x512xf32>
    %26 = arith.addf %25, %7 : vector<2x512xf32>
    %27 = vector.extract_strided_slice %26 {offsets = [0, 0], sizes = [2, 128], strides = [1, 1]} : vector<2x512xf32> to vector<2x128xf32>
    %28 = arith.negf %27 : vector<2x128xf32>
    %29 = math.exp %28 : vector<2x128xf32>
    %cst_22 = arith.constant 1.000000e+00 : f32
    %30 = vector.broadcast %cst_22 : f32 to vector<2x128xf32>
    %31 = arith.addf %30, %29 : vector<2x128xf32>
    %32 = arith.divf %30, %31 : vector<2x128xf32>
    %33 = vector.extract_strided_slice %26 {offsets = [0, 128], sizes = [2, 128], strides = [1, 1]} : vector<2x512xf32> to vector<2x128xf32>
    %34 = arith.negf %33 : vector<2x128xf32>
    %35 = math.exp %34 : vector<2x128xf32>
    %cst_23 = arith.constant 1.000000e+00 : f32
    %36 = vector.broadcast %cst_23 : f32 to vector<2x128xf32>
    %37 = arith.addf %36, %35 : vector<2x128xf32>
    %38 = arith.divf %36, %37 : vector<2x128xf32>
    %39 = vector.extract_strided_slice %26 {offsets = [0, 256], sizes = [2, 128], strides = [1, 1]} : vector<2x512xf32> to vector<2x128xf32>
    %40 = math.tanh %39 : vector<2x128xf32>
    %41 = vector.extract_strided_slice %26 {offsets = [0, 384], sizes = [2, 128], strides = [1, 1]} : vector<2x512xf32> to vector<2x128xf32>
    %42 = arith.negf %41 : vector<2x128xf32>
    %43 = math.exp %42 : vector<2x128xf32>
    %cst_24 = arith.constant 1.000000e+00 : f32
    %44 = vector.broadcast %cst_24 : f32 to vector<2x128xf32>
    %45 = arith.addf %44, %43 : vector<2x128xf32>
    %46 = arith.divf %44, %45 : vector<2x128xf32>
    %47 = arith.mulf %38, %20 : vector<2x128xf32>
    %48 = arith.mulf %32, %40 : vector<2x128xf32>
    %49 = arith.addf %47, %48 : vector<2x128xf32>
    %50 = math.tanh %49 : vector<2x128xf32>
    %51 = arith.mulf %46, %50 : vector<2x128xf32>
    %c0_25 = arith.constant 0 : index
    %c0_26 = arith.constant 0 : index
    %c0_27 = arith.constant 0 : index
    %52 = vector.load %arg16[%c0_25, %c0_26, %c0_27] : memref<8x2x128xf32, #tpu.memory_space<vmem>>, vector<1x2x128xf32>
    %53 = vector.shape_cast %52 : vector<1x2x128xf32> to vector<2x128xf32>
    %54 = vector.shape_cast %51 : vector<2x128xf32> to vector<1x2x128xf32>
    tpu.vector_store %arg16[%c0_25, %c0_26, %c0_27], %54 {strides = array<i32>} : memref<8x2x128xf32, #tpu.memory_space<vmem>>, vector<1x2x128xf32>,
    %c1 = arith.constant 1 : index
    %c0_28 = arith.constant 0 : index
    %c0_29 = arith.constant 0 : index
    %55 = vector.load %arg2[%c1, %c0_28, %c0_29] : memref<8x2x128xbf16, #tpu.memory_space<vmem>>, vector<1x2x128xbf16>
    %56 = vector.shape_cast %55 : vector<1x2x128xbf16> to vector<2x128xbf16>
    %57 = arith.truncf %51 : vector<2x128xf32> to vector<2x128xbf16>
    %58 = tpu.concatenate %56, %57 in 1 : vector<2x128xbf16>, vector<2x128xbf16> -> vector<2x256xbf16>
    %cst_30 = arith.constant dense<0.000000e+00> : vector<2x512xf32>
    %59 = tpu.matmul %58, %0, %cst_30 {dimension_numbers = #tpu.dot_dimension_numbers<[1], [0], [0], [1], [0, 0, 1, 1], [], []>} : vector<2x256xbf16>, vector<256x512xbf16>, vector<2x512xf32> -> vector<2x512xf32>
    %60 = arith.addf %59, %7 : vector<2x512xf32>
    %61 = vector.extract_strided_slice %60 {offsets = [0, 0], sizes = [2, 128], strides = [1, 1]} : vector<2x512xf32> to vector<2x128xf32>
    %62 = arith.negf %61 : vector<2x128xf32>
    %63 = math.exp %62 : vector<2x128xf32>
    %cst_31 = arith.constant 1.000000e+00 : f32
    %64 = vector.broadcast %cst_31 : f32 to vector<2x128xf32>
    %65 = arith.addf %64, %63 : vector<2x128xf32>
    %66 = arith.divf %64, %65 : vector<2x128xf32>
    %67 = vector.extract_strided_slice %60 {offsets = [0, 128], sizes = [2, 128], strides = [1, 1]} : vector<2x512xf32> to vector<2x128xf32>
    %68 = arith.negf %67 : vector<2x128xf32>
    %69 = math.exp %68 : vector<2x128xf32>
    %cst_32 = arith.constant 1.000000e+00 : f32
    %70 = vector.broadcast %cst_32 : f32 to vector<2x128xf32>
    %71 = arith.addf %70, %69 : vector<2x128xf32>
    %72 = arith.divf %70, %71 : vector<2x128xf32>
    %73 = vector.extract_strided_slice %60 {offsets = [0, 256], sizes = [2, 128], strides = [1, 1]} : vector<2x512xf32> to vector<2x128xf32>
    %74 = math.tanh %73 : vector<2x128xf32>
    %75 = vector.extract_strided_slice %60 {offsets = [0, 384], sizes = [2, 128], strides = [1, 1]} : vector<2x512xf32> to vector<2x128xf32>
    %76 = arith.negf %75 : vector<2x128xf32>
    %77 = math.exp %76 : vector<2x128xf32>
    %cst_33 = arith.constant 1.000000e+00 : f32
    %78 = vector.broadcast %cst_33 : f32 to vector<2x128xf32>
    %79 = arith.addf %78, %77 : vector<2x128xf32>
    %80 = arith.divf %78, %79 : vector<2x128xf32>
    %81 = arith.mulf %72, %49 : vector<2x128xf32>
    %82 = arith.mulf %66, %74 : vector<2x128xf32>
    %83 = arith.addf %81, %82 : vector<2x128xf32>
    %84 = math.tanh %83 : vector<2x128xf32>
    %85 = arith.mulf %80, %84 : vector<2x128xf32>
    %c1_34 = arith.constant 1 : index
    %c0_35 = arith.constant 0 : index
    %c0_36 = arith.constant 0 : index
    %86 = vector.load %arg16[%c1_34, %c0_35, %c0_36] : memref<8x2x128xf32, #tpu.memory_space<vmem>>, vector<1x2x128xf32>
    %87 = vector.shape_cast %86 : vector<1x2x128xf32> to vector<2x128xf32>
    %88 = vector.shape_cast %85 : vector<2x128xf32> to vector<1x2x128xf32>
    tpu.vector_store %arg16[%c1_34, %c0_35, %c0_36], %88 {strides = array<i32>} : memref<8x2x128xf32, #tpu.memory_space<vmem>>, vector<1x2x128xf32>,
    %c2 = arith.constant 2 : index
    %c0_37 = arith.constant 0 : index
    %c0_38 = arith.constant 0 : index
    %89 = vector.load %arg2[%c2, %c0_37, %c0_38] : memref<8x2x128xbf16, #tpu.memory_space<vmem>>, vector<1x2x128xbf16>
    %90 = vector.shape_cast %89 : vector<1x2x128xbf16> to vector<2x128xbf16>
    %91 = arith.truncf %85 : vector<2x128xf32> to vector<2x128xbf16>
    %92 = tpu.concatenate %90, %91 in 1 : vector<2x128xbf16>, vector<2x128xbf16> -> vector<2x256xbf16>
    %cst_39 = arith.constant dense<0.000000e+00> : vector<2x512xf32>
    %93 = tpu.matmul %92, %0, %cst_39 {dimension_numbers = #tpu.dot_dimension_numbers<[1], [0], [0], [1], [0, 0, 1, 1], [], []>} : vector<2x256xbf16>, vector<256x512xbf16>, vector<2x512xf32> -> vector<2x512xf32>
    %94 = arith.addf %93, %7 : vector<2x512xf32>
    %95 = vector.extract_strided_slice %94 {offsets = [0, 0], sizes = [2, 128], strides = [1, 1]} : vector<2x512xf32> to vector<2x128xf32>
    %96 = arith.negf %95 : vector<2x128xf32>
    %97 = math.exp %96 : vector<2x128xf32>
    %cst_40 = arith.constant 1.000000e+00 : f32
    %98 = vector.broadcast %cst_40 : f32 to vector<2x128xf32>
    %99 = arith.addf %98, %97 : vector<2x128xf32>
    %100 = arith.divf %98, %99 : vector<2x128xf32>
    %101 = vector.extract_strided_slice %94 {offsets = [0, 128], sizes = [2, 128], strides = [1, 1]} : vector<2x512xf32> to vector<2x128xf32>
    %102 = arith.negf %101 : vector<2x128xf32>
    %103 = math.exp %102 : vector<2x128xf32>
    %cst_41 = arith.constant 1.000000e+00 : f32
    %104 = vector.broadcast %cst_41 : f32 to vector<2x128xf32>
    %105 = arith.addf %104, %103 : vector<2x128xf32>
    %106 = arith.divf %104, %105 : vector<2x128xf32>
    %107 = vector.extract_strided_slice %94 {offsets = [0, 256], sizes = [2, 128], strides = [1, 1]} : vector<2x512xf32> to vector<2x128xf32>
    %108 = math.tanh %107 : vector<2x128xf32>
    %109 = vector.extract_strided_slice %94 {offsets = [0, 384], sizes = [2, 128], strides = [1, 1]} : vector<2x512xf32> to vector<2x128xf32>
    %110 = arith.negf %109 : vector<2x128xf32>
    %111 = math.exp %110 : vector<2x128xf32>
    %cst_42 = arith.constant 1.000000e+00 : f32
    %112 = vector.broadcast %cst_42 : f32 to vector<2x128xf32>
    %113 = arith.addf %112, %111 : vector<2x128xf32>
    %114 = arith.divf %112, %113 : vector<2x128xf32>
    %115 = arith.mulf %106, %83 : vector<2x128xf32>
    %116 = arith.mulf %100, %108 : vector<2x128xf32>
    %117 = arith.addf %115, %116 : vector<2x128xf32>
    %118 = math.tanh %117 : vector<2x128xf32>
    %119 = arith.mulf %114, %118 : vector<2x128xf32>
    %c2_43 = arith.constant 2 : index
    %c0_44 = arith.constant 0 : index
    %c0_45 = arith.constant 0 : index
    %120 = vector.load %arg16[%c2_43, %c0_44, %c0_45] : memref<8x2x128xf32, #tpu.memory_space<vmem>>, vector<1x2x128xf32>
    %121 = vector.shape_cast %120 : vector<1x2x128xf32> to vector<2x128xf32>
    %122 = vector.shape_cast %119 : vector<2x128xf32> to vector<1x2x128xf32>
    tpu.vector_store %arg16[%c2_43, %c0_44, %c0_45], %122 {strides = array<i32>} : memref<8x2x128xf32, #tpu.memory_space<vmem>>, vector<1x2x128xf32>,
    %c3 = arith.constant 3 : index
    %c0_46 = arith.constant 0 : index
    %c0_47 = arith.constant 0 : index
    %123 = vector.load %arg2[%c3, %c0_46, %c0_47] : memref<8x2x128xbf16, #tpu.memory_space<vmem>>, vector<1x2x128xbf16>
    %124 = vector.shape_cast %123 : vector<1x2x128xbf16> to vector<2x128xbf16>
    %125 = arith.truncf %119 : vector<2x128xf32> to vector<2x128xbf16>
    %126 = tpu.concatenate %124, %125 in 1 : vector<2x128xbf16>, vector<2x128xbf16> -> vector<2x256xbf16>
    %cst_48 = arith.constant dense<0.000000e+00> : vector<2x512xf32>
    %127 = tpu.matmul %126, %0, %cst_48 {dimension_numbers = #tpu.dot_dimension_numbers<[1], [0], [0], [1], [0, 0, 1, 1], [], []>} : vector<2x256xbf16>, vector<256x512xbf16>, vector<2x512xf32> -> vector<2x512xf32>
    %128 = arith.addf %127, %7 : vector<2x512xf32>
    %129 = vector.extract_strided_slice %128 {offsets = [0, 0], sizes = [2, 128], strides = [1, 1]} : vector<2x512xf32> to vector<2x128xf32>
    %130 = arith.negf %129 : vector<2x128xf32>
    %131 = math.exp %130 : vector<2x128xf32>
    %cst_49 = arith.constant 1.000000e+00 : f32
    %132 = vector.broadcast %cst_49 : f32 to vector<2x128xf32>
    %133 = arith.addf %132, %131 : vector<2x128xf32>
    %134 = arith.divf %132, %133 : vector<2x128xf32>
    %135 = vector.extract_strided_slice %128 {offsets = [0, 128], sizes = [2, 128], strides = [1, 1]} : vector<2x512xf32> to vector<2x128xf32>
    %136 = arith.negf %135 : vector<2x128xf32>
    %137 = math.exp %136 : vector<2x128xf32>
    %cst_50 = arith.constant 1.000000e+00 : f32
    %138 = vector.broadcast %cst_50 : f32 to vector<2x128xf32>
    %139 = arith.addf %138, %137 : vector<2x128xf32>
    %140 = arith.divf %138, %139 : vector<2x128xf32>
    %141 = vector.extract_strided_slice %128 {offsets = [0, 256], sizes = [2, 128], strides = [1, 1]} : vector<2x512xf32> to vector<2x128xf32>
    %142 = math.tanh %141 : vector<2x128xf32>
    %143 = vector.extract_strided_slice %128 {offsets = [0, 384], sizes = [2, 128], strides = [1, 1]} : vector<2x512xf32> to vector<2x128xf32>
    %144 = arith.negf %143 : vector<2x128xf32>
    %145 = math.exp %144 : vector<2x128xf32>
    %cst_51 = arith.constant 1.000000e+00 : f32
    %146 = vector.broadcast %cst_51 : f32 to vector<2x128xf32>
    %147 = arith.addf %146, %145 : vector<2x128xf32>
    %148 = arith.divf %146, %147 : vector<2x128xf32>
    %149 = arith.mulf %140, %117 : vector<2x128xf32>
    %150 = arith.mulf %134, %142 : vector<2x128xf32>
    %151 = arith.addf %149, %150 : vector<2x128xf32>
    %152 = math.tanh %151 : vector<2x128xf32>
    %153 = arith.mulf %148, %152 : vector<2x128xf32>
    %c3_52 = arith.constant 3 : index
    %c0_53 = arith.constant 0 : index
    %c0_54 = arith.constant 0 : index
    %154 = vector.load %arg16[%c3_52, %c0_53, %c0_54] : memref<8x2x128xf32, #tpu.memory_space<vmem>>, vector<1x2x128xf32>
    %155 = vector.shape_cast %154 : vector<1x2x128xf32> to vector<2x128xf32>
    %156 = vector.shape_cast %153 : vector<2x128xf32> to vector<1x2x128xf32>
    tpu.vector_store %arg16[%c3_52, %c0_53, %c0_54], %156 {strides = array<i32>} : memref<8x2x128xf32, #tpu.memory_space<vmem>>, vector<1x2x128xf32>,
    %c4 = arith.constant 4 : index
    %c0_55 = arith.constant 0 : index
    %c0_56 = arith.constant 0 : index
    %157 = vector.load %arg2[%c4, %c0_55, %c0_56] : memref<8x2x128xbf16, #tpu.memory_space<vmem>>, vector<1x2x128xbf16>
    %158 = vector.shape_cast %157 : vector<1x2x128xbf16> to vector<2x128xbf16>
    %159 = arith.truncf %153 : vector<2x128xf32> to vector<2x128xbf16>
    %160 = tpu.concatenate %158, %159 in 1 : vector<2x128xbf16>, vector<2x128xbf16> -> vector<2x256xbf16>
    %cst_57 = arith.constant dense<0.000000e+00> : vector<2x512xf32>
    %161 = tpu.matmul %160, %0, %cst_57 {dimension_numbers = #tpu.dot_dimension_numbers<[1], [0], [0], [1], [0, 0, 1, 1], [], []>} : vector<2x256xbf16>, vector<256x512xbf16>, vector<2x512xf32> -> vector<2x512xf32>
    %162 = arith.addf %161, %7 : vector<2x512xf32>
    %163 = vector.extract_strided_slice %162 {offsets = [0, 0], sizes = [2, 128], strides = [1, 1]} : vector<2x512xf32> to vector<2x128xf32>
    %164 = arith.negf %163 : vector<2x128xf32>
    %165 = math.exp %164 : vector<2x128xf32>
    %cst_58 = arith.constant 1.000000e+00 : f32
    %166 = vector.broadcast %cst_58 : f32 to vector<2x128xf32>
    %167 = arith.addf %166, %165 : vector<2x128xf32>
    %168 = arith.divf %166, %167 : vector<2x128xf32>
    %169 = vector.extract_strided_slice %162 {offsets = [0, 128], sizes = [2, 128], strides = [1, 1]} : vector<2x512xf32> to vector<2x128xf32>
    %170 = arith.negf %169 : vector<2x128xf32>
    %171 = math.exp %170 : vector<2x128xf32>
    %cst_59 = arith.constant 1.000000e+00 : f32
    %172 = vector.broadcast %cst_59 : f32 to vector<2x128xf32>
    %173 = arith.addf %172, %171 : vector<2x128xf32>
    %174 = arith.divf %172, %173 : vector<2x128xf32>
    %175 = vector.extract_strided_slice %162 {offsets = [0, 256], sizes = [2, 128], strides = [1, 1]} : vector<2x512xf32> to vector<2x128xf32>
    %176 = math.tanh %175 : vector<2x128xf32>
    %177 = vector.extract_strided_slice %162 {offsets = [0, 384], sizes = [2, 128], strides = [1, 1]} : vector<2x512xf32> to vector<2x128xf32>
    %178 = arith.negf %177 : vector<2x128xf32>
    %179 = math.exp %178 : vector<2x128xf32>
    %cst_60 = arith.constant 1.000000e+00 : f32
    %180 = vector.broadcast %cst_60 : f32 to vector<2x128xf32>
    %181 = arith.addf %180, %179 : vector<2x128xf32>
    %182 = arith.divf %180, %181 : vector<2x128xf32>
    %183 = arith.mulf %174, %151 : vector<2x128xf32>
    %184 = arith.mulf %168, %176 : vector<2x128xf32>
    %185 = arith.addf %183, %184 : vector<2x128xf32>
    %186 = math.tanh %185 : vector<2x128xf32>
    %187 = arith.mulf %182, %186 : vector<2x128xf32>
    %c4_61 = arith.constant 4 : index
    %c0_62 = arith.constant 0 : index
    %c0_63 = arith.constant 0 : index
    %188 = vector.load %arg16[%c4_61, %c0_62, %c0_63] : memref<8x2x128xf32, #tpu.memory_space<vmem>>, vector<1x2x128xf32>
    %189 = vector.shape_cast %188 : vector<1x2x128xf32> to vector<2x128xf32>
    %190 = vector.shape_cast %187 : vector<2x128xf32> to vector<1x2x128xf32>
    tpu.vector_store %arg16[%c4_61, %c0_62, %c0_63], %190 {strides = array<i32>} : memref<8x2x128xf32, #tpu.memory_space<vmem>>, vector<1x2x128xf32>,
    %c5 = arith.constant 5 : index
    %c0_64 = arith.constant 0 : index
    %c0_65 = arith.constant 0 : index
    %191 = vector.load %arg2[%c5, %c0_64, %c0_65] : memref<8x2x128xbf16, #tpu.memory_space<vmem>>, vector<1x2x128xbf16>
    %192 = vector.shape_cast %191 : vector<1x2x128xbf16> to vector<2x128xbf16>
    %193 = arith.truncf %187 : vector<2x128xf32> to vector<2x128xbf16>
    %194 = tpu.concatenate %192, %193 in 1 : vector<2x128xbf16>, vector<2x128xbf16> -> vector<2x256xbf16>
    %cst_66 = arith.constant dense<0.000000e+00> : vector<2x512xf32>
    %195 = tpu.matmul %194, %0, %cst_66 {dimension_numbers = #tpu.dot_dimension_numbers<[1], [0], [0], [1], [0, 0, 1, 1], [], []>} : vector<2x256xbf16>, vector<256x512xbf16>, vector<2x512xf32> -> vector<2x512xf32>
    %196 = arith.addf %195, %7 : vector<2x512xf32>
    %197 = vector.extract_strided_slice %196 {offsets = [0, 0], sizes = [2, 128], strides = [1, 1]} : vector<2x512xf32> to vector<2x128xf32>
    %198 = arith.negf %197 : vector<2x128xf32>
    %199 = math.exp %198 : vector<2x128xf32>
    %cst_67 = arith.constant 1.000000e+00 : f32
    %200 = vector.broadcast %cst_67 : f32 to vector<2x128xf32>
    %201 = arith.addf %200, %199 : vector<2x128xf32>
    %202 = arith.divf %200, %201 : vector<2x128xf32>
    %203 = vector.extract_strided_slice %196 {offsets = [0, 128], sizes = [2, 128], strides = [1, 1]} : vector<2x512xf32> to vector<2x128xf32>
    %204 = arith.negf %203 : vector<2x128xf32>
    %205 = math.exp %204 : vector<2x128xf32>
    %cst_68 = arith.constant 1.000000e+00 : f32
    %206 = vector.broadcast %cst_68 : f32 to vector<2x128xf32>
    %207 = arith.addf %206, %205 : vector<2x128xf32>
    %208 = arith.divf %206, %207 : vector<2x128xf32>
    %209 = vector.extract_strided_slice %196 {offsets = [0, 256], sizes = [2, 128], strides = [1, 1]} : vector<2x512xf32> to vector<2x128xf32>
    %210 = math.tanh %209 : vector<2x128xf32>
    %211 = vector.extract_strided_slice %196 {offsets = [0, 384], sizes = [2, 128], strides = [1, 1]} : vector<2x512xf32> to vector<2x128xf32>
    %212 = arith.negf %211 : vector<2x128xf32>
    %213 = math.exp %212 : vector<2x128xf32>
    %cst_69 = arith.constant 1.000000e+00 : f32
    %214 = vector.broadcast %cst_69 : f32 to vector<2x128xf32>
    %215 = arith.addf %214, %213 : vector<2x128xf32>
    %216 = arith.divf %214, %215 : vector<2x128xf32>
    %217 = arith.mulf %208, %185 : vector<2x128xf32>
    %218 = arith.mulf %202, %210 : vector<2x128xf32>
    %219 = arith.addf %217, %218 : vector<2x128xf32>
    %220 = math.tanh %219 : vector<2x128xf32>
    %221 = arith.mulf %216, %220 : vector<2x128xf32>
    %c5_70 = arith.constant 5 : index
    %c0_71 = arith.constant 0 : index
    %c0_72 = arith.constant 0 : index
    %222 = vector.load %arg16[%c5_70, %c0_71, %c0_72] : memref<8x2x128xf32, #tpu.memory_space<vmem>>, vector<1x2x128xf32>
    %223 = vector.shape_cast %222 : vector<1x2x128xf32> to vector<2x128xf32>
    %224 = vector.shape_cast %221 : vector<2x128xf32> to vector<1x2x128xf32>
    tpu.vector_store %arg16[%c5_70, %c0_71, %c0_72], %224 {strides = array<i32>} : memref<8x2x128xf32, #tpu.memory_space<vmem>>, vector<1x2x128xf32>,
    %c6 = arith.constant 6 : index
    %c0_73 = arith.constant 0 : index
    %c0_74 = arith.constant 0 : index
    %225 = vector.load %arg2[%c6, %c0_73, %c0_74] : memref<8x2x128xbf16, #tpu.memory_space<vmem>>, vector<1x2x128xbf16>
    %226 = vector.shape_cast %225 : vector<1x2x128xbf16> to vector<2x128xbf16>
    %227 = arith.truncf %221 : vector<2x128xf32> to vector<2x128xbf16>
    %228 = tpu.concatenate %226, %227 in 1 : vector<2x128xbf16>, vector<2x128xbf16> -> vector<2x256xbf16>
    %cst_75 = arith.constant dense<0.000000e+00> : vector<2x512xf32>
    %229 = tpu.matmul %228, %0, %cst_75 {dimension_numbers = #tpu.dot_dimension_numbers<[1], [0], [0], [1], [0, 0, 1, 1], [], []>} : vector<2x256xbf16>, vector<256x512xbf16>, vector<2x512xf32> -> vector<2x512xf32>
    %230 = arith.addf %229, %7 : vector<2x512xf32>
    %231 = vector.extract_strided_slice %230 {offsets = [0, 0], sizes = [2, 128], strides = [1, 1]} : vector<2x512xf32> to vector<2x128xf32>
    %232 = arith.negf %231 : vector<2x128xf32>
    %233 = math.exp %232 : vector<2x128xf32>
    %cst_76 = arith.constant 1.000000e+00 : f32
    %234 = vector.broadcast %cst_76 : f32 to vector<2x128xf32>
    %235 = arith.addf %234, %233 : vector<2x128xf32>
    %236 = arith.divf %234, %235 : vector<2x128xf32>
    %237 = vector.extract_strided_slice %230 {offsets = [0, 128], sizes = [2, 128], strides = [1, 1]} : vector<2x512xf32> to vector<2x128xf32>
    %238 = arith.negf %237 : vector<2x128xf32>
    %239 = math.exp %238 : vector<2x128xf32>
    %cst_77 = arith.constant 1.000000e+00 : f32
    %240 = vector.broadcast %cst_77 : f32 to vector<2x128xf32>
    %241 = arith.addf %240, %239 : vector<2x128xf32>
    %242 = arith.divf %240, %241 : vector<2x128xf32>
    %243 = vector.extract_strided_slice %230 {offsets = [0, 256], sizes = [2, 128], strides = [1, 1]} : vector<2x512xf32> to vector<2x128xf32>
    %244 = math.tanh %243 : vector<2x128xf32>
    %245 = vector.extract_strided_slice %230 {offsets = [0, 384], sizes = [2, 128], strides = [1, 1]} : vector<2x512xf32> to vector<2x128xf32>
    %246 = arith.negf %245 : vector<2x128xf32>
    %247 = math.exp %246 : vector<2x128xf32>
    %cst_78 = arith.constant 1.000000e+00 : f32
    %248 = vector.broadcast %cst_78 : f32 to vector<2x128xf32>
    %249 = arith.addf %248, %247 : vector<2x128xf32>
    %250 = arith.divf %248, %249 : vector<2x128xf32>
    %251 = arith.mulf %242, %219 : vector<2x128xf32>
    %252 = arith.mulf %236, %244 : vector<2x128xf32>
    %253 = arith.addf %251, %252 : vector<2x128xf32>
    %254 = math.tanh %253 : vector<2x128xf32>
    %255 = arith.mulf %250, %254 : vector<2x128xf32>
    %c6_79 = arith.constant 6 : index
    %c0_80 = arith.constant 0 : index
    %c0_81 = arith.constant 0 : index
    %256 = vector.load %arg16[%c6_79, %c0_80, %c0_81] : memref<8x2x128xf32, #tpu.memory_space<vmem>>, vector<1x2x128xf32>
    %257 = vector.shape_cast %256 : vector<1x2x128xf32> to vector<2x128xf32>
    %258 = vector.shape_cast %255 : vector<2x128xf32> to vector<1x2x128xf32>
    tpu.vector_store %arg16[%c6_79, %c0_80, %c0_81], %258 {strides = array<i32>} : memref<8x2x128xf32, #tpu.memory_space<vmem>>, vector<1x2x128xf32>,
    %c7 = arith.constant 7 : index
    %c0_82 = arith.constant 0 : index
    %c0_83 = arith.constant 0 : index
    %259 = vector.load %arg2[%c7, %c0_82, %c0_83] : memref<8x2x128xbf16, #tpu.memory_space<vmem>>, vector<1x2x128xbf16>
    %260 = vector.shape_cast %259 : vector<1x2x128xbf16> to vector<2x128xbf16>
    %261 = arith.truncf %255 : vector<2x128xf32> to vector<2x128xbf16>
    %262 = tpu.concatenate %260, %261 in 1 : vector<2x128xbf16>, vector<2x128xbf16> -> vector<2x256xbf16>
    %cst_84 = arith.constant dense<0.000000e+00> : vector<2x512xf32>
    %263 = tpu.matmul %262, %0, %cst_84 {dimension_numbers = #tpu.dot_dimension_numbers<[1], [0], [0], [1], [0, 0, 1, 1], [], []>} : vector<2x256xbf16>, vector<256x512xbf16>, vector<2x512xf32> -> vector<2x512xf32>
    %264 = arith.addf %263, %7 : vector<2x512xf32>
    %265 = vector.extract_strided_slice %264 {offsets = [0, 0], sizes = [2, 128], strides = [1, 1]} : vector<2x512xf32> to vector<2x128xf32>
    %266 = arith.negf %265 : vector<2x128xf32>
    %267 = math.exp %266 : vector<2x128xf32>
    %cst_85 = arith.constant 1.000000e+00 : f32
    %268 = vector.broadcast %cst_85 : f32 to vector<2x128xf32>
    %269 = arith.addf %268, %267 : vector<2x128xf32>
    %270 = arith.divf %268, %269 : vector<2x128xf32>
    %271 = vector.extract_strided_slice %264 {offsets = [0, 128], sizes = [2, 128], strides = [1, 1]} : vector<2x512xf32> to vector<2x128xf32>
    %272 = arith.negf %271 : vector<2x128xf32>
    %273 = math.exp %272 : vector<2x128xf32>
    %cst_86 = arith.constant 1.000000e+00 : f32
    %274 = vector.broadcast %cst_86 : f32 to vector<2x128xf32>
    %275 = arith.addf %274, %273 : vector<2x128xf32>
    %276 = arith.divf %274, %275 : vector<2x128xf32>
    %277 = vector.extract_strided_slice %264 {offsets = [0, 256], sizes = [2, 128], strides = [1, 1]} : vector<2x512xf32> to vector<2x128xf32>
    %278 = math.tanh %277 : vector<2x128xf32>
    %279 = vector.extract_strided_slice %264 {offsets = [0, 384], sizes = [2, 128], strides = [1, 1]} : vector<2x512xf32> to vector<2x128xf32>
    %280 = arith.negf %279 : vector<2x128xf32>
    %281 = math.exp %280 : vector<2x128xf32>
    %cst_87 = arith.constant 1.000000e+00 : f32
    %282 = vector.broadcast %cst_87 : f32 to vector<2x128xf32>
    %283 = arith.addf %282, %281 : vector<2x128xf32>
    %284 = arith.divf %282, %283 : vector<2x128xf32>
    %285 = arith.mulf %276, %253 : vector<2x128xf32>
    %286 = arith.mulf %270, %278 : vector<2x128xf32>
    %287 = arith.addf %285, %286 : vector<2x128xf32>
    %288 = math.tanh %287 : vector<2x128xf32>
    %289 = arith.mulf %284, %288 : vector<2x128xf32>
    %c7_88 = arith.constant 7 : index
    %c0_89 = arith.constant 0 : index
    %c0_90 = arith.constant 0 : index
    %290 = vector.load %arg16[%c7_88, %c0_89, %c0_90] : memref<8x2x128xf32, #tpu.memory_space<vmem>>, vector<1x2x128xf32>
    %291 = vector.shape_cast %290 : vector<1x2x128xf32> to vector<2x128xf32>
    %292 = vector.shape_cast %289 : vector<2x128xf32> to vector<1x2x128xf32>
    tpu.vector_store %arg16[%c7_88, %c0_89, %c0_90], %292 {strides = array<i32>} : memref<8x2x128xf32, #tpu.memory_space<vmem>>, vector<1x2x128xf32>,
    %c0_91 = arith.constant 0 : index
    %c0_92 = arith.constant 0 : index
    %c0_93 = arith.constant 0 : index
    %293 = vector.load %arg16[%c0_91, %c0_92, %c0_93] : memref<8x2x128xf32, #tpu.memory_space<vmem>>, vector<8x2x128xf32>
    %294 = vector.shape_cast %293 : vector<8x2x128xf32> to vector<16x128xf32>
    %295 = arith.truncf %294 : vector<16x128xf32> to vector<16x128xbf16>
    %c0_94 = arith.constant 0 : index
    %c0_95 = arith.constant 0 : index
    %296 = vector.load %arg7[%c0_94, %c0_95] : memref<128x128xbf16, #tpu.memory_space<vmem>>, vector<128x128xbf16>
    %cst_96 = arith.constant dense<0.000000e+00> : vector<16x128xf32>
    %297 = tpu.matmul %295, %296, %cst_96 {dimension_numbers = #tpu.dot_dimension_numbers<[1], [0], [0], [1], [0, 0, 1, 1], [], []>} : vector<16x128xbf16>, vector<128x128xbf16>, vector<16x128xf32> -> vector<16x128xf32>
    %c0_97 = arith.constant 0 : index
    %c0_98 = arith.constant 0 : index
    %298 = vector.load %arg9[%c0_97, %c0_98] : memref<1x128xf32, #tpu.memory_space<vmem>>, vector<1x128xf32>
    %299 = vector.broadcast %298 : vector<1x128xf32> to vector<16x128xf32>
    %300 = arith.addf %297, %299 : vector<16x128xf32>
    %301 = vector.shape_cast %300 : vector<16x128xf32> to vector<8x2x128xf32>
    %c0_99 = arith.constant 0 : index
    %c0_100 = arith.constant 0 : index
    %c0_101 = arith.constant 0 : index
    %302 = vector.load %arg3[%c0_99, %c0_100, %c0_101] : memref<7x2x128xbf16, #tpu.memory_space<vmem>>, vector<1x2x128xbf16>
    %303 = vector.shape_cast %302 : vector<1x2x128xbf16> to vector<2x128xbf16>
    %304 = arith.truncf %289 : vector<2x128xf32> to vector<2x128xbf16>
    %cst_102 = arith.constant dense<0.000000e+00> : vector<2x128xf32>
    %305 = tpu.matmul %304, %1, %cst_102 {dimension_numbers = #tpu.dot_dimension_numbers<[1], [0], [0], [1], [0, 0, 1, 1], [], []>} : vector<2x128xbf16>, vector<128x128xbf16>, vector<2x128xf32> -> vector<2x128xf32>
    %306 = vector.shape_cast %305 : vector<2x128xf32> to vector<1x2x128xf32>
    %307 = vector.broadcast %306 : vector<1x2x128xf32> to vector<8x2x128xf32>
    %308 = arith.addf %301, %307 : vector<8x2x128xf32>
    %309 = math.tanh %308 : vector<8x2x128xf32>
    %310 = arith.mulf %309, %17 : vector<8x2x128xf32>
    %cst_103 = arith.constant dense<0.000000e+00> : vector<8x2xf32>
    %311 = vector.multi_reduction <add>, %310, %cst_103 [2] : vector<8x2x128xf32> to vector<8x2xf32>
    %312 = vector.shape_cast %311 : vector<8x2xf32> to vector<8x2x1xf32>
    %cst_104 = arith.constant dense<0xFF800000> : vector<2x1xf32>
    %313 = vector.multi_reduction <maximumf>, %312, %cst_104 [0] : vector<8x2x1xf32> to vector<2x1xf32>
    %314 = vector.shape_cast %313 : vector<2x1xf32> to vector<1x2x1xf32>
    %315 = vector.broadcast %314 : vector<1x2x1xf32> to vector<8x2x1xf32>
    %316 = arith.subf %312, %315 : vector<8x2x1xf32>
    %317 = math.exp %316 : vector<8x2x1xf32>
    %cst_105 = arith.constant dense<0.000000e+00> : vector<2x1xf32>
    %318 = vector.multi_reduction <add>, %317, %cst_105 [0] : vector<8x2x1xf32> to vector<2x1xf32>
    %319 = vector.shape_cast %318 : vector<2x1xf32> to vector<1x2x1xf32>
    %320 = vector.broadcast %319 : vector<1x2x1xf32> to vector<8x2x1xf32>
    %321 = arith.divf %317, %320 : vector<8x2x1xf32>
    %322 = vector.broadcast %321 : vector<8x2x1xf32> to vector<8x2x128xf32>
    %323 = arith.mulf %322, %293 : vector<8x2x128xf32>
    %cst_106 = arith.constant dense<0.000000e+00> : vector<2x128xf32>
    %324 = vector.multi_reduction <add>, %323, %cst_106 [0] : vector<8x2x128xf32> to vector<2x128xf32>
    %325 = arith.truncf %324 : vector<2x128xf32> to vector<2x128xbf16>
    %326 = arith.truncf %289 : vector<2x128xf32> to vector<2x128xbf16>
    %327 = tpu.concatenate %303, %325, %326 in 1 : vector<2x128xbf16>, vector<2x128xbf16>, vector<2x128xbf16> -> vector<2x384xbf16>
    %cst_107 = arith.constant dense<0.000000e+00> : vector<2x512xf32>
    %328 = tpu.matmul %327, %2, %cst_107 {dimension_numbers = #tpu.dot_dimension_numbers<[1], [0], [0], [1], [0, 0, 1, 1], [], []>} : vector<2x384xbf16>, vector<384x512xbf16>, vector<2x512xf32> -> vector<2x512xf32>
    %329 = arith.addf %328, %10 : vector<2x512xf32>
    %330 = vector.extract_strided_slice %329 {offsets = [0, 0], sizes = [2, 128], strides = [1, 1]} : vector<2x512xf32> to vector<2x128xf32>
    %331 = arith.negf %330 : vector<2x128xf32>
    %332 = math.exp %331 : vector<2x128xf32>
    %cst_108 = arith.constant 1.000000e+00 : f32
    %333 = vector.broadcast %cst_108 : f32 to vector<2x128xf32>
    %334 = arith.addf %333, %332 : vector<2x128xf32>
    %335 = arith.divf %333, %334 : vector<2x128xf32>
    %336 = vector.extract_strided_slice %329 {offsets = [0, 128], sizes = [2, 128], strides = [1, 1]} : vector<2x512xf32> to vector<2x128xf32>
    %337 = arith.negf %336 : vector<2x128xf32>
    %338 = math.exp %337 : vector<2x128xf32>
    %cst_109 = arith.constant 1.000000e+00 : f32
    %339 = vector.broadcast %cst_109 : f32 to vector<2x128xf32>
    %340 = arith.addf %339, %338 : vector<2x128xf32>
    %341 = arith.divf %339, %340 : vector<2x128xf32>
    %342 = vector.extract_strided_slice %329 {offsets = [0, 256], sizes = [2, 128], strides = [1, 1]} : vector<2x512xf32> to vector<2x128xf32>
    %343 = math.tanh %342 : vector<2x128xf32>
    %344 = vector.extract_strided_slice %329 {offsets = [0, 384], sizes = [2, 128], strides = [1, 1]} : vector<2x512xf32> to vector<2x128xf32>
    %345 = arith.negf %344 : vector<2x128xf32>
    %346 = math.exp %345 : vector<2x128xf32>
    %cst_110 = arith.constant 1.000000e+00 : f32
    %347 = vector.broadcast %cst_110 : f32 to vector<2x128xf32>
    %348 = arith.addf %347, %346 : vector<2x128xf32>
    %349 = arith.divf %347, %348 : vector<2x128xf32>
    %350 = arith.mulf %341, %287 : vector<2x128xf32>
    %351 = arith.mulf %335, %343 : vector<2x128xf32>
    %352 = arith.addf %350, %351 : vector<2x128xf32>
    %353 = math.tanh %352 : vector<2x128xf32>
    %354 = arith.mulf %349, %353 : vector<2x128xf32>
    %355 = arith.truncf %354 : vector<2x128xf32> to vector<2x128xbf16>
    %356 = arith.truncf %324 : vector<2x128xf32> to vector<2x128xbf16>
    %357 = tpu.concatenate %355, %356, %303 in 1 : vector<2x128xbf16>, vector<2x128xbf16>, vector<2x128xbf16> -> vector<2x384xbf16>
    %cst_111 = arith.constant dense<0.000000e+00> : vector<2x128xf32>
    %358 = tpu.matmul %357, %3, %cst_111 {dimension_numbers = #tpu.dot_dimension_numbers<[1], [0], [0], [1], [0, 0, 1, 1], [], []>} : vector<2x384xbf16>, vector<384x128xbf16>, vector<2x128xf32> -> vector<2x128xf32>
    %359 = arith.addf %358, %13 : vector<2x128xf32>
    %c0_112 = arith.constant 0 : index
    %c0_113 = arith.constant 0 : index
    %c0_114 = arith.constant 0 : index
    %360 = vector.load %arg15[%c0_112, %c0_113, %c0_114] : memref<7x2x128xf32, #tpu.memory_space<vmem>>, vector<1x2x128xf32>
    %361 = vector.shape_cast %360 : vector<1x2x128xf32> to vector<2x128xf32>
    %362 = vector.shape_cast %359 : vector<2x128xf32> to vector<1x2x128xf32>
    tpu.vector_store %arg15[%c0_112, %c0_113, %c0_114], %362 {strides = array<i32>} : memref<7x2x128xf32, #tpu.memory_space<vmem>>, vector<1x2x128xf32>,
    %cst_115 = arith.constant dense<0xFF800000> : vector<2xf32>
    %363 = vector.multi_reduction <maximumf>, %359, %cst_115 [1] : vector<2x128xf32> to vector<2xf32>
    %364 = vector.shape_cast %363 : vector<2xf32> to vector<2x1xf32>
    %365 = vector.broadcast %364 : vector<2x1xf32> to vector<2x128xf32>
    %366 = arith.cmpf oeq, %359, %365 : vector<2x128xf32>
    %c128_i32 = arith.constant 128 : i32
    %367 = vector.broadcast %c128_i32 : i32 to vector<2x128xi32>
    %368 = arith.select %366, %18, %367 : vector<2x128xi1>, vector<2x128xi32>
    %cst_116 = arith.constant dense<2147483647> : vector<2xi32>
    %369 = vector.multi_reduction <minsi>, %368, %cst_116 [1] : vector<2x128xi32> to vector<2xi32>
    %370 = vector.shape_cast %369 : vector<2xi32> to vector<2x1xi32>
    %371 = vector.broadcast %370 : vector<2x1xi32> to vector<2x128xi32>
    %372 = arith.cmpi eq, %18, %371 : vector<2x128xi32>
    %373 = arith.extui %372 : vector<2x128xi1> to vector<2x128xi32>
    %374 = arith.sitofp %373 : vector<2x128xi32> to vector<2x128xf32>
    %375 = arith.truncf %374 : vector<2x128xf32> to vector<2x128xbf16>
    %cst_117 = arith.constant dense<0.000000e+00> : vector<2x128xf32>
    %376 = tpu.matmul %375, %4, %cst_117 {dimension_numbers = #tpu.dot_dimension_numbers<[1], [0], [0], [1], [0, 0, 1, 1], [], []>} : vector<2x128xbf16>, vector<128x128xbf16>, vector<2x128xf32> -> vector<2x128xf32>
    %377 = arith.truncf %376 : vector<2x128xf32> to vector<2x128xbf16>
    %c0_118 = arith.constant 0 : index
    %378 = memref.load %arg1[%c0_118] : memref<7xi32, #tpu.memory_space<smem>>
    %c0_i32 = arith.constant 0 : i32
    %379 = arith.cmpi ne, %378, %c0_i32 : i32
    %c1_119 = arith.constant 1 : index
    %c0_120 = arith.constant 0 : index
    %c0_121 = arith.constant 0 : index
    %380 = vector.load %arg3[%c1_119, %c0_120, %c0_121] : memref<7x2x128xbf16, #tpu.memory_space<vmem>>, vector<1x2x128xbf16>
    %381 = vector.shape_cast %380 : vector<1x2x128xbf16> to vector<2x128xbf16>
    %382 = arith.select %379, %381, %377 : vector<2x128xbf16>
    %383 = arith.truncf %354 : vector<2x128xf32> to vector<2x128xbf16>
    %cst_122 = arith.constant dense<0.000000e+00> : vector<2x128xf32>
    %384 = tpu.matmul %383, %1, %cst_122 {dimension_numbers = #tpu.dot_dimension_numbers<[1], [0], [0], [1], [0, 0, 1, 1], [], []>} : vector<2x128xbf16>, vector<128x128xbf16>, vector<2x128xf32> -> vector<2x128xf32>
    %385 = vector.shape_cast %384 : vector<2x128xf32> to vector<1x2x128xf32>
    %386 = vector.broadcast %385 : vector<1x2x128xf32> to vector<8x2x128xf32>
    %387 = arith.addf %301, %386 : vector<8x2x128xf32>
    %388 = math.tanh %387 : vector<8x2x128xf32>
    %389 = arith.mulf %388, %17 : vector<8x2x128xf32>
    %cst_123 = arith.constant dense<0.000000e+00> : vector<8x2xf32>
    %390 = vector.multi_reduction <add>, %389, %cst_123 [2] : vector<8x2x128xf32> to vector<8x2xf32>
    %391 = vector.shape_cast %390 : vector<8x2xf32> to vector<8x2x1xf32>
    %cst_124 = arith.constant dense<0xFF800000> : vector<2x1xf32>
    %392 = vector.multi_reduction <maximumf>, %391, %cst_124 [0] : vector<8x2x1xf32> to vector<2x1xf32>
    %393 = vector.shape_cast %392 : vector<2x1xf32> to vector<1x2x1xf32>
    %394 = vector.broadcast %393 : vector<1x2x1xf32> to vector<8x2x1xf32>
    %395 = arith.subf %391, %394 : vector<8x2x1xf32>
    %396 = math.exp %395 : vector<8x2x1xf32>
    %cst_125 = arith.constant dense<0.000000e+00> : vector<2x1xf32>
    %397 = vector.multi_reduction <add>, %396, %cst_125 [0] : vector<8x2x1xf32> to vector<2x1xf32>
    %398 = vector.shape_cast %397 : vector<2x1xf32> to vector<1x2x1xf32>
    %399 = vector.broadcast %398 : vector<1x2x1xf32> to vector<8x2x1xf32>
    %400 = arith.divf %396, %399 : vector<8x2x1xf32>
    %401 = vector.broadcast %400 : vector<8x2x1xf32> to vector<8x2x128xf32>
    %402 = arith.mulf %401, %293 : vector<8x2x128xf32>
    %cst_126 = arith.constant dense<0.000000e+00> : vector<2x128xf32>
    %403 = vector.multi_reduction <add>, %402, %cst_126 [0] : vector<8x2x128xf32> to vector<2x128xf32>
    %404 = arith.truncf %403 : vector<2x128xf32> to vector<2x128xbf16>
    %405 = arith.truncf %354 : vector<2x128xf32> to vector<2x128xbf16>
    %406 = tpu.concatenate %382, %404, %405 in 1 : vector<2x128xbf16>, vector<2x128xbf16>, vector<2x128xbf16> -> vector<2x384xbf16>
    %cst_127 = arith.constant dense<0.000000e+00> : vector<2x512xf32>
    %407 = tpu.matmul %406, %2, %cst_127 {dimension_numbers = #tpu.dot_dimension_numbers<[1], [0], [0], [1], [0, 0, 1, 1], [], []>} : vector<2x384xbf16>, vector<384x512xbf16>, vector<2x512xf32> -> vector<2x512xf32>
    %408 = arith.addf %407, %10 : vector<2x512xf32>
    %409 = vector.extract_strided_slice %408 {offsets = [0, 0], sizes = [2, 128], strides = [1, 1]} : vector<2x512xf32> to vector<2x128xf32>
    %410 = arith.negf %409 : vector<2x128xf32>
    %411 = math.exp %410 : vector<2x128xf32>
    %cst_128 = arith.constant 1.000000e+00 : f32
    %412 = vector.broadcast %cst_128 : f32 to vector<2x128xf32>
    %413 = arith.addf %412, %411 : vector<2x128xf32>
    %414 = arith.divf %412, %413 : vector<2x128xf32>
    %415 = vector.extract_strided_slice %408 {offsets = [0, 128], sizes = [2, 128], strides = [1, 1]} : vector<2x512xf32> to vector<2x128xf32>
    %416 = arith.negf %415 : vector<2x128xf32>
    %417 = math.exp %416 : vector<2x128xf32>
    %cst_129 = arith.constant 1.000000e+00 : f32
    %418 = vector.broadcast %cst_129 : f32 to vector<2x128xf32>
    %419 = arith.addf %418, %417 : vector<2x128xf32>
    %420 = arith.divf %418, %419 : vector<2x128xf32>
    %421 = vector.extract_strided_slice %408 {offsets = [0, 256], sizes = [2, 128], strides = [1, 1]} : vector<2x512xf32> to vector<2x128xf32>
    %422 = math.tanh %421 : vector<2x128xf32>
    %423 = vector.extract_strided_slice %408 {offsets = [0, 384], sizes = [2, 128], strides = [1, 1]} : vector<2x512xf32> to vector<2x128xf32>
    %424 = arith.negf %423 : vector<2x128xf32>
    %425 = math.exp %424 : vector<2x128xf32>
    %cst_130 = arith.constant 1.000000e+00 : f32
    %426 = vector.broadcast %cst_130 : f32 to vector<2x128xf32>
    %427 = arith.addf %426, %425 : vector<2x128xf32>
    %428 = arith.divf %426, %427 : vector<2x128xf32>
    %429 = arith.mulf %420, %352 : vector<2x128xf32>
    %430 = arith.mulf %414, %422 : vector<2x128xf32>
    %431 = arith.addf %429, %430 : vector<2x128xf32>
    %432 = math.tanh %431 : vector<2x128xf32>
    %433 = arith.mulf %428, %432 : vector<2x128xf32>
    %434 = arith.truncf %433 : vector<2x128xf32> to vector<2x128xbf16>
    %435 = arith.truncf %403 : vector<2x128xf32> to vector<2x128xbf16>
    %436 = tpu.concatenate %434, %435, %382 in 1 : vector<2x128xbf16>, vector<2x128xbf16>, vector<2x128xbf16> -> vector<2x384xbf16>
    %cst_131 = arith.constant dense<0.000000e+00> : vector<2x128xf32>
    %437 = tpu.matmul %436, %3, %cst_131 {dimension_numbers = #tpu.dot_dimension_numbers<[1], [0], [0], [1], [0, 0, 1, 1], [], []>} : vector<2x384xbf16>, vector<384x128xbf16>, vector<2x128xf32> -> vector<2x128xf32>
    %438 = arith.addf %437, %13 : vector<2x128xf32>
    %c1_132 = arith.constant 1 : index
    %c0_133 = arith.constant 0 : index
    %c0_134 = arith.constant 0 : index
    %439 = vector.load %arg15[%c1_132, %c0_133, %c0_134] : memref<7x2x128xf32, #tpu.memory_space<vmem>>, vector<1x2x128xf32>
    %440 = vector.shape_cast %439 : vector<1x2x128xf32> to vector<2x128xf32>
    %441 = vector.shape_cast %438 : vector<2x128xf32> to vector<1x2x128xf32>
    tpu.vector_store %arg15[%c1_132, %c0_133, %c0_134], %441 {strides = array<i32>} : memref<7x2x128xf32, #tpu.memory_space<vmem>>, vector<1x2x128xf32>,
    %cst_135 = arith.constant dense<0xFF800000> : vector<2xf32>
    %442 = vector.multi_reduction <maximumf>, %438, %cst_135 [1] : vector<2x128xf32> to vector<2xf32>
    %443 = vector.shape_cast %442 : vector<2xf32> to vector<2x1xf32>
    %444 = vector.broadcast %443 : vector<2x1xf32> to vector<2x128xf32>
    %445 = arith.cmpf oeq, %438, %444 : vector<2x128xf32>
    %c128_i32_136 = arith.constant 128 : i32
    %446 = vector.broadcast %c128_i32_136 : i32 to vector<2x128xi32>
    %447 = arith.select %445, %18, %446 : vector<2x128xi1>, vector<2x128xi32>
    %cst_137 = arith.constant dense<2147483647> : vector<2xi32>
    %448 = vector.multi_reduction <minsi>, %447, %cst_137 [1] : vector<2x128xi32> to vector<2xi32>
    %449 = vector.shape_cast %448 : vector<2xi32> to vector<2x1xi32>
    %450 = vector.broadcast %449 : vector<2x1xi32> to vector<2x128xi32>
    %451 = arith.cmpi eq, %18, %450 : vector<2x128xi32>
    %452 = arith.extui %451 : vector<2x128xi1> to vector<2x128xi32>
    %453 = arith.sitofp %452 : vector<2x128xi32> to vector<2x128xf32>
    %454 = arith.truncf %453 : vector<2x128xf32> to vector<2x128xbf16>
    %cst_138 = arith.constant dense<0.000000e+00> : vector<2x128xf32>
    %455 = tpu.matmul %454, %4, %cst_138 {dimension_numbers = #tpu.dot_dimension_numbers<[1], [0], [0], [1], [0, 0, 1, 1], [], []>} : vector<2x128xbf16>, vector<128x128xbf16>, vector<2x128xf32> -> vector<2x128xf32>
    %456 = arith.truncf %455 : vector<2x128xf32> to vector<2x128xbf16>
    %c1_139 = arith.constant 1 : index
    %457 = memref.load %arg1[%c1_139] : memref<7xi32, #tpu.memory_space<smem>>
    %c0_i32_140 = arith.constant 0 : i32
    %458 = arith.cmpi ne, %457, %c0_i32_140 : i32
    %c2_141 = arith.constant 2 : index
    %c0_142 = arith.constant 0 : index
    %c0_143 = arith.constant 0 : index
    %459 = vector.load %arg3[%c2_141, %c0_142, %c0_143] : memref<7x2x128xbf16, #tpu.memory_space<vmem>>, vector<1x2x128xbf16>
    %460 = vector.shape_cast %459 : vector<1x2x128xbf16> to vector<2x128xbf16>
    %461 = arith.select %458, %460, %456 : vector<2x128xbf16>
    %462 = arith.truncf %433 : vector<2x128xf32> to vector<2x128xbf16>
    %cst_144 = arith.constant dense<0.000000e+00> : vector<2x128xf32>
    %463 = tpu.matmul %462, %1, %cst_144 {dimension_numbers = #tpu.dot_dimension_numbers<[1], [0], [0], [1], [0, 0, 1, 1], [], []>} : vector<2x128xbf16>, vector<128x128xbf16>, vector<2x128xf32> -> vector<2x128xf32>
    %464 = vector.shape_cast %463 : vector<2x128xf32> to vector<1x2x128xf32>
    %465 = vector.broadcast %464 : vector<1x2x128xf32> to vector<8x2x128xf32>
    %466 = arith.addf %301, %465 : vector<8x2x128xf32>
    %467 = math.tanh %466 : vector<8x2x128xf32>
    %468 = arith.mulf %467, %17 : vector<8x2x128xf32>
    %cst_145 = arith.constant dense<0.000000e+00> : vector<8x2xf32>
    %469 = vector.multi_reduction <add>, %468, %cst_145 [2] : vector<8x2x128xf32> to vector<8x2xf32>
    %470 = vector.shape_cast %469 : vector<8x2xf32> to vector<8x2x1xf32>
    %cst_146 = arith.constant dense<0xFF800000> : vector<2x1xf32>
    %471 = vector.multi_reduction <maximumf>, %470, %cst_146 [0] : vector<8x2x1xf32> to vector<2x1xf32>
    %472 = vector.shape_cast %471 : vector<2x1xf32> to vector<1x2x1xf32>
    %473 = vector.broadcast %472 : vector<1x2x1xf32> to vector<8x2x1xf32>
    %474 = arith.subf %470, %473 : vector<8x2x1xf32>
    %475 = math.exp %474 : vector<8x2x1xf32>
    %cst_147 = arith.constant dense<0.000000e+00> : vector<2x1xf32>
    %476 = vector.multi_reduction <add>, %475, %cst_147 [0] : vector<8x2x1xf32> to vector<2x1xf32>
    %477 = vector.shape_cast %476 : vector<2x1xf32> to vector<1x2x1xf32>
    %478 = vector.broadcast %477 : vector<1x2x1xf32> to vector<8x2x1xf32>
    %479 = arith.divf %475, %478 : vector<8x2x1xf32>
    %480 = vector.broadcast %479 : vector<8x2x1xf32> to vector<8x2x128xf32>
    %481 = arith.mulf %480, %293 : vector<8x2x128xf32>
    %cst_148 = arith.constant dense<0.000000e+00> : vector<2x128xf32>
    %482 = vector.multi_reduction <add>, %481, %cst_148 [0] : vector<8x2x128xf32> to vector<2x128xf32>
    %483 = arith.truncf %482 : vector<2x128xf32> to vector<2x128xbf16>
    %484 = arith.truncf %433 : vector<2x128xf32> to vector<2x128xbf16>
    %485 = tpu.concatenate %461, %483, %484 in 1 : vector<2x128xbf16>, vector<2x128xbf16>, vector<2x128xbf16> -> vector<2x384xbf16>
    %cst_149 = arith.constant dense<0.000000e+00> : vector<2x512xf32>
    %486 = tpu.matmul %485, %2, %cst_149 {dimension_numbers = #tpu.dot_dimension_numbers<[1], [0], [0], [1], [0, 0, 1, 1], [], []>} : vector<2x384xbf16>, vector<384x512xbf16>, vector<2x512xf32> -> vector<2x512xf32>
    %487 = arith.addf %486, %10 : vector<2x512xf32>
    %488 = vector.extract_strided_slice %487 {offsets = [0, 0], sizes = [2, 128], strides = [1, 1]} : vector<2x512xf32> to vector<2x128xf32>
    %489 = arith.negf %488 : vector<2x128xf32>
    %490 = math.exp %489 : vector<2x128xf32>
    %cst_150 = arith.constant 1.000000e+00 : f32
    %491 = vector.broadcast %cst_150 : f32 to vector<2x128xf32>
    %492 = arith.addf %491, %490 : vector<2x128xf32>
    %493 = arith.divf %491, %492 : vector<2x128xf32>
    %494 = vector.extract_strided_slice %487 {offsets = [0, 128], sizes = [2, 128], strides = [1, 1]} : vector<2x512xf32> to vector<2x128xf32>
    %495 = arith.negf %494 : vector<2x128xf32>
    %496 = math.exp %495 : vector<2x128xf32>
    %cst_151 = arith.constant 1.000000e+00 : f32
    %497 = vector.broadcast %cst_151 : f32 to vector<2x128xf32>
    %498 = arith.addf %497, %496 : vector<2x128xf32>
    %499 = arith.divf %497, %498 : vector<2x128xf32>
    %500 = vector.extract_strided_slice %487 {offsets = [0, 256], sizes = [2, 128], strides = [1, 1]} : vector<2x512xf32> to vector<2x128xf32>
    %501 = math.tanh %500 : vector<2x128xf32>
    %502 = vector.extract_strided_slice %487 {offsets = [0, 384], sizes = [2, 128], strides = [1, 1]} : vector<2x512xf32> to vector<2x128xf32>
    %503 = arith.negf %502 : vector<2x128xf32>
    %504 = math.exp %503 : vector<2x128xf32>
    %cst_152 = arith.constant 1.000000e+00 : f32
    %505 = vector.broadcast %cst_152 : f32 to vector<2x128xf32>
    %506 = arith.addf %505, %504 : vector<2x128xf32>
    %507 = arith.divf %505, %506 : vector<2x128xf32>
    %508 = arith.mulf %499, %431 : vector<2x128xf32>
    %509 = arith.mulf %493, %501 : vector<2x128xf32>
    %510 = arith.addf %508, %509 : vector<2x128xf32>
    %511 = math.tanh %510 : vector<2x128xf32>
    %512 = arith.mulf %507, %511 : vector<2x128xf32>
    %513 = arith.truncf %512 : vector<2x128xf32> to vector<2x128xbf16>
    %514 = arith.truncf %482 : vector<2x128xf32> to vector<2x128xbf16>
    %515 = tpu.concatenate %513, %514, %461 in 1 : vector<2x128xbf16>, vector<2x128xbf16>, vector<2x128xbf16> -> vector<2x384xbf16>
    %cst_153 = arith.constant dense<0.000000e+00> : vector<2x128xf32>
    %516 = tpu.matmul %515, %3, %cst_153 {dimension_numbers = #tpu.dot_dimension_numbers<[1], [0], [0], [1], [0, 0, 1, 1], [], []>} : vector<2x384xbf16>, vector<384x128xbf16>, vector<2x128xf32> -> vector<2x128xf32>
    %517 = arith.addf %516, %13 : vector<2x128xf32>
    %c2_154 = arith.constant 2 : index
    %c0_155 = arith.constant 0 : index
    %c0_156 = arith.constant 0 : index
    %518 = vector.load %arg15[%c2_154, %c0_155, %c0_156] : memref<7x2x128xf32, #tpu.memory_space<vmem>>, vector<1x2x128xf32>
    %519 = vector.shape_cast %518 : vector<1x2x128xf32> to vector<2x128xf32>
    %520 = vector.shape_cast %517 : vector<2x128xf32> to vector<1x2x128xf32>
    tpu.vector_store %arg15[%c2_154, %c0_155, %c0_156], %520 {strides = array<i32>} : memref<7x2x128xf32, #tpu.memory_space<vmem>>, vector<1x2x128xf32>,
    %cst_157 = arith.constant dense<0xFF800000> : vector<2xf32>
    %521 = vector.multi_reduction <maximumf>, %517, %cst_157 [1] : vector<2x128xf32> to vector<2xf32>
    %522 = vector.shape_cast %521 : vector<2xf32> to vector<2x1xf32>
    %523 = vector.broadcast %522 : vector<2x1xf32> to vector<2x128xf32>
    %524 = arith.cmpf oeq, %517, %523 : vector<2x128xf32>
    %c128_i32_158 = arith.constant 128 : i32
    %525 = vector.broadcast %c128_i32_158 : i32 to vector<2x128xi32>
    %526 = arith.select %524, %18, %525 : vector<2x128xi1>, vector<2x128xi32>
    %cst_159 = arith.constant dense<2147483647> : vector<2xi32>
    %527 = vector.multi_reduction <minsi>, %526, %cst_159 [1] : vector<2x128xi32> to vector<2xi32>
    %528 = vector.shape_cast %527 : vector<2xi32> to vector<2x1xi32>
    %529 = vector.broadcast %528 : vector<2x1xi32> to vector<2x128xi32>
    %530 = arith.cmpi eq, %18, %529 : vector<2x128xi32>
    %531 = arith.extui %530 : vector<2x128xi1> to vector<2x128xi32>
    %532 = arith.sitofp %531 : vector<2x128xi32> to vector<2x128xf32>
    %533 = arith.truncf %532 : vector<2x128xf32> to vector<2x128xbf16>
    %cst_160 = arith.constant dense<0.000000e+00> : vector<2x128xf32>
    %534 = tpu.matmul %533, %4, %cst_160 {dimension_numbers = #tpu.dot_dimension_numbers<[1], [0], [0], [1], [0, 0, 1, 1], [], []>} : vector<2x128xbf16>, vector<128x128xbf16>, vector<2x128xf32> -> vector<2x128xf32>
    %535 = arith.truncf %534 : vector<2x128xf32> to vector<2x128xbf16>
    %c2_161 = arith.constant 2 : index
    %536 = memref.load %arg1[%c2_161] : memref<7xi32, #tpu.memory_space<smem>>
    %c0_i32_162 = arith.constant 0 : i32
    %537 = arith.cmpi ne, %536, %c0_i32_162 : i32
    %c3_163 = arith.constant 3 : index
    %c0_164 = arith.constant 0 : index
    %c0_165 = arith.constant 0 : index
    %538 = vector.load %arg3[%c3_163, %c0_164, %c0_165] : memref<7x2x128xbf16, #tpu.memory_space<vmem>>, vector<1x2x128xbf16>
    %539 = vector.shape_cast %538 : vector<1x2x128xbf16> to vector<2x128xbf16>
    %540 = arith.select %537, %539, %535 : vector<2x128xbf16>
    %541 = arith.truncf %512 : vector<2x128xf32> to vector<2x128xbf16>
    %cst_166 = arith.constant dense<0.000000e+00> : vector<2x128xf32>
    %542 = tpu.matmul %541, %1, %cst_166 {dimension_numbers = #tpu.dot_dimension_numbers<[1], [0], [0], [1], [0, 0, 1, 1], [], []>} : vector<2x128xbf16>, vector<128x128xbf16>, vector<2x128xf32> -> vector<2x128xf32>
    %543 = vector.shape_cast %542 : vector<2x128xf32> to vector<1x2x128xf32>
    %544 = vector.broadcast %543 : vector<1x2x128xf32> to vector<8x2x128xf32>
    %545 = arith.addf %301, %544 : vector<8x2x128xf32>
    %546 = math.tanh %545 : vector<8x2x128xf32>
    %547 = arith.mulf %546, %17 : vector<8x2x128xf32>
    %cst_167 = arith.constant dense<0.000000e+00> : vector<8x2xf32>
    %548 = vector.multi_reduction <add>, %547, %cst_167 [2] : vector<8x2x128xf32> to vector<8x2xf32>
    %549 = vector.shape_cast %548 : vector<8x2xf32> to vector<8x2x1xf32>
    %cst_168 = arith.constant dense<0xFF800000> : vector<2x1xf32>
    %550 = vector.multi_reduction <maximumf>, %549, %cst_168 [0] : vector<8x2x1xf32> to vector<2x1xf32>
    %551 = vector.shape_cast %550 : vector<2x1xf32> to vector<1x2x1xf32>
    %552 = vector.broadcast %551 : vector<1x2x1xf32> to vector<8x2x1xf32>
    %553 = arith.subf %549, %552 : vector<8x2x1xf32>
    %554 = math.exp %553 : vector<8x2x1xf32>
    %cst_169 = arith.constant dense<0.000000e+00> : vector<2x1xf32>
    %555 = vector.multi_reduction <add>, %554, %cst_169 [0] : vector<8x2x1xf32> to vector<2x1xf32>
    %556 = vector.shape_cast %555 : vector<2x1xf32> to vector<1x2x1xf32>
    %557 = vector.broadcast %556 : vector<1x2x1xf32> to vector<8x2x1xf32>
    %558 = arith.divf %554, %557 : vector<8x2x1xf32>
    %559 = vector.broadcast %558 : vector<8x2x1xf32> to vector<8x2x128xf32>
    %560 = arith.mulf %559, %293 : vector<8x2x128xf32>
    %cst_170 = arith.constant dense<0.000000e+00> : vector<2x128xf32>
    %561 = vector.multi_reduction <add>, %560, %cst_170 [0] : vector<8x2x128xf32> to vector<2x128xf32>
    %562 = arith.truncf %561 : vector<2x128xf32> to vector<2x128xbf16>
    %563 = arith.truncf %512 : vector<2x128xf32> to vector<2x128xbf16>
    %564 = tpu.concatenate %540, %562, %563 in 1 : vector<2x128xbf16>, vector<2x128xbf16>, vector<2x128xbf16> -> vector<2x384xbf16>
    %cst_171 = arith.constant dense<0.000000e+00> : vector<2x512xf32>
    %565 = tpu.matmul %564, %2, %cst_171 {dimension_numbers = #tpu.dot_dimension_numbers<[1], [0], [0], [1], [0, 0, 1, 1], [], []>} : vector<2x384xbf16>, vector<384x512xbf16>, vector<2x512xf32> -> vector<2x512xf32>
    %566 = arith.addf %565, %10 : vector<2x512xf32>
    %567 = vector.extract_strided_slice %566 {offsets = [0, 0], sizes = [2, 128], strides = [1, 1]} : vector<2x512xf32> to vector<2x128xf32>
    %568 = arith.negf %567 : vector<2x128xf32>
    %569 = math.exp %568 : vector<2x128xf32>
    %cst_172 = arith.constant 1.000000e+00 : f32
    %570 = vector.broadcast %cst_172 : f32 to vector<2x128xf32>
    %571 = arith.addf %570, %569 : vector<2x128xf32>
    %572 = arith.divf %570, %571 : vector<2x128xf32>
    %573 = vector.extract_strided_slice %566 {offsets = [0, 128], sizes = [2, 128], strides = [1, 1]} : vector<2x512xf32> to vector<2x128xf32>
    %574 = arith.negf %573 : vector<2x128xf32>
    %575 = math.exp %574 : vector<2x128xf32>
    %cst_173 = arith.constant 1.000000e+00 : f32
    %576 = vector.broadcast %cst_173 : f32 to vector<2x128xf32>
    %577 = arith.addf %576, %575 : vector<2x128xf32>
    %578 = arith.divf %576, %577 : vector<2x128xf32>
    %579 = vector.extract_strided_slice %566 {offsets = [0, 256], sizes = [2, 128], strides = [1, 1]} : vector<2x512xf32> to vector<2x128xf32>
    %580 = math.tanh %579 : vector<2x128xf32>
    %581 = vector.extract_strided_slice %566 {offsets = [0, 384], sizes = [2, 128], strides = [1, 1]} : vector<2x512xf32> to vector<2x128xf32>
    %582 = arith.negf %581 : vector<2x128xf32>
    %583 = math.exp %582 : vector<2x128xf32>
    %cst_174 = arith.constant 1.000000e+00 : f32
    %584 = vector.broadcast %cst_174 : f32 to vector<2x128xf32>
    %585 = arith.addf %584, %583 : vector<2x128xf32>
    %586 = arith.divf %584, %585 : vector<2x128xf32>
    %587 = arith.mulf %578, %510 : vector<2x128xf32>
    %588 = arith.mulf %572, %580 : vector<2x128xf32>
    %589 = arith.addf %587, %588 : vector<2x128xf32>
    %590 = math.tanh %589 : vector<2x128xf32>
    %591 = arith.mulf %586, %590 : vector<2x128xf32>
    %592 = arith.truncf %591 : vector<2x128xf32> to vector<2x128xbf16>
    %593 = arith.truncf %561 : vector<2x128xf32> to vector<2x128xbf16>
    %594 = tpu.concatenate %592, %593, %540 in 1 : vector<2x128xbf16>, vector<2x128xbf16>, vector<2x128xbf16> -> vector<2x384xbf16>
    %cst_175 = arith.constant dense<0.000000e+00> : vector<2x128xf32>
    %595 = tpu.matmul %594, %3, %cst_175 {dimension_numbers = #tpu.dot_dimension_numbers<[1], [0], [0], [1], [0, 0, 1, 1], [], []>} : vector<2x384xbf16>, vector<384x128xbf16>, vector<2x128xf32> -> vector<2x128xf32>
    %596 = arith.addf %595, %13 : vector<2x128xf32>
    %c3_176 = arith.constant 3 : index
    %c0_177 = arith.constant 0 : index
    %c0_178 = arith.constant 0 : index
    %597 = vector.load %arg15[%c3_176, %c0_177, %c0_178] : memref<7x2x128xf32, #tpu.memory_space<vmem>>, vector<1x2x128xf32>
    %598 = vector.shape_cast %597 : vector<1x2x128xf32> to vector<2x128xf32>
    %599 = vector.shape_cast %596 : vector<2x128xf32> to vector<1x2x128xf32>
    tpu.vector_store %arg15[%c3_176, %c0_177, %c0_178], %599 {strides = array<i32>} : memref<7x2x128xf32, #tpu.memory_space<vmem>>, vector<1x2x128xf32>,
    %cst_179 = arith.constant dense<0xFF800000> : vector<2xf32>
    %600 = vector.multi_reduction <maximumf>, %596, %cst_179 [1] : vector<2x128xf32> to vector<2xf32>
    %601 = vector.shape_cast %600 : vector<2xf32> to vector<2x1xf32>
    %602 = vector.broadcast %601 : vector<2x1xf32> to vector<2x128xf32>
    %603 = arith.cmpf oeq, %596, %602 : vector<2x128xf32>
    %c128_i32_180 = arith.constant 128 : i32
    %604 = vector.broadcast %c128_i32_180 : i32 to vector<2x128xi32>
    %605 = arith.select %603, %18, %604 : vector<2x128xi1>, vector<2x128xi32>
    %cst_181 = arith.constant dense<2147483647> : vector<2xi32>
    %606 = vector.multi_reduction <minsi>, %605, %cst_181 [1] : vector<2x128xi32> to vector<2xi32>
    %607 = vector.shape_cast %606 : vector<2xi32> to vector<2x1xi32>
    %608 = vector.broadcast %607 : vector<2x1xi32> to vector<2x128xi32>
    %609 = arith.cmpi eq, %18, %608 : vector<2x128xi32>
    %610 = arith.extui %609 : vector<2x128xi1> to vector<2x128xi32>
    %611 = arith.sitofp %610 : vector<2x128xi32> to vector<2x128xf32>
    %612 = arith.truncf %611 : vector<2x128xf32> to vector<2x128xbf16>
    %cst_182 = arith.constant dense<0.000000e+00> : vector<2x128xf32>
    %613 = tpu.matmul %612, %4, %cst_182 {dimension_numbers = #tpu.dot_dimension_numbers<[1], [0], [0], [1], [0, 0, 1, 1], [], []>} : vector<2x128xbf16>, vector<128x128xbf16>, vector<2x128xf32> -> vector<2x128xf32>
    %614 = arith.truncf %613 : vector<2x128xf32> to vector<2x128xbf16>
    %c3_183 = arith.constant 3 : index
    %615 = memref.load %arg1[%c3_183] : memref<7xi32, #tpu.memory_space<smem>>
    %c0_i32_184 = arith.constant 0 : i32
    %616 = arith.cmpi ne, %615, %c0_i32_184 : i32
    %c4_185 = arith.constant 4 : index
    %c0_186 = arith.constant 0 : index
    %c0_187 = arith.constant 0 : index
    %617 = vector.load %arg3[%c4_185, %c0_186, %c0_187] : memref<7x2x128xbf16, #tpu.memory_space<vmem>>, vector<1x2x128xbf16>
    %618 = vector.shape_cast %617 : vector<1x2x128xbf16> to vector<2x128xbf16>
    %619 = arith.select %616, %618, %614 : vector<2x128xbf16>
    %620 = arith.truncf %591 : vector<2x128xf32> to vector<2x128xbf16>
    %cst_188 = arith.constant dense<0.000000e+00> : vector<2x128xf32>
    %621 = tpu.matmul %620, %1, %cst_188 {dimension_numbers = #tpu.dot_dimension_numbers<[1], [0], [0], [1], [0, 0, 1, 1], [], []>} : vector<2x128xbf16>, vector<128x128xbf16>, vector<2x128xf32> -> vector<2x128xf32>
    %622 = vector.shape_cast %621 : vector<2x128xf32> to vector<1x2x128xf32>
    %623 = vector.broadcast %622 : vector<1x2x128xf32> to vector<8x2x128xf32>
    %624 = arith.addf %301, %623 : vector<8x2x128xf32>
    %625 = math.tanh %624 : vector<8x2x128xf32>
    %626 = arith.mulf %625, %17 : vector<8x2x128xf32>
    %cst_189 = arith.constant dense<0.000000e+00> : vector<8x2xf32>
    %627 = vector.multi_reduction <add>, %626, %cst_189 [2] : vector<8x2x128xf32> to vector<8x2xf32>
    %628 = vector.shape_cast %627 : vector<8x2xf32> to vector<8x2x1xf32>
    %cst_190 = arith.constant dense<0xFF800000> : vector<2x1xf32>
    %629 = vector.multi_reduction <maximumf>, %628, %cst_190 [0] : vector<8x2x1xf32> to vector<2x1xf32>
    %630 = vector.shape_cast %629 : vector<2x1xf32> to vector<1x2x1xf32>
    %631 = vector.broadcast %630 : vector<1x2x1xf32> to vector<8x2x1xf32>
    %632 = arith.subf %628, %631 : vector<8x2x1xf32>
    %633 = math.exp %632 : vector<8x2x1xf32>
    %cst_191 = arith.constant dense<0.000000e+00> : vector<2x1xf32>
    %634 = vector.multi_reduction <add>, %633, %cst_191 [0] : vector<8x2x1xf32> to vector<2x1xf32>
    %635 = vector.shape_cast %634 : vector<2x1xf32> to vector<1x2x1xf32>
    %636 = vector.broadcast %635 : vector<1x2x1xf32> to vector<8x2x1xf32>
    %637 = arith.divf %633, %636 : vector<8x2x1xf32>
    %638 = vector.broadcast %637 : vector<8x2x1xf32> to vector<8x2x128xf32>
    %639 = arith.mulf %638, %293 : vector<8x2x128xf32>
    %cst_192 = arith.constant dense<0.000000e+00> : vector<2x128xf32>
    %640 = vector.multi_reduction <add>, %639, %cst_192 [0] : vector<8x2x128xf32> to vector<2x128xf32>
    %641 = arith.truncf %640 : vector<2x128xf32> to vector<2x128xbf16>
    %642 = arith.truncf %591 : vector<2x128xf32> to vector<2x128xbf16>
    %643 = tpu.concatenate %619, %641, %642 in 1 : vector<2x128xbf16>, vector<2x128xbf16>, vector<2x128xbf16> -> vector<2x384xbf16>
    %cst_193 = arith.constant dense<0.000000e+00> : vector<2x512xf32>
    %644 = tpu.matmul %643, %2, %cst_193 {dimension_numbers = #tpu.dot_dimension_numbers<[1], [0], [0], [1], [0, 0, 1, 1], [], []>} : vector<2x384xbf16>, vector<384x512xbf16>, vector<2x512xf32> -> vector<2x512xf32>
    %645 = arith.addf %644, %10 : vector<2x512xf32>
    %646 = vector.extract_strided_slice %645 {offsets = [0, 0], sizes = [2, 128], strides = [1, 1]} : vector<2x512xf32> to vector<2x128xf32>
    %647 = arith.negf %646 : vector<2x128xf32>
    %648 = math.exp %647 : vector<2x128xf32>
    %cst_194 = arith.constant 1.000000e+00 : f32
    %649 = vector.broadcast %cst_194 : f32 to vector<2x128xf32>
    %650 = arith.addf %649, %648 : vector<2x128xf32>
    %651 = arith.divf %649, %650 : vector<2x128xf32>
    %652 = vector.extract_strided_slice %645 {offsets = [0, 128], sizes = [2, 128], strides = [1, 1]} : vector<2x512xf32> to vector<2x128xf32>
    %653 = arith.negf %652 : vector<2x128xf32>
    %654 = math.exp %653 : vector<2x128xf32>
    %cst_195 = arith.constant 1.000000e+00 : f32
    %655 = vector.broadcast %cst_195 : f32 to vector<2x128xf32>
    %656 = arith.addf %655, %654 : vector<2x128xf32>
    %657 = arith.divf %655, %656 : vector<2x128xf32>
    %658 = vector.extract_strided_slice %645 {offsets = [0, 256], sizes = [2, 128], strides = [1, 1]} : vector<2x512xf32> to vector<2x128xf32>
    %659 = math.tanh %658 : vector<2x128xf32>
    %660 = vector.extract_strided_slice %645 {offsets = [0, 384], sizes = [2, 128], strides = [1, 1]} : vector<2x512xf32> to vector<2x128xf32>
    %661 = arith.negf %660 : vector<2x128xf32>
    %662 = math.exp %661 : vector<2x128xf32>
    %cst_196 = arith.constant 1.000000e+00 : f32
    %663 = vector.broadcast %cst_196 : f32 to vector<2x128xf32>
    %664 = arith.addf %663, %662 : vector<2x128xf32>
    %665 = arith.divf %663, %664 : vector<2x128xf32>
    %666 = arith.mulf %657, %589 : vector<2x128xf32>
    %667 = arith.mulf %651, %659 : vector<2x128xf32>
    %668 = arith.addf %666, %667 : vector<2x128xf32>
    %669 = math.tanh %668 : vector<2x128xf32>
    %670 = arith.mulf %665, %669 : vector<2x128xf32>
    %671 = arith.truncf %670 : vector<2x128xf32> to vector<2x128xbf16>
    %672 = arith.truncf %640 : vector<2x128xf32> to vector<2x128xbf16>
    %673 = tpu.concatenate %671, %672, %619 in 1 : vector<2x128xbf16>, vector<2x128xbf16>, vector<2x128xbf16> -> vector<2x384xbf16>
    %cst_197 = arith.constant dense<0.000000e+00> : vector<2x128xf32>
    %674 = tpu.matmul %673, %3, %cst_197 {dimension_numbers = #tpu.dot_dimension_numbers<[1], [0], [0], [1], [0, 0, 1, 1], [], []>} : vector<2x384xbf16>, vector<384x128xbf16>, vector<2x128xf32> -> vector<2x128xf32>
    %675 = arith.addf %674, %13 : vector<2x128xf32>
    %c4_198 = arith.constant 4 : index
    %c0_199 = arith.constant 0 : index
    %c0_200 = arith.constant 0 : index
    %676 = vector.load %arg15[%c4_198, %c0_199, %c0_200] : memref<7x2x128xf32, #tpu.memory_space<vmem>>, vector<1x2x128xf32>
    %677 = vector.shape_cast %676 : vector<1x2x128xf32> to vector<2x128xf32>
    %678 = vector.shape_cast %675 : vector<2x128xf32> to vector<1x2x128xf32>
    tpu.vector_store %arg15[%c4_198, %c0_199, %c0_200], %678 {strides = array<i32>} : memref<7x2x128xf32, #tpu.memory_space<vmem>>, vector<1x2x128xf32>,
    %cst_201 = arith.constant dense<0xFF800000> : vector<2xf32>
    %679 = vector.multi_reduction <maximumf>, %675, %cst_201 [1] : vector<2x128xf32> to vector<2xf32>
    %680 = vector.shape_cast %679 : vector<2xf32> to vector<2x1xf32>
    %681 = vector.broadcast %680 : vector<2x1xf32> to vector<2x128xf32>
    %682 = arith.cmpf oeq, %675, %681 : vector<2x128xf32>
    %c128_i32_202 = arith.constant 128 : i32
    %683 = vector.broadcast %c128_i32_202 : i32 to vector<2x128xi32>
    %684 = arith.select %682, %18, %683 : vector<2x128xi1>, vector<2x128xi32>
    %cst_203 = arith.constant dense<2147483647> : vector<2xi32>
    %685 = vector.multi_reduction <minsi>, %684, %cst_203 [1] : vector<2x128xi32> to vector<2xi32>
    %686 = vector.shape_cast %685 : vector<2xi32> to vector<2x1xi32>
    %687 = vector.broadcast %686 : vector<2x1xi32> to vector<2x128xi32>
    %688 = arith.cmpi eq, %18, %687 : vector<2x128xi32>
    %689 = arith.extui %688 : vector<2x128xi1> to vector<2x128xi32>
    %690 = arith.sitofp %689 : vector<2x128xi32> to vector<2x128xf32>
    %691 = arith.truncf %690 : vector<2x128xf32> to vector<2x128xbf16>
    %cst_204 = arith.constant dense<0.000000e+00> : vector<2x128xf32>
    %692 = tpu.matmul %691, %4, %cst_204 {dimension_numbers = #tpu.dot_dimension_numbers<[1], [0], [0], [1], [0, 0, 1, 1], [], []>} : vector<2x128xbf16>, vector<128x128xbf16>, vector<2x128xf32> -> vector<2x128xf32>
    %693 = arith.truncf %692 : vector<2x128xf32> to vector<2x128xbf16>
    %c4_205 = arith.constant 4 : index
    %694 = memref.load %arg1[%c4_205] : memref<7xi32, #tpu.memory_space<smem>>
    %c0_i32_206 = arith.constant 0 : i32
    %695 = arith.cmpi ne, %694, %c0_i32_206 : i32
    %c5_207 = arith.constant 5 : index
    %c0_208 = arith.constant 0 : index
    %c0_209 = arith.constant 0 : index
    %696 = vector.load %arg3[%c5_207, %c0_208, %c0_209] : memref<7x2x128xbf16, #tpu.memory_space<vmem>>, vector<1x2x128xbf16>
    %697 = vector.shape_cast %696 : vector<1x2x128xbf16> to vector<2x128xbf16>
    %698 = arith.select %695, %697, %693 : vector<2x128xbf16>
    %699 = arith.truncf %670 : vector<2x128xf32> to vector<2x128xbf16>
    %cst_210 = arith.constant dense<0.000000e+00> : vector<2x128xf32>
    %700 = tpu.matmul %699, %1, %cst_210 {dimension_numbers = #tpu.dot_dimension_numbers<[1], [0], [0], [1], [0, 0, 1, 1], [], []>} : vector<2x128xbf16>, vector<128x128xbf16>, vector<2x128xf32> -> vector<2x128xf32>
    %701 = vector.shape_cast %700 : vector<2x128xf32> to vector<1x2x128xf32>
    %702 = vector.broadcast %701 : vector<1x2x128xf32> to vector<8x2x128xf32>
    %703 = arith.addf %301, %702 : vector<8x2x128xf32>
    %704 = math.tanh %703 : vector<8x2x128xf32>
    %705 = arith.mulf %704, %17 : vector<8x2x128xf32>
    %cst_211 = arith.constant dense<0.000000e+00> : vector<8x2xf32>
    %706 = vector.multi_reduction <add>, %705, %cst_211 [2] : vector<8x2x128xf32> to vector<8x2xf32>
    %707 = vector.shape_cast %706 : vector<8x2xf32> to vector<8x2x1xf32>
    %cst_212 = arith.constant dense<0xFF800000> : vector<2x1xf32>
    %708 = vector.multi_reduction <maximumf>, %707, %cst_212 [0] : vector<8x2x1xf32> to vector<2x1xf32>
    %709 = vector.shape_cast %708 : vector<2x1xf32> to vector<1x2x1xf32>
    %710 = vector.broadcast %709 : vector<1x2x1xf32> to vector<8x2x1xf32>
    %711 = arith.subf %707, %710 : vector<8x2x1xf32>
    %712 = math.exp %711 : vector<8x2x1xf32>
    %cst_213 = arith.constant dense<0.000000e+00> : vector<2x1xf32>
    %713 = vector.multi_reduction <add>, %712, %cst_213 [0] : vector<8x2x1xf32> to vector<2x1xf32>
    %714 = vector.shape_cast %713 : vector<2x1xf32> to vector<1x2x1xf32>
    %715 = vector.broadcast %714 : vector<1x2x1xf32> to vector<8x2x1xf32>
    %716 = arith.divf %712, %715 : vector<8x2x1xf32>
    %717 = vector.broadcast %716 : vector<8x2x1xf32> to vector<8x2x128xf32>
    %718 = arith.mulf %717, %293 : vector<8x2x128xf32>
    %cst_214 = arith.constant dense<0.000000e+00> : vector<2x128xf32>
    %719 = vector.multi_reduction <add>, %718, %cst_214 [0] : vector<8x2x128xf32> to vector<2x128xf32>
    %720 = arith.truncf %719 : vector<2x128xf32> to vector<2x128xbf16>
    %721 = arith.truncf %670 : vector<2x128xf32> to vector<2x128xbf16>
    %722 = tpu.concatenate %698, %720, %721 in 1 : vector<2x128xbf16>, vector<2x128xbf16>, vector<2x128xbf16> -> vector<2x384xbf16>
    %cst_215 = arith.constant dense<0.000000e+00> : vector<2x512xf32>
    %723 = tpu.matmul %722, %2, %cst_215 {dimension_numbers = #tpu.dot_dimension_numbers<[1], [0], [0], [1], [0, 0, 1, 1], [], []>} : vector<2x384xbf16>, vector<384x512xbf16>, vector<2x512xf32> -> vector<2x512xf32>
    %724 = arith.addf %723, %10 : vector<2x512xf32>
    %725 = vector.extract_strided_slice %724 {offsets = [0, 0], sizes = [2, 128], strides = [1, 1]} : vector<2x512xf32> to vector<2x128xf32>
    %726 = arith.negf %725 : vector<2x128xf32>
    %727 = math.exp %726 : vector<2x128xf32>
    %cst_216 = arith.constant 1.000000e+00 : f32
    %728 = vector.broadcast %cst_216 : f32 to vector<2x128xf32>
    %729 = arith.addf %728, %727 : vector<2x128xf32>
    %730 = arith.divf %728, %729 : vector<2x128xf32>
    %731 = vector.extract_strided_slice %724 {offsets = [0, 128], sizes = [2, 128], strides = [1, 1]} : vector<2x512xf32> to vector<2x128xf32>
    %732 = arith.negf %731 : vector<2x128xf32>
    %733 = math.exp %732 : vector<2x128xf32>
    %cst_217 = arith.constant 1.000000e+00 : f32
    %734 = vector.broadcast %cst_217 : f32 to vector<2x128xf32>
    %735 = arith.addf %734, %733 : vector<2x128xf32>
    %736 = arith.divf %734, %735 : vector<2x128xf32>
    %737 = vector.extract_strided_slice %724 {offsets = [0, 256], sizes = [2, 128], strides = [1, 1]} : vector<2x512xf32> to vector<2x128xf32>
    %738 = math.tanh %737 : vector<2x128xf32>
    %739 = vector.extract_strided_slice %724 {offsets = [0, 384], sizes = [2, 128], strides = [1, 1]} : vector<2x512xf32> to vector<2x128xf32>
    %740 = arith.negf %739 : vector<2x128xf32>
    %741 = math.exp %740 : vector<2x128xf32>
    %cst_218 = arith.constant 1.000000e+00 : f32
    %742 = vector.broadcast %cst_218 : f32 to vector<2x128xf32>
    %743 = arith.addf %742, %741 : vector<2x128xf32>
    %744 = arith.divf %742, %743 : vector<2x128xf32>
    %745 = arith.mulf %736, %668 : vector<2x128xf32>
    %746 = arith.mulf %730, %738 : vector<2x128xf32>
    %747 = arith.addf %745, %746 : vector<2x128xf32>
    %748 = math.tanh %747 : vector<2x128xf32>
    %749 = arith.mulf %744, %748 : vector<2x128xf32>
    %750 = arith.truncf %749 : vector<2x128xf32> to vector<2x128xbf16>
    %751 = arith.truncf %719 : vector<2x128xf32> to vector<2x128xbf16>
    %752 = tpu.concatenate %750, %751, %698 in 1 : vector<2x128xbf16>, vector<2x128xbf16>, vector<2x128xbf16> -> vector<2x384xbf16>
    %cst_219 = arith.constant dense<0.000000e+00> : vector<2x128xf32>
    %753 = tpu.matmul %752, %3, %cst_219 {dimension_numbers = #tpu.dot_dimension_numbers<[1], [0], [0], [1], [0, 0, 1, 1], [], []>} : vector<2x384xbf16>, vector<384x128xbf16>, vector<2x128xf32> -> vector<2x128xf32>
    %754 = arith.addf %753, %13 : vector<2x128xf32>
    %c5_220 = arith.constant 5 : index
    %c0_221 = arith.constant 0 : index
    %c0_222 = arith.constant 0 : index
    %755 = vector.load %arg15[%c5_220, %c0_221, %c0_222] : memref<7x2x128xf32, #tpu.memory_space<vmem>>, vector<1x2x128xf32>
    %756 = vector.shape_cast %755 : vector<1x2x128xf32> to vector<2x128xf32>
    %757 = vector.shape_cast %754 : vector<2x128xf32> to vector<1x2x128xf32>
    tpu.vector_store %arg15[%c5_220, %c0_221, %c0_222], %757 {strides = array<i32>} : memref<7x2x128xf32, #tpu.memory_space<vmem>>, vector<1x2x128xf32>,
    %cst_223 = arith.constant dense<0xFF800000> : vector<2xf32>
    %758 = vector.multi_reduction <maximumf>, %754, %cst_223 [1] : vector<2x128xf32> to vector<2xf32>
    %759 = vector.shape_cast %758 : vector<2xf32> to vector<2x1xf32>
    %760 = vector.broadcast %759 : vector<2x1xf32> to vector<2x128xf32>
    %761 = arith.cmpf oeq, %754, %760 : vector<2x128xf32>
    %c128_i32_224 = arith.constant 128 : i32
    %762 = vector.broadcast %c128_i32_224 : i32 to vector<2x128xi32>
    %763 = arith.select %761, %18, %762 : vector<2x128xi1>, vector<2x128xi32>
    %cst_225 = arith.constant dense<2147483647> : vector<2xi32>
    %764 = vector.multi_reduction <minsi>, %763, %cst_225 [1] : vector<2x128xi32> to vector<2xi32>
    %765 = vector.shape_cast %764 : vector<2xi32> to vector<2x1xi32>
    %766 = vector.broadcast %765 : vector<2x1xi32> to vector<2x128xi32>
    %767 = arith.cmpi eq, %18, %766 : vector<2x128xi32>
    %768 = arith.extui %767 : vector<2x128xi1> to vector<2x128xi32>
    %769 = arith.sitofp %768 : vector<2x128xi32> to vector<2x128xf32>
    %770 = arith.truncf %769 : vector<2x128xf32> to vector<2x128xbf16>
    %cst_226 = arith.constant dense<0.000000e+00> : vector<2x128xf32>
    %771 = tpu.matmul %770, %4, %cst_226 {dimension_numbers = #tpu.dot_dimension_numbers<[1], [0], [0], [1], [0, 0, 1, 1], [], []>} : vector<2x128xbf16>, vector<128x128xbf16>, vector<2x128xf32> -> vector<2x128xf32>
    %772 = arith.truncf %771 : vector<2x128xf32> to vector<2x128xbf16>
    %c5_227 = arith.constant 5 : index
    %773 = memref.load %arg1[%c5_227] : memref<7xi32, #tpu.memory_space<smem>>
    %c0_i32_228 = arith.constant 0 : i32
    %774 = arith.cmpi ne, %773, %c0_i32_228 : i32
    %c6_229 = arith.constant 6 : index
    %c0_230 = arith.constant 0 : index
    %c0_231 = arith.constant 0 : index
    %775 = vector.load %arg3[%c6_229, %c0_230, %c0_231] : memref<7x2x128xbf16, #tpu.memory_space<vmem>>, vector<1x2x128xbf16>
    %776 = vector.shape_cast %775 : vector<1x2x128xbf16> to vector<2x128xbf16>
    %777 = arith.select %774, %776, %772 : vector<2x128xbf16>
    %778 = arith.truncf %749 : vector<2x128xf32> to vector<2x128xbf16>
    %cst_232 = arith.constant dense<0.000000e+00> : vector<2x128xf32>
    %779 = tpu.matmul %778, %1, %cst_232 {dimension_numbers = #tpu.dot_dimension_numbers<[1], [0], [0], [1], [0, 0, 1, 1], [], []>} : vector<2x128xbf16>, vector<128x128xbf16>, vector<2x128xf32> -> vector<2x128xf32>
    %780 = vector.shape_cast %779 : vector<2x128xf32> to vector<1x2x128xf32>
    %781 = vector.broadcast %780 : vector<1x2x128xf32> to vector<8x2x128xf32>
    %782 = arith.addf %301, %781 : vector<8x2x128xf32>
    %783 = math.tanh %782 : vector<8x2x128xf32>
    %784 = arith.mulf %783, %17 : vector<8x2x128xf32>
    %cst_233 = arith.constant dense<0.000000e+00> : vector<8x2xf32>
    %785 = vector.multi_reduction <add>, %784, %cst_233 [2] : vector<8x2x128xf32> to vector<8x2xf32>
    %786 = vector.shape_cast %785 : vector<8x2xf32> to vector<8x2x1xf32>
    %cst_234 = arith.constant dense<0xFF800000> : vector<2x1xf32>
    %787 = vector.multi_reduction <maximumf>, %786, %cst_234 [0] : vector<8x2x1xf32> to vector<2x1xf32>
    %788 = vector.shape_cast %787 : vector<2x1xf32> to vector<1x2x1xf32>
    %789 = vector.broadcast %788 : vector<1x2x1xf32> to vector<8x2x1xf32>
    %790 = arith.subf %786, %789 : vector<8x2x1xf32>
    %791 = math.exp %790 : vector<8x2x1xf32>
    %cst_235 = arith.constant dense<0.000000e+00> : vector<2x1xf32>
    %792 = vector.multi_reduction <add>, %791, %cst_235 [0] : vector<8x2x1xf32> to vector<2x1xf32>
    %793 = vector.shape_cast %792 : vector<2x1xf32> to vector<1x2x1xf32>
    %794 = vector.broadcast %793 : vector<1x2x1xf32> to vector<8x2x1xf32>
    %795 = arith.divf %791, %794 : vector<8x2x1xf32>
    %796 = vector.broadcast %795 : vector<8x2x1xf32> to vector<8x2x128xf32>
    %797 = arith.mulf %796, %293 : vector<8x2x128xf32>
    %cst_236 = arith.constant dense<0.000000e+00> : vector<2x128xf32>
    %798 = vector.multi_reduction <add>, %797, %cst_236 [0] : vector<8x2x128xf32> to vector<2x128xf32>
    %799 = arith.truncf %798 : vector<2x128xf32> to vector<2x128xbf16>
    %800 = arith.truncf %749 : vector<2x128xf32> to vector<2x128xbf16>
    %801 = tpu.concatenate %777, %799, %800 in 1 : vector<2x128xbf16>, vector<2x128xbf16>, vector<2x128xbf16> -> vector<2x384xbf16>
    %cst_237 = arith.constant dense<0.000000e+00> : vector<2x512xf32>
    %802 = tpu.matmul %801, %2, %cst_237 {dimension_numbers = #tpu.dot_dimension_numbers<[1], [0], [0], [1], [0, 0, 1, 1], [], []>} : vector<2x384xbf16>, vector<384x512xbf16>, vector<2x512xf32> -> vector<2x512xf32>
    %803 = arith.addf %802, %10 : vector<2x512xf32>
    %804 = vector.extract_strided_slice %803 {offsets = [0, 0], sizes = [2, 128], strides = [1, 1]} : vector<2x512xf32> to vector<2x128xf32>
    %805 = arith.negf %804 : vector<2x128xf32>
    %806 = math.exp %805 : vector<2x128xf32>
    %cst_238 = arith.constant 1.000000e+00 : f32
    %807 = vector.broadcast %cst_238 : f32 to vector<2x128xf32>
    %808 = arith.addf %807, %806 : vector<2x128xf32>
    %809 = arith.divf %807, %808 : vector<2x128xf32>
    %810 = vector.extract_strided_slice %803 {offsets = [0, 128], sizes = [2, 128], strides = [1, 1]} : vector<2x512xf32> to vector<2x128xf32>
    %811 = arith.negf %810 : vector<2x128xf32>
    %812 = math.exp %811 : vector<2x128xf32>
    %cst_239 = arith.constant 1.000000e+00 : f32
    %813 = vector.broadcast %cst_239 : f32 to vector<2x128xf32>
    %814 = arith.addf %813, %812 : vector<2x128xf32>
    %815 = arith.divf %813, %814 : vector<2x128xf32>
    %816 = vector.extract_strided_slice %803 {offsets = [0, 256], sizes = [2, 128], strides = [1, 1]} : vector<2x512xf32> to vector<2x128xf32>
    %817 = math.tanh %816 : vector<2x128xf32>
    %818 = vector.extract_strided_slice %803 {offsets = [0, 384], sizes = [2, 128], strides = [1, 1]} : vector<2x512xf32> to vector<2x128xf32>
    %819 = arith.negf %818 : vector<2x128xf32>
    %820 = math.exp %819 : vector<2x128xf32>
    %cst_240 = arith.constant 1.000000e+00 : f32
    %821 = vector.broadcast %cst_240 : f32 to vector<2x128xf32>
    %822 = arith.addf %821, %820 : vector<2x128xf32>
    %823 = arith.divf %821, %822 : vector<2x128xf32>
    %824 = arith.mulf %815, %747 : vector<2x128xf32>
    %825 = arith.mulf %809, %817 : vector<2x128xf32>
    %826 = arith.addf %824, %825 : vector<2x128xf32>
    %827 = math.tanh %826 : vector<2x128xf32>
    %828 = arith.mulf %823, %827 : vector<2x128xf32>
    %829 = arith.truncf %828 : vector<2x128xf32> to vector<2x128xbf16>
    %830 = arith.truncf %798 : vector<2x128xf32> to vector<2x128xbf16>
    %831 = tpu.concatenate %829, %830, %777 in 1 : vector<2x128xbf16>, vector<2x128xbf16>, vector<2x128xbf16> -> vector<2x384xbf16>
    %cst_241 = arith.constant dense<0.000000e+00> : vector<2x128xf32>
    %832 = tpu.matmul %831, %3, %cst_241 {dimension_numbers = #tpu.dot_dimension_numbers<[1], [0], [0], [1], [0, 0, 1, 1], [], []>} : vector<2x384xbf16>, vector<384x128xbf16>, vector<2x128xf32> -> vector<2x128xf32>
    %833 = arith.addf %832, %13 : vector<2x128xf32>
    %c6_242 = arith.constant 6 : index
    %c0_243 = arith.constant 0 : index
    %c0_244 = arith.constant 0 : index
    %834 = vector.load %arg15[%c6_242, %c0_243, %c0_244] : memref<7x2x128xf32, #tpu.memory_space<vmem>>, vector<1x2x128xf32>
    %835 = vector.shape_cast %834 : vector<1x2x128xf32> to vector<2x128xf32>
    %836 = vector.shape_cast %833 : vector<2x128xf32> to vector<1x2x128xf32>
    tpu.vector_store %arg15[%c6_242, %c0_243, %c0_244], %836 {strides = array<i32>} : memref<7x2x128xf32, #tpu.memory_space<vmem>>, vector<1x2x128xf32>,
    return
  }
  func.func @transform_0(%arg0: i32, %arg1: memref<7xi32, #tpu.memory_space<smem>>) -> (i32, i32, i32) {
    %c0_i32 = arith.constant 0 : i32
    %c0_i32_0 = arith.constant 0 : i32
    %c0_i32_1 = arith.constant 0 : i32
    %c0_i32_2 = arith.constant 0 : i32
    return %c0_i32, %c0_i32_0, %c0_i32_1 : i32, i32, i32
  }
  func.func @transform_1(%arg0: i32, %arg1: memref<7xi32, #tpu.memory_space<smem>>) -> (i32, i32, i32) {
    %c0_i32 = arith.constant 0 : i32
    %c0_i32_0 = arith.constant 0 : i32
    %c0_i32_1 = arith.constant 0 : i32
    %c0_i32_2 = arith.constant 0 : i32
    return %c0_i32, %c0_i32_0, %c0_i32_1 : i32, i32, i32
  }
  func.func @transform_2(%arg0: i32, %arg1: memref<7xi32, #tpu.memory_space<smem>>) -> (i32, i32) {
    %c0_i32 = arith.constant 0 : i32
    %c0_i32_0 = arith.constant 0 : i32
    %c0_i32_1 = arith.constant 0 : i32
    return %c0_i32, %c0_i32_0 : i32, i32
  }
  func.func @transform_3(%arg0: i32, %arg1: memref<7xi32, #tpu.memory_space<smem>>) -> (i32, i32) {
    %c0_i32 = arith.constant 0 : i32
    %c0_i32_0 = arith.constant 0 : i32
    %c0_i32_1 = arith.constant 0 : i32
    return %c0_i32, %c0_i32_0 : i32, i32
  }
  func.func @transform_4(%arg0: i32, %arg1: memref<7xi32, #tpu.memory_space<smem>>) -> (i32, i32) {
    %c0_i32 = arith.constant 0 : i32
    %c0_i32_0 = arith.constant 0 : i32
    %c0_i32_1 = arith.constant 0 : i32
    return %c0_i32, %c0_i32_0 : i32, i32
  }
  func.func @transform_5(%arg0: i32, %arg1: memref<7xi32, #tpu.memory_space<smem>>) -> (i32, i32) {
    %c0_i32 = arith.constant 0 : i32
    %c0_i32_0 = arith.constant 0 : i32
    %c0_i32_1 = arith.constant 0 : i32
    return %c0_i32, %c0_i32_0 : i32, i32
  }
  func.func @transform_6(%arg0: i32, %arg1: memref<7xi32, #tpu.memory_space<smem>>) -> (i32, i32) {
    %c0_i32 = arith.constant 0 : i32
    %c0_i32_0 = arith.constant 0 : i32
    %c0_i32_1 = arith.constant 0 : i32
    return %c0_i32, %c0_i32_0 : i32, i32
  }
  func.func @transform_7(%arg0: i32, %arg1: memref<7xi32, #tpu.memory_space<smem>>) -> (i32, i32) {
    %c0_i32 = arith.constant 0 : i32
    %c0_i32_0 = arith.constant 0 : i32
    %c0_i32_1 = arith.constant 0 : i32
    return %c0_i32, %c0_i32_0 : i32, i32
  }
  func.func @transform_8(%arg0: i32, %arg1: memref<7xi32, #tpu.memory_space<smem>>) -> (i32, i32) {
    %c0_i32 = arith.constant 0 : i32
    %c0_i32_0 = arith.constant 0 : i32
    %c0_i32_1 = arith.constant 0 : i32
    return %c0_i32, %c0_i32_0 : i32, i32
  }
  func.func @transform_9(%arg0: i32, %arg1: memref<7xi32, #tpu.memory_space<smem>>) -> (i32, i32) {
    %c0_i32 = arith.constant 0 : i32
    %c0_i32_0 = arith.constant 0 : i32
    %c0_i32_1 = arith.constant 0 : i32
    return %c0_i32, %c0_i32_0 : i32, i32
  }
  func.func @transform_10(%arg0: i32, %arg1: memref<7xi32, #tpu.memory_space<smem>>) -> (i32, i32) {
    %c0_i32 = arith.constant 0 : i32
    %c0_i32_0 = arith.constant 0 : i32
    %c0_i32_1 = arith.constant 0 : i32
    return %c0_i32, %c0_i32_0 : i32, i32
  }
  func.func @transform_11(%arg0: i32, %arg1: memref<7xi32, #tpu.memory_space<smem>>) -> (i32, i32) {
    %c0_i32 = arith.constant 0 : i32
    %c0_i32_0 = arith.constant 0 : i32
    %c0_i32_1 = arith.constant 0 : i32
    return %c0_i32, %c0_i32_0 : i32, i32
  }
  func.func @transform_12(%arg0: i32, %arg1: memref<7xi32, #tpu.memory_space<smem>>) -> (i32, i32) {
    %c0_i32 = arith.constant 0 : i32
    %c0_i32_0 = arith.constant 0 : i32
    %c0_i32_1 = arith.constant 0 : i32
    return %c0_i32, %c0_i32_0 : i32, i32
  }
  func.func @transform_13(%arg0: i32, %arg1: memref<7xi32, #tpu.memory_space<smem>>) -> (i32, i32, i32) {
    %c0_i32 = arith.constant 0 : i32
    %c0_i32_0 = arith.constant 0 : i32
    %c0_i32_1 = arith.constant 0 : i32
    %c0_i32_2 = arith.constant 0 : i32
    return %c0_i32, %c0_i32_0, %c0_i32_1 : i32, i32, i32
  }
}

</mosaic_0001>

<bundles_post_ra>
// kernel: attn_seq2seq_forward.1
= control target key start
LH: loop header
LB: loop body
LE: loop exit
PB: predicated region body
PF: predicated region fallthrough
CT: control target
= control target key end

     0   :  { %s14135_s0 = inlined_call_operand.vmem [shape: s32[7], index: 0, kind: input, shape index: {}]   ;;  %s14136_s1 = inlined_call_operand.vmem [shape: bf16[8,2,128], index: 1, kind: input, shape index: {}]   ;;  %s14137_s2 = inlined_call_operand.vmem [shape: bf16[7,2,128], index: 2, kind: input, shape index: {}]   ;;  %s14138_s3 = inlined_call_operand.vmem [shape: bf16[128,128], index: 3, kind: input, shape index: {}]   ;;  %s14139_s4 = inlined_call_operand.vmem [shape: bf16[256,512], index: 4, kind: input, shape index: {}]   ;;  %s14140_s5 = inlined_call_operand.vmem [shape: f32[1,512], index: 5, kind: input, shape index: {}]   ;;  %s14141_s6 = inlined_call_operand.vmem [shape: bf16[128,128], index: 6, kind: input, shape index: {}]   ;;  %s14142_s7 = inlined_call_operand.vmem [shape: bf16[128,128], index: 7, kind: input, shape index: {}]   ;;  %s14143_s8 = inlined_call_operand.vmem [shape: f32[1,128], index: 8, kind: input, shape index: {}]   ;;  %s14144_s9 = inlined_call_operand.vmem [shape: f32[1,128], index: 9, kind: input, shape index: {}]   ;;  %s14145_s10 = inlined_call_operand.vmem [shape: bf16[384,512], index: 10, kind: input, shape index: {}]   ;;  %s14146_s11 = inlined_call_operand.vmem [shape: f32[1,512], index: 11, kind: input, shape index: {}]   ;;  %s14147_s12 = inlined_call_operand.vmem [shape: bf16[384,128], index: 12, kind: input, shape index: {}]   ;;  %s14148_s13 = inlined_call_operand.vmem [shape: f32[1,128], index: 13, kind: input, shape index: {}]   ;;  %s14149_s14 = inlined_call_operand.vmem [shape: f32[7,2,128], index: 14, kind: output, shape index: {}]  }
   0x1   :  { %s19_s15 = sshll.u32 %s14135_s0, 4  ;;  %s20_s15 = int_to_ptr.vmem [resolvable:$true] %s19_s15 }
   0x2   :  { %s8482_s16 = scalar_lea.vmem %s20_s15, 16  ;;  %p8487_p1 = scmp.lt.s32.totalorder %s20_s15, %s20_s15 }
   0x3   :  { %p8483_p0 = scmp.ne.s32.totalorder %s20_s15, %s8482_s16  ;;  %p8488_p2 = scmp.lt.s32.totalorder %s8482_s16, %s8482_s16 }
   0x5   :  { %p8489_p3 = por %p8488_p2, %p8487_p1 }
   0x7   :  { %p8490_p4 = pnand %p8489_p3, %p8483_p0 }
   0x9   :  { %8493 = shalt.err (!%p8490_p4)  }
   0xa   :  { %s8496_s17 = smov [#allocation4]  }
   0xb   :  { %22 = dma.vmem_to_smem %s20_s15, 16, %s8496_s17, [#allocation3] }
   0xc   :  { %8494 = dma.done.wait [#allocation3], 16 }
   0xd   :  { %8495 = vsyncadd [#allocation3], 4294967280 }
   0xe   :  { %24 = sfence }
   0xf   :  { %v8583_v0 = vld [vmem:[%s14139_s4 + $0x4] ss:$16 sps:$4 sm:$0xff]   ;;  %v8588_v1 = vld [vmem:[%s14139_s4] ss:$16 sps:$4 sm:$0xff]   ;;  %v14150_v2 = vmov 0   ;;  %vm8499_vm0 = vmmov 0  }
  0x10   :  { %706 = vmatprep.mubr.bf16.mxu0 %v14150_v2  ;;  %747 = vmatprep.mubr.bf16.mxu1 %v14150_v2  ;;  %v8596_v3 = vld [vmem:[%s14139_s4 + $0x24] ss:$16 sps:$4 sm:$0xff]   ;;  %v8602_v4 = vld [vmem:[%s14139_s4 + $0x20] ss:$16 sps:$4 sm:$0xff]   ;;  %v8613_v6 = vld [vmem:[%s14139_s4 + $0xc] ss:$16 sps:$4 sm:$0xff]  }
  0x11   :  { %674 = vmatprep.subr.bf16.mxu0 %v8583_v0  ;;  %v8608_v5 = vld [vmem:[%s14139_s4 + $0x44] ss:$16 sps:$4 sm:$0xff]   ;;  %v8618_v7 = vld [vmem:[%s14139_s4 + $0x8] ss:$16 sps:$4 sm:$0xff]   ;;  %v8624_v8 = vld [vmem:[%s14139_s4 + $0x40] ss:$16 sps:$4 sm:$0xff]   ;;  %715 = vmatprep.subr.bf16.mxu1 %v8613_v6 }
  0x12   :  { %675 = vmatpush1.bf16.msra.mxu0 %v8588_v1  ;;  %v8631_v9 = vld [vmem:[%s14139_s4 + $0x64] ss:$16 sps:$4 sm:$0xff]   ;;  %716 = vmatpush1.bf16.msra.mxu1 %v8618_v7  ;;  %v8637_v10 = vld [vmem:[%s14139_s4 + $0x2c] ss:$16 sps:$4 sm:$0xff]   ;;  %v8642_v11 = vld [vmem:[%s14139_s4 + $0x28] ss:$16 sps:$4 sm:$0xff]  }
  0x13   :  { %676 = vmatprep.subr.bf16.mxu0 %v8596_v3  ;;  %717 = vmatprep.subr.bf16.mxu1 %v8637_v10  ;;  %v8649_v12 = vld [vmem:[%s14139_s4 + $0x60] ss:$16 sps:$4 sm:$0xff]   ;;  %v8654_v13 = vld [vmem:[%s14139_s4 + $0x84] ss:$16 sps:$4 sm:$0xff]   ;;  %v8659_v14 = vld [vmem:[%s14139_s4 + $0x4c] ss:$16 sps:$4 sm:$0xff]  }
  0x14   :  { %v8666_v15 = vld [vmem:[%s14139_s4 + $0x48] ss:$16 sps:$4 sm:$0xff]   ;;  %v8672_v16 = vld [vmem:[%s14139_s4 + $0x6c] ss:$16 sps:$4 sm:$0xff]   ;;  %v8678_v17 = vld [vmem:[%s14139_s4 + $0x80] ss:$16 sps:$4 sm:$0xff]  }
  0x15   :  { %v8684_v18 = vld [vmem:[%s14139_s4 + $0xa4] ss:$16 sps:$4 sm:$0xff]   ;;  %v8690_v19 = vld [vmem:[%s14139_s4 + $0x68] ss:$16 sps:$4 sm:$0xff]   ;;  %v8696_v20 = vld [vmem:[%s14139_s4 + $0x8c] ss:$16 sps:$4 sm:$0xff]  }
  0x16   :  { %677 = vmatpush1.bf16.msra.mxu0 %v8602_v4  ;;  %718 = vmatpush1.bf16.msra.mxu1 %v8642_v11  ;;  %v8702_v21 = vld [vmem:[%s14139_s4 + $0xa0] ss:$16 sps:$4 sm:$0xff]   ;;  %v8707_v22 = vld [vmem:[%s14139_s4 + $0xc4] ss:$16 sps:$4 sm:$0xff]   ;;  %v8714_v23 = vld [vmem:[%s14139_s4 + $0x88] ss:$16 sps:$4 sm:$0xff]  }
  0x17   :  { %678 = vmatprep.subr.bf16.mxu0 %v8608_v5  ;;  %719 = vmatprep.subr.bf16.mxu1 %v8659_v14  ;;  %v8720_v24 = vld [vmem:[%s14139_s4 + $0xac] ss:$16 sps:$4 sm:$0xff]   ;;  %v8726_v25 = vld [vmem:[%s14139_s4 + $0xc0] ss:$16 sps:$4 sm:$0xff]   ;;  %v8732_v26 = vld [vmem:[%s14139_s4 + $0xe4] ss:$16 sps:$4 sm:$0xff]  }
  0x18   :  { %v8738_v27 = vld [vmem:[%s14139_s4 + $0xa8] ss:$16 sps:$4 sm:$0xff]   ;;  %v8744_v28 = vld [vmem:[%s14139_s4 + $0xcc] ss:$16 sps:$4 sm:$0xff]   ;;  %v8750_v29 = vld [vmem:[%s14139_s4 + $0xe0] ss:$16 sps:$4 sm:$0xff]  }
  0x19   :  { %v8755_v30 = vld [vmem:[%s14139_s4 + $0x104] ss:$16 sps:$4 sm:$0xff]   ;;  %v8762_v31 = vld [vmem:[%s14139_s4 + $0xc8] ss:$16 sps:$4 sm:$0xff]   ;;  %v8768_v32 = vld [vmem:[%s14139_s4 + $0xec] ss:$16 sps:$4 sm:$0xff]  }
  0x1a   :  { %679 = vmatpush1.bf16.msra.mxu0 %v8624_v8  ;;  %720 = vmatpush1.bf16.msra.mxu1 %v8666_v15  ;;  %v8774_v33 = vld [vmem:[%s14139_s4 + $0x100] ss:$16 sps:$4 sm:$0xff]   ;;  %v8780_v34 = vld [vmem:[%s14139_s4 + $0x124] ss:$16 sps:$4 sm:$0xff]   ;;  %v8786_v35 = vld [vmem:[%s14139_s4 + $0xe8] ss:$16 sps:$4 sm:$0xff]  }
  0x1b   :  { %680 = vmatprep.subr.bf16.mxu0 %v8631_v9  ;;  %721 = vmatprep.subr.bf16.mxu1 %v8672_v16  ;;  %v8792_v36 = vld [vmem:[%s14139_s4 + $0x10c] ss:$16 sps:$4 sm:$0xff]   ;;  %v8798_v37 = vld [vmem:[%s14139_s4 + $0x120] ss:$16 sps:$4 sm:$0xff]   ;;  %v8803_v38 = vld [vmem:[%s14139_s4 + $0x144] ss:$16 sps:$4 sm:$0xff]  }
  0x1c   :  { %v8810_v39 = vld [vmem:[%s14139_s4 + $0x108] ss:$16 sps:$4 sm:$0xff]   ;;  %v8816_v40 = vld [vmem:[%s14139_s4 + $0x12c] ss:$16 sps:$4 sm:$0xff]   ;;  %v8821_v41 = vld [vmem:[%s14139_s4 + $0x140] ss:$16 sps:$4 sm:$0xff]  }
  0x1d   :  { %v8827_v42 = vld [vmem:[%s14139_s4 + $0x164] ss:$16 sps:$4 sm:$0xff]   ;;  %v8834_v43 = vld [vmem:[%s14139_s4 + $0x128] ss:$16 sps:$4 sm:$0xff]   ;;  %v8839_v44 = vld [vmem:[%s14139_s4 + $0x160] ss:$16 sps:$4 sm:$0xff]  }
  0x1e   :  { %681 = vmatpush1.bf16.msra.mxu0 %v8649_v12  ;;  %722 = vmatpush1.bf16.msra.mxu1 %v8690_v19  ;;  %v8845_v45 = vld [vmem:[%s14139_s4 + $0x14c] ss:$16 sps:$4 sm:$0xff]   ;;  %v8850_v46 = vld [vmem:[%s14139_s4 + $0x184] ss:$16 sps:$4 sm:$0xff]   ;;  %v8855_v47 = vld [vmem:[%s14139_s4 + $0x148] ss:$16 sps:$4 sm:$0xff]  }
  0x1f   :  { %682 = vmatprep.subr.bf16.mxu0 %v8654_v13  ;;  %723 = vmatprep.subr.bf16.mxu1 %v8696_v20  ;;  %14552 = vst [vmem:[#allocation6_spill] sm:$0xff] %v8850_v46  ;;  %v8861_v48 = vld [vmem:[%s14139_s4 + $0x16c] ss:$16 sps:$4 sm:$0xff]   ;;  %v8868_v49 = vld [vmem:[%s14139_s4 + $0x180] ss:$16 sps:$4 sm:$0xff]   ;;  %vm1881_vm1 = vcmask 1041408  }
  0x20   :  { %14553 = vst [vmem:[#allocation7_spill] sm:$0xff] %v8868_v49  ;;  %v8874_v50 = vld [vmem:[%s14139_s4 + $0x1a4] ss:$16 sps:$4 sm:$0xff]   ;;  %v8879_v51 = vld [vmem:[%s14139_s4 + $0x168] ss:$16 sps:$4 sm:$0xff]   ;;  %s3000_s17 = sld [smem:[#allocation4]] }
  0x21   :  { %14554 = vst [vmem:[#allocation8_spill] sm:$0xff] %v8874_v50  ;;  %v8885_v52 = vld [vmem:[%s14139_s4 + $0x18c] ss:$16 sps:$4 sm:$0xff]   ;;  %v8892_v53 = vld [vmem:[%s14139_s4 + $0x1a0] ss:$16 sps:$4 sm:$0xff]   ;;  %s6327_s20 = sld [smem:[#allocation4 + $0x1]] }
  0x22   :  { %683 = vmatpush1.bf16.msra.mxu0 %v8678_v17  ;;  %724 = vmatpush1.bf16.msra.mxu1 %v8714_v23  ;;  %14555 = vst [vmem:[#allocation9_spill] sm:$0xff] %v8885_v52  ;;  %14556 = vst [vmem:[#allocation10_spill] sm:$0xff] %v8892_v53  ;;  %v8898_v54 = vld [vmem:[%s14139_s4 + $0x1c4] ss:$16 sps:$4 sm:$0xff]   ;;  %v8903_v55 = vld [vmem:[%s14139_s4 + $0x188] ss:$16 sps:$4 sm:$0xff]  }
  0x23   :  { %684 = vmatprep.subr.bf16.mxu0 %v8684_v18  ;;  %725 = vmatprep.subr.bf16.mxu1 %v8720_v24  ;;  %14557 = vst [vmem:[#allocation11_spill] sm:$0xff] %v8898_v54  ;;  %14558 = vst [vmem:[#allocation12_spill] sm:$0xff] %v8903_v55  ;;  %v8909_v56 = vld [vmem:[%s14139_s4 + $0x1ac] ss:$16 sps:$4 sm:$0xff]   ;;  %v8916_v57 = vld [vmem:[%s14139_s4 + $0x1c0] ss:$16 sps:$4 sm:$0xff]  }
  0x24   :  { %14559 = vst [vmem:[#allocation13_spill] sm:$0xff] %v8909_v56  ;;  %14560 = vst [vmem:[#allocation14_spill] sm:$0xff] %v8916_v57  ;;  %v8922_v58 = vld [vmem:[%s14139_s4 + $0x1e4] ss:$16 sps:$4 sm:$0xff]   ;;  %v8927_v59 = vld [vmem:[%s14139_s4 + $0x1a8] ss:$16 sps:$4 sm:$0xff]  }
  0x25   :  { %14561 = vst [vmem:[#allocation15_spill] sm:$0xff] %v8922_v58  ;;  %14562 = vst [vmem:[#allocation16_spill] sm:$0xff] %v8927_v59  ;;  %v8933_v60 = vld [vmem:[%s14139_s4 + $0x1cc] ss:$16 sps:$4 sm:$0xff]   ;;  %v8940_v61 = vld [vmem:[%s14139_s4 + $0x1e0] ss:$16 sps:$4 sm:$0xff]  }
  0x26   :  { %685 = vmatpush1.bf16.msra.mxu0 %v8702_v21  ;;  %726 = vmatpush1.bf16.msra.mxu1 %v8738_v27  ;;  %14563 = vst [vmem:[#allocation17_spill] sm:$0xff] %v8933_v60  ;;  %14564 = vst [vmem:[#allocation18_spill] sm:$0xff] %v8940_v61  ;;  %v8946_v62 = vld [vmem:[%s14139_s4 + $0x1c8] ss:$16 sps:$4 sm:$0xff]   ;;  %v8952_v63 = vld [vmem:[%s14139_s4 + $0x1ec] ss:$16 sps:$4 sm:$0xff]  }
  0x27   :  { %686 = vmatprep.subr.bf16.mxu0 %v8707_v22  ;;  %727 = vmatprep.subr.bf16.mxu1 %v8744_v28  ;;  %14565 = vst [vmem:[#allocation19_spill] sm:$0xff] %v8946_v62  ;;  %14566 = vst [vmem:[#allocation20_spill] sm:$0xff] %v8952_v63  ;;  %v353_v2 = vld [vmem:[%s14136_s1] sm:$0x1]  ;;  %p3001_p5 = scmp.ne.s32.totalorder %s3000_s17, 0  ;;  %p3523_p6 = scmp.ne.s32.totalorder %s6327_s20, 0 }
  0x28   :  { %s6336_s24 = sld [smem:[#allocation4 + $0x2]]  ;;  %s6345_s27 = sld [smem:[#allocation4 + $0x3]] }
  0x29   :  { %s3004_s18 = scalar_select %p3001_p5, 1, 0 }
  0x2a   :  { %687 = vmatpush1.bf16.msra.mxu0 %v8726_v25  ;;  %728 = vmatpush1.bf16.msra.mxu1 %v8762_v31  ;;  %s6354_s26 = sld [smem:[#allocation4 + $0x4]]  ;;  %s6363_s0 = sld [smem:[#allocation4 + $0x5]] }
  0x2b   :  { %688 = vmatprep.subr.bf16.mxu0 %v8732_v26  ;;  %729 = vmatprep.subr.bf16.mxu1 %v8768_v32 }
  0x2e   :  { %689 = vmatpush1.bf16.msra.mxu0 %v8750_v29  ;;  %730 = vmatpush1.bf16.msra.mxu1 %v8786_v35  ;;  %p4045_p7 = scmp.ne.s32.totalorder %s6336_s24, 0  ;;  %p4567_p8 = scmp.ne.s32.totalorder %s6345_s27, 0 }
  0x2f   :  { %690 = vmatprep.subr.bf16.mxu0 %v8755_v30  ;;  %731 = vmatprep.subr.bf16.mxu1 %v8792_v36 }
  0x30   :  { %s4048_s25 = scalar_select %p4045_p7, 1, 0 }
  0x31   :  { %s4570_s28 = scalar_select %p4567_p8, 1, 0 }
  0x32   :  { %691 = vmatpush1.bf16.msra.mxu0 %v8774_v33  ;;  %732 = vmatpush1.bf16.msra.mxu1 %v8810_v39  ;;  %p5089_p9 = scmp.ne.s32.totalorder %s6354_s26, 0  ;;  %p5611_p10 = scmp.ne.s32.totalorder %s6363_s0, 0 }
  0x33   :  { %692 = vmatprep.subr.bf16.mxu0 %v8780_v34  ;;  %733 = vmatprep.subr.bf16.mxu1 %v8816_v40 }
  0x34   :  { %s5092_s27 = scalar_select %p5089_p9, 1, 0 }
  0x35   :  { %s5614_s21 = scalar_select %p5611_p10, 1, 0 }
  0x36   :  { %693 = vmatpush1.bf16.msra.mxu0 %v8798_v37  ;;  %734 = vmatpush1.bf16.msra.mxu1 %v8834_v43 }
  0x37   :  { %694 = vmatprep.subr.bf16.mxu0 %v8803_v38  ;;  %735 = vmatprep.subr.bf16.mxu1 %v8845_v45 }
  0x3a   :  { %695 = vmatpush1.bf16.msra.mxu0 %v8821_v41  ;;  %736 = vmatpush1.bf16.msra.mxu1 %v8855_v47 }
  0x3b   :  { %696 = vmatprep.subr.bf16.mxu0 %v8827_v42  ;;  %737 = vmatprep.subr.bf16.mxu1 %v8861_v48 }
  0x3e   :  { %697 = vmatpush1.bf16.msra.mxu0 %v8839_v44  ;;  %738 = vmatpush1.bf16.msra.mxu1 %v8879_v51 }
  0x3f   :  { %698 = vmatprep.subr.bf16.mxu0 %v8850_v46  ;;  %739 = vmatprep.subr.bf16.mxu1 %v8885_v52 }
  0x42   :  { %699 = vmatpush1.bf16.msra.mxu0 %v8868_v49  ;;  %740 = vmatpush1.bf16.msra.mxu1 %v8903_v55 }
  0x43   :  { %700 = vmatprep.subr.bf16.mxu0 %v8874_v50  ;;  %741 = vmatprep.subr.bf16.mxu1 %v8909_v56  ;;  %v8963_v56 = vld [vmem:[%s14139_s4 + $0x1e8] ss:$16 sps:$4 sm:$0xff]  }
  0x44   :  { %14567 = vst [vmem:[#allocation21_spill] sm:$0xff] %v8963_v56 }
  0x46   :  { %701 = vmatpush1.bf16.msra.mxu0 %v8892_v53  ;;  %742 = vmatpush1.bf16.msra.mxu1 %v8927_v59 }
  0x47   :  { %702 = vmatprep.subr.bf16.mxu0 %v8898_v54  ;;  %743 = vmatprep.subr.bf16.mxu1 %v8933_v60 }
  0x4a   :  { %703 = vmatpush1.bf16.msra.mxu0 %v8916_v57  ;;  %744 = vmatpush1.bf16.msra.mxu1 %v8946_v62 }
  0x4b   :  { %704 = vmatprep.subr.bf16.mxu0 %v8922_v58  ;;  %745 = vmatprep.subr.bf16.mxu1 %v8952_v63 }
  0x4e   :  { %705 = vmatpush1.bf16.msra.mxu0 %v8940_v61  ;;  %746 = vmatpush1.bf16.msra.mxu1 %v8963_v56 }
  0x4f   :  { %784 = vmatprep.subr.bf16.mxu0 %v8583_v0  ;;  %825 = vmatprep.subr.bf16.mxu1 %v8613_v6 }
  0x51   :  { %707 = vmatmul.mubr.bf16.vlgmr.msra.gmra.mrb[0].mxu0 %v353_v2  ;;  %748 = vmatmul.mubr.bf16.vlgmr.msra.gmra.mrb[0].mxu1 %v353_v2  ;;  %v14568_v2 = vld [vmem:[#allocation13_spill] sm:$0xff] }
  0x52   :  { %785 = vmatpush1.bf16.msra.mxu0 %v8588_v1  ;;  %826 = vmatpush1.bf16.msra.mxu1 %v8618_v7 }
  0x53   :  { %786 = vmatprep.subr.bf16.mxu0 %v8596_v3  ;;  %827 = vmatprep.subr.bf16.mxu1 %v8637_v10 }
  0x56   :  { %787 = vmatpush1.bf16.msra.mxu0 %v8602_v4  ;;  %828 = vmatpush1.bf16.msra.mxu1 %v8642_v11 }
  0x57   :  { %788 = vmatprep.subr.bf16.mxu0 %v8608_v5  ;;  %829 = vmatprep.subr.bf16.mxu1 %v8659_v14 }
  0x5a   :  { %789 = vmatpush1.bf16.msra.mxu0 %v8624_v8  ;;  %830 = vmatpush1.bf16.msra.mxu1 %v8666_v15 }
  0x5b   :  { %790 = vmatprep.subr.bf16.mxu0 %v8631_v9  ;;  %831 = vmatprep.subr.bf16.mxu1 %v8672_v16 }
  0x5e   :  { %791 = vmatpush1.bf16.msra.mxu0 %v8649_v12  ;;  %832 = vmatpush1.bf16.msra.mxu1 %v8690_v19 }
  0x5f   :  { %792 = vmatprep.subr.bf16.mxu0 %v8654_v13  ;;  %833 = vmatprep.subr.bf16.mxu1 %v8696_v20 }
  0x62   :  { %793 = vmatpush1.bf16.msra.mxu0 %v8678_v17  ;;  %834 = vmatpush1.bf16.msra.mxu1 %v8714_v23 }
  0x63   :  { %794 = vmatprep.subr.bf16.mxu0 %v8684_v18  ;;  %835 = vmatprep.subr.bf16.mxu1 %v8720_v24 }
  0x66   :  { %795 = vmatpush1.bf16.msra.mxu0 %v8702_v21  ;;  %836 = vmatpush1.bf16.msra.mxu1 %v8738_v27 }
  0x67   :  { %796 = vmatprep.subr.bf16.mxu0 %v8707_v22  ;;  %837 = vmatprep.subr.bf16.mxu1 %v8744_v28 }
  0x6a   :  { %797 = vmatpush1.bf16.msra.mxu0 %v8726_v25  ;;  %838 = vmatpush1.bf16.msra.mxu1 %v8762_v31 }
  0x6b   :  { %798 = vmatprep.subr.bf16.mxu0 %v8732_v26  ;;  %839 = vmatprep.subr.bf16.mxu1 %v8768_v32 }
  0x6e   :  { %799 = vmatpush1.bf16.msra.mxu0 %v8750_v29  ;;  %840 = vmatpush1.bf16.msra.mxu1 %v8786_v35 }
  0x6f   :  { %800 = vmatprep.subr.bf16.mxu0 %v8755_v30  ;;  %841 = vmatprep.subr.bf16.mxu1 %v8792_v36 }
  0x72   :  { %801 = vmatpush1.bf16.msra.mxu0 %v8774_v33  ;;  %842 = vmatpush1.bf16.msra.mxu1 %v8810_v39 }
  0x73   :  { %802 = vmatprep.subr.bf16.mxu0 %v8780_v34  ;;  %843 = vmatprep.subr.bf16.mxu1 %v8816_v40 }
  0x76   :  { %803 = vmatpush1.bf16.msra.mxu0 %v8798_v37  ;;  %844 = vmatpush1.bf16.msra.mxu1 %v8834_v43 }
  0x77   :  { %804 = vmatprep.subr.bf16.mxu0 %v8803_v38  ;;  %845 = vmatprep.subr.bf16.mxu1 %v8845_v45 }
  0x7a   :  { %805 = vmatpush1.bf16.msra.mxu0 %v8821_v41  ;;  %846 = vmatpush1.bf16.msra.mxu1 %v8855_v47 }
  0x7b   :  { %806 = vmatprep.subr.bf16.mxu0 %v8827_v42  ;;  %847 = vmatprep.subr.bf16.mxu1 %v8861_v48 }
  0x7e   :  { %807 = vmatpush1.bf16.msra.mxu0 %v8839_v44  ;;  %848 = vmatpush1.bf16.msra.mxu1 %v8879_v51 }
  0x7f   :  { %808 = vmatprep.subr.bf16.mxu0 %v8850_v46  ;;  %849 = vmatprep.subr.bf16.mxu1 %v8885_v52 }
  0x82   :  { %809 = vmatpush1.bf16.msra.mxu0 %v8868_v49  ;;  %850 = vmatpush1.bf16.msra.mxu1 %v8903_v55 }
  0x83   :  { %810 = vmatprep.subr.bf16.mxu0 %v8874_v50  ;;  %851 = vmatprep.subr.bf16.mxu1 %v14568_v2 }
  0x86   :  { %811 = vmatpush1.bf16.msra.mxu0 %v8892_v53  ;;  %852 = vmatpush1.bf16.msra.mxu1 %v8927_v59 }
  0x87   :  { %812 = vmatprep.subr.bf16.mxu0 %v8898_v54  ;;  %853 = vmatprep.subr.bf16.mxu1 %v8933_v60  ;;  %v14166_v54 = vlaneseq }
  0x8a   :  { %813 = vmatpush1.bf16.msra.mxu0 %v8916_v57  ;;  %854 = vmatpush1.bf16.msra.mxu1 %v8946_v62  ;;  %v9036_v57 = vshrl.u32 %v14166_v54, 7 }
  0x8b   :  { %814 = vmatprep.subr.bf16.mxu0 %v8922_v58  ;;  %855 = vmatprep.subr.bf16.mxu1 %v8952_v63 }
  0x8c   :  { %14569 = vst [vmem:[#allocation22_spill] sm:$0xff] %v9036_v57  ;;  %v14179_v58 = vsub.s32 0, %v9036_v57  ;;  %v14182_v62 = vsub.s32 1, %v9036_v57  ;;  %v14195_v49 = vsub.s32 2, %v9036_v57 }
  0x8e   :  { %815 = vmatpush1.bf16.msra.mxu0 %v8940_v61  ;;  %856 = vmatpush1.bf16.msra.mxu1 %v8963_v56  ;;  %v293_v61 = vld [vmem:[%s14140_s5] sm:$0xf] }
  0x8f   :  { %895 = vmatprep.subr.bf16.mxu0 %v8583_v0  ;;  %936 = vmatprep.subr.bf16.mxu1 %v8613_v6  ;;  %v9045_v0 = vrot.slane %v293_v61, %v14179_v58  ;;  %v9049_v56 = vrot.slane %v293_v61, %v14182_v62  ;;  %v14186_v6 = vsub.s32 3, %v9036_v57 }
  0x91   :  { %14570 = vst [vmem:[#allocation23_spill] sm:$0xff] %v9045_v0  ;;  %14571 = vst [vmem:[#allocation24_spill] sm:$0xff] %v9049_v56  ;;  %v9056_v55 = vrot.slane %v293_v61, %v14186_v6 }
  0x93   :  { %14572 = vst [vmem:[#allocation25_spill] sm:$0xff] %v9056_v55 }
 0x124   :  { %v708_v54 = vpop.f32.mrb[0].mxu0  ;;  %v749_v62 = vpop.f32.mrb[0].mxu1 }
 0x125   :  { %v709_v63 = vadd.f32 %v708_v54, %v9045_v0  ;;  %v710_v60 = vpop.f32.mrb[1].mxu0  ;;  %v751_v52 = vpop.f32.mrb[1].mxu1 }
 0x126   :  { %v711_v59 = vadd.f32 %v710_v60, %v9049_v56  ;;  %v712_v53 = vpop.f32.mrb[2].mxu0  ;;  %v752_v46 = vadd.f32 %v751_v52, %v9056_v55  ;;  %v753_v54 = vpop.f32.mrb[2].mxu1  ;;  %v9062_v60 = vrot.slane %v293_v61, %v14195_v49 }
 0x127   :  { %v6137_v2 = vmul.f32 -1.442695, %v709_v63  ;;  %v713_v50 = vpop.f32.mrb[3].mxu0  ;;  %v754_v53 = vpop.f32.mrb[3].mxu1 }
 0x128   :  { %v6138_v58 = vmul.f32 -1.442695, %v711_v59  ;;  %v6139_v50 = vmul.f32 -1.442695, %v752_v46  ;;  %v750_v63 = vadd.f32 %v749_v62, %v9062_v60 }
 0x129   :  { %7510 = vpow2.f32 %v6137_v2 }
 0x12a   :  { %7512 = vpow2.f32 %v6138_v58 }
 0x12b   :  { %7514 = vpow2.f32 %v6139_v50 }
 0x12c   :  { %7516 = vtanh.f32 %v750_v63 }
 0x133   :  { %v7511_v6 = vpop.eup %7510 }
 0x134   :  { %v7513_v59 = vpop.eup %7512  ;;  %v759_v56 = vadd.f32 1.0, %v7511_v6 }
 0x135   :  { %v765_v2 = vadd.f32 1.0, %v7513_v59  ;;  %v7515_v58 = vpop.eup %7514 }
 0x136   :  { %7518 = vrcp.f32 %v759_v56  ;;  %v7517_v0 = vpop.eup %7516  ;;  %v772_v54 = vadd.f32 1.0, %v7515_v58  ;;  %v6140_v56 = vld [vmem:[%s14136_s1 + $0x1] sm:$0x1] }
 0x137   :  { %7520 = vrcp.f32 %v765_v2 }
 0x138   :  { %7522 = vrcp.f32 %v772_v54 }
 0x140   :  { %v7519_v52 = vpop.eup %7518 }
 0x141   :  { %v7521_v55 = vpop.eup %7520  ;;  %v776_v57 = vmul.f32 %v7519_v52, %v7517_v0 }
 0x142   :  { %v775_v61 = vmul.f32 0.0, %v7521_v55  ;;  %v7523_v46 = vpop.eup %7522 }
 0x144   :  { %v9065_v49 = vadd.f32 %v776_v57, %v775_v61  ;;  %v6144_v61 = vld [vmem:[%s14136_s1 + $0x2] sm:$0x1] }
 0x146   :  { %7524 = vtanh.f32 %v9065_v49 }
 0x150   :  { %v7525_v62 = vpop.eup %7524 }
 0x151   :  { %v779_v53 = vmul.f32 %v7525_v62, %v7523_v46  ;;  %v9165_v46 = vld [vmem:[%s14139_s4 + $0x8] ss:$16 sps:$4 sm:$0xff]   ;;  %v9171_v62 = vld [vmem:[%s14139_s4 + $0x24] ss:$16 sps:$4 sm:$0xff]  }
 0x153   :  { %780 = vst [vmem:[#allocation2] sm:$0x3] %v779_v53  ;;  %v783_v6 = vpack.c.bf16 %v779_v53, %v779_v53  ;;  %v9177_v53 = vld [vmem:[%s14139_s4 + $0x2c] ss:$16 sps:$4 sm:$0xff]  }
 0x155   :  { %816 = vmatprep.mubr.bf16.mxu0 %v783_v6  ;;  %857 = vmatprep.mubr.bf16.mxu1 %v783_v6  ;;  %v9183_v6 = vld [vmem:[%s14139_s4 + $0x20] ss:$16 sps:$4 sm:$0xff]  }
 0x156   :  { %817 = vmatmul.mubr.bf16.vlgmr.msra.gmra.mrb[4].mxu0 %v6140_v56  ;;  %858 = vmatmul.mubr.bf16.vlgmr.msra.gmra.mrb[4].mxu1 %v6140_v56  ;;  %v9189_v56 = vld [vmem:[%s14139_s4 + $0x28] ss:$16 sps:$4 sm:$0xff]  }
 0x157   :  { %896 = vmatpush1.bf16.msra.mxu0 %v8588_v1  ;;  %937 = vmatpush1.bf16.msra.mxu1 %v8618_v7  ;;  %v14573_v1 = vld [vmem:[#allocation6_spill] sm:$0xff]  ;;  %v14577_v7 = vld [vmem:[#allocation8_spill] sm:$0xff] }
 0x158   :  { %897 = vmatprep.subr.bf16.mxu0 %v8596_v3  ;;  %938 = vmatprep.subr.bf16.mxu1 %v8637_v10  ;;  %v14574_v3 = vld [vmem:[#allocation9_spill] sm:$0xff]  ;;  %v14580_v10 = vld [vmem:[#allocation16_spill] sm:$0xff] }
 0x15b   :  { %898 = vmatpush1.bf16.msra.mxu0 %v8602_v4  ;;  %939 = vmatpush1.bf16.msra.mxu1 %v8642_v11  ;;  %v14575_v4 = vld [vmem:[#allocation7_spill] sm:$0xff] }
 0x15c   :  { %899 = vmatprep.subr.bf16.mxu0 %v8608_v5  ;;  %940 = vmatprep.subr.bf16.mxu1 %v8659_v14  ;;  %v14576_v5 = vld [vmem:[#allocation12_spill] sm:$0xff]  ;;  %v14581_v11 = vld [vmem:[#allocation11_spill] sm:$0xff] }
 0x15d   :  { %v14584_v14 = vld [vmem:[#allocation19_spill] sm:$0xff] }
 0x15f   :  { %900 = vmatpush1.bf16.msra.mxu0 %v8624_v8  ;;  %941 = vmatpush1.bf16.msra.mxu1 %v8666_v15  ;;  %v14578_v8 = vld [vmem:[#allocation13_spill] sm:$0xff]  ;;  %v14585_v15 = vld [vmem:[#allocation15_spill] sm:$0xff] }
 0x160   :  { %901 = vmatprep.subr.bf16.mxu0 %v8631_v9  ;;  %942 = vmatprep.subr.bf16.mxu1 %v8672_v16  ;;  %v14579_v9 = vld [vmem:[#allocation10_spill] sm:$0xff]  ;;  %v14586_v16 = vld [vmem:[#allocation20_spill] sm:$0xff] }
 0x163   :  { %902 = vmatpush1.bf16.msra.mxu0 %v8649_v12  ;;  %943 = vmatpush1.bf16.msra.mxu1 %v8690_v19  ;;  %v14582_v12 = vld [vmem:[#allocation17_spill] sm:$0xff]  ;;  %v9136_v19 = vld [vmem:[%s14139_s4 + $0x4] ss:$16 sps:$4 sm:$0xff]  }
 0x164   :  { %903 = vmatprep.subr.bf16.mxu0 %v8654_v13  ;;  %944 = vmatprep.subr.bf16.mxu1 %v8696_v20  ;;  %v14583_v13 = vld [vmem:[#allocation14_spill] sm:$0xff]  ;;  %14589 = vst [vmem:[#allocation6_spill] sm:$0xff] %v9136_v19  ;;  %v9142_v20 = vld [vmem:[%s14139_s4 + $0xc] ss:$16 sps:$4 sm:$0xff]  }
 0x165   :  { %14590 = vst [vmem:[#allocation9_spill] sm:$0xff] %v9142_v20 }
 0x167   :  { %904 = vmatpush1.bf16.msra.mxu0 %v8678_v17  ;;  %945 = vmatpush1.bf16.msra.mxu1 %v8714_v23  ;;  %v14587_v17 = vld [vmem:[#allocation18_spill] sm:$0xff]  ;;  %v14591_v23 = vld [vmem:[#allocation23_spill] sm:$0xff] }
 0x168   :  { %905 = vmatprep.subr.bf16.mxu0 %v8684_v18  ;;  %946 = vmatprep.subr.bf16.mxu1 %v8720_v24  ;;  %v14588_v18 = vld [vmem:[#allocation21_spill] sm:$0xff] }
 0x16b   :  { %906 = vmatpush1.bf16.msra.mxu0 %v8702_v21  ;;  %947 = vmatpush1.bf16.msra.mxu1 %v8738_v27  ;;  %v14592_v27 = vld [vmem:[#allocation24_spill] sm:$0xff] }
 0x16c   :  { %907 = vmatprep.subr.bf16.mxu0 %v8707_v22  ;;  %948 = vmatprep.subr.bf16.mxu1 %v8744_v28 }
 0x16f   :  { %908 = vmatpush1.bf16.msra.mxu0 %v8726_v25  ;;  %949 = vmatpush1.bf16.msra.mxu1 %v8762_v31 }
 0x170   :  { %909 = vmatprep.subr.bf16.mxu0 %v8732_v26  ;;  %950 = vmatprep.subr.bf16.mxu1 %v8768_v32 }
 0x173   :  { %910 = vmatpush1.bf16.msra.mxu0 %v8750_v29  ;;  %951 = vmatpush1.bf16.msra.mxu1 %v8786_v35  ;;  %v14593_v35 = vld [vmem:[#allocation25_spill] sm:$0xff] }
 0x174   :  { %911 = vmatprep.subr.bf16.mxu0 %v8755_v30  ;;  %952 = vmatprep.subr.bf16.mxu1 %v8792_v36 }
 0x177   :  { %912 = vmatpush1.bf16.msra.mxu0 %v8774_v33  ;;  %953 = vmatpush1.bf16.msra.mxu1 %v8810_v39 }
 0x178   :  { %913 = vmatprep.subr.bf16.mxu0 %v8780_v34  ;;  %954 = vmatprep.subr.bf16.mxu1 %v8816_v40 }
 0x17b   :  { %914 = vmatpush1.bf16.msra.mxu0 %v8798_v37  ;;  %955 = vmatpush1.bf16.msra.mxu1 %v8834_v43 }
 0x17c   :  { %915 = vmatprep.subr.bf16.mxu0 %v8803_v38  ;;  %956 = vmatprep.subr.bf16.mxu1 %v8845_v45 }
 0x17f   :  { %916 = vmatpush1.bf16.msra.mxu0 %v8821_v41  ;;  %957 = vmatpush1.bf16.msra.mxu1 %v8855_v47 }
 0x180   :  { %917 = vmatprep.subr.bf16.mxu0 %v8827_v42  ;;  %958 = vmatprep.subr.bf16.mxu1 %v8861_v48 }
 0x183   :  { %918 = vmatpush1.bf16.msra.mxu0 %v8839_v44  ;;  %959 = vmatpush1.bf16.msra.mxu1 %v8879_v51 }
 0x184   :  { %919 = vmatprep.subr.bf16.mxu0 %v14573_v1  ;;  %960 = vmatprep.subr.bf16.mxu1 %v14574_v3  ;;  %v9195_v1 = vld [vmem:[%s14139_s4 + $0x44] ss:$16 sps:$4 sm:$0xff]  }
 0x187   :  { %920 = vmatpush1.bf16.msra.mxu0 %v14575_v4  ;;  %961 = vmatpush1.bf16.msra.mxu1 %v14576_v5 }
 0x188   :  { %921 = vmatprep.subr.bf16.mxu0 %v14577_v7  ;;  %962 = vmatprep.subr.bf16.mxu1 %v14578_v8 }
 0x18b   :  { %922 = vmatpush1.bf16.msra.mxu0 %v14579_v9  ;;  %963 = vmatpush1.bf16.msra.mxu1 %v14580_v10 }
 0x18c   :  { %923 = vmatprep.subr.bf16.mxu0 %v14581_v11  ;;  %964 = vmatprep.subr.bf16.mxu1 %v14582_v12 }
 0x18f   :  { %924 = vmatpush1.bf16.msra.mxu0 %v14583_v13  ;;  %965 = vmatpush1.bf16.msra.mxu1 %v14584_v14 }
 0x190   :  { %925 = vmatprep.subr.bf16.mxu0 %v14585_v15  ;;  %966 = vmatprep.subr.bf16.mxu1 %v14586_v16 }
 0x193   :  { %926 = vmatpush1.bf16.msra.mxu0 %v14587_v17  ;;  %967 = vmatpush1.bf16.msra.mxu1 %v14588_v18 }
 0x194   :  { %1006 = vmatprep.subr.bf16.mxu0 %v9136_v19  ;;  %1047 = vmatprep.subr.bf16.mxu1 %v9142_v20 }
 0x229   :  { %v818_v21 = vpop.f32.mrb[4].mxu0  ;;  %v859_v22 = vpop.f32.mrb[4].mxu1 }
 0x22a   :  { %v819_v24 = vadd.f32 %v818_v21, %v14591_v23  ;;  %v820_v25 = vpop.f32.mrb[5].mxu0  ;;  %v861_v26 = vpop.f32.mrb[5].mxu1  ;;  %v860_v38 = vadd.f32 %v859_v22, %v9062_v60  ;;  %v9201_v21 = vld [vmem:[%s14139_s4 + $0x4c] ss:$16 sps:$4 sm:$0xff]   ;;  %v9207_v22 = vld [vmem:[%s14139_s4 + $0x40] ss:$16 sps:$4 sm:$0xff]  }
 0x22b   :  { %v821_v28 = vadd.f32 %v820_v25, %v14592_v27  ;;  %v822_v29 = vpop.f32.mrb[6].mxu0  ;;  %v863_v30 = vpop.f32.mrb[6].mxu1  ;;  %v862_v36 = vadd.f32 %v861_v26, %v14593_v35  ;;  %v9219_v25 = vld [vmem:[%s14139_s4 + $0x64] ss:$16 sps:$4 sm:$0xff]   ;;  %v9225_v26 = vld [vmem:[%s14139_s4 + $0x6c] ss:$16 sps:$4 sm:$0xff]  }
 0x22c   :  { %v6141_v31 = vmul.f32 -1.442695, %v819_v24  ;;  %v823_v32 = vpop.f32.mrb[7].mxu0  ;;  %v864_v33 = vpop.f32.mrb[7].mxu1  ;;  %v9213_v24 = vld [vmem:[%s14139_s4 + $0x48] ss:$16 sps:$4 sm:$0xff]  }
 0x22d   :  { %v6142_v34 = vmul.f32 -1.442695, %v821_v28  ;;  %v6143_v37 = vmul.f32 -1.442695, %v862_v36  ;;  %v9231_v28 = vld [vmem:[%s14139_s4 + $0x60] ss:$16 sps:$4 sm:$0xff]  }
 0x22e   :  { %7526 = vpow2.f32 %v6141_v31  ;;  %v9237_v29 = vld [vmem:[%s14139_s4 + $0x68] ss:$16 sps:$4 sm:$0xff]   ;;  %v9243_v30 = vld [vmem:[%s14139_s4 + $0x84] ss:$16 sps:$4 sm:$0xff]   ;;  %v9249_v31 = vld [vmem:[%s14139_s4 + $0x8c] ss:$16 sps:$4 sm:$0xff]  }
 0x22f   :  { %7528 = vpow2.f32 %v6142_v34  ;;  %v9255_v32 = vld [vmem:[%s14139_s4 + $0x80] ss:$16 sps:$4 sm:$0xff]   ;;  %v9261_v33 = vld [vmem:[%s14139_s4 + $0x88] ss:$16 sps:$4 sm:$0xff]   ;;  %v9267_v34 = vld [vmem:[%s14139_s4 + $0xa4] ss:$16 sps:$4 sm:$0xff]  }
 0x230   :  { %7530 = vpow2.f32 %v6143_v37  ;;  %v9273_v36 = vld [vmem:[%s14139_s4 + $0xac] ss:$16 sps:$4 sm:$0xff]   ;;  %v9279_v37 = vld [vmem:[%s14139_s4 + $0xa0] ss:$16 sps:$4 sm:$0xff]  }
 0x231   :  { %7532 = vtanh.f32 %v860_v38  ;;  %v9285_v38 = vld [vmem:[%s14139_s4 + $0xa8] ss:$16 sps:$4 sm:$0xff]  }
 0x238   :  { %v7527_v39 = vpop.eup %7526 }
 0x239   :  { %v7529_v40 = vpop.eup %7528  ;;  %v869_v41 = vadd.f32 1.0, %v7527_v39  ;;  %v9291_v39 = vld [vmem:[%s14139_s4 + $0xc4] ss:$16 sps:$4 sm:$0xff]  }
 0x23a   :  { %v875_v42 = vadd.f32 1.0, %v7529_v40  ;;  %v7531_v43 = vpop.eup %7530  ;;  %v9297_v40 = vld [vmem:[%s14139_s4 + $0xcc] ss:$16 sps:$4 sm:$0xff]  }
 0x23b   :  { %7534 = vrcp.f32 %v869_v41  ;;  %v7533_v44 = vpop.eup %7532  ;;  %v882_v57 = vadd.f32 1.0, %v7531_v43  ;;  %v9303_v41 = vld [vmem:[%s14139_s4 + $0xc0] ss:$16 sps:$4 sm:$0xff]   ;;  %v9315_v43 = vld [vmem:[%s14139_s4 + $0xe4] ss:$16 sps:$4 sm:$0xff]  }
 0x23c   :  { %7536 = vrcp.f32 %v875_v42  ;;  %v9309_v42 = vld [vmem:[%s14139_s4 + $0xc8] ss:$16 sps:$4 sm:$0xff]  }
 0x23d   :  { %7538 = vrcp.f32 %v882_v57  ;;  %v9333_v57 = vld [vmem:[%s14139_s4 + $0xe8] ss:$16 sps:$4 sm:$0xff]  }
 0x245   :  { %v7535_v55 = vpop.eup %7534 }
 0x246   :  { %v7537_v0 = vpop.eup %7536  ;;  %v886_v50 = vmul.f32 %v7535_v55, %v7533_v44  ;;  %v9321_v44 = vld [vmem:[%s14139_s4 + $0xec] ss:$16 sps:$4 sm:$0xff]   ;;  %v9327_v55 = vld [vmem:[%s14139_s4 + $0xe0] ss:$16 sps:$4 sm:$0xff]  }
 0x247   :  { %v885_v63 = vmul.f32 %v7537_v0, %v9065_v49  ;;  %v7539_v2 = vpop.eup %7538  ;;  %v9159_v49 = vld [vmem:[%s14139_s4] ss:$16 sps:$4 sm:$0xff]   ;;  %v9339_v0 = vld [vmem:[%s14139_s4 + $0x104] ss:$16 sps:$4 sm:$0xff]  }
 0x249   :  { %v9150_v59 = vadd.f32 %v886_v50, %v885_v63  ;;  %v9345_v50 = vld [vmem:[%s14139_s4 + $0x10c] ss:$16 sps:$4 sm:$0xff]   ;;  %v9351_v63 = vld [vmem:[%s14139_s4 + $0x100] ss:$16 sps:$4 sm:$0xff]  }
 0x24b   :  { %7540 = vtanh.f32 %v9150_v59 }
 0x255   :  { %v7541_v58 = vpop.eup %7540 }
 0x256   :  { %v889_v52 = vmul.f32 %v7541_v58, %v7539_v2  ;;  %v9357_v2 = vld [vmem:[%s14139_s4 + $0x108] ss:$16 sps:$4 sm:$0xff]   ;;  %v9363_v58 = vld [vmem:[%s14139_s4 + $0x124] ss:$16 sps:$4 sm:$0xff]  }
 0x257   :  { %14594 = vst [vmem:[#allocation7_spill] sm:$0xff] %v9363_v58 }
 0x258   :  { %891 = vst [vmem:[#allocation2 + $0x2] sm:$0x3] %v889_v52  ;;  %v894_v54 = vpack.c.bf16 %v889_v52, %v889_v52  ;;  %v9369_v52 = vld [vmem:[%s14139_s4 + $0x12c] ss:$16 sps:$4 sm:$0xff]  }
 0x25a   :  { %927 = vmatprep.mubr.bf16.mxu0 %v894_v54  ;;  %968 = vmatprep.mubr.bf16.mxu1 %v894_v54  ;;  %v9375_v54 = vld [vmem:[%s14139_s4 + $0x120] ss:$16 sps:$4 sm:$0xff]  }
 0x25b   :  { %928 = vmatmul.mubr.bf16.vlgmr.msra.gmra.mrb[8].mxu0 %v6144_v61  ;;  %969 = vmatmul.mubr.bf16.vlgmr.msra.gmra.mrb[8].mxu1 %v6144_v61  ;;  %14595 = vst [vmem:[#allocation12_spill] sm:$0xff] %v9375_v54  ;;  %v9381_v61 = vld [vmem:[%s14139_s4 + $0x128] ss:$16 sps:$4 sm:$0xff]  }
 0x25c   :  { %1007 = vmatpush1.bf16.msra.mxu0 %v9159_v49  ;;  %1048 = vmatpush1.bf16.msra.mxu1 %v9165_v46  ;;  %14596 = vst [vmem:[#allocation8_spill] sm:$0xff] %v9381_v61 }
 0x25d   :  { %1008 = vmatprep.subr.bf16.mxu0 %v9171_v62  ;;  %1049 = vmatprep.subr.bf16.mxu1 %v9177_v53 }
 0x260   :  { %1009 = vmatpush1.bf16.msra.mxu0 %v9183_v6  ;;  %1050 = vmatpush1.bf16.msra.mxu1 %v9189_v56 }
 0x261   :  { %1010 = vmatprep.subr.bf16.mxu0 %v9195_v1  ;;  %1051 = vmatprep.subr.bf16.mxu1 %v9201_v21 }
 0x264   :  { %1011 = vmatpush1.bf16.msra.mxu0 %v9207_v22  ;;  %1052 = vmatpush1.bf16.msra.mxu1 %v9213_v24 }
 0x265   :  { %1012 = vmatprep.subr.bf16.mxu0 %v9219_v25  ;;  %1053 = vmatprep.subr.bf16.mxu1 %v9225_v26 }
 0x268   :  { %1013 = vmatpush1.bf16.msra.mxu0 %v9231_v28  ;;  %1054 = vmatpush1.bf16.msra.mxu1 %v9237_v29 }
 0x269   :  { %1014 = vmatprep.subr.bf16.mxu0 %v9243_v30  ;;  %1055 = vmatprep.subr.bf16.mxu1 %v9249_v31 }
 0x26c   :  { %1015 = vmatpush1.bf16.msra.mxu0 %v9255_v32  ;;  %1056 = vmatpush1.bf16.msra.mxu1 %v9261_v33 }
 0x26d   :  { %1016 = vmatprep.subr.bf16.mxu0 %v9267_v34  ;;  %1057 = vmatprep.subr.bf16.mxu1 %v9273_v36 }
 0x270   :  { %1017 = vmatpush1.bf16.msra.mxu0 %v9279_v37  ;;  %1058 = vmatpush1.bf16.msra.mxu1 %v9285_v38 }
 0x271   :  { %1018 = vmatprep.subr.bf16.mxu0 %v9291_v39  ;;  %1059 = vmatprep.subr.bf16.mxu1 %v9297_v40 }
 0x274   :  { %1019 = vmatpush1.bf16.msra.mxu0 %v9303_v41  ;;  %1060 = vmatpush1.bf16.msra.mxu1 %v9309_v42 }
 0x275   :  { %1020 = vmatprep.subr.bf16.mxu0 %v9315_v43  ;;  %1061 = vmatprep.subr.bf16.mxu1 %v9321_v44 }
 0x278   :  { %1021 = vmatpush1.bf16.msra.mxu0 %v9327_v55  ;;  %1062 = vmatpush1.bf16.msra.mxu1 %v9333_v57 }
 0x279   :  { %1022 = vmatprep.subr.bf16.mxu0 %v9339_v0  ;;  %1063 = vmatprep.subr.bf16.mxu1 %v9345_v50 }
 0x27c   :  { %1023 = vmatpush1.bf16.msra.mxu0 %v9351_v63  ;;  %1064 = vmatpush1.bf16.msra.mxu1 %v9357_v2 }
 0x27d   :  { %1024 = vmatprep.subr.bf16.mxu0 %v9363_v58  ;;  %1065 = vmatprep.subr.bf16.mxu1 %v9369_v52  ;;  %v9387_v58 = vld [vmem:[%s14139_s4 + $0x144] ss:$16 sps:$4 sm:$0xff]  }
 0x280   :  { %1025 = vmatpush1.bf16.msra.mxu0 %v9375_v54  ;;  %1066 = vmatpush1.bf16.msra.mxu1 %v9381_v61  ;;  %v9394_v54 = vld [vmem:[%s14139_s4 + $0x140] ss:$16 sps:$4 sm:$0xff]   ;;  %v9401_v61 = vld [vmem:[%s14139_s4 + $0x164] ss:$16 sps:$4 sm:$0xff]  }
 0x281   :  { %1026 = vmatprep.subr.bf16.mxu0 %v9387_v58  ;;  %1067 = vmatprep.subr.bf16.mxu1 %v8845_v45  ;;  %14597 = vst [vmem:[#allocation13_spill] sm:$0xff] %v9401_v61  ;;  %v9408_v45 = vld [vmem:[%s14139_s4 + $0x160] ss:$16 sps:$4 sm:$0xff]  }
 0x282   :  { %14598 = vst [vmem:[#allocation10_spill] sm:$0xff] %v9408_v45 }
 0x284   :  { %1027 = vmatpush1.bf16.msra.mxu0 %v9394_v54  ;;  %1068 = vmatpush1.bf16.msra.mxu1 %v8855_v47  ;;  %v9415_v47 = vld [vmem:[%s14139_s4 + $0x184] ss:$16 sps:$4 sm:$0xff]  }
 0x285   :  { %1028 = vmatprep.subr.bf16.mxu0 %v9401_v61  ;;  %1069 = vmatprep.subr.bf16.mxu1 %v8861_v48  ;;  %14599 = vst [vmem:[#allocation16_spill] sm:$0xff] %v9415_v47 }
 0x288   :  { %1029 = vmatpush1.bf16.msra.mxu0 %v9408_v45  ;;  %1070 = vmatpush1.bf16.msra.mxu1 %v8879_v51 }
 0x289   :  { %1030 = vmatprep.subr.bf16.mxu0 %v9415_v47  ;;  %1071 = vmatprep.subr.bf16.mxu1 %v14574_v3 }
 0x28c   :  { %1031 = vmatpush1.bf16.msra.mxu0 %v14575_v4  ;;  %1072 = vmatpush1.bf16.msra.mxu1 %v14576_v5 }
 0x28d   :  { %1032 = vmatprep.subr.bf16.mxu0 %v14577_v7  ;;  %1073 = vmatprep.subr.bf16.mxu1 %v14578_v8 }
 0x290   :  { %1033 = vmatpush1.bf16.msra.mxu0 %v14579_v9  ;;  %1074 = vmatpush1.bf16.msra.mxu1 %v14580_v10 }
 0x291   :  { %1034 = vmatprep.subr.bf16.mxu0 %v14581_v11  ;;  %1075 = vmatprep.subr.bf16.mxu1 %v14582_v12 }
 0x294   :  { %1035 = vmatpush1.bf16.msra.mxu0 %v14583_v13  ;;  %1076 = vmatpush1.bf16.msra.mxu1 %v14584_v14 }
 0x295   :  { %1036 = vmatprep.subr.bf16.mxu0 %v14585_v15  ;;  %1077 = vmatprep.subr.bf16.mxu1 %v14586_v16 }
 0x298   :  { %1037 = vmatpush1.bf16.msra.mxu0 %v14587_v17  ;;  %1078 = vmatpush1.bf16.msra.mxu1 %v14588_v18 }
 0x299   :  { %1117 = vmatprep.subr.bf16.mxu0 %v9136_v19  ;;  %1158 = vmatprep.subr.bf16.mxu1 %v9142_v20 }
 0x32e   :  { %v929_v48 = vpop.f32.mrb[8].mxu0  ;;  %v970_v51 = vpop.f32.mrb[8].mxu1 }
 0x32f   :  { %v930_v3 = vadd.f32 %v929_v48, %v14591_v23  ;;  %v931_v4 = vpop.f32.mrb[9].mxu0  ;;  %v972_v5 = vpop.f32.mrb[9].mxu1  ;;  %v971_v16 = vadd.f32 %v970_v51, %v9062_v60 }
 0x330   :  { %v932_v7 = vadd.f32 %v931_v4, %v14592_v27  ;;  %v933_v8 = vpop.f32.mrb[10].mxu0  ;;  %v974_v9 = vpop.f32.mrb[10].mxu1  ;;  %v973_v14 = vadd.f32 %v972_v5, %v14593_v35 }
 0x331   :  { %v6145_v10 = vmul.f32 -1.442695, %v930_v3  ;;  %v934_v11 = vpop.f32.mrb[11].mxu0  ;;  %v975_v12 = vpop.f32.mrb[11].mxu1 }
 0x332   :  { %v6146_v13 = vmul.f32 -1.442695, %v932_v7  ;;  %v6147_v15 = vmul.f32 -1.442695, %v973_v14 }
 0x333   :  { %7542 = vpow2.f32 %v6145_v10 }
 0x334   :  { %7544 = vpow2.f32 %v6146_v13 }
 0x335   :  { %7546 = vpow2.f32 %v6147_v15  ;;  %v14601_v15 = vld [vmem:[#allocation12_spill] sm:$0xff] }
 0x336   :  { %7548 = vtanh.f32 %v971_v16  ;;  %v14602_v16 = vld [vmem:[#allocation8_spill] sm:$0xff] }
 0x33d   :  { %v7543_v17 = vpop.eup %7542 }
 0x33e   :  { %v7545_v18 = vpop.eup %7544  ;;  %v980_v48 = vadd.f32 1.0, %v7543_v17  ;;  %v9488_v17 = vld [vmem:[%s14139_s4 + $0x14c] ss:$16 sps:$4 sm:$0xff]  }
 0x33f   :  { %v986_v23 = vadd.f32 1.0, %v7545_v18  ;;  %v7547_v4 = vpop.eup %7546  ;;  %v9495_v18 = vld [vmem:[%s14139_s4 + $0x148] ss:$16 sps:$4 sm:$0xff]  }
 0x340   :  { %7550 = vrcp.f32 %v980_v48  ;;  %v7549_v3 = vpop.eup %7548  ;;  %v993_v9 = vadd.f32 1.0, %v7547_v4  ;;  %v9502_v48 = vld [vmem:[%s14139_s4 + $0x16c] ss:$16 sps:$4 sm:$0xff]   ;;  %v9509_v4 = vld [vmem:[%s14139_s4 + $0x168] ss:$16 sps:$4 sm:$0xff]  }
 0x341   :  { %7552 = vrcp.f32 %v986_v23  ;;  %v6148_v23 = vld [vmem:[%s14136_s1 + $0x3] sm:$0x1]  ;;  %14603 = vst [vmem:[#allocation11_spill] sm:$0xff] %v9502_v48  ;;  %14604 = vst [vmem:[#allocation17_spill] sm:$0xff] %v9509_v4 }
 0x342   :  { %7554 = vrcp.f32 %v993_v9  ;;  %v9528_v9 = vld [vmem:[%s14139_s4 + $0x188] ss:$16 sps:$4 sm:$0xff]  }
 0x343   :  { %14607 = vst [vmem:[#allocation15_spill] sm:$0xff] %v9528_v9 }
 0x34a   :  { %v7551_v8 = vpop.eup %7550 }
 0x34b   :  { %v7553_v7 = vpop.eup %7552  ;;  %v997_v10 = vmul.f32 %v7551_v8, %v7549_v3  ;;  %v9516_v3 = vld [vmem:[%s14139_s4 + $0x18c] ss:$16 sps:$4 sm:$0xff]   ;;  %v9522_v8 = vld [vmem:[%s14139_s4 + $0x180] ss:$16 sps:$4 sm:$0xff]  }
 0x34c   :  { %v996_v11 = vmul.f32 %v7553_v7, %v9150_v59  ;;  %v7555_v51 = vpop.eup %7554  ;;  %v14600_v59 = vld [vmem:[#allocation7_spill] sm:$0xff]  ;;  %14605 = vst [vmem:[#allocation14_spill] sm:$0xff] %v9516_v3  ;;  %14606 = vst [vmem:[#allocation19_spill] sm:$0xff] %v9522_v8  ;;  %v9534_v7 = vld [vmem:[%s14139_s4 + $0x1a4] ss:$16 sps:$4 sm:$0xff]  }
 0x34d   :  { %14608 = vst [vmem:[#allocation20_spill] sm:$0xff] %v9534_v7 }
 0x34e   :  { %v9440_v5 = vadd.f32 %v997_v10, %v996_v11  ;;  %v9540_v10 = vld [vmem:[%s14139_s4 + $0x1ac] ss:$16 sps:$4 sm:$0xff]   ;;  %v9546_v11 = vld [vmem:[%s14139_s4 + $0x1a0] ss:$16 sps:$4 sm:$0xff]  }
 0x34f   :  { %14609 = vst [vmem:[#allocation18_spill] sm:$0xff] %v9540_v10  ;;  %14610 = vst [vmem:[#allocation21_spill] sm:$0xff] %v9546_v11 }
 0x350   :  { %7556 = vtanh.f32 %v9440_v5 }
 0x35a   :  { %v7557_v12 = vpop.eup %7556 }
 0x35b   :  { %v1000_v13 = vmul.f32 %v7557_v12, %v7555_v51  ;;  %v9552_v51 = vld [vmem:[%s14139_s4 + $0x1a8] ss:$16 sps:$4 sm:$0xff]   ;;  %v9558_v12 = vld [vmem:[%s14139_s4 + $0x1c4] ss:$16 sps:$4 sm:$0xff]  }
 0x35c   :  { %14611 = vst [vmem:[#allocation24_spill] sm:$0xff] %v9552_v51  ;;  %14612 = vst [vmem:[#allocation25_spill] sm:$0xff] %v9558_v12 }
 0x35d   :  { %1002 = vst [vmem:[#allocation2 + $0x4] sm:$0x3] %v1000_v13  ;;  %v1005_v14 = vpack.c.bf16 %v1000_v13, %v1000_v13  ;;  %v9564_v13 = vld [vmem:[%s14139_s4 + $0x1cc] ss:$16 sps:$4 sm:$0xff]  }
 0x35e   :  { %14613 = vst [vmem:[#allocation7_spill] sm:$0xff] %v9564_v13 }
 0x35f   :  { %1038 = vmatprep.mubr.bf16.mxu0 %v1005_v14  ;;  %1079 = vmatprep.mubr.bf16.mxu1 %v1005_v14  ;;  %v9570_v14 = vld [vmem:[%s14139_s4 + $0x1c0] ss:$16 sps:$4 sm:$0xff]  }
 0x360   :  { %1039 = vmatmul.mubr.bf16.vlgmr.msra.gmra.mrb[12].mxu0 %v6148_v23  ;;  %1080 = vmatmul.mubr.bf16.vlgmr.msra.gmra.mrb[12].mxu1 %v6148_v23  ;;  %14614 = vst [vmem:[#allocation12_spill] sm:$0xff] %v9570_v14  ;;  %v9576_v23 = vld [vmem:[%s14139_s4 + $0x1c8] ss:$16 sps:$4 sm:$0xff]  }
 0x361   :  { %1118 = vmatpush1.bf16.msra.mxu0 %v9159_v49  ;;  %1159 = vmatpush1.bf16.msra.mxu1 %v9165_v46  ;;  %14615 = vst [vmem:[#allocation8_spill] sm:$0xff] %v9576_v23 }
 0x362   :  { %1119 = vmatprep.subr.bf16.mxu0 %v9171_v62  ;;  %1160 = vmatprep.subr.bf16.mxu1 %v9177_v53 }
 0x365   :  { %1120 = vmatpush1.bf16.msra.mxu0 %v9183_v6  ;;  %1161 = vmatpush1.bf16.msra.mxu1 %v9189_v56 }
 0x366   :  { %1121 = vmatprep.subr.bf16.mxu0 %v9195_v1  ;;  %1162 = vmatprep.subr.bf16.mxu1 %v9201_v21 }
 0x369   :  { %1122 = vmatpush1.bf16.msra.mxu0 %v9207_v22  ;;  %1163 = vmatpush1.bf16.msra.mxu1 %v9213_v24 }
 0x36a   :  { %1123 = vmatprep.subr.bf16.mxu0 %v9219_v25  ;;  %1164 = vmatprep.subr.bf16.mxu1 %v9225_v26 }
 0x36d   :  { %1124 = vmatpush1.bf16.msra.mxu0 %v9231_v28  ;;  %1165 = vmatpush1.bf16.msra.mxu1 %v9237_v29 }
 0x36e   :  { %1125 = vmatprep.subr.bf16.mxu0 %v9243_v30  ;;  %1166 = vmatprep.subr.bf16.mxu1 %v9249_v31 }
 0x371   :  { %1126 = vmatpush1.bf16.msra.mxu0 %v9255_v32  ;;  %1167 = vmatpush1.bf16.msra.mxu1 %v9261_v33 }
 0x372   :  { %1127 = vmatprep.subr.bf16.mxu0 %v9267_v34  ;;  %1168 = vmatprep.subr.bf16.mxu1 %v9273_v36 }
 0x375   :  { %1128 = vmatpush1.bf16.msra.mxu0 %v9279_v37  ;;  %1169 = vmatpush1.bf16.msra.mxu1 %v9285_v38 }
 0x376   :  { %1129 = vmatprep.subr.bf16.mxu0 %v9291_v39  ;;  %1170 = vmatprep.subr.bf16.mxu1 %v9297_v40 }
 0x379   :  { %1130 = vmatpush1.bf16.msra.mxu0 %v9303_v41  ;;  %1171 = vmatpush1.bf16.msra.mxu1 %v9309_v42 }
 0x37a   :  { %1131 = vmatprep.subr.bf16.mxu0 %v9315_v43  ;;  %1172 = vmatprep.subr.bf16.mxu1 %v9321_v44 }
 0x37d   :  { %1132 = vmatpush1.bf16.msra.mxu0 %v9327_v55  ;;  %1173 = vmatpush1.bf16.msra.mxu1 %v9333_v57 }
 0x37e   :  { %1133 = vmatprep.subr.bf16.mxu0 %v9339_v0  ;;  %1174 = vmatprep.subr.bf16.mxu1 %v9345_v50 }
 0x381   :  { %1134 = vmatpush1.bf16.msra.mxu0 %v9351_v63  ;;  %1175 = vmatpush1.bf16.msra.mxu1 %v9357_v2 }
 0x382   :  { %1135 = vmatprep.subr.bf16.mxu0 %v14600_v59  ;;  %1176 = vmatprep.subr.bf16.mxu1 %v9369_v52 }
 0x385   :  { %1136 = vmatpush1.bf16.msra.mxu0 %v14601_v15  ;;  %1177 = vmatpush1.bf16.msra.mxu1 %v14602_v16 }
 0x386   :  { %1137 = vmatprep.subr.bf16.mxu0 %v9387_v58  ;;  %1178 = vmatprep.subr.bf16.mxu1 %v9488_v17 }
 0x389   :  { %1138 = vmatpush1.bf16.msra.mxu0 %v9394_v54  ;;  %1179 = vmatpush1.bf16.msra.mxu1 %v9495_v18 }
 0x38a   :  { %1139 = vmatprep.subr.bf16.mxu0 %v9401_v61  ;;  %1180 = vmatprep.subr.bf16.mxu1 %v9502_v48 }
 0x38d   :  { %1140 = vmatpush1.bf16.msra.mxu0 %v9408_v45  ;;  %1181 = vmatpush1.bf16.msra.mxu1 %v9509_v4 }
 0x38e   :  { %1141 = vmatprep.subr.bf16.mxu0 %v9415_v47  ;;  %1182 = vmatprep.subr.bf16.mxu1 %v9516_v3 }
 0x391   :  { %1142 = vmatpush1.bf16.msra.mxu0 %v9522_v8  ;;  %1183 = vmatpush1.bf16.msra.mxu1 %v9528_v9 }
 0x392   :  { %1143 = vmatprep.subr.bf16.mxu0 %v9534_v7  ;;  %1184 = vmatprep.subr.bf16.mxu1 %v9540_v10 }
 0x395   :  { %1144 = vmatpush1.bf16.msra.mxu0 %v9546_v11  ;;  %1185 = vmatpush1.bf16.msra.mxu1 %v9552_v51  ;;  %v14620_v51 = vld [vmem:[#allocation23_spill] sm:$0xff] }
 0x396   :  { %1145 = vmatprep.subr.bf16.mxu0 %v9558_v12  ;;  %1186 = vmatprep.subr.bf16.mxu1 %v9564_v13  ;;  %v9582_v12 = vld [vmem:[%s14139_s4 + $0x1e4] ss:$16 sps:$4 sm:$0xff]   ;;  %v9588_v13 = vld [vmem:[%s14139_s4 + $0x1ec] ss:$16 sps:$4 sm:$0xff]  }
 0x397   :  { %14616 = vst [vmem:[#allocation26_spill] sm:$0xff] %v9582_v12  ;;  %14617 = vst [vmem:[#allocation27_spill] sm:$0xff] %v9588_v13 }
 0x399   :  { %1146 = vmatpush1.bf16.msra.mxu0 %v9570_v14  ;;  %1187 = vmatpush1.bf16.msra.mxu1 %v9576_v23  ;;  %v9594_v14 = vld [vmem:[%s14139_s4 + $0x1e0] ss:$16 sps:$4 sm:$0xff]   ;;  %v9600_v23 = vld [vmem:[%s14139_s4 + $0x1e8] ss:$16 sps:$4 sm:$0xff]  }
 0x39a   :  { %1147 = vmatprep.subr.bf16.mxu0 %v9582_v12  ;;  %1188 = vmatprep.subr.bf16.mxu1 %v9588_v13  ;;  %14618 = vst [vmem:[#allocation28_spill] sm:$0xff] %v9594_v14  ;;  %14619 = vst [vmem:[#allocation29_spill] sm:$0xff] %v9600_v23 }
 0x39d   :  { %1148 = vmatpush1.bf16.msra.mxu0 %v9594_v14  ;;  %1189 = vmatpush1.bf16.msra.mxu1 %v9600_v23 }
 0x39e   :  { %1228 = vmatprep.subr.bf16.mxu0 %v9136_v19  ;;  %1269 = vmatprep.subr.bf16.mxu1 %v9142_v20 }
 0x433   :  { %v1040_v12 = vpop.f32.mrb[12].mxu0  ;;  %v1081_v13 = vpop.f32.mrb[12].mxu1 }
 0x434   :  { %v1041_v11 = vadd.f32 %v1040_v12, %v14620_v51  ;;  %v1042_v10 = vpop.f32.mrb[13].mxu0  ;;  %v1083_v7 = vpop.f32.mrb[13].mxu1  ;;  %v1082_v20 = vadd.f32 %v1081_v13, %v9062_v60  ;;  %v14623_v13 = vld [vmem:[#allocation10_spill] sm:$0xff] }
 0x435   :  { %v1043_v9 = vadd.f32 %v1042_v10, %v14592_v27  ;;  %v1044_v14 = vpop.f32.mrb[14].mxu0  ;;  %v1085_v8 = vpop.f32.mrb[14].mxu1  ;;  %v1084_v19 = vadd.f32 %v1083_v7, %v14593_v35 }
 0x436   :  { %v6149_v3 = vmul.f32 -1.442695, %v1041_v11  ;;  %v1045_v47 = vpop.f32.mrb[15].mxu0  ;;  %v1086_v4 = vpop.f32.mrb[15].mxu1  ;;  %v14624_v14 = vld [vmem:[#allocation17_spill] sm:$0xff] }
 0x437   :  { %v6150_v45 = vmul.f32 -1.442695, %v1043_v9  ;;  %v6151_v23 = vmul.f32 -1.442695, %v1084_v19 }
 0x438   :  { %7558 = vpow2.f32 %v6149_v3 }
 0x439   :  { %7560 = vpow2.f32 %v6150_v45 }
 0x43a   :  { %7562 = vpow2.f32 %v6151_v23  ;;  %v14625_v23 = vld [vmem:[#allocation16_spill] sm:$0xff] }
 0x43b   :  { %7564 = vtanh.f32 %v1082_v20 }
 0x442   :  { %v7559_v48 = vpop.eup %7558 }
 0x443   :  { %v7561_v12 = vpop.eup %7560  ;;  %v1091_v51 = vadd.f32 1.0, %v7559_v48 }
 0x444   :  { %v1097_v61 = vadd.f32 1.0, %v7561_v12  ;;  %v7563_v8 = vpop.eup %7562  ;;  %v14626_v12 = vld [vmem:[#allocation14_spill] sm:$0xff] }
 0x445   :  { %7566 = vrcp.f32 %v1091_v51  ;;  %v7565_v10 = vpop.eup %7564  ;;  %v1104_v4 = vadd.f32 1.0, %v7563_v8  ;;  %v14622_v51 = vld [vmem:[#allocation11_spill] sm:$0xff] }
 0x446   :  { %7568 = vrcp.f32 %v1097_v61  ;;  %v6152_v61 = vld [vmem:[%s14136_s1 + $0x4] sm:$0x1]  ;;  %v14627_v8 = vld [vmem:[#allocation19_spill] sm:$0xff] }
 0x447   :  { %7570 = vrcp.f32 %v1104_v4  ;;  %v14630_v4 = vld [vmem:[#allocation18_spill] sm:$0xff] }
 0x44f   :  { %v7567_v47 = vpop.eup %7566 }
 0x450   :  { %v7569_v9 = vpop.eup %7568  ;;  %v1108_v3 = vmul.f32 %v7567_v47, %v7565_v10  ;;  %v14628_v10 = vld [vmem:[#allocation15_spill] sm:$0xff]  ;;  %v14629_v47 = vld [vmem:[#allocation20_spill] sm:$0xff] }
 0x451   :  { %v1107_v45 = vmul.f32 %v7569_v9, %v9440_v5  ;;  %v7571_v19 = vpop.eup %7570  ;;  %v14621_v5 = vld [vmem:[#allocation13_spill] sm:$0xff] }
 0x452   :  { %v14631_v9 = vld [vmem:[#allocation21_spill] sm:$0xff] }
 0x453   :  { %v9610_v7 = vadd.f32 %v1108_v3, %v1107_v45  ;;  %v14632_v3 = vld [vmem:[#allocation24_spill] sm:$0xff]  ;;  %v14633_v45 = vld [vmem:[#allocation25_spill] sm:$0xff] }
 0x455   :  { %7572 = vtanh.f32 %v9610_v7 }
 0x45f   :  { %v7573_v11 = vpop.eup %7572 }
 0x460   :  { %v1111_v48 = vmul.f32 %v7573_v11, %v7571_v19  ;;  %v14634_v19 = vld [vmem:[#allocation7_spill] sm:$0xff]  ;;  %v14635_v11 = vld [vmem:[#allocation12_spill] sm:$0xff] }
 0x462   :  { %1113 = vst [vmem:[#allocation2 + $0x6] sm:$0x3] %v1111_v48  ;;  %v1116_v20 = vpack.c.bf16 %v1111_v48, %v1111_v48  ;;  %v14636_v48 = vld [vmem:[#allocation8_spill] sm:$0xff] }
 0x464   :  { %1149 = vmatprep.mubr.bf16.mxu0 %v1116_v20  ;;  %1190 = vmatprep.mubr.bf16.mxu1 %v1116_v20  ;;  %v14637_v20 = vld [vmem:[#allocation26_spill] sm:$0xff] }
 0x465   :  { %1150 = vmatmul.mubr.bf16.vlgmr.msra.gmra.mrb[16].mxu0 %v6152_v61  ;;  %1191 = vmatmul.mubr.bf16.vlgmr.msra.gmra.mrb[16].mxu1 %v6152_v61  ;;  %v14638_v61 = vld [vmem:[#allocation27_spill] sm:$0xff] }
 0x466   :  { %1229 = vmatpush1.bf16.msra.mxu0 %v9159_v49  ;;  %1270 = vmatpush1.bf16.msra.mxu1 %v9165_v46 }
 0x467   :  { %1230 = vmatprep.subr.bf16.mxu0 %v9171_v62  ;;  %1271 = vmatprep.subr.bf16.mxu1 %v9177_v53 }
 0x46a   :  { %1231 = vmatpush1.bf16.msra.mxu0 %v9183_v6  ;;  %1272 = vmatpush1.bf16.msra.mxu1 %v9189_v56 }
 0x46b   :  { %1232 = vmatprep.subr.bf16.mxu0 %v9195_v1  ;;  %1273 = vmatprep.subr.bf16.mxu1 %v9201_v21 }
 0x46e   :  { %1233 = vmatpush1.bf16.msra.mxu0 %v9207_v22  ;;  %1274 = vmatpush1.bf16.msra.mxu1 %v9213_v24 }
 0x46f   :  { %1234 = vmatprep.subr.bf16.mxu0 %v9219_v25  ;;  %1275 = vmatprep.subr.bf16.mxu1 %v9225_v26 }
 0x472   :  { %1235 = vmatpush1.bf16.msra.mxu0 %v9231_v28  ;;  %1276 = vmatpush1.bf16.msra.mxu1 %v9237_v29 }
 0x473   :  { %1236 = vmatprep.subr.bf16.mxu0 %v9243_v30  ;;  %1277 = vmatprep.subr.bf16.mxu1 %v9249_v31 }
 0x476   :  { %1237 = vmatpush1.bf16.msra.mxu0 %v9255_v32  ;;  %1278 = vmatpush1.bf16.msra.mxu1 %v9261_v33 }
 0x477   :  { %1238 = vmatprep.subr.bf16.mxu0 %v9267_v34  ;;  %1279 = vmatprep.subr.bf16.mxu1 %v9273_v36 }
 0x47a   :  { %1239 = vmatpush1.bf16.msra.mxu0 %v9279_v37  ;;  %1280 = vmatpush1.bf16.msra.mxu1 %v9285_v38 }
 0x47b   :  { %1240 = vmatprep.subr.bf16.mxu0 %v9291_v39  ;;  %1281 = vmatprep.subr.bf16.mxu1 %v9297_v40 }
 0x47e   :  { %1241 = vmatpush1.bf16.msra.mxu0 %v9303_v41  ;;  %1282 = vmatpush1.bf16.msra.mxu1 %v9309_v42 }
 0x47f   :  { %1242 = vmatprep.subr.bf16.mxu0 %v9315_v43  ;;  %1283 = vmatprep.subr.bf16.mxu1 %v9321_v44 }
 0x482   :  { %1243 = vmatpush1.bf16.msra.mxu0 %v9327_v55  ;;  %1284 = vmatpush1.bf16.msra.mxu1 %v9333_v57 }
 0x483   :  { %1244 = vmatprep.subr.bf16.mxu0 %v9339_v0  ;;  %1285 = vmatprep.subr.bf16.mxu1 %v9345_v50 }
 0x486   :  { %1245 = vmatpush1.bf16.msra.mxu0 %v9351_v63  ;;  %1286 = vmatpush1.bf16.msra.mxu1 %v9357_v2 }
 0x487   :  { %1246 = vmatprep.subr.bf16.mxu0 %v14600_v59  ;;  %1287 = vmatprep.subr.bf16.mxu1 %v9369_v52 }
 0x48a   :  { %1247 = vmatpush1.bf16.msra.mxu0 %v14601_v15  ;;  %1288 = vmatpush1.bf16.msra.mxu1 %v14602_v16 }
 0x48b   :  { %1248 = vmatprep.subr.bf16.mxu0 %v9387_v58  ;;  %1289 = vmatprep.subr.bf16.mxu1 %v9488_v17 }
 0x48e   :  { %1249 = vmatpush1.bf16.msra.mxu0 %v9394_v54  ;;  %1290 = vmatpush1.bf16.msra.mxu1 %v9495_v18 }
 0x48f   :  { %1250 = vmatprep.subr.bf16.mxu0 %v14621_v5  ;;  %1291 = vmatprep.subr.bf16.mxu1 %v14622_v51 }
 0x492   :  { %1251 = vmatpush1.bf16.msra.mxu0 %v14623_v13  ;;  %1292 = vmatpush1.bf16.msra.mxu1 %v14624_v14 }
 0x493   :  { %1252 = vmatprep.subr.bf16.mxu0 %v14625_v23  ;;  %1293 = vmatprep.subr.bf16.mxu1 %v14626_v12 }
 0x496   :  { %1253 = vmatpush1.bf16.msra.mxu0 %v14627_v8  ;;  %1294 = vmatpush1.bf16.msra.mxu1 %v14628_v10  ;;  %v14639_v10 = vld [vmem:[#allocation28_spill] sm:$0xff]  ;;  %v14643_v8 = vld [vmem:[#allocation23_spill] sm:$0xff] }
 0x497   :  { %1254 = vmatprep.subr.bf16.mxu0 %v14629_v47  ;;  %1295 = vmatprep.subr.bf16.mxu1 %v14630_v4  ;;  %v14640_v47 = vld [vmem:[#allocation29_spill] sm:$0xff]  ;;  %v14641_v4 = vld [vmem:[#allocation6_spill] sm:$0xff] }
 0x49a   :  { %1255 = vmatpush1.bf16.msra.mxu0 %v14631_v9  ;;  %1296 = vmatpush1.bf16.msra.mxu1 %v14632_v3  ;;  %v14642_v9 = vld [vmem:[#allocation9_spill] sm:$0xff] }
 0x49b   :  { %1256 = vmatprep.subr.bf16.mxu0 %v14633_v45  ;;  %1297 = vmatprep.subr.bf16.mxu1 %v14634_v19 }
 0x49e   :  { %1257 = vmatpush1.bf16.msra.mxu0 %v14635_v11  ;;  %1298 = vmatpush1.bf16.msra.mxu1 %v14636_v48 }
 0x49f   :  { %1258 = vmatprep.subr.bf16.mxu0 %v14637_v20  ;;  %1299 = vmatprep.subr.bf16.mxu1 %v14638_v61 }
 0x4a2   :  { %1259 = vmatpush1.bf16.msra.mxu0 %v14639_v10  ;;  %1300 = vmatpush1.bf16.msra.mxu1 %v14640_v47 }
 0x4a3   :  { %1339 = vmatprep.subr.bf16.mxu0 %v14641_v4  ;;  %1380 = vmatprep.subr.bf16.mxu1 %v14642_v9 }
 0x538   :  { %v1151_v3 = vpop.f32.mrb[16].mxu0  ;;  %v1192_v45 = vpop.f32.mrb[16].mxu1 }
 0x539   :  { %v1152_v19 = vadd.f32 %v1151_v3, %v14643_v8  ;;  %v1153_v12 = vpop.f32.mrb[17].mxu0  ;;  %v1194_v11 = vpop.f32.mrb[17].mxu1  ;;  %v1193_v9 = vadd.f32 %v1192_v45, %v9062_v60  ;;  %v14646_v45 = vld [vmem:[#allocation10_spill] sm:$0xff] }
 0x53a   :  { %v1154_v48 = vadd.f32 %v1153_v12, %v14592_v27  ;;  %v1155_v23 = vpop.f32.mrb[18].mxu0  ;;  %v1196_v20 = vpop.f32.mrb[18].mxu1  ;;  %v1195_v4 = vadd.f32 %v1194_v11, %v14593_v35 }
 0x53b   :  { %v6153_v14 = vmul.f32 -1.442695, %v1152_v19  ;;  %v1156_v61 = vpop.f32.mrb[19].mxu0  ;;  %v1197_v13 = vpop.f32.mrb[19].mxu1  ;;  %v14647_v20 = vld [vmem:[#allocation17_spill] sm:$0xff] }
 0x53c   :  { %v6154_v10 = vmul.f32 -1.442695, %v1154_v48  ;;  %v6155_v47 = vmul.f32 -1.442695, %v1195_v4  ;;  %v14648_v61 = vld [vmem:[#allocation16_spill] sm:$0xff] }
 0x53d   :  { %7574 = vpow2.f32 %v6153_v14 }
 0x53e   :  { %7576 = vpow2.f32 %v6154_v10 }
 0x53f   :  { %7578 = vpow2.f32 %v6155_v47 }
 0x540   :  { %7580 = vtanh.f32 %v1193_v9 }
 0x547   :  { %v7575_v51 = vpop.eup %7574 }
 0x548   :  { %v7577_v3 = vpop.eup %7576  ;;  %v1202_v8 = vadd.f32 1.0, %v7575_v51 }
 0x549   :  { %v1208_v5 = vadd.f32 1.0, %v7577_v3  ;;  %v7579_v23 = vpop.eup %7578  ;;  %v14649_v3 = vld [vmem:[#allocation14_spill] sm:$0xff] }
 0x54a   :  { %7582 = vrcp.f32 %v1202_v8  ;;  %v7581_v12 = vpop.eup %7580  ;;  %v1215_v13 = vadd.f32 1.0, %v7579_v23  ;;  %v14645_v8 = vld [vmem:[#allocation11_spill] sm:$0xff] }
 0x54b   :  { %7584 = vrcp.f32 %v1208_v5  ;;  %v6156_v5 = vld [vmem:[%s14136_s1 + $0x5] sm:$0x1]  ;;  %v14650_v23 = vld [vmem:[#allocation19_spill] sm:$0xff] }
 0x54c   :  { %7586 = vrcp.f32 %v1215_v13  ;;  %v14653_v13 = vld [vmem:[#allocation18_spill] sm:$0xff] }
 0x554   :  { %v7583_v19 = vpop.eup %7582 }
 0x555   :  { %v7585_v48 = vpop.eup %7584  ;;  %v1219_v14 = vmul.f32 %v7583_v19, %v7581_v12  ;;  %v14651_v12 = vld [vmem:[#allocation15_spill] sm:$0xff]  ;;  %v14652_v19 = vld [vmem:[#allocation20_spill] sm:$0xff] }
 0x556   :  { %v1218_v10 = vmul.f32 %v7585_v48, %v9610_v7  ;;  %v7587_v47 = vpop.eup %7586  ;;  %v14644_v7 = vld [vmem:[#allocation13_spill] sm:$0xff] }
 0x557   :  { %v14654_v48 = vld [vmem:[#allocation21_spill] sm:$0xff] }
 0x558   :  { %v9685_v11 = vadd.f32 %v1219_v14, %v1218_v10  ;;  %v14655_v14 = vld [vmem:[#allocation24_spill] sm:$0xff]  ;;  %v14656_v10 = vld [vmem:[#allocation25_spill] sm:$0xff] }
 0x55a   :  { %7588 = vtanh.f32 %v9685_v11 }
 0x564   :  { %v7589_v4 = vpop.eup %7588 }
 0x565   :  { %v1222_v51 = vmul.f32 %v7589_v4, %v7587_v47  ;;  %v14657_v47 = vld [vmem:[#allocation7_spill] sm:$0xff]  ;;  %v14658_v4 = vld [vmem:[#allocation12_spill] sm:$0xff] }
 0x567   :  { %1224 = vst [vmem:[#allocation2 + $0x8] sm:$0x3] %v1222_v51  ;;  %v1227_v9 = vpack.c.bf16 %v1222_v51, %v1222_v51  ;;  %v14659_v51 = vld [vmem:[#allocation8_spill] sm:$0xff] }
 0x569   :  { %1260 = vmatprep.mubr.bf16.mxu0 %v1227_v9  ;;  %1301 = vmatprep.mubr.bf16.mxu1 %v1227_v9  ;;  %v14660_v9 = vld [vmem:[#allocation26_spill] sm:$0xff] }
 0x56a   :  { %1261 = vmatmul.mubr.bf16.vlgmr.msra.gmra.mrb[20].mxu0 %v6156_v5  ;;  %1302 = vmatmul.mubr.bf16.vlgmr.msra.gmra.mrb[20].mxu1 %v6156_v5  ;;  %v14661_v5 = vld [vmem:[#allocation27_spill] sm:$0xff] }
 0x56b   :  { %1340 = vmatpush1.bf16.msra.mxu0 %v9159_v49  ;;  %1381 = vmatpush1.bf16.msra.mxu1 %v9165_v46 }
 0x56c   :  { %1341 = vmatprep.subr.bf16.mxu0 %v9171_v62  ;;  %1382 = vmatprep.subr.bf16.mxu1 %v9177_v53 }
 0x56f   :  { %1342 = vmatpush1.bf16.msra.mxu0 %v9183_v6  ;;  %1383 = vmatpush1.bf16.msra.mxu1 %v9189_v56 }
 0x570   :  { %1343 = vmatprep.subr.bf16.mxu0 %v9195_v1  ;;  %1384 = vmatprep.subr.bf16.mxu1 %v9201_v21 }
 0x573   :  { %1344 = vmatpush1.bf16.msra.mxu0 %v9207_v22  ;;  %1385 = vmatpush1.bf16.msra.mxu1 %v9213_v24 }
 0x574   :  { %1345 = vmatprep.subr.bf16.mxu0 %v9219_v25  ;;  %1386 = vmatprep.subr.bf16.mxu1 %v9225_v26 }
 0x577   :  { %1346 = vmatpush1.bf16.msra.mxu0 %v9231_v28  ;;  %1387 = vmatpush1.bf16.msra.mxu1 %v9237_v29 }
 0x578   :  { %1347 = vmatprep.subr.bf16.mxu0 %v9243_v30  ;;  %1388 = vmatprep.subr.bf16.mxu1 %v9249_v31 }
 0x57b   :  { %1348 = vmatpush1.bf16.msra.mxu0 %v9255_v32  ;;  %1389 = vmatpush1.bf16.msra.mxu1 %v9261_v33 }
 0x57c   :  { %1349 = vmatprep.subr.bf16.mxu0 %v9267_v34  ;;  %1390 = vmatprep.subr.bf16.mxu1 %v9273_v36 }
 0x57f   :  { %1350 = vmatpush1.bf16.msra.mxu0 %v9279_v37  ;;  %1391 = vmatpush1.bf16.msra.mxu1 %v9285_v38 }
 0x580   :  { %1351 = vmatprep.subr.bf16.mxu0 %v9291_v39  ;;  %1392 = vmatprep.subr.bf16.mxu1 %v9297_v40 }
 0x583   :  { %1352 = vmatpush1.bf16.msra.mxu0 %v9303_v41  ;;  %1393 = vmatpush1.bf16.msra.mxu1 %v9309_v42 }
 0x584   :  { %1353 = vmatprep.subr.bf16.mxu0 %v9315_v43  ;;  %1394 = vmatprep.subr.bf16.mxu1 %v9321_v44 }
 0x587   :  { %1354 = vmatpush1.bf16.msra.mxu0 %v9327_v55  ;;  %1395 = vmatpush1.bf16.msra.mxu1 %v9333_v57 }
 0x588   :  { %1355 = vmatprep.subr.bf16.mxu0 %v9339_v0  ;;  %1396 = vmatprep.subr.bf16.mxu1 %v9345_v50 }
 0x58b   :  { %1356 = vmatpush1.bf16.msra.mxu0 %v9351_v63  ;;  %1397 = vmatpush1.bf16.msra.mxu1 %v9357_v2 }
 0x58c   :  { %1357 = vmatprep.subr.bf16.mxu0 %v14600_v59  ;;  %1398 = vmatprep.subr.bf16.mxu1 %v9369_v52 }
 0x58f   :  { %1358 = vmatpush1.bf16.msra.mxu0 %v14601_v15  ;;  %1399 = vmatpush1.bf16.msra.mxu1 %v14602_v16 }
 0x590   :  { %1359 = vmatprep.subr.bf16.mxu0 %v9387_v58  ;;  %1400 = vmatprep.subr.bf16.mxu1 %v9488_v17 }
 0x593   :  { %1360 = vmatpush1.bf16.msra.mxu0 %v9394_v54  ;;  %1401 = vmatpush1.bf16.msra.mxu1 %v9495_v18 }
 0x594   :  { %1361 = vmatprep.subr.bf16.mxu0 %v14644_v7  ;;  %1402 = vmatprep.subr.bf16.mxu1 %v14645_v8 }
 0x597   :  { %1362 = vmatpush1.bf16.msra.mxu0 %v14646_v45  ;;  %1403 = vmatpush1.bf16.msra.mxu1 %v14647_v20 }
 0x598   :  { %1363 = vmatprep.subr.bf16.mxu0 %v14648_v61  ;;  %1404 = vmatprep.subr.bf16.mxu1 %v14649_v3 }
 0x59b   :  { %1364 = vmatpush1.bf16.msra.mxu0 %v14650_v23  ;;  %1405 = vmatpush1.bf16.msra.mxu1 %v14651_v12  ;;  %v14662_v12 = vld [vmem:[#allocation28_spill] sm:$0xff]  ;;  %v14666_v23 = vld [vmem:[#allocation23_spill] sm:$0xff] }
 0x59c   :  { %1365 = vmatprep.subr.bf16.mxu0 %v14652_v19  ;;  %1406 = vmatprep.subr.bf16.mxu1 %v14653_v13  ;;  %v14663_v19 = vld [vmem:[#allocation29_spill] sm:$0xff]  ;;  %v14664_v13 = vld [vmem:[#allocation6_spill] sm:$0xff] }
 0x59f   :  { %1366 = vmatpush1.bf16.msra.mxu0 %v14654_v48  ;;  %1407 = vmatpush1.bf16.msra.mxu1 %v14655_v14  ;;  %v14665_v48 = vld [vmem:[#allocation9_spill] sm:$0xff] }
 0x5a0   :  { %1367 = vmatprep.subr.bf16.mxu0 %v14656_v10  ;;  %1408 = vmatprep.subr.bf16.mxu1 %v14657_v47 }
 0x5a3   :  { %1368 = vmatpush1.bf16.msra.mxu0 %v14658_v4  ;;  %1409 = vmatpush1.bf16.msra.mxu1 %v14659_v51 }
 0x5a4   :  { %1369 = vmatprep.subr.bf16.mxu0 %v14660_v9  ;;  %1410 = vmatprep.subr.bf16.mxu1 %v14661_v5 }
 0x5a7   :  { %1370 = vmatpush1.bf16.msra.mxu0 %v14662_v12  ;;  %1411 = vmatpush1.bf16.msra.mxu1 %v14663_v19 }
 0x5a8   :  { %1450 = vmatprep.subr.bf16.mxu0 %v14664_v13  ;;  %1491 = vmatprep.subr.bf16.mxu1 %v14665_v48 }
 0x63d   :  { %v1262_v14 = vpop.f32.mrb[20].mxu0  ;;  %v1303_v10 = vpop.f32.mrb[20].mxu1 }
 0x63e   :  { %v1263_v47 = vadd.f32 %v1262_v14, %v14666_v23  ;;  %v1264_v3 = vpop.f32.mrb[21].mxu0  ;;  %v1305_v4 = vpop.f32.mrb[21].mxu1  ;;  %v1304_v48 = vadd.f32 %v1303_v10, %v9062_v60 }
 0x63f   :  { %v1265_v51 = vadd.f32 %v1264_v3, %v14592_v27  ;;  %v1266_v61 = vpop.f32.mrb[22].mxu0  ;;  %v1307_v9 = vpop.f32.mrb[22].mxu1  ;;  %v1306_v13 = vadd.f32 %v1305_v4, %v14593_v35 }
 0x640   :  { %v6157_v20 = vmul.f32 -1.442695, %v1263_v47  ;;  %v1267_v5 = vpop.f32.mrb[23].mxu0  ;;  %v1308_v45 = vpop.f32.mrb[23].mxu1 }
 0x641   :  { %v6158_v12 = vmul.f32 -1.442695, %v1265_v51  ;;  %v6159_v19 = vmul.f32 -1.442695, %v1306_v13 }
 0x642   :  { %7590 = vpow2.f32 %v6157_v20 }
 0x643   :  { %7592 = vpow2.f32 %v6158_v12 }
 0x644   :  { %7594 = vpow2.f32 %v6159_v19 }
 0x645   :  { %7596 = vtanh.f32 %v1304_v48 }
 0x64c   :  { %v7591_v8 = vpop.eup %7590 }
 0x64d   :  { %v7593_v14 = vpop.eup %7592  ;;  %v1313_v23 = vadd.f32 1.0, %v7591_v8 }
 0x64e   :  { %v1319_v7 = vadd.f32 1.0, %v7593_v14  ;;  %v7595_v61 = vpop.eup %7594 }
 0x64f   :  { %7598 = vrcp.f32 %v1313_v23  ;;  %v7597_v3 = vpop.eup %7596  ;;  %v1326_v45 = vadd.f32 1.0, %v7595_v61 }
 0x650   :  { %7600 = vrcp.f32 %v1319_v7  ;;  %v6160_v7 = vld [vmem:[%s14136_s1 + $0x6] sm:$0x1] }
 0x651   :  { %7602 = vrcp.f32 %v1326_v45 }
 0x659   :  { %v7599_v47 = vpop.eup %7598 }
 0x65a   :  { %v7601_v51 = vpop.eup %7600  ;;  %v1330_v20 = vmul.f32 %v7599_v47, %v7597_v3 }
 0x65b   :  { %v1329_v12 = vmul.f32 %v7601_v51, %v9685_v11  ;;  %v7603_v19 = vpop.eup %7602  ;;  %v6164_v51 = vld [vmem:[%s14136_s1 + $0x7] sm:$0x1] }
 0x65d   :  { %v9760_v4 = vadd.f32 %v1330_v20, %v1329_v12  ;;  %v7318_v20 = vld [vmem:[%s14142_s7] sm:$0xff]   ;;  %v14247_v12 = vmov 0.0  }
 0x65f   :  { %7604 = vtanh.f32 %v9760_v4 }
 0x669   :  { %v7605_v10 = vpop.eup %7604 }
 0x66a   :  { %v1333_v8 = vmul.f32 %v7605_v10, %v7603_v19  ;;  %v7320_v19 = vld [vmem:[%s14142_s7 + $0x10] sm:$0xff]   ;;  %v7321_v10 = vld [vmem:[%s14142_s7 + $0x18] sm:$0xff]  }
 0x66c   :  { %1335 = vst [vmem:[#allocation2 + $0xa] sm:$0x3] %v1333_v8  ;;  %v1338_v9 = vpack.c.bf16 %v1333_v8, %v1333_v8  ;;  %v7322_v8 = vld [vmem:[%s14141_s6] sm:$0xff]  }
 0x66e   :  { %1371 = vmatprep.mubr.bf16.mxu0 %v1338_v9  ;;  %1412 = vmatprep.mubr.bf16.mxu1 %v1338_v9  ;;  %v7323_v9 = vld [vmem:[%s14142_s7 + $0x20] sm:$0xff]  }
 0x66f   :  { %1372 = vmatmul.mubr.bf16.vlgmr.msra.gmra.mrb[24].mxu0 %v6160_v7  ;;  %1413 = vmatmul.mubr.bf16.vlgmr.msra.gmra.mrb[24].mxu1 %v6160_v7  ;;  %v7324_v7 = vld [vmem:[%s14141_s6 + $0x8] sm:$0xff]  }
 0x670   :  { %1451 = vmatpush1.bf16.msra.mxu0 %v9159_v49  ;;  %1492 = vmatpush1.bf16.msra.mxu1 %v9165_v46  ;;  %v14667_v49 = vld [vmem:[#allocation13_spill] sm:$0xff]  ;;  %v14668_v46 = vld [vmem:[#allocation11_spill] sm:$0xff] }
 0x671   :  { %1452 = vmatprep.subr.bf16.mxu0 %v9171_v62  ;;  %1493 = vmatprep.subr.bf16.mxu1 %v9177_v53  ;;  %v14669_v62 = vld [vmem:[#allocation10_spill] sm:$0xff]  ;;  %v14670_v53 = vld [vmem:[#allocation17_spill] sm:$0xff] }
 0x674   :  { %1453 = vmatpush1.bf16.msra.mxu0 %v9183_v6  ;;  %1494 = vmatpush1.bf16.msra.mxu1 %v9189_v56  ;;  %v14671_v6 = vld [vmem:[#allocation16_spill] sm:$0xff]  ;;  %v14672_v56 = vld [vmem:[#allocation14_spill] sm:$0xff] }
 0x675   :  { %1454 = vmatprep.subr.bf16.mxu0 %v9195_v1  ;;  %1495 = vmatprep.subr.bf16.mxu1 %v9201_v21  ;;  %v14673_v1 = vld [vmem:[#allocation19_spill] sm:$0xff] }
 0x676   :  { %v14674_v21 = vld [vmem:[#allocation15_spill] sm:$0xff] }
 0x678   :  { %1455 = vmatpush1.bf16.msra.mxu0 %v9207_v22  ;;  %1496 = vmatpush1.bf16.msra.mxu1 %v9213_v24  ;;  %v14675_v22 = vld [vmem:[#allocation20_spill] sm:$0xff]  ;;  %v14676_v24 = vld [vmem:[#allocation18_spill] sm:$0xff] }
 0x679   :  { %1456 = vmatprep.subr.bf16.mxu0 %v9219_v25  ;;  %1497 = vmatprep.subr.bf16.mxu1 %v9225_v26  ;;  %v14677_v25 = vld [vmem:[#allocation21_spill] sm:$0xff]  ;;  %v14678_v26 = vld [vmem:[#allocation24_spill] sm:$0xff] }
 0x67c   :  { %1457 = vmatpush1.bf16.msra.mxu0 %v9231_v28  ;;  %1498 = vmatpush1.bf16.msra.mxu1 %v9237_v29  ;;  %v14679_v28 = vld [vmem:[#allocation25_spill] sm:$0xff]  ;;  %v14680_v29 = vld [vmem:[#allocation7_spill] sm:$0xff] }
 0x67d   :  { %1458 = vmatprep.subr.bf16.mxu0 %v9243_v30  ;;  %1499 = vmatprep.subr.bf16.mxu1 %v9249_v31  ;;  %v14681_v30 = vld [vmem:[#allocation12_spill] sm:$0xff] }
 0x67e   :  { %v14682_v31 = vld [vmem:[#allocation8_spill] sm:$0xff] }
 0x680   :  { %1459 = vmatpush1.bf16.msra.mxu0 %v9255_v32  ;;  %1500 = vmatpush1.bf16.msra.mxu1 %v9261_v33  ;;  %v14683_v32 = vld [vmem:[#allocation26_spill] sm:$0xff]  ;;  %v14684_v33 = vld [vmem:[#allocation27_spill] sm:$0xff] }
 0x681   :  { %1460 = vmatprep.subr.bf16.mxu0 %v9267_v34  ;;  %1501 = vmatprep.subr.bf16.mxu1 %v9273_v36  ;;  %v14685_v34 = vld [vmem:[#allocation28_spill] sm:$0xff]  ;;  %v14686_v36 = vld [vmem:[#allocation29_spill] sm:$0xff] }
 0x684   :  { %1461 = vmatpush1.bf16.msra.mxu0 %v9279_v37  ;;  %1502 = vmatpush1.bf16.msra.mxu1 %v9285_v38 }
 0x685   :  { %1462 = vmatprep.subr.bf16.mxu0 %v9291_v39  ;;  %1503 = vmatprep.subr.bf16.mxu1 %v9297_v40  ;;  %v14687_v39 = vld [vmem:[#allocation23_spill] sm:$0xff] }
 0x688   :  { %1463 = vmatpush1.bf16.msra.mxu0 %v9303_v41  ;;  %1504 = vmatpush1.bf16.msra.mxu1 %v9309_v42 }
 0x689   :  { %1464 = vmatprep.subr.bf16.mxu0 %v9315_v43  ;;  %1505 = vmatprep.subr.bf16.mxu1 %v9321_v44 }
 0x68c   :  { %1465 = vmatpush1.bf16.msra.mxu0 %v9327_v55  ;;  %1506 = vmatpush1.bf16.msra.mxu1 %v9333_v57 }
 0x68d   :  { %1466 = vmatprep.subr.bf16.mxu0 %v9339_v0  ;;  %1507 = vmatprep.subr.bf16.mxu1 %v9345_v50 }
 0x690   :  { %1467 = vmatpush1.bf16.msra.mxu0 %v9351_v63  ;;  %1508 = vmatpush1.bf16.msra.mxu1 %v9357_v2 }
 0x691   :  { %1468 = vmatprep.subr.bf16.mxu0 %v14600_v59  ;;  %1509 = vmatprep.subr.bf16.mxu1 %v9369_v52 }
 0x694   :  { %1469 = vmatpush1.bf16.msra.mxu0 %v14601_v15  ;;  %1510 = vmatpush1.bf16.msra.mxu1 %v14602_v16 }
 0x695   :  { %1470 = vmatprep.subr.bf16.mxu0 %v9387_v58  ;;  %1511 = vmatprep.subr.bf16.mxu1 %v9488_v17 }
 0x698   :  { %1471 = vmatpush1.bf16.msra.mxu0 %v9394_v54  ;;  %1512 = vmatpush1.bf16.msra.mxu1 %v9495_v18 }
 0x699   :  { %1472 = vmatprep.subr.bf16.mxu0 %v14667_v49  ;;  %1513 = vmatprep.subr.bf16.mxu1 %v14668_v46  ;;  %v7325_v49 = vld [vmem:[%s14142_s7 + $0x28] sm:$0xff]   ;;  %v7326_v46 = vld [vmem:[%s14141_s6 + $0x10] sm:$0xff]  }
 0x69c   :  { %1473 = vmatpush1.bf16.msra.mxu0 %v14669_v62  ;;  %1514 = vmatpush1.bf16.msra.mxu1 %v14670_v53  ;;  %v7327_v62 = vld [vmem:[%s14142_s7 + $0x30] sm:$0xff]   ;;  %v7328_v53 = vld [vmem:[%s14141_s6 + $0x18] sm:$0xff]  }
 0x69d   :  { %1474 = vmatprep.subr.bf16.mxu0 %v14671_v6  ;;  %1515 = vmatprep.subr.bf16.mxu1 %v14672_v56  ;;  %v7329_v6 = vld [vmem:[%s14142_s7 + $0x38] sm:$0xff]   ;;  %v7330_v56 = vld [vmem:[%s14141_s6 + $0x20] sm:$0xff]  }
 0x6a0   :  { %1475 = vmatpush1.bf16.msra.mxu0 %v14673_v1  ;;  %1516 = vmatpush1.bf16.msra.mxu1 %v14674_v21  ;;  %v7331_v1 = vld [vmem:[%s14141_s6 + $0x28] sm:$0xff]   ;;  %v7332_v21 = vld [vmem:[%s14141_s6 + $0x30] sm:$0xff]  }
 0x6a1   :  { %1476 = vmatprep.subr.bf16.mxu0 %v14675_v22  ;;  %1517 = vmatprep.subr.bf16.mxu1 %v14676_v24  ;;  %v7333_v22 = vld [vmem:[%s14141_s6 + $0x38] sm:$0xff]  }
 0x6a4   :  { %1477 = vmatpush1.bf16.msra.mxu0 %v14677_v25  ;;  %1518 = vmatpush1.bf16.msra.mxu1 %v14678_v26 }
 0x6a5   :  { %1478 = vmatprep.subr.bf16.mxu0 %v14679_v28  ;;  %1519 = vmatprep.subr.bf16.mxu1 %v14680_v29 }
 0x6a8   :  { %1479 = vmatpush1.bf16.msra.mxu0 %v14681_v30  ;;  %1520 = vmatpush1.bf16.msra.mxu1 %v14682_v31 }
 0x6a9   :  { %1480 = vmatprep.subr.bf16.mxu0 %v14683_v32  ;;  %1521 = vmatprep.subr.bf16.mxu1 %v14684_v33 }
 0x6ac   :  { %1481 = vmatpush1.bf16.msra.mxu0 %v14685_v34  ;;  %1522 = vmatpush1.bf16.msra.mxu1 %v14686_v36 }
 0x6ad   :  { %6732 = vmatprep.subr.bf16.mxu1 %v14247_v12  ;;  %6712 = vmatprep.subr.bf16.mxu0 %v14247_v12 }
 0x742   :  { %v1373_v37 = vpop.f32.mrb[24].mxu0  ;;  %v1414_v38 = vpop.f32.mrb[24].mxu1 }
 0x743   :  { %v1374_v40 = vadd.f32 %v1373_v37, %v14687_v39  ;;  %v1375_v41 = vpop.f32.mrb[25].mxu0  ;;  %v1416_v42 = vpop.f32.mrb[25].mxu1  ;;  %v1415_v52 = vadd.f32 %v1414_v38, %v9062_v60 }
 0x744   :  { %v1376_v43 = vadd.f32 %v1375_v41, %v14592_v27  ;;  %v1377_v44 = vpop.f32.mrb[26].mxu0  ;;  %v1418_v55 = vpop.f32.mrb[26].mxu1  ;;  %v1417_v2 = vadd.f32 %v1416_v42, %v14593_v35 }
 0x745   :  { %v6161_v57 = vmul.f32 -1.442695, %v1374_v40  ;;  %v1378_v0 = vpop.f32.mrb[27].mxu0  ;;  %v1419_v50 = vpop.f32.mrb[27].mxu1 }
 0x746   :  { %v6162_v63 = vmul.f32 -1.442695, %v1376_v43  ;;  %v6163_v58 = vmul.f32 -1.442695, %v1417_v2 }
 0x747   :  { %7606 = vpow2.f32 %v6161_v57 }
 0x748   :  { %7608 = vpow2.f32 %v6162_v63 }
 0x749   :  { %7610 = vpow2.f32 %v6163_v58 }
 0x74a   :  { %7612 = vtanh.f32 %v1415_v52 }
 0x751   :  { %v7607_v54 = vpop.eup %7606 }
 0x752   :  { %v7609_v59 = vpop.eup %7608  ;;  %v1424_v15 = vadd.f32 1.0, %v7607_v54  ;;  %v8500_v54 = vmov 1983009808  }
 0x753   :  { %v1430_v16 = vadd.f32 1.0, %v7609_v59  ;;  %v7611_v17 = vpop.eup %7610  ;;  %v1577_v59 = vunpack.c.l.s4 %v8500_v54 }
 0x754   :  { %7614 = vrcp.f32 %v1424_v15  ;;  %v7613_v18 = vpop.eup %7612  ;;  %v1437_v23 = vadd.f32 1.0, %v7611_v17 }
 0x755   :  { %7616 = vrcp.f32 %v1430_v16  ;;  %v9917_v16 = vld [vmem:[#allocation2 + $0x6] sm:$0x3]  ;;  %v1578_v17 = vunpack.c.0.s8 %v1577_v59 }
 0x756   :  { %7618 = vrcp.f32 %v1437_v23  ;;  %v9924_v23 = vld [vmem:[#allocation2 + $0xa] sm:$0x3] }
 0x75e   :  { %v7615_v11 = vpop.eup %7614 }
 0x75f   :  { %v7617_v5 = vpop.eup %7616  ;;  %v1441_v13 = vmul.f32 %v7615_v11, %v7613_v18  ;;  %v9920_v18 = vld [vmem:[#allocation2 + $0x2] sm:$0x3]  ;;  %v9922_v11 = vld [vmem:[#allocation2 + $0x4] sm:$0x3] }
 0x760   :  { %v1440_v48 = vmul.f32 %v7617_v5, %v9760_v4  ;;  %v7619_v61 = vpop.eup %7618  ;;  %v7319_v4 = vld [vmem:[%s14142_s7 + $0x8] sm:$0xff]   ;;  %v1575_v5 = vcombine.low %v9922_v11, %v9917_v16 }
 0x762   :  { %v9833_v14 = vadd.f32 %v1441_v13, %v1440_v48  ;;  %v9928_v13 = vld [vmem:[#allocation2] sm:$0x3]  ;;  %v9930_v48 = vld [vmem:[#allocation2 + $0x8] sm:$0x3] }
 0x764   :  { %7620 = vtanh.f32 %v9833_v14 }
 0x76e   :  { %v7621_v3 = vpop.eup %7620 }
 0x76f   :  { %v1444_v47 = vmul.f32 %v7621_v3, %v7619_v61  ;;  %v14688_v61 = vld [vmem:[#allocation22_spill] sm:$0xff] }
 0x770   :  { %v1581_v3 = vsub.s32 %v1578_v17, %v14688_v61 }
 0x771   :  { %1446 = vst [vmem:[#allocation2 + $0xc] sm:$0x3] %v1444_v47  ;;  %v1449_v45 = vpack.c.bf16 %v1444_v47, %v1444_v47  ;;  %v1591_v47 = vcombine.low %v9930_v48, %v9924_v23 }
 0x773   :  { %1482 = vmatprep.mubr.bf16.mxu0 %v1449_v45  ;;  %1523 = vmatprep.mubr.bf16.mxu1 %v1449_v45 }
 0x774   :  { %1483 = vmatmul.mubr.bf16.vlgmr.msra.gmra.mrb[28].mxu0 %v6164_v51  ;;  %1524 = vmatmul.mubr.bf16.vlgmr.msra.gmra.mrb[28].mxu1 %v6164_v51 }
 0x775   :  { %6733 = vmatpush3.bf16.msra.mxu1 %v7318_v20  ;;  %6713 = vmatpush3.bf16.msra.mxu0 %v7322_v8  ;;  %v1589_v20 = vrot.slane %v1575_v5, %v1581_v3 }
 0x776   :  { %6734 = vmatprep.subr.bf16.mxu1 %v14247_v12  ;;  %6714 = vmatprep.subr.bf16.mxu0 %v14247_v12 }
 0x777   :  { %6748 = vmatprep.mubr.msk.bf16.mxu1 %vm8499_vm0, %v14247_v12  ;;  %6728 = vmatprep.mubr.msk.bf16.mxu0 %vm8499_vm0, %v14247_v12 }
 0x778   :  { %v9937_v45 = vld [vmem:[#allocation2 + $0xc] sm:$0x3] }
 0x779   :  { %6735 = vmatpush3.bf16.msra.mxu1 %v7319_v4  ;;  %6715 = vmatpush3.bf16.msra.mxu0 %v7324_v7 }
 0x77a   :  { %6736 = vmatprep.subr.bf16.mxu1 %v14247_v12  ;;  %6716 = vmatprep.subr.bf16.mxu0 %v14247_v12 }
 0x77d   :  { %6737 = vmatpush3.bf16.msra.mxu1 %v7320_v19  ;;  %6717 = vmatpush3.bf16.msra.mxu0 %v7326_v46 }
 0x77e   :  { %6738 = vmatprep.subr.bf16.mxu1 %v14247_v12  ;;  %6718 = vmatprep.subr.bf16.mxu0 %v14247_v12 }
 0x781   :  { %6739 = vmatpush3.bf16.msra.mxu1 %v7321_v10  ;;  %6719 = vmatpush3.bf16.msra.mxu0 %v7328_v53  ;;  %v1599_v10 = vrot.slane %v1591_v47, %v1581_v3 }
 0x782   :  { %6740 = vmatprep.subr.bf16.mxu1 %v14247_v12  ;;  %6720 = vmatprep.subr.bf16.mxu0 %v14247_v12 }
 0x785   :  { %6741 = vmatpush3.bf16.msra.mxu1 %v7323_v9  ;;  %6721 = vmatpush3.bf16.msra.mxu0 %v7330_v56  ;;  %v6168_v56 = vld [vmem:[%s14143_s8] ss:$0 sm:$0xff] }
 0x786   :  { %6742 = vmatprep.subr.bf16.mxu1 %v14247_v12  ;;  %6722 = vmatprep.subr.bf16.mxu0 %v14247_v12 }
 0x789   :  { %6743 = vmatpush3.bf16.msra.mxu1 %v7325_v49  ;;  %6723 = vmatpush3.bf16.msra.mxu0 %v7331_v1 }
 0x78a   :  { %6744 = vmatprep.subr.bf16.mxu1 %v14247_v12  ;;  %6724 = vmatprep.subr.bf16.mxu0 %v14247_v12 }
 0x78d   :  { %6745 = vmatpush3.bf16.msra.mxu1 %v7327_v62  ;;  %6725 = vmatpush3.bf16.msra.mxu0 %v7332_v21 }
 0x78e   :  { %6746 = vmatprep.subr.bf16.mxu1 %v14247_v12  ;;  %6726 = vmatprep.subr.bf16.mxu0 %v14247_v12 }
 0x791   :  { %6747 = vmatpush3.bf16.msra.mxu1 %v7329_v6  ;;  %6727 = vmatpush3.bf16.msra.mxu0 %v7333_v22 }
 0x847   :  { %v1484_v24 = vpop.f32.mrb[28].mxu0  ;;  %v1525_v25 = vpop.f32.mrb[28].mxu1 }
 0x848   :  { %v1485_v26 = vadd.f32 %v1484_v24, %v14687_v39  ;;  %v1486_v28 = vpop.f32.mrb[29].mxu0  ;;  %v1527_v29 = vpop.f32.mrb[29].mxu1  ;;  %v1526_v41 = vadd.f32 %v1525_v25, %v9062_v60 }
 0x849   :  { %v1487_v30 = vadd.f32 %v1486_v28, %v14592_v27  ;;  %v1488_v31 = vpop.f32.mrb[30].mxu0  ;;  %v1529_v32 = vpop.f32.mrb[30].mxu1  ;;  %v1528_v38 = vadd.f32 %v1527_v29, %v14593_v35 }
 0x84a   :  { %v6165_v33 = vmul.f32 -1.442695, %v1485_v26  ;;  %v1489_v34 = vpop.f32.mrb[31].mxu0  ;;  %v1530_v36 = vpop.f32.mrb[31].mxu1 }
 0x84b   :  { %v6166_v37 = vmul.f32 -1.442695, %v1487_v30  ;;  %v6167_v40 = vmul.f32 -1.442695, %v1528_v38 }
 0x84c   :  { %7622 = vpow2.f32 %v6165_v33 }
 0x84d   :  { %7624 = vpow2.f32 %v6166_v37 }
 0x84e   :  { %7626 = vpow2.f32 %v6167_v40 }
 0x84f   :  { %7628 = vtanh.f32 %v1526_v41 }
 0x856   :  { %v7623_v42 = vpop.eup %7622 }
 0x857   :  { %v7625_v39 = vpop.eup %7624  ;;  %v1535_v43 = vadd.f32 1.0, %v7623_v42 }
 0x858   :  { %v1541_v44 = vadd.f32 1.0, %v7625_v39  ;;  %v7627_v27 = vpop.eup %7626 }
 0x859   :  { %7630 = vrcp.f32 %v1535_v43  ;;  %v7629_v55 = vpop.eup %7628  ;;  %v1548_v0 = vadd.f32 1.0, %v7627_v27 }
 0x85a   :  { %7632 = vrcp.f32 %v1541_v44 }
 0x85b   :  { %7634 = vrcp.f32 %v1548_v0 }
 0x863   :  { %v7631_v57 = vpop.eup %7630 }
 0x864   :  { %v7633_v50 = vpop.eup %7632  ;;  %v1552_v63 = vmul.f32 %v7631_v57, %v7629_v55  ;;  %v6072_v57 = vld [vmem:[%s14144_s9] ss:$0 sm:$0xff] }
 0x865   :  { %v1551_v2 = vmul.f32 %v7633_v50, %v9833_v14  ;;  %v7635_v60 = vpop.eup %7634  ;;  %v1574_v14 = vcombine.low %v9928_v13, %v9920_v18 }
 0x867   :  { %v9912_v35 = vadd.f32 %v1552_v63, %v1551_v2  ;;  %v1582_v19 = vrot.slane %v1574_v14, %v1581_v3 }
 0x869   :  { %7636 = vtanh.f32 %v9912_v35  ;;  %v1590_v9 = vcombine.low %v1582_v19, %v1589_v20 }
 0x873   :  { %v7637_v58 = vpop.eup %7636 }
 0x874   :  { %v1555_v52 = vmul.f32 %v7637_v58, %v7635_v60 }
 0x876   :  { %1557 = vst [vmem:[#allocation2 + $0xe] sm:$0x3] %v1555_v52  ;;  %v9915_v15 = vpack.c.bf16 %v1555_v52, %v1555_v52 }
 0x878   :  { %6749 = vmatmul.mubr.bf16.vlgmr.msra.gmra.mrb[32].mxu1 %v9915_v15 }
 0x87d   :  { %v9939_v51 = vld [vmem:[#allocation2 + $0xe] sm:$0x3] }
 0x87e   :  { %v1592_v4 = vcombine.low %v9937_v45, %v9939_v51 }
 0x880   :  { %v1606_v8 = vrot.slane %v1592_v4, %v1581_v3 }
 0x882   :  { %v1607_v7 = vcombine.low %v1599_v10, %v1606_v8 }
 0x884   :  { %v1610_v49 = vpack.c.bf16 %v1607_v7, %v1590_v9 }
 0x886   :  { %6729 = vmatmul.mubr.bf16.vlgmr.msra.gmra.mrb[32].mxu0 %v1610_v49 }
 0x94b   :  { %v1851_v46 = vpop.f32.mrb[32].mxu1 }
 0x94c   :  { %v6750_v62 = vpop.f32.mrb[33].mxu1 }
 0x94d   :  { %v1854_v53 = vpop.f32.mrb[34].mxu1 }
 0x94e   :  { %v6751_v6 = vpop.f32.mrb[35].mxu1  ;;  %v7334_v53 = vld [vmem:[%s14145_s10 + $0x4] ss:$16 sps:$4 sm:$0xff]  }
 0x94f   :  { %v9995_v6 = vld [vmem:[%s14145_s10 + $0xc] ss:$16 sps:$4 sm:$0xff]   ;;  %2473 = vmatprep.subr.bf16.mxu0 %v7334_v53  ;;  %v7400_v53 = vld [vmem:[%s14145_s10 + $0x164] ss:$16 sps:$4 sm:$0xff]  }
 0x950   :  { %2555 = vmatprep.subr.bf16.mxu1 %v9995_v6 }
 0x959   :  { %v1716_v1 = vpop.f32.mrb[32].mxu0 }
 0x95a   :  { %v1717_v21 = vadd.f32 %v6168_v56, %v1716_v1  ;;  %v6730_v22 = vpop.f32.mrb[33].mxu0  ;;  %v10003_v1 = vld [vmem:[%s14145_s10 + $0x8] ss:$16 sps:$4 sm:$0xff]  }
 0x95b   :  { %v1719_v24 = vpop.f32.mrb[34].mxu0  ;;  %2556 = vmatpush1.bf16.msra.mxu1 %v10003_v1  ;;  %v10013_v22 = vld [vmem:[%s14145_s10 + $0x2c] ss:$16 sps:$4 sm:$0xff]  }
 0x95c   :  { %v1725_v25 = vcombine.high %v1717_v21, %v1717_v21  ;;  %v9946_v26 = vrot.slane %v1717_v21, %v1581_v3  ;;  %v1720_v28 = vadd.f32 %v6168_v56, %v1719_v24  ;;  %v6731_v29 = vpop.f32.mrb[35].mxu0  ;;  %v7338_v56 = vld [vmem:[%s14145_s10] ss:$16 sps:$4 sm:$0xff]   ;;  %v7340_v21 = vld [vmem:[%s14145_s10 + $0x24] ss:$16 sps:$4 sm:$0xff]   ;;  %2557 = vmatprep.subr.bf16.mxu1 %v10013_v22 }
 0x95d   :  { %2474 = vmatpush1.bf16.msra.mxu0 %v7338_v56  ;;  %v7344_v24 = vld [vmem:[%s14145_s10 + $0x20] ss:$16 sps:$4 sm:$0xff]   ;;  %v10031_v29 = vld [vmem:[%s14145_s10 + $0x4c] ss:$16 sps:$4 sm:$0xff]  }
 0x95e   :  { %14689 = vst [vmem:[#allocation6_spill] sm:$0xff] %v9946_v26  ;;  %v9948_v30 = vrot.slane %v1725_v25, %v1581_v3  ;;  %v9952_v31 = vcombine.high %v9946_v26, %v9946_v26  ;;  %v1742_v32 = vcombine.high %v1720_v28, %v1720_v28  ;;  %v9954_v33 = vrot.slane %v1720_v28, %v1581_v3  ;;  %v10021_v25 = vld [vmem:[%s14145_s10 + $0x28] ss:$16 sps:$4 sm:$0xff]   ;;  %v7346_v28 = vld [vmem:[%s14145_s10 + $0x44] ss:$16 sps:$4 sm:$0xff]  }
 0x95f   :  { %v1857_v34 = vadd.f32 %v1851_v46, %v9946_v26  ;;  %2475 = vmatprep.subr.bf16.mxu0 %v7340_v21  ;;  %2558 = vmatpush1.bf16.msra.mxu1 %v10021_v25  ;;  %v10192_v56 = vld [vmem:[%s14145_s10 + $0x16c] ss:$16 sps:$4 sm:$0xff]   ;;  %v7404_v21 = vld [vmem:[%s14145_s10 + $0x160] ss:$16 sps:$4 sm:$0xff]  }
 0x960   :  { %14690 = vst [vmem:[#allocation9_spill] sm:$0xff] %v9948_v30  ;;  %14691 = vst [vmem:[#allocation13_spill] sm:$0xff] %v9952_v31  ;;  %v9959_v36 = vcombine.high %v9948_v30, %v9948_v30  ;;  %v9961_v37 = vrot.slane %v1742_v32, %v1581_v3  ;;  %v9965_v38 = vcombine.high %v9954_v33, %v9954_v33  ;;  %v7350_v32 = vld [vmem:[%s14145_s10 + $0x40] ss:$16 sps:$4 sm:$0xff]   ;;  %2559 = vmatprep.subr.bf16.mxu1 %v10031_v29 }
 0x961   :  { %14692 = vst [vmem:[#allocation11_spill] sm:$0xff] %v9954_v33  ;;  %v1859_v40 = vadd.f32 %v1851_v46, %v9948_v30  ;;  %7638 = vtanh.f32 %v1857_v34  ;;  %v1858_v41 = vadd.f32 %v1851_v46, %v9952_v31  ;;  %v1861_v42 = vadd.f32 %v1851_v46, %v9954_v33  ;;  %2476 = vmatpush1.bf16.msra.mxu0 %v7344_v24  ;;  %v10039_v34 = vld [vmem:[%s14145_s10 + $0x48] ss:$16 sps:$4 sm:$0xff]  }
 0x962   :  { %14693 = vst [vmem:[#allocation10_spill] sm:$0xff] %v9959_v36  ;;  %14694 = vst [vmem:[#allocation17_spill] sm:$0xff] %v9961_v37  ;;  %v9972_v39 = vcombine.high %v9961_v37, %v9961_v37  ;;  %v1860_v43 = vadd.f32 %v1851_v46, %v9959_v36  ;;  %v1862_v44 = vadd.f32 %v1851_v46, %v9965_v38  ;;  %2477 = vmatprep.subr.bf16.mxu0 %v7346_v28  ;;  %v10201_v24 = vld [vmem:[%s14145_s10 + $0x168] ss:$16 sps:$4 sm:$0xff]   ;;  %v7406_v28 = vld [vmem:[%s14145_s10 + $0x184] ss:$16 sps:$4 sm:$0xff]  }
 0x963   :  { %14695 = vst [vmem:[#allocation16_spill] sm:$0xff] %v9965_v38  ;;  %7640 = vtanh.f32 %v1859_v40  ;;  %v1863_v27 = vadd.f32 %v1851_v46, %v9961_v37  ;;  %2560 = vmatpush1.bf16.msra.mxu1 %v10039_v34  ;;  %v7352_v40 = vld [vmem:[%s14145_s10 + $0x64] ss:$16 sps:$4 sm:$0xff]   ;;  %14699 = vst [vmem:[#allocation20_spill] sm:$0xff] %v10192_v56 }
 0x964   :  { %14696 = vst [vmem:[#allocation14_spill] sm:$0xff] %v9972_v39  ;;  %7642 = vtanh.f32 %v1858_v41  ;;  %v1864_v55 = vadd.f32 %v1851_v46, %v9972_v39  ;;  %v10049_v41 = vld [vmem:[%s14145_s10 + $0x6c] ss:$16 sps:$4 sm:$0xff]   ;;  %14700 = vst [vmem:[#allocation18_spill] sm:$0xff] %v10201_v24 }
 0x965   :  { %7644 = vtanh.f32 %v1860_v43  ;;  %2478 = vmatpush1.bf16.msra.mxu0 %v7350_v32  ;;  %v10057_v43 = vld [vmem:[%s14145_s10 + $0x68] ss:$16 sps:$4 sm:$0xff]   ;;  %2561 = vmatprep.subr.bf16.mxu1 %v10049_v41  ;;  %v10210_v32 = vld [vmem:[%s14145_s10 + $0x18c] ss:$16 sps:$4 sm:$0xff]  }
 0x966   :  { %7646 = vtanh.f32 %v1861_v42  ;;  %v7356_v42 = vld [vmem:[%s14145_s10 + $0x60] ss:$16 sps:$4 sm:$0xff]   ;;  %2479 = vmatprep.subr.bf16.mxu0 %v7352_v40  ;;  %14701 = vst [vmem:[#allocation21_spill] sm:$0xff] %v10210_v32 }
 0x967   :  { %7648 = vtanh.f32 %v1862_v44  ;;  %2562 = vmatpush1.bf16.msra.mxu1 %v10057_v43  ;;  %v7358_v44 = vld [vmem:[%s14145_s10 + $0x84] ss:$16 sps:$4 sm:$0xff]   ;;  %v7410_v40 = vld [vmem:[%s14145_s10 + $0x180] ss:$16 sps:$4 sm:$0xff]  }
 0x968   :  { %7650 = vtanh.f32 %v1863_v27  ;;  %v10067_v27 = vld [vmem:[%s14145_s10 + $0x8c] ss:$16 sps:$4 sm:$0xff]  }
 0x969   :  { %7652 = vtanh.f32 %v1864_v55  ;;  %2480 = vmatpush1.bf16.msra.mxu0 %v7356_v42  ;;  %v7362_v55 = vld [vmem:[%s14145_s10 + $0x80] ss:$16 sps:$4 sm:$0xff]   ;;  %2563 = vmatprep.subr.bf16.mxu1 %v10067_v27  ;;  %v10219_v42 = vld [vmem:[%s14145_s10 + $0x188] ss:$16 sps:$4 sm:$0xff]  }
 0x96a   :  { %2481 = vmatprep.subr.bf16.mxu0 %v7358_v44  ;;  %14702 = vst [vmem:[#allocation24_spill] sm:$0xff] %v10219_v42  ;;  %v7412_v44 = vld [vmem:[%s14145_s10 + $0x1a4] ss:$16 sps:$4 sm:$0xff]  }
 0x96b   :  { %v7639_v0 = vpop.eup %7638 }
 0x96c   :  { %v1873_v63 = vmul.f32 %v7639_v0, %v6072_v57  ;;  %v7364_v0 = vld [vmem:[%s14145_s10 + $0xa4] ss:$16 sps:$4 sm:$0xff]  }
 0x96d   :  { %v7641_v50 = vpop.eup %7640  ;;  %2482 = vmatpush1.bf16.msra.mxu0 %v7362_v55  ;;  %v10228_v55 = vld [vmem:[%s14145_s10 + $0x1ac] ss:$16 sps:$4 sm:$0xff]  }
 0x96e   :  { %v7643_v2 = vpop.eup %7642  ;;  %v1875_v60 = vmul.f32 %v7641_v50, %v6072_v57  ;;  %v1882_v52 = vsel %vm1881_vm1, %v1873_v63, 0.0  ;;  %v10085_v50 = vld [vmem:[%s14145_s10 + $0xac] ss:$16 sps:$4 sm:$0xff]   ;;  %v7368_v63 = vld [vmem:[%s14145_s10 + $0xa0] ss:$16 sps:$4 sm:$0xff]   ;;  %2483 = vmatprep.subr.bf16.mxu0 %v7364_v0  ;;  %14703 = vst [vmem:[#allocation25_spill] sm:$0xff] %v10228_v55 }
 0x96f   :  { %v7645_v58 = vpop.eup %7644  ;;  %v1874_v54 = vmul.f32 %v7643_v2, %v6072_v57  ;;  %1883 = vadd.xlane.f32.xlu0 %v1882_v52  ;;  %v10093_v2 = vld [vmem:[%s14145_s10 + $0xa8] ss:$16 sps:$4 sm:$0xff]   ;;  %v7374_v52 = vld [vmem:[%s14145_s10 + $0xc0] ss:$16 sps:$4 sm:$0xff]  }
 0x970   :  { %v7647_v59 = vpop.eup %7646  ;;  %v1888_v17 = vsel %vm1881_vm1, %v1875_v60, 0.0  ;;  %v1876_v5 = vmul.f32 %v7645_v58, %v6072_v57  ;;  %v7370_v60 = vld [vmem:[%s14145_s10 + $0xc4] ss:$16 sps:$4 sm:$0xff]   ;;  %v10103_v58 = vld [vmem:[%s14145_s10 + $0xcc] ss:$16 sps:$4 sm:$0xff]  }
 0x971   :  { %v7649_v14 = vpop.eup %7648  ;;  %1889 = vadd.xlane.f32.xlu1 %v1888_v17  ;;  %v1885_v3 = vsel %vm1881_vm1, %v1874_v54, 0.0  ;;  %v1877_v47 = vmul.f32 %v7647_v59, %v6072_v57  ;;  %2484 = vmatpush1.bf16.msra.mxu0 %v7368_v63  ;;  %v10111_v54 = vld [vmem:[%s14145_s10 + $0xc8] ss:$16 sps:$4 sm:$0xff]   ;;  %v7376_v59 = vld [vmem:[%s14145_s10 + $0xe4] ss:$16 sps:$4 sm:$0xff]  }
 0x972   :  { %v7651_v20 = vpop.eup %7650  ;;  %v1891_v4 = vsel %vm1881_vm1, %v1876_v5, 0.0  ;;  %v1878_v19 = vmul.f32 %v7649_v14, %v6072_v57  ;;  %2485 = vmatprep.subr.bf16.mxu0 %v7370_v60  ;;  %v10121_v17 = vld [vmem:[%s14145_s10 + $0xec] ss:$16 sps:$4 sm:$0xff]   ;;  %v7380_v5 = vld [vmem:[%s14145_s10 + $0xe0] ss:$16 sps:$4 sm:$0xff]  }
 0x973   :  { %1886 = vadd.xlane.f32.xlu0 %v1885_v3  ;;  %v7653_v10 = vpop.eup %7652  ;;  %v1894_v8 = vsel %vm1881_vm1, %v1877_v47, 0.0  ;;  %v1879_v9 = vmul.f32 %v7651_v20, %v6072_v57  ;;  %v10129_v14 = vld [vmem:[%s14145_s10 + $0xe8] ss:$16 sps:$4 sm:$0xff]   ;;  %v7382_v3 = vld [vmem:[%s14145_s10 + $0x104] ss:$16 sps:$4 sm:$0xff]  }
 0x974   :  { %v1897_v7 = vsel %vm1881_vm1, %v1878_v19, 0.0  ;;  %v1880_v49 = vmul.f32 %v7653_v10, %v6072_v57  ;;  %v10075_v57 = vld [vmem:[%s14145_s10 + $0x88] ss:$16 sps:$4 sm:$0xff]   ;;  %v10137_v47 = vld [vmem:[%s14145_s10 + $0x10c] ss:$16 sps:$4 sm:$0xff]  }
 0x975   :  { %1892 = vadd.xlane.f32.xlu1 %v1891_v4  ;;  %v1900_v46 = vsel %vm1881_vm1, %v1879_v9, 0.0  ;;  %2564 = vmatpush1.bf16.msra.mxu1 %v10075_v57  ;;  %v7386_v20 = vld [vmem:[%s14145_s10 + $0x100] ss:$16 sps:$4 sm:$0xff]   ;;  %v10147_v4 = vld [vmem:[%s14145_s10 + $0x108] ss:$16 sps:$4 sm:$0xff]  }
 0x976   :  { %v1903_v62 = vsel %vm1881_vm1, %v1880_v49, 0.0  ;;  %2565 = vmatprep.subr.bf16.mxu1 %v10085_v50  ;;  %2486 = vmatpush1.bf16.msra.mxu0 %v7374_v52  ;;  %v7388_v19 = vld [vmem:[%s14145_s10 + $0x124] ss:$16 sps:$4 sm:$0xff]   ;;  %v10156_v10 = vld [vmem:[%s14145_s10 + $0x12c] ss:$16 sps:$4 sm:$0xff]  }
 0x977   :  { %1895 = vadd.xlane.f32.xlu0 %v1894_v8  ;;  %2487 = vmatprep.subr.bf16.mxu0 %v7376_v59  ;;  %v7392_v8 = vld [vmem:[%s14145_s10 + $0x120] ss:$16 sps:$4 sm:$0xff]   ;;  %v10165_v9 = vld [vmem:[%s14145_s10 + $0x128] ss:$16 sps:$4 sm:$0xff]   ;;  %v10174_v49 = vld [vmem:[%s14145_s10 + $0x14c] ss:$16 sps:$4 sm:$0xff]  }
 0x978   :  { %14697 = vst [vmem:[#allocation19_spill] sm:$0xff] %v10174_v49  ;;  %v7416_v0 = vld [vmem:[%s14145_s10 + $0x1a0] ss:$16 sps:$4 sm:$0xff]   ;;  %v10237_v63 = vld [vmem:[%s14145_s10 + $0x1a8] ss:$16 sps:$4 sm:$0xff]  }
 0x979   :  { %1898 = vadd.xlane.f32.xlu1 %v1897_v7  ;;  %2566 = vmatpush1.bf16.msra.mxu1 %v10093_v2  ;;  %v7394_v7 = vld [vmem:[%s14145_s10 + $0x144] ss:$16 sps:$4 sm:$0xff]   ;;  %14704 = vst [vmem:[#allocation7_spill] sm:$0xff] %v10237_v63  ;;  %v10246_v52 = vld [vmem:[%s14145_s10 + $0x1cc] ss:$16 sps:$4 sm:$0xff]  }
 0x97a   :  { %2567 = vmatprep.subr.bf16.mxu1 %v10103_v58  ;;  %2488 = vmatpush1.bf16.msra.mxu0 %v7380_v5  ;;  %v7418_v60 = vld [vmem:[%s14145_s10 + $0x1c4] ss:$16 sps:$4 sm:$0xff]   ;;  %14705 = vst [vmem:[#allocation12_spill] sm:$0xff] %v10246_v52  ;;  %v7422_v59 = vld [vmem:[%s14145_s10 + $0x1c0] ss:$16 sps:$4 sm:$0xff]  }
 0x97b   :  { %1901 = vadd.xlane.f32.xlu0 %v1900_v46  ;;  %2489 = vmatprep.subr.bf16.mxu0 %v7382_v3  ;;  %v7398_v46 = vld [vmem:[%s14145_s10 + $0x140] ss:$16 sps:$4 sm:$0xff]   ;;  %v10255_v5 = vld [vmem:[%s14145_s10 + $0x1c8] ss:$16 sps:$4 sm:$0xff]   ;;  %v7424_v3 = vld [vmem:[%s14145_s10 + $0x1e4] ss:$16 sps:$4 sm:$0xff]  }
 0x97c   :  { %14706 = vst [vmem:[#allocation8_spill] sm:$0xff] %v10255_v5 }
 0x97d   :  { %1904 = vadd.xlane.f32.xlu1 %v1903_v62  ;;  %2568 = vmatpush1.bf16.msra.mxu1 %v10111_v54  ;;  %v10183_v62 = vld [vmem:[%s14145_s10 + $0x148] ss:$16 sps:$4 sm:$0xff]  }
 0x97e   :  { %2569 = vmatprep.subr.bf16.mxu1 %v10121_v17  ;;  %2490 = vmatpush1.bf16.msra.mxu0 %v7386_v20  ;;  %14698 = vst [vmem:[#allocation15_spill] sm:$0xff] %v10183_v62  ;;  %v10264_v20 = vld [vmem:[%s14145_s10 + $0x1ec] ss:$16 sps:$4 sm:$0xff]  }
 0x97f   :  { %2491 = vmatprep.subr.bf16.mxu0 %v7388_v19  ;;  %14707 = vst [vmem:[#allocation26_spill] sm:$0xff] %v10264_v20  ;;  %v7428_v19 = vld [vmem:[%s14145_s10 + $0x1e0] ss:$16 sps:$4 sm:$0xff]  }
 0x981   :  { %2570 = vmatpush1.bf16.msra.mxu1 %v10129_v14 }
 0x982   :  { %2571 = vmatprep.subr.bf16.mxu1 %v10137_v47  ;;  %2492 = vmatpush1.bf16.msra.mxu0 %v7392_v8  ;;  %v10273_v8 = vld [vmem:[%s14145_s10 + $0x1e8] ss:$16 sps:$4 sm:$0xff]  }
 0x983   :  { %2493 = vmatprep.subr.bf16.mxu0 %v7394_v7  ;;  %14708 = vst [vmem:[#allocation27_spill] sm:$0xff] %v10273_v8  ;;  %v7430_v7 = vld [vmem:[%s14145_s10 + $0x204] ss:$16 sps:$4 sm:$0xff]  }
 0x985   :  { %2572 = vmatpush1.bf16.msra.mxu1 %v10147_v4 }
 0x986   :  { %2573 = vmatprep.subr.bf16.mxu1 %v10156_v10  ;;  %2494 = vmatpush1.bf16.msra.mxu0 %v7398_v46  ;;  %v10282_v46 = vld [vmem:[%s14145_s10 + $0x20c] ss:$16 sps:$4 sm:$0xff]  }
 0x987   :  { %2495 = vmatprep.subr.bf16.mxu0 %v7400_v53  ;;  %14709 = vst [vmem:[#allocation28_spill] sm:$0xff] %v10282_v46 }
 0x989   :  { %2574 = vmatpush1.bf16.msra.mxu1 %v10165_v9 }
 0x98a   :  { %2575 = vmatprep.subr.bf16.mxu1 %v10174_v49  ;;  %2496 = vmatpush1.bf16.msra.mxu0 %v7404_v21 }
 0x98b   :  { %2497 = vmatprep.subr.bf16.mxu0 %v7406_v28 }
 0x98d   :  { %2576 = vmatpush1.bf16.msra.mxu1 %v10183_v62 }
 0x98e   :  { %2577 = vmatprep.subr.bf16.mxu1 %v10192_v56  ;;  %2498 = vmatpush1.bf16.msra.mxu0 %v7410_v40 }
 0x98f   :  { %2499 = vmatprep.subr.bf16.mxu0 %v7412_v44 }
 0x991   :  { %2578 = vmatpush1.bf16.msra.mxu1 %v10201_v24 }
 0x992   :  { %2579 = vmatprep.subr.bf16.mxu1 %v10210_v32  ;;  %2500 = vmatpush1.bf16.msra.mxu0 %v7416_v0 }
 0x993   :  { %2501 = vmatprep.subr.bf16.mxu0 %v7418_v60 }
 0x995   :  { %2580 = vmatpush1.bf16.msra.mxu1 %v10219_v42 }
 0x996   :  { %2581 = vmatprep.subr.bf16.mxu1 %v10228_v55  ;;  %2502 = vmatpush1.bf16.msra.mxu0 %v7422_v59 }
 0x997   :  { %2503 = vmatprep.subr.bf16.mxu0 %v7424_v3 }
 0x999   :  { %2582 = vmatpush1.bf16.msra.mxu1 %v10237_v63 }
 0x99a   :  { %2583 = vmatprep.subr.bf16.mxu1 %v10246_v52  ;;  %2504 = vmatpush1.bf16.msra.mxu0 %v7428_v19 }
 0x99b   :  { %2514 = vmatprep.subr.bf16.mxu0 %v7430_v7 }
 0x99d   :  { %2584 = vmatpush1.bf16.msra.mxu1 %v10255_v5 }
 0x99e   :  { %2585 = vmatprep.subr.bf16.mxu1 %v10264_v20 }
 0x9a1   :  { %2586 = vmatpush1.bf16.msra.mxu1 %v10273_v8 }
 0x9a2   :  { %2596 = vmatprep.subr.bf16.mxu1 %v10282_v46 }
 0x9fc   :  { %v1884_v53 = vpop.xlane.xlu0 %1883 }
 0x9fd   :  { %v1906_v7 = vsel %vm1881_vm1, %v1884_v53, -inf }
 0x9fe   :  { %v1890_v21 = vpop.xlane.xlu1 %1889 }
 0x9ff   :  { %v1908_v36 = vsel %vm1881_vm1, %v1890_v21, -inf }
 0xa00   :  { %v1887_v28 = vpop.xlane.xlu0 %1886 }
 0xa01   :  { %v1907_v59 = vsel %vm1881_vm1, %v1887_v28, -inf }
 0xa02   :  { %v1893_v40 = vpop.xlane.xlu1 %1892 }
 0xa03   :  { %v1909_v31 = vsel %vm1881_vm1, %v1893_v40, -inf }
 0xa04   :  { %v1896_v44 = vpop.xlane.xlu0 %1895 }
 0xa05   :  { %v1910_v3 = vsel %vm1881_vm1, %v1896_v44, -inf }
 0xa06   :  { %v1899_v0 = vpop.xlane.xlu1 %1898  ;;  %v1911_v33 = vmax.f32 %v1906_v7, %v1910_v3 }
 0xa07   :  { %v1912_v60 = vsel %vm1881_vm1, %v1899_v0, -inf }
 0xa08   :  { %v1902_v12 = vpop.xlane.xlu0 %1901  ;;  %v1913_v39 = vmax.f32 %v1907_v59, %v1912_v60 }
 0xa09   :  { %v1914_v19 = vsel %vm1881_vm1, %v1902_v12, -inf }
 0xa0a   :  { %v1905_v38 = vpop.xlane.xlu1 %1904  ;;  %v1915_v30 = vmax.f32 %v1908_v36, %v1914_v19  ;;  %v1918_v46 = vmax.f32 %v1911_v33, %v1913_v39 }
 0xa0b   :  { %v1916_v37 = vsel %vm1881_vm1, %v1905_v38, -inf }
 0xa0c   :  { %v1917_v26 = vmax.f32 %v1909_v31, %v1916_v37 }
 0xa0e   :  { %v1919_v8 = vmax.f32 %v1915_v30, %v1917_v26 }
 0xa10   :  { %v1920_v20 = vmax.f32 %v1918_v46, %v1919_v8 }
 0xa12   :  { %v1921_v5 = vsub.f32 %v1884_v53, %v1920_v20  ;;  %v1922_v52 = vsub.f32 %v1887_v28, %v1920_v20  ;;  %v1923_v60 = vsub.f32 %v1890_v21, %v1920_v20  ;;  %v1924_v59 = vsub.f32 %v1893_v40, %v1920_v20 }
 0xa13   :  { %v1925_v63 = vsub.f32 %v1896_v44, %v1920_v20  ;;  %v1926_v24 = vsub.f32 %v1899_v0, %v1920_v20  ;;  %v1927_v62 = vsub.f32 %v1902_v12, %v1920_v20  ;;  %v1928_v36 = vsub.f32 %v1905_v38, %v1920_v20 }
 0xa14   :  { %v1929_v55 = vmul.f32 1.442695, %v1921_v5  ;;  %v1931_v42 = vmul.f32 1.442695, %v1922_v52  ;;  %v1933_v32 = vmul.f32 1.442695, %v1923_v60 }
 0xa15   :  { %v1935_v56 = vmul.f32 1.442695, %v1924_v59  ;;  %v1937_v49 = vmul.f32 1.442695, %v1925_v63  ;;  %v1939_v31 = vmul.f32 1.442695, %v1926_v24 }
 0xa16   :  { %7654 = vpow2.f32 %v1929_v55  ;;  %v1941_v26 = vmul.f32 1.442695, %v1927_v62  ;;  %v1943_v30 = vmul.f32 1.442695, %v1928_v36 }
 0xa17   :  { %7656 = vpow2.f32 %v1931_v42 }
 0xa18   :  { %7658 = vpow2.f32 %v1933_v32 }
 0xa19   :  { %7660 = vpow2.f32 %v1935_v56 }
 0xa1a   :  { %7662 = vpow2.f32 %v1937_v49 }
 0xa1b   :  { %7664 = vpow2.f32 %v1939_v31 }
 0xa1c   :  { %7666 = vpow2.f32 %v1941_v26 }
 0xa1d   :  { %7668 = vpow2.f32 %v1943_v30 }
 0xa20   :  { %v7655_v33 = vpop.eup %7654 }
 0xa21   :  { %v7657_v37 = vpop.eup %7656  ;;  %v1945_v39 = vsel %vm1881_vm1, %v7655_v33, 0.0 }
 0xa22   :  { %v7659_v52 = vpop.eup %7658  ;;  %v1946_v55 = vsel %vm1881_vm1, %v7657_v37, 0.0 }
 0xa23   :  { %v7661_v12 = vpop.eup %7660  ;;  %v1947_v42 = vadd.f32 %v1946_v55, %v1945_v39  ;;  %v1948_v32 = vsel %vm1881_vm1, %v7659_v52, 0.0 }
 0xa24   :  { %v7663_v38 = vpop.eup %7662  ;;  %v1950_v49 = vsel %vm1881_vm1, %v7661_v12, 0.0 }
 0xa25   :  { %v1949_v56 = vadd.f32 %v1948_v32, %v1947_v42  ;;  %v7665_v62 = vpop.eup %7664  ;;  %v1952_v63 = vsel %vm1881_vm1, %v7663_v38, 0.0 }
 0xa26   :  { %v7667_v5 = vpop.eup %7666  ;;  %v1954_v8 = vsel %vm1881_vm1, %v7665_v62, 0.0 }
 0xa27   :  { %v1951_v24 = vadd.f32 %v1950_v49, %v1949_v56  ;;  %v7669_v46 = vpop.eup %7668  ;;  %v1956_v21 = vsel %vm1881_vm1, %v7667_v5, 0.0 }
 0xa28   :  { %v1958_v40 = vsel %vm1881_vm1, %v7669_v46, 0.0 }
 0xa29   :  { %v1953_v20 = vadd.f32 %v1952_v63, %v1951_v24 }
 0xa2b   :  { %v1955_v53 = vadd.f32 %v1954_v8, %v1953_v20 }
 0xa2d   :  { %v1957_v28 = vadd.f32 %v1956_v21, %v1955_v53  ;;  %v10338_v53 = vld [vmem:[%s14145_s10 + $0x224] ss:$16 sps:$4 sm:$0xff]   ;;  %v10343_v21 = vld [vmem:[%s14145_s10 + $0x22c] ss:$16 sps:$4 sm:$0xff]  }
 0xa2f   :  { %v1959_v44 = vadd.f32 %v1958_v40, %v1957_v28  ;;  %v10354_v28 = vld [vmem:[%s14145_s10 + $0x220] ss:$16 sps:$4 sm:$0xff]   ;;  %v10359_v40 = vld [vmem:[%s14145_s10 + $0x228] ss:$16 sps:$4 sm:$0xff]  }
 0xa31   :  { %7670 = vrcp.f32 %v1959_v44  ;;  %v10366_v44 = vld [vmem:[%s14145_s10 + $0x244] ss:$16 sps:$4 sm:$0xff]  }
 0xa3b   :  { %v7671_v0 = vpop.eup %7670 }
 0xa3c   :  { %v1961_v3 = vmul.f32 %v7671_v0, %v7655_v33  ;;  %v1962_v19 = vmul.f32 %v7671_v0, %v7657_v37  ;;  %v1963_v7 = vmul.f32 %v7671_v0, %v7659_v52  ;;  %v1964_v60 = vmul.f32 %v7671_v0, %v7661_v12 }
 0xa3d   :  { %v1965_v59 = vmul.f32 %v7671_v0, %v7663_v38  ;;  %v1966_v30 = vmul.f32 %v7671_v0, %v7665_v62  ;;  %v1967_v56 = vmul.f32 %v7671_v0, %v7667_v5  ;;  %v1968_v12 = vmul.f32 %v7671_v0, %v7669_v46  ;;  %v10333_v46 = vld [vmem:[%s14145_s10 + $0x208] ss:$16 sps:$4 sm:$0xff]   ;;  %v10371_v0 = vld [vmem:[%s14145_s10 + $0x24c] ss:$16 sps:$4 sm:$0xff]  }
 0xa3e   :  { %v1969_v36 = vmul.f32 %v1961_v3, %v9928_v13  ;;  %v1970_v31 = vmul.f32 %v1962_v19, %v9920_v18  ;;  %v1971_v26 = vmul.f32 %v1963_v7, %v9922_v11  ;;  %v1972_v39 = vmul.f32 %v1964_v60, %v9917_v16  ;;  %v10380_v19 = vld [vmem:[%s14145_s10 + $0x240] ss:$16 sps:$4 sm:$0xff]   ;;  %v10385_v7 = vld [vmem:[%s14145_s10 + $0x248] ss:$16 sps:$4 sm:$0xff]   ;;  %v10392_v60 = vld [vmem:[%s14145_s10 + $0x264] ss:$16 sps:$4 sm:$0xff]  }
 0xa3f   :  { %v1973_v33 = vmul.f32 %v1965_v59, %v9930_v48  ;;  %v1974_v13 = vmul.f32 %v1966_v30, %v9924_v23  ;;  %v1975_v38 = vmul.f32 %v1967_v56, %v9937_v45  ;;  %v1976_v62 = vmul.f32 %v1968_v12, %v9939_v51  ;;  %v10323_v45 = vld [vmem:[%s14137_s2] sm:$0x1]  ;;  %v10397_v59 = vld [vmem:[%s14145_s10 + $0x26c] ss:$16 sps:$4 sm:$0xff]  }
 0xa40   :  { %v1977_v55 = vsel %vm1881_vm1, %v1969_v36, 0.0  ;;  %v1978_v42 = vsel %vm1881_vm1, %v1970_v31, 0.0  ;;  %v1980_v37 = vsel %vm1881_vm1, %v1971_v26, 0.0  ;;  %v1982_v18 = vsel %vm1881_vm1, %v1972_v39, 0.0  ;;  %v10328_v51 = vld [vmem:[%s14145_s10 + $0x200] ss:$16 sps:$4 sm:$0xff]  }
 0xa41   :  { %v1979_v32 = vadd.f32 %v1978_v42, %v1977_v55  ;;  %v1984_v16 = vsel %vm1881_vm1, %v1973_v33, 0.0  ;;  %v1986_v24 = vsel %vm1881_vm1, %v1974_v13, 0.0  ;;  %v1988_v48 = vsel %vm1881_vm1, %v1975_v38, 0.0  ;;  %v10404_v36 = vld [vmem:[%s14145_s10 + $0x260] ss:$16 sps:$4 sm:$0xff]  }
 0xa42   :  { %v1990_v20 = vsel %vm1881_vm1, %v1976_v62, 0.0  ;;  %v14710_v3 = vmov 0   ;;  %v10409_v31 = vld [vmem:[%s14145_s10 + $0x268] ss:$16 sps:$4 sm:$0xff]   ;;  %v10416_v26 = vld [vmem:[%s14145_s10 + $0x284] ss:$16 sps:$4 sm:$0xff]  }
 0xa43   :  { %v1981_v52 = vadd.f32 %v1980_v37, %v1979_v32  ;;  %v10421_v30 = vld [vmem:[%s14145_s10 + $0x28c] ss:$16 sps:$4 sm:$0xff]   ;;  %v10428_v39 = vld [vmem:[%s14145_s10 + $0x280] ss:$16 sps:$4 sm:$0xff]   ;;  %v10433_v55 = vld [vmem:[%s14145_s10 + $0x288] ss:$16 sps:$4 sm:$0xff]  }
 0xa44   :  { %v10440_v42 = vld [vmem:[%s14145_s10 + $0x2a4] ss:$16 sps:$4 sm:$0xff]   ;;  %v10445_v32 = vld [vmem:[%s14145_s10 + $0x2ac] ss:$16 sps:$4 sm:$0xff]   ;;  %v10452_v56 = vld [vmem:[%s14145_s10 + $0x2a0] ss:$16 sps:$4 sm:$0xff]  }
 0xa45   :  { %v1983_v11 = vadd.f32 %v1982_v18, %v1981_v52  ;;  %v10457_v33 = vld [vmem:[%s14145_s10 + $0x2a8] ss:$16 sps:$4 sm:$0xff]   ;;  %v10464_v37 = vld [vmem:[%s14145_s10 + $0x2c4] ss:$16 sps:$4 sm:$0xff]   ;;  %v10469_v52 = vld [vmem:[%s14145_s10 + $0x2cc] ss:$16 sps:$4 sm:$0xff]  }
 0xa46   :  { %14711 = vst [vmem:[#allocation29_spill] sm:$0xff] %v10464_v37  ;;  %14712 = vst [vmem:[#allocation23_spill] sm:$0xff] %v10469_v52  ;;  %v10476_v12 = vld [vmem:[%s14145_s10 + $0x2c0] ss:$16 sps:$4 sm:$0xff]   ;;  %v10481_v13 = vld [vmem:[%s14145_s10 + $0x2c8] ss:$16 sps:$4 sm:$0xff]  }
 0xa47   :  { %v1985_v49 = vadd.f32 %v1984_v16, %v1983_v11  ;;  %14713 = vst [vmem:[#allocation22_spill] sm:$0xff] %v10476_v12  ;;  %14714 = vst [vmem:[#allocation30_spill] sm:$0xff] %v10481_v13  ;;  %v10488_v18 = vld [vmem:[%s14145_s10 + $0x2e4] ss:$16 sps:$4 sm:$0xff]   ;;  %v10493_v11 = vld [vmem:[%s14145_s10 + $0x2ec] ss:$16 sps:$4 sm:$0xff]  }
 0xa48   :  { %14715 = vst [vmem:[#allocation31_spill] sm:$0xff] %v10488_v18  ;;  %14716 = vst [vmem:[#allocation32_spill] sm:$0xff] %v10493_v11  ;;  %v10500_v38 = vld [vmem:[%s14145_s10 + $0x2e0] ss:$16 sps:$4 sm:$0xff]   ;;  %v10505_v16 = vld [vmem:[%s14145_s10 + $0x2e8] ss:$16 sps:$4 sm:$0xff]  }
 0xa49   :  { %v1987_v63 = vadd.f32 %v1986_v24, %v1985_v49  ;;  %14717 = vst [vmem:[#allocation33_spill] sm:$0xff] %v10500_v38  ;;  %14718 = vst [vmem:[#allocation34_spill] sm:$0xff] %v10505_v16  ;;  %v10514_v49 = vld [vmem:[%s14147_s12 + $0x80] sm:$0xff]   ;;  %v14720_v62 = vmov 0.0   ;;  %v10524_v24 = vld [vmem:[%s14147_s12 + $0x88] sm:$0xff]  }
 0xa4a   :  { %14719 = vst [vmem:[#allocation35_spill] sm:$0xff] %v10514_v49  ;;  %14721 = vst [vmem:[#allocation36_spill] sm:$0xff] %v10524_v24 }
 0xa4b   :  { %v1989_v5 = vadd.f32 %v1988_v48, %v1987_v63  ;;  %v10540_v63 = vld [vmem:[%s14147_s12 + $0x98] sm:$0xff]   ;;  %v10548_v48 = vld [vmem:[%s14147_s12 + $0xa0] sm:$0xff]  }
 0xa4c   :  { %14723 = vst [vmem:[#allocation38_spill] sm:$0xff] %v10540_v63  ;;  %14724 = vst [vmem:[#allocation39_spill] sm:$0xff] %v10548_v48 }
 0xa4d   :  { %v1991_v8 = vadd.f32 %v1990_v20, %v1989_v5  ;;  %v10555_v5 = vld [vmem:[%s14147_s12 + $0xa8] sm:$0xff]   ;;  %v10562_v20 = vld [vmem:[%s14147_s12 + $0xb0] sm:$0xff]  }
 0xa4e   :  { %14725 = vst [vmem:[#allocation40_spill] sm:$0xff] %v10555_v5  ;;  %14726 = vst [vmem:[#allocation41_spill] sm:$0xff] %v10562_v20 }
 0xa4f   :  { %v10318_v23 = vpack.c.bf16 %v1991_v8, %v1991_v8  ;;  %v10569_v8 = vld [vmem:[%s14147_s12 + $0xb8] sm:$0xff]  }
 0xa50   :  { %14727 = vst [vmem:[#allocation42_spill] sm:$0xff] %v10569_v8 }
 0xa51   :  { %2505 = vmatprep.mubr.bf16.mxu0 %v10318_v23  ;;  %2587 = vmatprep.mubr.bf16.mxu1 %v10318_v23 }
 0xa52   :  { %2506 = vmatmul.mubr.bf16.vlgmr.msra.gmra.mrb[36].mxu0 %v10323_v45  ;;  %2588 = vmatmul.mubr.bf16.vlgmr.msra.gmra.mrb[36].mxu1 %v10323_v45 }
 0xa53   :  { %2515 = vmatpush1.bf16.msra.mxu0 %v10328_v51  ;;  %2597 = vmatpush1.bf16.msra.mxu1 %v10333_v46 }
 0xa54   :  { %2516 = vmatprep.subr.bf16.mxu0 %v10338_v53  ;;  %2598 = vmatprep.subr.bf16.mxu1 %v10343_v21 }
 0xa55   :  { %2546 = vmatprep.mubr.bf16.mxu0 %v14710_v3  ;;  %2628 = vmatprep.mubr.bf16.mxu1 %v14710_v3 }
 0xa57   :  { %2517 = vmatpush1.bf16.msra.mxu0 %v10354_v28  ;;  %2599 = vmatpush1.bf16.msra.mxu1 %v10359_v40 }
 0xa58   :  { %2518 = vmatprep.subr.bf16.mxu0 %v10366_v44  ;;  %2600 = vmatprep.subr.bf16.mxu1 %v10371_v0 }
 0xa5b   :  { %2519 = vmatpush1.bf16.msra.mxu0 %v10380_v19  ;;  %2601 = vmatpush1.bf16.msra.mxu1 %v10385_v7 }
 0xa5c   :  { %2520 = vmatprep.subr.bf16.mxu0 %v10392_v60  ;;  %2602 = vmatprep.subr.bf16.mxu1 %v10397_v59 }
 0xa5f   :  { %2521 = vmatpush1.bf16.msra.mxu0 %v10404_v36  ;;  %2603 = vmatpush1.bf16.msra.mxu1 %v10409_v31 }
 0xa60   :  { %2522 = vmatprep.subr.bf16.mxu0 %v10416_v26  ;;  %2604 = vmatprep.subr.bf16.mxu1 %v10421_v30 }
 0xa63   :  { %2523 = vmatpush1.bf16.msra.mxu0 %v10428_v39  ;;  %2605 = vmatpush1.bf16.msra.mxu1 %v10433_v55 }
 0xa64   :  { %2524 = vmatprep.subr.bf16.mxu0 %v10440_v42  ;;  %2606 = vmatprep.subr.bf16.mxu1 %v10445_v32 }
 0xa67   :  { %2525 = vmatpush1.bf16.msra.mxu0 %v10452_v56  ;;  %2607 = vmatpush1.bf16.msra.mxu1 %v10457_v33 }
 0xa68   :  { %2526 = vmatprep.subr.bf16.mxu0 %v10464_v37  ;;  %2608 = vmatprep.subr.bf16.mxu1 %v10469_v52 }
 0xa6b   :  { %2527 = vmatpush1.bf16.msra.mxu0 %v10476_v12  ;;  %2609 = vmatpush1.bf16.msra.mxu1 %v10481_v13 }
 0xa6c   :  { %2528 = vmatprep.subr.bf16.mxu0 %v10488_v18  ;;  %2610 = vmatprep.subr.bf16.mxu1 %v10493_v11 }
 0xa6f   :  { %2529 = vmatpush1.bf16.msra.mxu0 %v10500_v38  ;;  %2611 = vmatpush1.bf16.msra.mxu1 %v10505_v16 }
 0xa70   :  { %6752 = vmatprep.subr.bf16.mxu1 %v14720_v62 }
 0xa72   :  { %2547 = vmatmul.mubr.bf16.vlgmr.msra.gmra.mrb[36].mxu0 %v9915_v15  ;;  %2629 = vmatmul.mubr.bf16.vlgmr.msra.gmra.mrb[36].mxu1 %v9915_v15  ;;  %v10533_v15 = vld [vmem:[%s14147_s12 + $0x90] sm:$0xff]  }
 0xa73   :  { %2838 = vmatprep.mubr.bf16.mxu0 %v10318_v23  ;;  %6753 = vmatpush3.bf16.msra.mxu1 %v10514_v49  ;;  %14722 = vst [vmem:[#allocation37_spill] sm:$0xff] %v10533_v15  ;;  %v10575_v23 = vld [vmem:[%s14147_s12 + $0x40] sm:$0xff]  }
 0xa74   :  { %6754 = vmatprep.subr.bf16.mxu1 %v14720_v62  ;;  %6768 = vmatprep.mubr.msk.bf16.mxu1 %vm8499_vm0, %v14720_v62  ;;  %14728 = vst [vmem:[#allocation43_spill] sm:$0xff] %v10575_v23 }
 0xa75   :  { %6387 = vmatprep.subr.bf16.mxu0 %v10575_v23 }
 0xa77   :  { %6755 = vmatpush3.bf16.msra.mxu1 %v10524_v24 }
 0xa78   :  { %6756 = vmatprep.subr.bf16.mxu1 %v14720_v62 }
 0xa7b   :  { %6757 = vmatpush3.bf16.msra.mxu1 %v10533_v15  ;;  %v10635_v15 = vld [vmem:[%s14147_s12 + $0x58] sm:$0xff]  }
 0xa7c   :  { %6758 = vmatprep.subr.bf16.mxu1 %v14720_v62  ;;  %14737 = vst [vmem:[#allocation52_spill] sm:$0xff] %v10635_v15 }
 0xa7f   :  { %6759 = vmatpush3.bf16.msra.mxu1 %v10540_v63  ;;  %v10622_v63 = vld [vmem:[%s14147_s12 + $0x10] sm:$0xff]  }
 0xa80   :  { %6760 = vmatprep.subr.bf16.mxu1 %v14720_v62  ;;  %14735 = vst [vmem:[#allocation50_spill] sm:$0xff] %v10622_v63 }
 0xa83   :  { %6761 = vmatpush3.bf16.msra.mxu1 %v10548_v48  ;;  %v10616_v48 = vld [vmem:[%s14147_s12 + $0x50] sm:$0xff]  }
 0xa84   :  { %6762 = vmatprep.subr.bf16.mxu1 %v14720_v62  ;;  %14734 = vst [vmem:[#allocation49_spill] sm:$0xff] %v10616_v48 }
 0xa87   :  { %6763 = vmatpush3.bf16.msra.mxu1 %v10555_v5  ;;  %v10595_v5 = vld [vmem:[%s14147_s12 + $0x48] sm:$0xff]  }
 0xa88   :  { %6764 = vmatprep.subr.bf16.mxu1 %v14720_v62  ;;  %14731 = vst [vmem:[#allocation46_spill] sm:$0xff] %v10595_v5 }
 0xa8b   :  { %6765 = vmatpush3.bf16.msra.mxu1 %v10562_v20  ;;  %v10581_v20 = vld [vmem:[%s14147_s12] sm:$0xff]  }
 0xa8c   :  { %6766 = vmatprep.subr.bf16.mxu1 %v14720_v62  ;;  %14729 = vst [vmem:[#allocation44_spill] sm:$0xff] %v10581_v20  ;;  %6388 = vmatpush3.bf16.msra.mxu0 %v10581_v20 }
 0xa8d   :  { %6389 = vmatprep.subr.bf16.mxu0 %v10595_v5 }
 0xa8f   :  { %6767 = vmatpush3.bf16.msra.mxu1 %v10569_v8  ;;  %v10589_v8 = vld [vmem:[%s14142_s7] sm:$0xff]  }
 0xa90   :  { %6792 = vmatprep.subr.bf16.mxu1 %v14720_v62  ;;  %14730 = vst [vmem:[#allocation45_spill] sm:$0xff] %v10589_v8 }
 0xa92   :  { %6769 = vmatmul.mubr.bf16.vlgmr.msra.gmra.mrb[40].mxu1 %v10323_v45  ;;  %v10603_v45 = vld [vmem:[%s14147_s12 + $0x8] sm:$0xff]  }
 0xa93   :  { %6793 = vmatpush3.bf16.msra.mxu1 %v10589_v8  ;;  %6808 = vmatprep.mubr.msk.bf16.mxu1 %vm8499_vm0, %v14720_v62  ;;  %14732 = vst [vmem:[#allocation47_spill] sm:$0xff] %v10603_v45  ;;  %v10610_v8 = vld [vmem:[%s14142_s7 + $0x8] sm:$0xff]  }
 0xa94   :  { %6794 = vmatprep.subr.bf16.mxu1 %v14720_v62  ;;  %6390 = vmatpush3.bf16.msra.mxu0 %v10603_v45  ;;  %14733 = vst [vmem:[#allocation48_spill] sm:$0xff] %v10610_v8  ;;  %v10659_v45 = vld [vmem:[%s14147_s12 + $0x20] sm:$0xff]  }
 0xa95   :  { %6391 = vmatprep.subr.bf16.mxu0 %v10616_v48  ;;  %v10641_v48 = vld [vmem:[%s14147_s12 + $0x18] sm:$0xff]   ;;  %14741 = vst [vmem:[#allocation56_spill] sm:$0xff] %v10659_v45 }
 0xa96   :  { %14738 = vst [vmem:[#allocation53_spill] sm:$0xff] %v10641_v48 }
 0xa97   :  { %6795 = vmatpush3.bf16.msra.mxu1 %v10610_v8  ;;  %v10629_v8 = vld [vmem:[%s14142_s7 + $0x10] sm:$0xff]  }
 0xa98   :  { %6796 = vmatprep.subr.bf16.mxu1 %v14720_v62  ;;  %6392 = vmatpush3.bf16.msra.mxu0 %v10622_v63  ;;  %14736 = vst [vmem:[#allocation51_spill] sm:$0xff] %v10629_v8  ;;  %v10646_v63 = vld [vmem:[%s14147_s12 + $0x60] sm:$0xff]  }
 0xa99   :  { %14739 = vst [vmem:[#allocation54_spill] sm:$0xff] %v10646_v63  ;;  %6393 = vmatprep.subr.bf16.mxu0 %v10635_v15 }
 0xa9b   :  { %6797 = vmatpush3.bf16.msra.mxu1 %v10629_v8  ;;  %v10653_v8 = vld [vmem:[%s14142_s7 + $0x18] sm:$0xff]  }
 0xa9c   :  { %6798 = vmatprep.subr.bf16.mxu1 %v14720_v62  ;;  %6394 = vmatpush3.bf16.msra.mxu0 %v10641_v48  ;;  %14740 = vst [vmem:[#allocation55_spill] sm:$0xff] %v10653_v8  ;;  %v10666_v48 = vld [vmem:[%s14147_s12 + $0x68] sm:$0xff]  }
 0xa9d   :  { %6395 = vmatprep.subr.bf16.mxu0 %v10646_v63  ;;  %14742 = vst [vmem:[#allocation57_spill] sm:$0xff] %v10666_v48  ;;  %v10678_v63 = vld [vmem:[%s14147_s12 + $0x28] sm:$0xff]  }
 0xa9e   :  { %14744 = vst [vmem:[#allocation59_spill] sm:$0xff] %v10678_v63 }
 0xa9f   :  { %6799 = vmatpush3.bf16.msra.mxu1 %v10653_v8  ;;  %v10672_v8 = vld [vmem:[%s14142_s7 + $0x20] sm:$0xff]  }
 0xaa0   :  { %6800 = vmatprep.subr.bf16.mxu1 %v14720_v62  ;;  %6396 = vmatpush3.bf16.msra.mxu0 %v10659_v45  ;;  %14743 = vst [vmem:[#allocation58_spill] sm:$0xff] %v10672_v8  ;;  %v10685_v45 = vld [vmem:[%s14147_s12 + $0x70] sm:$0xff]  }
 0xaa1   :  { %6397 = vmatprep.subr.bf16.mxu0 %v10666_v48  ;;  %14745 = vst [vmem:[#allocation60_spill] sm:$0xff] %v10685_v45  ;;  %v10697_v48 = vld [vmem:[%s14147_s12 + $0x30] sm:$0xff]  }
 0xaa2   :  { %14747 = vst [vmem:[#allocation62_spill] sm:$0xff] %v10697_v48 }
 0xaa3   :  { %6801 = vmatpush3.bf16.msra.mxu1 %v10672_v8  ;;  %v10691_v8 = vld [vmem:[%s14142_s7 + $0x28] sm:$0xff]  }
 0xaa4   :  { %6802 = vmatprep.subr.bf16.mxu1 %v14720_v62  ;;  %6398 = vmatpush3.bf16.msra.mxu0 %v10678_v63  ;;  %14746 = vst [vmem:[#allocation61_spill] sm:$0xff] %v10691_v8  ;;  %v10704_v63 = vld [vmem:[%s14147_s12 + $0x78] sm:$0xff]  }
 0xaa5   :  { %6399 = vmatprep.subr.bf16.mxu0 %v10685_v45  ;;  %14748 = vst [vmem:[#allocation63_spill] sm:$0xff] %v10704_v63  ;;  %v10716_v45 = vld [vmem:[%s14147_s12 + $0x38] sm:$0xff]  }
 0xaa6   :  { %14750 = vst [vmem:[#allocation65_spill] sm:$0xff] %v10716_v45 }
 0xaa7   :  { %6803 = vmatpush3.bf16.msra.mxu1 %v10691_v8  ;;  %v10710_v8 = vld [vmem:[%s14142_s7 + $0x30] sm:$0xff]  }
 0xaa8   :  { %6804 = vmatprep.subr.bf16.mxu1 %v14720_v62  ;;  %6400 = vmatpush3.bf16.msra.mxu0 %v10697_v48  ;;  %14749 = vst [vmem:[#allocation64_spill] sm:$0xff] %v10710_v8  ;;  %v10724_v48 = vld [vmem:[%s14142_s7 + $0x38] sm:$0xff]  }
 0xaa9   :  { %6401 = vmatprep.subr.bf16.mxu0 %v10704_v63  ;;  %14751 = vst [vmem:[#allocation66_spill] sm:$0xff] %v10724_v48  ;;  %v14752_v63 = vsub.s32 0, %v14688_v61 }
 0xaab   :  { %6805 = vmatpush3.bf16.msra.mxu1 %v10710_v8  ;;  %v315_v8 = vld [vmem:[%s14146_s11] sm:$0xf]  ;;  %s3526_s11 = scalar_select %p3523_p6, 1, 0 }
 0xaac   :  { %6806 = vmatprep.subr.bf16.mxu1 %v14720_v62  ;;  %6402 = vmatpush3.bf16.msra.mxu0 %v10716_v45  ;;  %v10734_v15 = vrot.slane %v315_v8, %v14752_v63  ;;  %v14754_v45 = vsub.s32 1, %v14688_v61  ;;  %v14755_v63 = vsub.s32 3, %v14688_v61 }
 0xaad   :  { %6772 = vmatprep.subr.bf16.mxu0 %v14720_v62 }
 0xaae   :  { %14753 = vst [vmem:[#allocation67_spill] sm:$0xff] %v10734_v15  ;;  %v10738_v24 = vrot.slane %v315_v8, %v14754_v45  ;;  %v10744_v52 = vrot.slane %v315_v8, %v14755_v63 }
 0xaaf   :  { %6807 = vmatpush3.bf16.msra.mxu1 %v10724_v48 }
 0xab0   :  { %3268 = vmatprep.subr.bf16.mxu1 %v9995_v6 }
 0xb45   :  { %v2548_v5 = vpop.f32.mrb[36].mxu0  ;;  %v2630_v20 = vpop.f32.mrb[36].mxu1 }
 0xb46   :  { %v7132_v48 = vadd.f32 %v2548_v5, %v10734_v15  ;;  %v2550_v49 = vpop.f32.mrb[37].mxu0  ;;  %v2632_v23 = vpop.f32.mrb[37].mxu1  ;;  %v14756_v5 = vsub.s32 2, %v14688_v61 }
 0xb47   :  { %v7133_v6 = vadd.f32 %v2550_v49, %v10738_v24  ;;  %v2552_v16 = vpop.f32.mrb[38].mxu0  ;;  %v2634_v38 = vpop.f32.mrb[38].mxu1  ;;  %v7135_v45 = vadd.f32 %v2632_v23, %v10744_v52 }
 0xb48   :  { %v6281_v11 = vmul.f32 -1.442695, %v7132_v48  ;;  %v2553_v18 = vpop.f32.mrb[39].mxu0  ;;  %v2635_v13 = vpop.f32.mrb[39].mxu1  ;;  %v10749_v15 = vrot.slane %v315_v8, %v14756_v5 }
 0xb49   :  { %v6282_v12 = vmul.f32 -1.442695, %v7133_v6  ;;  %v6283_v37 = vmul.f32 -1.442695, %v7135_v45 }
 0xb4a   :  { %7672 = vpow2.f32 %v6281_v11  ;;  %v7134_v16 = vadd.f32 %v2630_v20, %v10749_v15 }
 0xb4b   :  { %7674 = vpow2.f32 %v6282_v12 }
 0xb4c   :  { %7676 = vpow2.f32 %v6283_v37 }
 0xb4d   :  { %7678 = vtanh.f32 %v7134_v16 }
 0xb54   :  { %v7673_v38 = vpop.eup %7672 }
 0xb55   :  { %v7675_v49 = vpop.eup %7674  ;;  %v2640_v18 = vadd.f32 1.0, %v7673_v38 }
 0xb56   :  { %v2646_v13 = vadd.f32 1.0, %v7675_v49  ;;  %v7677_v48 = vpop.eup %7676 }
 0xb57   :  { %7680 = vrcp.f32 %v2640_v18  ;;  %v7679_v11 = vpop.eup %7678  ;;  %v2653_v63 = vadd.f32 1.0, %v7677_v48 }
 0xb58   :  { %7682 = vrcp.f32 %v2646_v13 }
 0xb59   :  { %7684 = vrcp.f32 %v2653_v63  ;;  %v14770_v63 = vld [vmem:[#allocation6_spill] sm:$0xff] }
 0xb61   :  { %v7681_v12 = vpop.eup %7680 }
 0xb62   :  { %v7683_v6 = vpop.eup %7682  ;;  %v2657_v23 = vmul.f32 %v7681_v12, %v7679_v11 }
 0xb63   :  { %v2656_v61 = vmul.f32 %v7683_v6, %v9912_v35  ;;  %v7685_v20 = vpop.eup %7684  ;;  %v14757_v35 = vld [vmem:[#allocation19_spill] sm:$0xff] }
 0xb65   :  { %v10753_v8 = vadd.f32 %v2657_v23, %v2656_v61 }
 0xb67   :  { %7686 = vtanh.f32 %v10753_v8 }
 0xb71   :  { %v7687_v45 = vpop.eup %7686 }
 0xb72   :  { %v2660_v37 = vmul.f32 %v7687_v45, %v7685_v20  ;;  %v14771_v20 = vld [vmem:[#allocation9_spill] sm:$0xff] }
 0xb74   :  { %v10756_v5 = vpack.c.bf16 %v2660_v37, %v2660_v37  ;;  %v14772_v37 = vlaneseq }
 0xb76   :  { %2839 = vmatmul.mubr.bf16.vlgmr.msra.gmra.mrb[40].mxu0 %v10756_v5  ;;  %6809 = vmatmul.mubr.bf16.vlgmr.msra.gmra.mrb[44].mxu1 %v10756_v5 }
 0xb77   :  { %6788 = vmatprep.mubr.msk.bf16.mxu0 %vm8499_vm0, %v14720_v62  ;;  %3269 = vmatpush1.bf16.msra.mxu1 %v10003_v1  ;;  %v14758_v1 = vld [vmem:[#allocation15_spill] sm:$0xff] }
 0xb78   :  { %3270 = vmatprep.subr.bf16.mxu1 %v10013_v22  ;;  %v14759_v22 = vld [vmem:[#allocation20_spill] sm:$0xff] }
 0xb7b   :  { %3271 = vmatpush1.bf16.msra.mxu1 %v10021_v25  ;;  %v14760_v25 = vld [vmem:[#allocation18_spill] sm:$0xff] }
 0xb7c   :  { %3272 = vmatprep.subr.bf16.mxu1 %v10031_v29  ;;  %v14761_v29 = vld [vmem:[#allocation21_spill] sm:$0xff] }
 0xb7f   :  { %3273 = vmatpush1.bf16.msra.mxu1 %v10039_v34  ;;  %v14762_v34 = vld [vmem:[#allocation24_spill] sm:$0xff] }
 0xb80   :  { %3274 = vmatprep.subr.bf16.mxu1 %v10049_v41  ;;  %v14763_v41 = vld [vmem:[#allocation25_spill] sm:$0xff] }
 0xb83   :  { %3275 = vmatpush1.bf16.msra.mxu1 %v10057_v43  ;;  %v14764_v43 = vld [vmem:[#allocation7_spill] sm:$0xff] }
 0xb84   :  { %3276 = vmatprep.subr.bf16.mxu1 %v10067_v27  ;;  %v14765_v27 = vld [vmem:[#allocation12_spill] sm:$0xff] }
 0xb87   :  { %3277 = vmatpush1.bf16.msra.mxu1 %v10075_v57  ;;  %v2880_v57 = vpop.f32.mrb[40].mxu1 }
 0xb88   :  { %3278 = vmatprep.subr.bf16.mxu1 %v10085_v50  ;;  %v6770_v50 = vpop.f32.mrb[41].mxu1 }
 0xb8b   :  { %3279 = vmatpush1.bf16.msra.mxu1 %v10093_v2  ;;  %v14766_v2 = vld [vmem:[#allocation8_spill] sm:$0xff] }
 0xb8c   :  { %3280 = vmatprep.subr.bf16.mxu1 %v10103_v58  ;;  %v2883_v58 = vpop.f32.mrb[42].mxu1 }
 0xb8f   :  { %3281 = vmatpush1.bf16.msra.mxu1 %v10111_v54  ;;  %v14767_v54 = vld [vmem:[#allocation26_spill] sm:$0xff] }
 0xb90   :  { %3282 = vmatprep.subr.bf16.mxu1 %v10121_v17  ;;  %v6771_v17 = vpop.f32.mrb[43].mxu1 }
 0xb93   :  { %3283 = vmatpush1.bf16.msra.mxu1 %v10129_v14  ;;  %v14768_v14 = vld [vmem:[#allocation27_spill] sm:$0xff] }
 0xb94   :  { %3284 = vmatprep.subr.bf16.mxu1 %v10137_v47  ;;  %v14769_v47 = vld [vmem:[#allocation28_spill] sm:$0xff] }
 0xb97   :  { %3285 = vmatpush1.bf16.msra.mxu1 %v10147_v4 }
 0xb98   :  { %3286 = vmatprep.subr.bf16.mxu1 %v10156_v10 }
 0xb9b   :  { %3287 = vmatpush1.bf16.msra.mxu1 %v10165_v9  ;;  %v10799_v9 = vld [vmem:[%s14148_s13] ss:$0 sm:$0xff] }
 0xb9c   :  { %3288 = vmatprep.subr.bf16.mxu1 %v14757_v35  ;;  %v10811_v35 = vand.u32 127, %v14772_v37  ;;  %v14777_v37 = vld [vmem:[#allocation13_spill] sm:$0xff] }
 0xb9e   :  { %14773 = vst [vmem:[#allocation19_spill] sm:$0xff] %v10811_v35 }
 0xb9f   :  { %3289 = vmatpush1.bf16.msra.mxu1 %v14758_v1  ;;  %v14774_v1 = vld [vmem:[#allocation11_spill] sm:$0xff] }
 0xba0   :  { %3290 = vmatprep.subr.bf16.mxu1 %v14759_v22 }
 0xba3   :  { %3291 = vmatpush1.bf16.msra.mxu1 %v14760_v25 }
 0xba4   :  { %3292 = vmatprep.subr.bf16.mxu1 %v14761_v29 }
 0xba7   :  { %3293 = vmatpush1.bf16.msra.mxu1 %v14762_v34  ;;  %v14775_v34 = vld [vmem:[#allocation17_spill] sm:$0xff] }
 0xba8   :  { %3294 = vmatprep.subr.bf16.mxu1 %v14763_v41 }
 0xbab   :  { %3295 = vmatpush1.bf16.msra.mxu1 %v14764_v43 }
 0xbac   :  { %3296 = vmatprep.subr.bf16.mxu1 %v14765_v27 }
 0xbaf   :  { %3297 = vmatpush1.bf16.msra.mxu1 %v14766_v2  ;;  %v10822_v2 = vld [vmem:[%s14144_s9] ss:$0 sm:$0xff] }
 0xbb0   :  { %3298 = vmatprep.subr.bf16.mxu1 %v14767_v54  ;;  %14776 = vst [vmem:[#allocation15_spill] sm:$0xff] %v10822_v2 }
 0xbb3   :  { %3299 = vmatpush1.bf16.msra.mxu1 %v14768_v14 }
 0xbb4   :  { %3309 = vmatprep.subr.bf16.mxu1 %v14769_v47 }
 0xc49   :  { %v6403_v4 = vpop.f32.mrb[40].mxu0  ;;  %v10794_v10 = vpop.f32.mrb[44].mxu1 }
 0xc4a   :  { %v6404_v16 = vpop.f32.mrb[41].mxu0  ;;  %v6810_v38 = vpop.f32.mrb[45].mxu1  ;;  %v3051_v61 = vadd.f32 %v10794_v10, %v14770_v63  ;;  %v3053_v45 = vadd.f32 %v10794_v10, %v14771_v20  ;;  %v3055_v22 = vadd.f32 %v10794_v10, %v14774_v1  ;;  %v3057_v41 = vadd.f32 %v10794_v10, %v14775_v34  ;;  %v10964_v1 = vld [vmem:[%s14145_s10 + $0x84] ss:$16 sps:$4 sm:$0xff]  }
 0xc4b   :  { %v6405_v49 = vadd.f32 %v6404_v16, %v6403_v4  ;;  %v6406_v18 = vpop.f32.mrb[42].mxu0  ;;  %v3048_v13 = vpop.f32.mrb[46].mxu1  ;;  %14787 = vst [vmem:[#allocation12_spill] sm:$0xff] %v10964_v1 }
 0xc4c   :  { %v6407_v48 = vpop.f32.mrb[43].mxu0  ;;  %v6811_v11 = vpop.f32.mrb[47].mxu1  ;;  %7688 = vtanh.f32 %v3051_v61  ;;  %v10869_v61 = vld [vmem:[%s14138_s3 + $0x28] sm:$0xff]  }
 0xc4d   :  { %v2841_v12 = vadd.f32 %v6405_v49, %v10799_v9  ;;  %7690 = vtanh.f32 %v3053_v45  ;;  %v10835_v48 = vld [vmem:[%s14138_s3] sm:$0xff]   ;;  %v10841_v11 = vld [vmem:[%s14138_s3 + $0x8] sm:$0xff]   ;;  %v10876_v45 = vld [vmem:[%s14138_s3 + $0x30] sm:$0xff]  }
 0xc4e   :  { %7692 = vtanh.f32 %v3055_v22  ;;  %6773 = vmatpush3.bf16.msra.mxu0 %v10835_v48  ;;  %v3052_v22 = vadd.f32 %v10794_v10, %v14777_v37 }
 0xc4f   :  { %v2881_v6 = vadd.f32 %v2880_v57, %v2841_v12  ;;  %7694 = vtanh.f32 %v3057_v41  ;;  %6774 = vmatprep.subr.bf16.mxu0 %v14720_v62  ;;  %v10848_v12 = vld [vmem:[%s14138_s3 + $0x10] sm:$0xff]   ;;  %v14779_v41 = vld [vmem:[#allocation16_spill] sm:$0xff] }
 0xc50   :  { %7696 = vtanh.f32 %v3052_v22 }
 0xc51   :  { %2886 = vst [vmem:[%s14149_s14] sm:$0x3] %v2881_v6  ;;  %v2887_v23 = vsel %vm1881_vm1, %v2881_v6, -inf }
 0xc52   :  { %2888 = vmax.xlane.f32.xlu0 %v2887_v23  ;;  %6775 = vmatpush3.bf16.msra.mxu0 %v10841_v11  ;;  %v10862_v23 = vld [vmem:[%s14138_s3 + $0x20] sm:$0xff]  }
 0xc53   :  { %6776 = vmatprep.subr.bf16.mxu0 %v14720_v62 }
 0xc56   :  { %v7689_v27 = vpop.eup %7688  ;;  %6777 = vmatpush3.bf16.msra.mxu0 %v10848_v12 }
 0xc57   :  { %v3067_v58 = vmul.f32 %v10822_v2, %v7689_v27  ;;  %v7691_v54 = vpop.eup %7690  ;;  %6778 = vmatprep.subr.bf16.mxu0 %v14720_v62  ;;  %v3056_v27 = vadd.f32 %v10794_v10, %v14779_v41 }
 0xc58   :  { %v3069_v14 = vmul.f32 %v10822_v2, %v7691_v54  ;;  %v7693_v47 = vpop.eup %7692 }
 0xc59   :  { %v3075_v17 = vsel %vm1881_vm1, %v3067_v58, 0.0  ;;  %v3071_v16 = vmul.f32 %v10822_v2, %v7693_v47  ;;  %v7695_v38 = vpop.eup %7694  ;;  %v14780_v58 = vld [vmem:[#allocation14_spill] sm:$0xff] }
 0xc5a   :  { %v3081_v4 = vsel %vm1881_vm1, %v3069_v14, 0.0  ;;  %v3073_v18 = vmul.f32 %v10822_v2, %v7695_v38  ;;  %v3058_v54 = vadd.f32 %v10794_v10, %v14780_v58 }
 0xc5b   :  { %v3087_v49 = vsel %vm1881_vm1, %v3071_v16, 0.0 }
 0xc5c   :  { %v3093_v13 = vsel %vm1881_vm1, %v3073_v18, 0.0 }
 0xcdf   :  { %v2889_v25 = vpop.xlane.xlu0 %2888 }
 0xce0   :  { %vm2890_vm2 = vcmp.eq.f32.partialorder %v2881_v6, %v2889_v25  ;;  %v10855_v6 = vld [vmem:[%s14138_s3 + $0x18] sm:$0xff]   ;;  %v14778_v25 = vld [vmem:[#allocation10_spill] sm:$0xff] }
 0xce1   :  { %v2891_v29 = vsel %vm2890_vm2, %v10811_v35, 128  ;;  %6779 = vmatpush3.bf16.msra.mxu0 %v10855_v6 }
 0xce2   :  { %v2892_v43 = vsel %vm1881_vm1, %v2891_v29, 2147483647  ;;  %6780 = vmatprep.subr.bf16.mxu0 %v14720_v62  ;;  %v3054_v29 = vadd.f32 %v10794_v10, %v14778_v25 }
 0xce3   :  { %v2894_v57 = vshra.s32 %v2892_v43, 16 }
 0xce4   :  { %7698 = vtanh.f32 %v3054_v29 }
 0xce5   :  { %v2896_v50 = vcvt.s32.f32 %v2894_v57  ;;  %6781 = vmatpush3.bf16.msra.mxu0 %v10862_v23  ;;  %v2893_v57 = vand.u32 65535, %v2892_v43  ;;  %7700 = vtanh.f32 %v3056_v27 }
 0xce6   :  { %6782 = vmatprep.subr.bf16.mxu0 %v14720_v62  ;;  %7702 = vtanh.f32 %v3058_v54  ;;  %v10906_v54 = vld [vmem:[%s14145_s10 + $0x4] ss:$16 sps:$4 sm:$0xff]  }
 0xce7   :  { %2897 = vmin.xlane.f32.xlu1 %v2896_v50  ;;  %v2895_v47 = vcvt.s32.f32 %v2893_v57  ;;  %v10900_v57 = vld [vmem:[%s14138_s3 + $0x38] sm:$0xff]  }
 0xce9   :  { %6783 = vmatpush3.bf16.msra.mxu0 %v10869_v61 }
 0xcea   :  { %6784 = vmatprep.subr.bf16.mxu0 %v14720_v62 }
 0xceb   :  { %3076 = vadd.xlane.f32.xlu1 %v3075_v17  ;;  %v7697_v17 = vpop.eup %7696 }
 0xcec   :  { %v3068_v16 = vmul.f32 %v10822_v2, %v7697_v17 }
 0xced   :  { %6785 = vmatpush3.bf16.msra.mxu0 %v10876_v45 }
 0xcee   :  { %6786 = vmatprep.subr.bf16.mxu0 %v14720_v62  ;;  %v7699_v38 = vpop.eup %7698 }
 0xcef   :  { %3082 = vadd.xlane.f32.xlu1 %v3081_v4  ;;  %v3070_v18 = vmul.f32 %v10822_v2, %v7699_v38 }
 0xcf1   :  { %v3084_v43 = vsel %vm1881_vm1, %v3070_v18, 0.0  ;;  %6787 = vmatpush3.bf16.msra.mxu0 %v10900_v57 }
 0xcf2   :  { %3186 = vmatprep.subr.bf16.mxu0 %v10906_v54 }
 0xcf3   :  { %3088 = vadd.xlane.f32.xlu1 %v3087_v49  ;;  %v3078_v49 = vsel %vm1881_vm1, %v3068_v16, 0.0 }
 0xcf7   :  { %3094 = vadd.xlane.f32.xlu1 %v3093_v13  ;;  %v7701_v13 = vpop.eup %7700 }
 0xcf8   :  { %v3072_v10 = vmul.f32 %v10822_v2, %v7701_v13  ;;  %v7703_v22 = vpop.eup %7702 }
 0xcf9   :  { %v3074_v29 = vmul.f32 %v10822_v2, %v7703_v22 }
 0xcfb   :  { %v3096_v27 = vsel %vm1881_vm1, %v3074_v29, 0.0 }
 0xd74   :  { %v2898_v14 = vpop.xlane.xlu1 %2897 }
 0xd75   :  { %vm2899_vm3 = vcmp.eq.f32.partialorder %v2896_v50, %v2898_v14  ;;  %v3090_v50 = vsel %vm1881_vm1, %v3072_v10, 0.0  ;;  %v14320_v10 = vmov 1.0|1.0  }
 0xd76   :  { %v2900_v4 = vsel %vm2899_vm3, %v2895_v47, inf  ;;  %v2904_v47 = vcvt.f32.s32 %v2898_v14  ;;  %v10920_v14 = vld [vmem:[%s14145_s10 + $0x24] ss:$16 sps:$4 sm:$0xff]  }
 0xd77   :  { %2901 = vmin.xlane.f32.xlu0 %v2900_v4  ;;  %14782 = vst [vmem:[#allocation18_spill] sm:$0xff] %v10920_v14 }
 0xd78   :  { %v3077_v17 = vpop.xlane.xlu1 %3076  ;;  %v2905_v38 = vshll.u32 %v2904_v47, 16  ;;  %v10926_v47 = vld [vmem:[%s14145_s10 + $0x20] ss:$16 sps:$4 sm:$0xff]  }
 0xd79   :  { %14783 = vst [vmem:[#allocation21_spill] sm:$0xff] %v10926_v47  ;;  %v3099_v58 = vsel %vm1881_vm1, %v3077_v17, -inf }
 0xd7b   :  { %3079 = vadd.xlane.f32.xlu0 %v3078_v49 }
 0xd7c   :  { %v3083_v4 = vpop.xlane.xlu1 %3082 }
 0xd7d   :  { %v3101_v41 = vsel %vm1881_vm1, %v3083_v4, -inf }
 0xd7f   :  { %3085 = vadd.xlane.f32.xlu0 %v3084_v43 }
 0xd80   :  { %v3089_v43 = vpop.xlane.xlu1 %3088 }
 0xd83   :  { %3091 = vadd.xlane.f32.xlu0 %v3090_v50  ;;  %v10914_v50 = vld [vmem:[%s14145_s10] ss:$16 sps:$4 sm:$0xff]  }
 0xd84   :  { %14781 = vst [vmem:[#allocation20_spill] sm:$0xff] %v10914_v50  ;;  %v3095_v29 = vpop.xlane.xlu1 %3094 }
 0xd87   :  { %3097 = vadd.xlane.f32.xlu0 %v3096_v27 }
 0xe04   :  { %v2902_v16 = vpop.xlane.xlu0 %2901 }
 0xe05   :  { %v2903_v49 = vcvt.f32.s32 %v2902_v16 }
 0xe07   :  { %v2906_v18 = vadd.s32 %v2905_v38, %v2903_v49  ;;  %v10933_v38 = vld [vmem:[%s14145_s10 + $0x44] ss:$16 sps:$4 sm:$0xff]   ;;  %v3103_v49 = vsel %vm1881_vm1, %v3089_v43, -inf }
 0xe08   :  { %v3080_v13 = vpop.xlane.xlu0 %3079  ;;  %14784 = vst [vmem:[#allocation24_spill] sm:$0xff] %v10933_v38 }
 0xe09   :  { %vm2907_vm4 = vcmp.eq.s32.totalorder %v10811_v35, %v2906_v18  ;;  %v3107_v18 = vsel %vm1881_vm1, %v3095_v29, -inf  ;;  %v10958_v35 = vld [vmem:[%s14145_s10 + $0x60] ss:$16 sps:$4 sm:$0xff]  }
 0xe0a   :  { %vm6317_vm5 = vmpackc.low %vm2907_vm4, %vm2907_vm4  ;;  %v3108_v37 = vmax.f32 %v3101_v41, %v3107_v18  ;;  %v10988_v18 = vld [vmem:[%s14145_s10 + $0xc4] ss:$16 sps:$4 sm:$0xff]  }
 0xe0b   :  { %6789 = vmatmul.mubr.msk.bf16.vlgmr.msra.gmra.mrb[44].mxu0 %vm6317_vm5, %v14320_v10  ;;  %v3100_v10 = vsel %vm1881_vm1, %v3080_v13, -inf  ;;  %14791 = vst [vmem:[#allocation28_spill] sm:$0xff] %v10988_v18 }
 0xe0c   :  { %v3086_v22 = vpop.xlane.xlu0 %3085  ;;  %3187 = vmatpush1.bf16.msra.mxu0 %v10914_v50 }
 0xe0d   :  { %3188 = vmatprep.subr.bf16.mxu0 %v10920_v14 }
 0xe10   :  { %v3092_v27 = vpop.xlane.xlu0 %3091  ;;  %3189 = vmatpush1.bf16.msra.mxu0 %v10926_v47  ;;  %v10942_v47 = vld [vmem:[%s14145_s10 + $0x40] ss:$16 sps:$4 sm:$0xff]  }
 0xe11   :  { %v3105_v16 = vsel %vm1881_vm1, %v3092_v27, -inf  ;;  %3190 = vmatprep.subr.bf16.mxu0 %v10933_v38  ;;  %14785 = vst [vmem:[#allocation25_spill] sm:$0xff] %v10942_v47  ;;  %v3102_v38 = vsel %vm1881_vm1, %v3086_v22, -inf }
 0xe12   :  { %v3106_v14 = vmax.f32 %v3100_v10, %v3105_v16  ;;  %v10952_v10 = vld [vmem:[%s14145_s10 + $0x64] ss:$16 sps:$4 sm:$0xff]   ;;  %v3104_v16 = vmax.f32 %v3099_v58, %v3103_v49 }
 0xe13   :  { %14786 = vst [vmem:[#allocation7_spill] sm:$0xff] %v10952_v10 }
 0xe14   :  { %v3098_v50 = vpop.xlane.xlu0 %3097  ;;  %3191 = vmatpush1.bf16.msra.mxu0 %v10942_v47  ;;  %v3111_v34 = vmax.f32 %v3104_v16, %v3106_v14 }
 0xe15   :  { %v3109_v25 = vsel %vm1881_vm1, %v3098_v50, -inf  ;;  %3192 = vmatprep.subr.bf16.mxu0 %v10952_v10 }
 0xe16   :  { %v3110_v2 = vmax.f32 %v3102_v38, %v3109_v25  ;;  %v10976_v38 = vld [vmem:[%s14145_s10 + $0xa4] ss:$16 sps:$4 sm:$0xff]  }
 0xe17   :  { %14789 = vst [vmem:[#allocation26_spill] sm:$0xff] %v10976_v38 }
 0xe18   :  { %v3112_v47 = vmax.f32 %v3108_v37, %v3110_v2  ;;  %3193 = vmatpush1.bf16.msra.mxu0 %v10958_v35  ;;  %v10970_v2 = vld [vmem:[%s14145_s10 + $0x80] ss:$16 sps:$4 sm:$0xff]  }
 0xe19   :  { %3194 = vmatprep.subr.bf16.mxu0 %v10964_v1  ;;  %14788 = vst [vmem:[#allocation8_spill] sm:$0xff] %v10970_v2 }
 0xe1a   :  { %v3113_v10 = vmax.f32 %v3111_v34, %v3112_v47  ;;  %v10982_v47 = vld [vmem:[%s14145_s10 + $0xa0] ss:$16 sps:$4 sm:$0xff]  }
 0xe1b   :  { %14790 = vst [vmem:[#allocation27_spill] sm:$0xff] %v10982_v47 }
 0xe1c   :  { %v3114_v58 = vsub.f32 %v3077_v17, %v3113_v10  ;;  %v3115_v41 = vsub.f32 %v3080_v13, %v3113_v10  ;;  %v3116_v25 = vsub.f32 %v3083_v4, %v3113_v10  ;;  %v3117_v14 = vsub.f32 %v3086_v22, %v3113_v10  ;;  %3195 = vmatpush1.bf16.msra.mxu0 %v10970_v2 }
 0xe1d   :  { %v3118_v37 = vsub.f32 %v3089_v43, %v3113_v10  ;;  %3196 = vmatprep.subr.bf16.mxu0 %v10976_v38  ;;  %v3119_v4 = vsub.f32 %v3092_v27, %v3113_v10  ;;  %v3120_v43 = vsub.f32 %v3095_v29, %v3113_v10  ;;  %v3121_v27 = vsub.f32 %v3098_v50, %v3113_v10  ;;  %v11006_v10 = vld [vmem:[%s14145_s10 + $0xe0] ss:$16 sps:$4 sm:$0xff]   ;;  %v11113_v38 = vld [vmem:[#allocation2 + $0x4] sm:$0x3] }
 0xe1e   :  { %v3122_v34 = vmul.f32 1.442695, %v3114_v58  ;;  %v3124_v17 = vmul.f32 1.442695, %v3115_v41  ;;  %v3126_v13 = vmul.f32 1.442695, %v3116_v25 }
 0xe1f   :  { %v3128_v22 = vmul.f32 1.442695, %v3117_v14  ;;  %v3130_v49 = vmul.f32 1.442695, %v3118_v37  ;;  %v3132_v16 = vmul.f32 1.442695, %v3119_v4 }
 0xe20   :  { %7704 = vpow2.f32 %v3122_v34  ;;  %3197 = vmatpush1.bf16.msra.mxu0 %v10982_v47  ;;  %v10994_v58 = vld [vmem:[%s14145_s10 + $0xc0] ss:$16 sps:$4 sm:$0xff]   ;;  %v3134_v29 = vmul.f32 1.442695, %v3120_v43  ;;  %v11000_v41 = vld [vmem:[%s14145_s10 + $0xe4] ss:$16 sps:$4 sm:$0xff]  }
 0xe21   :  { %7706 = vpow2.f32 %v3124_v17  ;;  %3198 = vmatprep.subr.bf16.mxu0 %v10988_v18  ;;  %14792 = vst [vmem:[#allocation68_spill] sm:$0xff] %v10994_v58  ;;  %14793 = vst [vmem:[#allocation69_spill] sm:$0xff] %v11000_v41  ;;  %v3136_v50 = vmul.f32 1.442695, %v3121_v27  ;;  %v11012_v25 = vld [vmem:[%s14145_s10 + $0x104] ss:$16 sps:$4 sm:$0xff]  }
 0xe22   :  { %7708 = vpow2.f32 %v3126_v13  ;;  %14794 = vst [vmem:[#allocation70_spill] sm:$0xff] %v11006_v10  ;;  %14795 = vst [vmem:[#allocation71_spill] sm:$0xff] %v11012_v25  ;;  %v11020_v4 = vld [vmem:[%s14145_s10 + $0x100] ss:$16 sps:$4 sm:$0xff]  }
 0xe23   :  { %7710 = vpow2.f32 %v3128_v22  ;;  %14796 = vst [vmem:[#allocation72_spill] sm:$0xff] %v11020_v4  ;;  %v11110_v47 = vld [vmem:[#allocation2 + $0x2] sm:$0x3]  ;;  %14812 = vst [vmem:[#allocation88_spill] sm:$0xff] %v11113_v38 }
 0xe24   :  { %3199 = vmatpush1.bf16.msra.mxu0 %v10994_v58  ;;  %7712 = vpow2.f32 %v3130_v49  ;;  %v11026_v49 = vld [vmem:[%s14145_s10 + $0x124] ss:$16 sps:$4 sm:$0xff]   ;;  %v11062_v58 = vld [vmem:[%s14145_s10 + $0x160] ss:$16 sps:$4 sm:$0xff]   ;;  %14811 = vst [vmem:[#allocation87_spill] sm:$0xff] %v11110_v47 }
 0xe25   :  { %3200 = vmatprep.subr.bf16.mxu0 %v11000_v41  ;;  %7714 = vpow2.f32 %v3132_v16  ;;  %14797 = vst [vmem:[#allocation73_spill] sm:$0xff] %v11026_v49  ;;  %v11048_v41 = vld [vmem:[%s14145_s10 + $0x140] ss:$16 sps:$4 sm:$0xff]   ;;  %14802 = vst [vmem:[#allocation78_spill] sm:$0xff] %v11062_v58 }
 0xe26   :  { %7716 = vpow2.f32 %v3134_v29  ;;  %14800 = vst [vmem:[#allocation76_spill] sm:$0xff] %v11048_v41 }
 0xe27   :  { %7718 = vpow2.f32 %v3136_v50 }
 0xe28   :  { %3201 = vmatpush1.bf16.msra.mxu0 %v11006_v10 }
 0xe29   :  { %3202 = vmatprep.subr.bf16.mxu0 %v11012_v25  ;;  %v11034_v25 = vld [vmem:[%s14145_s10 + $0x120] ss:$16 sps:$4 sm:$0xff]  }
 0xe2a   :  { %v7705_v14 = vpop.eup %7704  ;;  %14798 = vst [vmem:[#allocation74_spill] sm:$0xff] %v11034_v25 }
 0xe2b   :  { %v7707_v37 = vpop.eup %7706  ;;  %v3138_v34 = vsel %vm1881_vm1, %v7705_v14, 0.0 }
 0xe2c   :  { %v7709_v17 = vpop.eup %7708  ;;  %v3139_v13 = vsel %vm1881_vm1, %v7707_v37, 0.0  ;;  %3203 = vmatpush1.bf16.msra.mxu0 %v11020_v4  ;;  %v11040_v4 = vld [vmem:[%s14145_s10 + $0x144] ss:$16 sps:$4 sm:$0xff]  }
 0xe2d   :  { %v7711_v22 = vpop.eup %7710  ;;  %v3140_v43 = vadd.f32 %v3139_v13, %v3138_v34  ;;  %3204 = vmatprep.subr.bf16.mxu0 %v11026_v49  ;;  %v3141_v27 = vsel %vm1881_vm1, %v7709_v17, 0.0  ;;  %14799 = vst [vmem:[#allocation75_spill] sm:$0xff] %v11040_v4 }
 0xe2e   :  { %v7713_v16 = vpop.eup %7712  ;;  %v3143_v50 = vsel %vm1881_vm1, %v7711_v22, 0.0 }
 0xe2f   :  { %v3142_v29 = vadd.f32 %v3141_v27, %v3140_v43  ;;  %v7715_v34 = vpop.eup %7714  ;;  %v3145_v43 = vsel %vm1881_vm1, %v7713_v16, 0.0 }
 0xe30   :  { %3205 = vmatpush1.bf16.msra.mxu0 %v11034_v25  ;;  %v7717_v27 = vpop.eup %7716  ;;  %v3147_v10 = vsel %vm1881_vm1, %v7715_v34, 0.0  ;;  %v11054_v25 = vld [vmem:[%s14145_s10 + $0x164] ss:$16 sps:$4 sm:$0xff]  }
 0xe31   :  { %v3144_v13 = vadd.f32 %v3143_v50, %v3142_v29  ;;  %3206 = vmatprep.subr.bf16.mxu0 %v11040_v4  ;;  %v7719_v29 = vpop.eup %7718  ;;  %14801 = vst [vmem:[#allocation77_spill] sm:$0xff] %v11054_v25 }
 0xe32   :  { %v3151_v4 = vsel %vm1881_vm1, %v7719_v29, 0.0 }
 0xe33   :  { %v3146_v49 = vadd.f32 %v3145_v43, %v3144_v13  ;;  %v3149_v13 = vsel %vm1881_vm1, %v7717_v27, 0.0 }
 0xe34   :  { %3207 = vmatpush1.bf16.msra.mxu0 %v11048_v41  ;;  %v11107_v41 = vld [vmem:[#allocation2] sm:$0x3] }
 0xe35   :  { %v3148_v50 = vadd.f32 %v3147_v10, %v3146_v49  ;;  %3208 = vmatprep.subr.bf16.mxu0 %v11054_v25  ;;  %v11068_v49 = vld [vmem:[%s14145_s10 + $0x184] ss:$16 sps:$4 sm:$0xff]   ;;  %14810 = vst [vmem:[#allocation86_spill] sm:$0xff] %v11107_v41 }
 0xe36   :  { %14803 = vst [vmem:[#allocation79_spill] sm:$0xff] %v11068_v49 }
 0xe37   :  { %v3150_v43 = vadd.f32 %v3149_v13, %v3148_v50  ;;  %v11074_v50 = vld [vmem:[%s14145_s10 + $0x180] ss:$16 sps:$4 sm:$0xff]   ;;  %v11080_v13 = vld [vmem:[%s14145_s10 + $0x1a4] ss:$16 sps:$4 sm:$0xff]  }
 0xe38   :  { %3209 = vmatpush1.bf16.msra.mxu0 %v11062_v58  ;;  %14804 = vst [vmem:[#allocation80_spill] sm:$0xff] %v11074_v50  ;;  %14805 = vst [vmem:[#allocation81_spill] sm:$0xff] %v11080_v13 }
 0xe39   :  { %v3152_v10 = vadd.f32 %v3151_v4, %v3150_v43  ;;  %3210 = vmatprep.subr.bf16.mxu0 %v11068_v49  ;;  %v11086_v4 = vld [vmem:[%s14145_s10 + $0x1a0] ss:$16 sps:$4 sm:$0xff]   ;;  %v11092_v43 = vld [vmem:[%s14145_s10 + $0x1c4] ss:$16 sps:$4 sm:$0xff]  }
 0xe3a   :  { %14806 = vst [vmem:[#allocation82_spill] sm:$0xff] %v11086_v4  ;;  %14807 = vst [vmem:[#allocation83_spill] sm:$0xff] %v11092_v43 }
 0xe3b   :  { %7720 = vrcp.f32 %v3152_v10  ;;  %v11098_v10 = vld [vmem:[%s14145_s10 + $0x1c0] ss:$16 sps:$4 sm:$0xff]  }
 0xe3c   :  { %3211 = vmatpush1.bf16.msra.mxu0 %v11074_v50  ;;  %14808 = vst [vmem:[#allocation84_spill] sm:$0xff] %v11098_v10  ;;  %v11104_v50 = vld [vmem:[%s14145_s10 + $0x1e4] ss:$16 sps:$4 sm:$0xff]  }
 0xe3d   :  { %3212 = vmatprep.subr.bf16.mxu0 %v11080_v13  ;;  %14809 = vst [vmem:[#allocation85_spill] sm:$0xff] %v11104_v50 }
 0xe40   :  { %3213 = vmatpush1.bf16.msra.mxu0 %v11086_v4 }
 0xe41   :  { %3214 = vmatprep.subr.bf16.mxu0 %v11092_v43 }
 0xe44   :  { %3215 = vmatpush1.bf16.msra.mxu0 %v11098_v10 }
 0xe45   :  { %v7721_v13 = vpop.eup %7720  ;;  %3216 = vmatprep.subr.bf16.mxu0 %v11104_v50 }
 0xe46   :  { %v3154_v4 = vmul.f32 %v7721_v13, %v7705_v14  ;;  %v3155_v49 = vmul.f32 %v7721_v13, %v7707_v37  ;;  %v3156_v58 = vmul.f32 %v7721_v13, %v7709_v17  ;;  %v3157_v25 = vmul.f32 %v7721_v13, %v7711_v22  ;;  %v11119_v14 = vld [vmem:[%s14145_s10 + $0x1e0] ss:$16 sps:$4 sm:$0xff]   ;;  %v11125_v37 = vld [vmem:[%s14145_s10 + $0x204] ss:$16 sps:$4 sm:$0xff]  }
 0xe47   :  { %v3158_v43 = vmul.f32 %v7721_v13, %v7713_v16  ;;  %14813 = vst [vmem:[#allocation89_spill] sm:$0xff] %v11119_v14  ;;  %14814 = vst [vmem:[#allocation90_spill] sm:$0xff] %v11125_v37  ;;  %v3159_v17 = vmul.f32 %v7721_v13, %v7715_v34  ;;  %v11128_v22 = vld [vmem:[#allocation2 + $0x6] sm:$0x3]  ;;  %v3161_v1 = vmul.f32 %v7721_v13, %v7719_v29 }
 0xe48   :  { %v3162_v18 = vmul.f32 %v11107_v41, %v3154_v4  ;;  %v3163_v10 = vmul.f32 %v11110_v47, %v3155_v49  ;;  %v3164_v2 = vmul.f32 %v11113_v38, %v3156_v58  ;;  %3217 = vmatpush1.bf16.msra.mxu0 %v11119_v14  ;;  %14815 = vst [vmem:[#allocation91_spill] sm:$0xff] %v11128_v22  ;;  %v11133_v47 = vld [vmem:[#allocation2 + $0x8] sm:$0x3] }
 0xe49   :  { %3227 = vmatprep.subr.bf16.mxu0 %v11125_v37  ;;  %v3165_v16 = vmul.f32 %v11128_v22, %v3157_v25  ;;  %v3160_v38 = vmul.f32 %v7721_v13, %v7717_v27  ;;  %v3166_v14 = vmul.f32 %v11133_v47, %v3158_v43  ;;  %v11137_v37 = vld [vmem:[#allocation2 + $0xa] sm:$0x3] }
 0xe4a   :  { %v3170_v58 = vsel %vm1881_vm1, %v3162_v18, 0.0  ;;  %v3171_v49 = vsel %vm1881_vm1, %v3163_v10, 0.0  ;;  %v3173_v41 = vsel %vm1881_vm1, %v3164_v2, 0.0  ;;  %v3167_v34 = vmul.f32 %v11137_v37, %v3159_v17  ;;  %v11141_v18 = vld [vmem:[#allocation2 + $0xc] sm:$0x3] }
 0xe4b   :  { %v3172_v4 = vadd.f32 %v3171_v49, %v3170_v58  ;;  %v3175_v25 = vsel %vm1881_vm1, %v3165_v16, 0.0  ;;  %v3168_v10 = vmul.f32 %v11141_v18, %v3160_v38  ;;  %v3177_v27 = vsel %vm1881_vm1, %v3166_v14, 0.0  ;;  %v11145_v49 = vld [vmem:[#allocation2 + $0xe] sm:$0x3] }
 0xe4c   :  { %v3169_v2 = vmul.f32 %v11145_v49, %v3161_v1  ;;  %v3005_v38 = vstv %s3004_s18 }
 0xe4d   :  { %v3174_v50 = vadd.f32 %v3173_v41, %v3172_v4  ;;  %v3179_v41 = vsel %vm1881_vm1, %v3167_v34, 0.0  ;;  %v3181_v13 = vsel %vm1881_vm1, %v3168_v10, 0.0  ;;  %vm3006_vm6 = vcmp.eq.s32.totalorder %v3005_v38, 1  ;;  %v6319_v4 = vld [vmem:[%s14137_s2 + $0x1] sm:$0x1]  ;;  %v14847_v38 = vld [vmem:[#allocation65_spill] sm:$0xff] }
 0xe4e   :  { %v3183_v17 = vsel %vm1881_vm1, %v3169_v2, 0.0  ;;  %v3007_v14 = vsel %vm3006_vm6, 1, %v14710_v3  ;;  %v14839_v2 = vld [vmem:[#allocation57_spill] sm:$0xff] }
 0xe4f   :  { %v3176_v22 = vadd.f32 %v3175_v25, %v3174_v50  ;;  %v3008_v1 = vpack.c.b16 %v3007_v14, %v3007_v14  ;;  %v14848_v14 = vld [vmem:[#allocation45_spill] sm:$0xff] }
 0xe51   :  { %v3178_v58 = vadd.f32 %v3177_v27, %v3176_v22  ;;  %vm3009_vm7 = vcmp.ne.s16.totalorder %v3008_v1, 0  ;;  %v14849_v1 = vld [vmem:[#allocation48_spill] sm:$0xff] }
 0xe53   :  { %v3180_v29 = vadd.f32 %v3179_v41, %v3178_v58  ;;  %v14840_v41 = vld [vmem:[#allocation40_spill] sm:$0xff] }
 0xe55   :  { %v3182_v43 = vadd.f32 %v3181_v13, %v3180_v29  ;;  %v14841_v29 = vld [vmem:[#allocation59_spill] sm:$0xff]  ;;  %v14842_v13 = vld [vmem:[#allocation60_spill] sm:$0xff] }
 0xe57   :  { %v3184_v50 = vadd.f32 %v3183_v17, %v3182_v43  ;;  %v14843_v43 = vld [vmem:[#allocation41_spill] sm:$0xff]  ;;  %v14844_v17 = vld [vmem:[#allocation62_spill] sm:$0xff] }
 0xe59   :  { %v3185_v16 = vpack.c.bf16 %v3184_v50, %v3184_v50  ;;  %v14845_v50 = vld [vmem:[#allocation63_spill] sm:$0xff] }
 0xe5b   :  { %3218 = vmatprep.mubr.bf16.mxu0 %v3185_v16  ;;  %3300 = vmatprep.mubr.bf16.mxu1 %v3185_v16 }
 0xede   :  { %v2993_v22 = vpop.f32.mrb[44].mxu0 }
 0xedf   :  { %v2999_v34 = vpack.c.bf16 %v2993_v22, %v2993_v22  ;;  %v6790_v25 = vpop.f32.mrb[45].mxu0  ;;  %v14850_v22 = vld [vmem:[#allocation51_spill] sm:$0xff] }
 0xee0   :  { %v2996_v10 = vpop.f32.mrb[46].mxu0  ;;  %v14853_v25 = vld [vmem:[#allocation61_spill] sm:$0xff] }
 0xee1   :  { %v6791_v27 = vpop.f32.mrb[47].mxu0  ;;  %v11155_v58 = vsel %vm3009_vm7, %v6319_v4, %v2999_v34  ;;  %v14851_v4 = vld [vmem:[#allocation55_spill] sm:$0xff]  ;;  %v14852_v34 = vld [vmem:[#allocation58_spill] sm:$0xff]  ;;  %v14854_v10 = vld [vmem:[#allocation64_spill] sm:$0xff] }
 0xee2   :  { %3219 = vmatmul.mubr.bf16.vlgmr.msra.gmra.mrb[48].mxu0 %v11155_v58  ;;  %3301 = vmatmul.mubr.bf16.vlgmr.msra.gmra.mrb[48].mxu1 %v11155_v58  ;;  %v14855_v27 = vld [vmem:[#allocation66_spill] sm:$0xff] }
 0xee3   :  { %3228 = vmatpush1.bf16.msra.mxu0 %v10328_v51  ;;  %3310 = vmatpush1.bf16.msra.mxu1 %v10333_v46  ;;  %v14816_v51 = vld [vmem:[#allocation29_spill] sm:$0xff]  ;;  %v14817_v46 = vld [vmem:[#allocation23_spill] sm:$0xff] }
 0xee4   :  { %3229 = vmatprep.subr.bf16.mxu0 %v10338_v53  ;;  %3311 = vmatprep.subr.bf16.mxu1 %v10343_v21  ;;  %v14818_v53 = vld [vmem:[#allocation22_spill] sm:$0xff] }
 0xee5   :  { %3259 = vmatprep.mubr.bf16.mxu0 %v14710_v3  ;;  %3341 = vmatprep.mubr.bf16.mxu1 %v14710_v3  ;;  %v14819_v21 = vld [vmem:[#allocation30_spill] sm:$0xff] }
 0xee7   :  { %3230 = vmatpush1.bf16.msra.mxu0 %v10354_v28  ;;  %3312 = vmatpush1.bf16.msra.mxu1 %v10359_v40  ;;  %v14820_v28 = vld [vmem:[#allocation31_spill] sm:$0xff]  ;;  %v14821_v40 = vld [vmem:[#allocation32_spill] sm:$0xff] }
 0xee8   :  { %3231 = vmatprep.subr.bf16.mxu0 %v10366_v44  ;;  %3313 = vmatprep.subr.bf16.mxu1 %v10371_v0  ;;  %v14822_v44 = vld [vmem:[#allocation33_spill] sm:$0xff]  ;;  %v14823_v0 = vld [vmem:[#allocation34_spill] sm:$0xff] }
 0xeeb   :  { %3232 = vmatpush1.bf16.msra.mxu0 %v10380_v19  ;;  %3314 = vmatpush1.bf16.msra.mxu1 %v10385_v7  ;;  %v14824_v19 = vld [vmem:[#allocation43_spill] sm:$0xff] }
 0xeec   :  { %3233 = vmatprep.subr.bf16.mxu0 %v10392_v60  ;;  %3315 = vmatprep.subr.bf16.mxu1 %v10397_v59  ;;  %v14825_v7 = vld [vmem:[#allocation35_spill] sm:$0xff]  ;;  %v14826_v60 = vld [vmem:[#allocation44_spill] sm:$0xff]  ;;  %v14827_v59 = vld [vmem:[#allocation46_spill] sm:$0xff] }
 0xeef   :  { %3234 = vmatpush1.bf16.msra.mxu0 %v10404_v36  ;;  %3316 = vmatpush1.bf16.msra.mxu1 %v10409_v31  ;;  %v14828_v36 = vld [vmem:[#allocation36_spill] sm:$0xff]  ;;  %v14829_v31 = vld [vmem:[#allocation47_spill] sm:$0xff] }
 0xef0   :  { %3235 = vmatprep.subr.bf16.mxu0 %v10416_v26  ;;  %3317 = vmatprep.subr.bf16.mxu1 %v10421_v30  ;;  %v14830_v26 = vld [vmem:[#allocation49_spill] sm:$0xff] }
 0xef1   :  { %v14831_v30 = vld [vmem:[#allocation37_spill] sm:$0xff] }
 0xef3   :  { %3236 = vmatpush1.bf16.msra.mxu0 %v10428_v39  ;;  %3318 = vmatpush1.bf16.msra.mxu1 %v10433_v55  ;;  %v14832_v39 = vld [vmem:[#allocation50_spill] sm:$0xff]  ;;  %v14833_v55 = vld [vmem:[#allocation52_spill] sm:$0xff] }
 0xef4   :  { %3237 = vmatprep.subr.bf16.mxu0 %v10440_v42  ;;  %3319 = vmatprep.subr.bf16.mxu1 %v10445_v32  ;;  %v14834_v42 = vld [vmem:[#allocation38_spill] sm:$0xff]  ;;  %v14835_v32 = vld [vmem:[#allocation53_spill] sm:$0xff] }
 0xef7   :  { %3238 = vmatpush1.bf16.msra.mxu0 %v10452_v56  ;;  %3320 = vmatpush1.bf16.msra.mxu1 %v10457_v33  ;;  %v14836_v56 = vld [vmem:[#allocation54_spill] sm:$0xff]  ;;  %v14837_v33 = vld [vmem:[#allocation39_spill] sm:$0xff] }
 0xef8   :  { %3239 = vmatprep.subr.bf16.mxu0 %v14816_v51  ;;  %3321 = vmatprep.subr.bf16.mxu1 %v14817_v46 }
 0xefb   :  { %3240 = vmatpush1.bf16.msra.mxu0 %v14818_v53  ;;  %3322 = vmatpush1.bf16.msra.mxu1 %v14819_v21  ;;  %v14856_v53 = vld [vmem:[#allocation67_spill] sm:$0xff] }
 0xefc   :  { %3241 = vmatprep.subr.bf16.mxu0 %v14820_v28  ;;  %3323 = vmatprep.subr.bf16.mxu1 %v14821_v40 }
 0xeff   :  { %3242 = vmatpush1.bf16.msra.mxu0 %v14822_v44  ;;  %3324 = vmatpush1.bf16.msra.mxu1 %v14823_v0 }
 0xf00   :  { %6812 = vmatprep.subr.bf16.mxu1 %v14720_v62  ;;  %6436 = vmatprep.subr.bf16.mxu0 %v14824_v19 }
 0xf02   :  { %3260 = vmatmul.mubr.bf16.vlgmr.msra.gmra.mrb[48].mxu0 %v10756_v5  ;;  %3342 = vmatmul.mubr.bf16.vlgmr.msra.gmra.mrb[48].mxu1 %v10756_v5  ;;  %v14838_v5 = vld [vmem:[#allocation56_spill] sm:$0xff] }
 0xf03   :  { %3407 = vmatprep.mubr.bf16.mxu0 %v3185_v16  ;;  %6813 = vmatpush3.bf16.msra.mxu1 %v14825_v7  ;;  %v14846_v16 = vld [vmem:[#allocation42_spill] sm:$0xff] }
 0xf04   :  { %6814 = vmatprep.subr.bf16.mxu1 %v14720_v62  ;;  %6828 = vmatprep.mubr.msk.bf16.mxu1 %vm8499_vm0, %v14720_v62 }
 0xf05   :  { %6437 = vmatpush3.bf16.msra.mxu0 %v14826_v60 }
 0xf06   :  { %6438 = vmatprep.subr.bf16.mxu0 %v14827_v59 }
 0xf07   :  { %6815 = vmatpush3.bf16.msra.mxu1 %v14828_v36 }
 0xf08   :  { %6816 = vmatprep.subr.bf16.mxu1 %v14720_v62 }
 0xf09   :  { %6439 = vmatpush3.bf16.msra.mxu0 %v14829_v31 }
 0xf0a   :  { %6440 = vmatprep.subr.bf16.mxu0 %v14830_v26 }
 0xf0b   :  { %6817 = vmatpush3.bf16.msra.mxu1 %v14831_v30 }
 0xf0c   :  { %6818 = vmatprep.subr.bf16.mxu1 %v14720_v62 }
 0xf0d   :  { %6441 = vmatpush3.bf16.msra.mxu0 %v14832_v39 }
 0xf0e   :  { %6442 = vmatprep.subr.bf16.mxu0 %v14833_v55 }
 0xf0f   :  { %6819 = vmatpush3.bf16.msra.mxu1 %v14834_v42 }
 0xf10   :  { %6820 = vmatprep.subr.bf16.mxu1 %v14720_v62 }
 0xf11   :  { %6443 = vmatpush3.bf16.msra.mxu0 %v14835_v32 }
 0xf12   :  { %6444 = vmatprep.subr.bf16.mxu0 %v14836_v56 }
 0xf13   :  { %6821 = vmatpush3.bf16.msra.mxu1 %v14837_v33 }
 0xf14   :  { %6822 = vmatprep.subr.bf16.mxu1 %v14720_v62 }
 0xf15   :  { %6445 = vmatpush3.bf16.msra.mxu0 %v14838_v5 }
 0xf16   :  { %6446 = vmatprep.subr.bf16.mxu0 %v14839_v2 }
 0xf17   :  { %6823 = vmatpush3.bf16.msra.mxu1 %v14840_v41 }
 0xf18   :  { %6824 = vmatprep.subr.bf16.mxu1 %v14720_v62 }
 0xf19   :  { %6447 = vmatpush3.bf16.msra.mxu0 %v14841_v29 }
 0xf1a   :  { %6448 = vmatprep.subr.bf16.mxu0 %v14842_v13 }
 0xf1b   :  { %6825 = vmatpush3.bf16.msra.mxu1 %v14843_v43 }
 0xf1c   :  { %6826 = vmatprep.subr.bf16.mxu1 %v14720_v62 }
 0xf1d   :  { %6449 = vmatpush3.bf16.msra.mxu0 %v14844_v17 }
 0xf1e   :  { %6450 = vmatprep.subr.bf16.mxu0 %v14845_v50 }
 0xf1f   :  { %6827 = vmatpush3.bf16.msra.mxu1 %v14846_v16 }
 0xf20   :  { %6852 = vmatprep.subr.bf16.mxu1 %v14720_v62 }
 0xf21   :  { %6451 = vmatpush3.bf16.msra.mxu0 %v14847_v38 }
 0xf22   :  { %6829 = vmatmul.mubr.bf16.vlgmr.msra.gmra.mrb[52].mxu1 %v11155_v58  ;;  %6832 = vmatprep.subr.bf16.mxu0 %v14720_v62  ;;  %v11250_v58 = vld [vmem:[%s14145_s10 + $0xc] ss:$16 sps:$4 sm:$0xff]  }
 0xf23   :  { %6853 = vmatpush3.bf16.msra.mxu1 %v14848_v14  ;;  %6868 = vmatprep.mubr.msk.bf16.mxu1 %vm8499_vm0, %v14720_v62 }
 0xf24   :  { %6854 = vmatprep.subr.bf16.mxu1 %v14720_v62 }
 0xf27   :  { %6855 = vmatpush3.bf16.msra.mxu1 %v14849_v1 }
 0xf28   :  { %6856 = vmatprep.subr.bf16.mxu1 %v14720_v62 }
 0xf2b   :  { %6857 = vmatpush3.bf16.msra.mxu1 %v14850_v22 }
 0xf2c   :  { %6858 = vmatprep.subr.bf16.mxu1 %v14720_v62 }
 0xf2f   :  { %6859 = vmatpush3.bf16.msra.mxu1 %v14851_v4 }
 0xf30   :  { %6860 = vmatprep.subr.bf16.mxu1 %v14720_v62 }
 0xf33   :  { %6861 = vmatpush3.bf16.msra.mxu1 %v14852_v34  ;;  %v11280_v34 = vld [vmem:[%s14145_s10 + $0x2c] ss:$16 sps:$4 sm:$0xff]  }
 0xf34   :  { %6862 = vmatprep.subr.bf16.mxu1 %v14720_v62 }
 0xf37   :  { %6863 = vmatpush3.bf16.msra.mxu1 %v14853_v25  ;;  %v11294_v25 = vld [vmem:[%s14145_s10 + $0x4c] ss:$16 sps:$4 sm:$0xff]  }
 0xf38   :  { %6864 = vmatprep.subr.bf16.mxu1 %v14720_v62 }
 0xf3b   :  { %6865 = vmatpush3.bf16.msra.mxu1 %v14854_v10  ;;  %v11308_v10 = vld [vmem:[%s14145_s10 + $0x6c] ss:$16 sps:$4 sm:$0xff]  }
 0xf3c   :  { %6866 = vmatprep.subr.bf16.mxu1 %v14720_v62 }
 0xf3f   :  { %6867 = vmatpush3.bf16.msra.mxu1 %v14855_v27  ;;  %v11322_v27 = vld [vmem:[%s14145_s10 + $0x8c] ss:$16 sps:$4 sm:$0xff]  }
 0xf40   :  { %3790 = vmatprep.subr.bf16.mxu1 %v11250_v58 }
 0xfd5   :  { %v3261_v51 = vpop.f32.mrb[48].mxu0  ;;  %v3343_v46 = vpop.f32.mrb[48].mxu1 }
 0xfd6   :  { %v7136_v21 = vadd.f32 %v3261_v51, %v14856_v53  ;;  %v3263_v28 = vpop.f32.mrb[49].mxu0  ;;  %v3345_v40 = vpop.f32.mrb[49].mxu1  ;;  %v7138_v30 = vadd.f32 %v3343_v46, %v10749_v15  ;;  %v11336_v51 = vld [vmem:[%s14145_s10 + $0xac] ss:$16 sps:$4 sm:$0xff]  }
 0xfd7   :  { %v7137_v44 = vadd.f32 %v3263_v28, %v10738_v24  ;;  %v3265_v0 = vpop.f32.mrb[50].mxu0  ;;  %v3347_v19 = vpop.f32.mrb[50].mxu1  ;;  %v7139_v31 = vadd.f32 %v3345_v40, %v10744_v52  ;;  %v11350_v46 = vld [vmem:[%s14145_s10 + $0xcc] ss:$16 sps:$4 sm:$0xff]   ;;  %v11396_v40 = vld [vmem:[%s14145_s10 + $0x128] ss:$16 sps:$4 sm:$0xff]  }
 0xfd8   :  { %v6320_v7 = vmul.f32 -1.442695, %v7136_v21  ;;  %v3266_v60 = vpop.f32.mrb[51].mxu0  ;;  %v3348_v59 = vpop.f32.mrb[51].mxu1  ;;  %v11364_v21 = vld [vmem:[%s14145_s10 + $0xec] ss:$16 sps:$4 sm:$0xff]  }
 0xfd9   :  { %v6321_v36 = vmul.f32 -1.442695, %v7137_v44  ;;  %v6322_v26 = vmul.f32 -1.442695, %v7139_v31  ;;  %v11378_v28 = vld [vmem:[%s14145_s10 + $0x10c] ss:$16 sps:$4 sm:$0xff]  }
 0xfda   :  { %7722 = vpow2.f32 %v6320_v7  ;;  %v11402_v44 = vld [vmem:[%s14145_s10 + $0x14c] ss:$16 sps:$4 sm:$0xff]   ;;  %v11408_v0 = vld [vmem:[%s14145_s10 + $0x148] ss:$16 sps:$4 sm:$0xff]  }
 0xfdb   :  { %7724 = vpow2.f32 %v6321_v36  ;;  %14857 = vst [vmem:[#allocation29_spill] sm:$0xff] %v11408_v0  ;;  %v11414_v19 = vld [vmem:[%s14145_s10 + $0x16c] ss:$16 sps:$4 sm:$0xff]   ;;  %v11420_v7 = vld [vmem:[%s14145_s10 + $0x168] ss:$16 sps:$4 sm:$0xff]  }
 0xfdc   :  { %7726 = vpow2.f32 %v6322_v26  ;;  %14858 = vst [vmem:[#allocation23_spill] sm:$0xff] %v11414_v19  ;;  %14859 = vst [vmem:[#allocation22_spill] sm:$0xff] %v11420_v7  ;;  %v11426_v60 = vld [vmem:[%s14145_s10 + $0x18c] ss:$16 sps:$4 sm:$0xff]   ;;  %v11432_v59 = vld [vmem:[%s14145_s10 + $0x188] ss:$16 sps:$4 sm:$0xff]  }
 0xfdd   :  { %7728 = vtanh.f32 %v7138_v30  ;;  %14860 = vst [vmem:[#allocation30_spill] sm:$0xff] %v11426_v60  ;;  %14861 = vst [vmem:[#allocation31_spill] sm:$0xff] %v11432_v59  ;;  %v11438_v36 = vld [vmem:[%s14145_s10 + $0x1ac] ss:$16 sps:$4 sm:$0xff]   ;;  %v11444_v31 = vld [vmem:[%s14145_s10 + $0x1a8] ss:$16 sps:$4 sm:$0xff]  }
 0xfde   :  { %14862 = vst [vmem:[#allocation32_spill] sm:$0xff] %v11438_v36  ;;  %14863 = vst [vmem:[#allocation33_spill] sm:$0xff] %v11444_v31  ;;  %v11450_v26 = vld [vmem:[%s14145_s10 + $0x1cc] ss:$16 sps:$4 sm:$0xff]   ;;  %v11456_v30 = vld [vmem:[%s14145_s10 + $0x1c8] ss:$16 sps:$4 sm:$0xff]  }
 0xfdf   :  { %14864 = vst [vmem:[#allocation34_spill] sm:$0xff] %v11450_v26  ;;  %14865 = vst [vmem:[#allocation43_spill] sm:$0xff] %v11456_v30 }
 0xfe4   :  { %v7723_v39 = vpop.eup %7722 }
 0xfe5   :  { %v7725_v55 = vpop.eup %7724  ;;  %v3353_v42 = vadd.f32 1.0, %v7723_v39  ;;  %v11462_v39 = vld [vmem:[%s14145_s10 + $0x1ec] ss:$16 sps:$4 sm:$0xff]  }
 0xfe6   :  { %v3359_v32 = vadd.f32 1.0, %v7725_v55  ;;  %v7727_v56 = vpop.eup %7726  ;;  %14866 = vst [vmem:[#allocation35_spill] sm:$0xff] %v11462_v39  ;;  %v11468_v55 = vld [vmem:[%s14145_s10 + $0x1e8] ss:$16 sps:$4 sm:$0xff]  }
 0xfe7   :  { %7730 = vrcp.f32 %v3353_v42  ;;  %v7729_v33 = vpop.eup %7728  ;;  %v3366_v29 = vadd.f32 1.0, %v7727_v56  ;;  %14867 = vst [vmem:[#allocation44_spill] sm:$0xff] %v11468_v55  ;;  %v11474_v42 = vld [vmem:[%s14145_s10 + $0x20c] ss:$16 sps:$4 sm:$0xff]  }
 0xfe8   :  { %7732 = vrcp.f32 %v3359_v32  ;;  %14868 = vst [vmem:[#allocation46_spill] sm:$0xff] %v11474_v42 }
 0xfe9   :  { %7734 = vrcp.f32 %v3366_v29 }
 0xff1   :  { %v7731_v5 = vpop.eup %7730 }
 0xff2   :  { %v7733_v2 = vpop.eup %7732  ;;  %v3370_v41 = vmul.f32 %v7731_v5, %v7729_v33 }
 0xff3   :  { %v3369_v13 = vmul.f32 %v7733_v2, %v10753_v8  ;;  %v7735_v14 = vpop.eup %7734  ;;  %v11274_v8 = vld [vmem:[%s14145_s10 + $0x8] ss:$16 sps:$4 sm:$0xff]  }
 0xff5   :  { %v11258_v43 = vadd.f32 %v3370_v41, %v3369_v13  ;;  %v11260_v17 = vpop.f32.mrb[52].mxu1 }
 0xff6   :  { %v6830_v50 = vpop.f32.mrb[53].mxu1 }
 0xff7   :  { %v3452_v16 = vpop.f32.mrb[54].mxu1  ;;  %7736 = vtanh.f32 %v11258_v43 }
 0xff8   :  { %v6831_v38 = vpop.f32.mrb[55].mxu1 }
0x1001   :  { %v7737_v1 = vpop.eup %7736 }
0x1002   :  { %v3373_v22 = vmul.f32 %v7737_v1, %v7735_v14 }
0x1004   :  { %v11263_v4 = vpack.c.bf16 %v3373_v22, %v3373_v22 }
0x1006   :  { %3408 = vmatmul.mubr.bf16.vlgmr.msra.gmra.mrb[52].mxu0 %v11263_v4  ;;  %6869 = vmatmul.mubr.bf16.vlgmr.msra.gmra.mrb[56].mxu1 %v11263_v4 }
0x1007   :  { %6833 = vmatpush3.bf16.msra.mxu0 %v10835_v48  ;;  %6848 = vmatprep.mubr.msk.bf16.mxu0 %vm8499_vm0, %v14720_v62  ;;  %v11288_v48 = vld [vmem:[%s14145_s10 + $0x28] ss:$16 sps:$4 sm:$0xff]  }
0x1008   :  { %6834 = vmatprep.subr.bf16.mxu0 %v14720_v62  ;;  %3791 = vmatpush1.bf16.msra.mxu1 %v11274_v8 }
0x1009   :  { %3792 = vmatprep.subr.bf16.mxu1 %v11280_v34 }
0x100b   :  { %6835 = vmatpush3.bf16.msra.mxu0 %v10841_v11  ;;  %v11302_v11 = vld [vmem:[%s14145_s10 + $0x48] ss:$16 sps:$4 sm:$0xff]  }
0x100c   :  { %6836 = vmatprep.subr.bf16.mxu0 %v14720_v62  ;;  %3793 = vmatpush1.bf16.msra.mxu1 %v11288_v48 }
0x100d   :  { %3794 = vmatprep.subr.bf16.mxu1 %v11294_v25 }
0x100f   :  { %6837 = vmatpush3.bf16.msra.mxu0 %v10848_v12  ;;  %v11316_v12 = vld [vmem:[%s14145_s10 + $0x68] ss:$16 sps:$4 sm:$0xff]  }
0x1010   :  { %6838 = vmatprep.subr.bf16.mxu0 %v14720_v62  ;;  %3795 = vmatpush1.bf16.msra.mxu1 %v11302_v11 }
0x1011   :  { %3796 = vmatprep.subr.bf16.mxu1 %v11308_v10 }
0x1013   :  { %6839 = vmatpush3.bf16.msra.mxu0 %v10855_v6  ;;  %v11330_v6 = vld [vmem:[%s14145_s10 + $0x88] ss:$16 sps:$4 sm:$0xff]  }
0x1014   :  { %6840 = vmatprep.subr.bf16.mxu0 %v14720_v62  ;;  %3797 = vmatpush1.bf16.msra.mxu1 %v11316_v12 }
0x1015   :  { %3798 = vmatprep.subr.bf16.mxu1 %v11322_v27 }
0x1017   :  { %6841 = vmatpush3.bf16.msra.mxu0 %v10862_v23  ;;  %v11344_v23 = vld [vmem:[%s14145_s10 + $0xa8] ss:$16 sps:$4 sm:$0xff]  }
0x1018   :  { %6842 = vmatprep.subr.bf16.mxu0 %v14720_v62  ;;  %3799 = vmatpush1.bf16.msra.mxu1 %v11330_v6 }
0x1019   :  { %3800 = vmatprep.subr.bf16.mxu1 %v11336_v51 }
0x101b   :  { %6843 = vmatpush3.bf16.msra.mxu0 %v10869_v61  ;;  %v11358_v61 = vld [vmem:[%s14145_s10 + $0xc8] ss:$16 sps:$4 sm:$0xff]  }
0x101c   :  { %6844 = vmatprep.subr.bf16.mxu0 %v14720_v62  ;;  %3801 = vmatpush1.bf16.msra.mxu1 %v11344_v23 }
0x101d   :  { %3802 = vmatprep.subr.bf16.mxu1 %v11350_v46 }
0x101f   :  { %6845 = vmatpush3.bf16.msra.mxu0 %v10876_v45  ;;  %v11372_v45 = vld [vmem:[%s14145_s10 + $0xe8] ss:$16 sps:$4 sm:$0xff]  }
0x1020   :  { %6846 = vmatprep.subr.bf16.mxu0 %v14720_v62  ;;  %3803 = vmatpush1.bf16.msra.mxu1 %v11358_v61 }
0x1021   :  { %3804 = vmatprep.subr.bf16.mxu1 %v11364_v21 }
0x1023   :  { %6847 = vmatpush3.bf16.msra.mxu0 %v10900_v57  ;;  %v11384_v57 = vld [vmem:[%s14145_s10 + $0x108] ss:$16 sps:$4 sm:$0xff]  }
0x1024   :  { %3708 = vmatprep.subr.bf16.mxu0 %v10906_v54  ;;  %3805 = vmatpush1.bf16.msra.mxu1 %v11372_v45  ;;  %v11390_v54 = vld [vmem:[%s14145_s10 + $0x12c] ss:$16 sps:$4 sm:$0xff]  }
0x1025   :  { %3806 = vmatprep.subr.bf16.mxu1 %v11378_v28 }
0x1028   :  { %3807 = vmatpush1.bf16.msra.mxu1 %v11384_v57 }
0x1029   :  { %3808 = vmatprep.subr.bf16.mxu1 %v11390_v54 }
0x102c   :  { %3809 = vmatpush1.bf16.msra.mxu1 %v11396_v40 }
0x102d   :  { %3810 = vmatprep.subr.bf16.mxu1 %v11402_v44 }
0x1030   :  { %3811 = vmatpush1.bf16.msra.mxu1 %v11408_v0  ;;  %v14886_v0 = vld [vmem:[#allocation26_spill] sm:$0xff] }
0x1031   :  { %3812 = vmatprep.subr.bf16.mxu1 %v11414_v19 }
0x1034   :  { %3813 = vmatpush1.bf16.msra.mxu1 %v11420_v7  ;;  %v14885_v7 = vld [vmem:[#allocation8_spill] sm:$0xff] }
0x1035   :  { %3814 = vmatprep.subr.bf16.mxu1 %v11426_v60 }
0x1038   :  { %3815 = vmatpush1.bf16.msra.mxu1 %v11432_v59 }
0x1039   :  { %3816 = vmatprep.subr.bf16.mxu1 %v11438_v36 }
0x103c   :  { %3817 = vmatpush1.bf16.msra.mxu1 %v11444_v31 }
0x103d   :  { %3818 = vmatprep.subr.bf16.mxu1 %v11450_v26 }
0x1040   :  { %3819 = vmatpush1.bf16.msra.mxu1 %v11456_v30 }
0x1041   :  { %3820 = vmatprep.subr.bf16.mxu1 %v11462_v39 }
0x1044   :  { %3821 = vmatpush1.bf16.msra.mxu1 %v11468_v55 }
0x1045   :  { %3831 = vmatprep.subr.bf16.mxu1 %v11474_v42 }
0x10d9   :  { %v6452_v32 = vpop.f32.mrb[52].mxu0  ;;  %v3567_v56 = vpop.f32.mrb[56].mxu1 }
0x10da   :  { %v6453_v33 = vpop.f32.mrb[53].mxu0  ;;  %v6870_v5 = vpop.f32.mrb[57].mxu1  ;;  %v3573_v1 = vadd.f32 %v3567_v56, %v14770_v63  ;;  %v3575_v22 = vadd.f32 %v3567_v56, %v14771_v20 }
0x10db   :  { %v6454_v2 = vadd.f32 %v6453_v33, %v6452_v32  ;;  %v6455_v41 = vpop.f32.mrb[54].mxu0  ;;  %v3570_v29 = vpop.f32.mrb[58].mxu1  ;;  %v14869_v32 = vld [vmem:[#allocation11_spill] sm:$0xff] }
0x10dc   :  { %v6456_v13 = vpop.f32.mrb[55].mxu0  ;;  %v6871_v50 = vpop.f32.mrb[59].mxu1  ;;  %7738 = vtanh.f32 %v3573_v1  ;;  %v3577_v33 = vadd.f32 %v3567_v56, %v14869_v32 }
0x10dd   :  { %v3410_v16 = vadd.f32 %v6454_v2, %v10799_v9  ;;  %7740 = vtanh.f32 %v3575_v22  ;;  %v14870_v9 = vld [vmem:[#allocation19_spill] sm:$0xff] }
0x10de   :  { %7742 = vtanh.f32 %v3577_v33 }
0x10df   :  { %v3450_v38 = vadd.f32 %v11260_v17, %v3410_v16  ;;  %v14871_v17 = vld [vmem:[#allocation17_spill] sm:$0xff] }
0x10e0   :  { %v3579_v41 = vadd.f32 %v3567_v56, %v14871_v17 }
0x10e1   :  { %6323 = vst [vmem:[%s14149_s14 + $0x2] sm:$0x3] %v3450_v38  ;;  %v3457_v14 = vsel %vm1881_vm1, %v3450_v38, -inf }
0x10e2   :  { %3458 = vmax.xlane.f32.xlu1 %v3457_v14  ;;  %7744 = vtanh.f32 %v3579_v41  ;;  %v14872_v14 = vld [vmem:[#allocation15_spill] sm:$0xff] }
0x10e6   :  { %v7739_v13 = vpop.eup %7738 }
0x10e7   :  { %v3589_v1 = vmul.f32 %v14872_v14, %v7739_v13  ;;  %v7741_v63 = vpop.eup %7740 }
0x10e8   :  { %v3591_v32 = vmul.f32 %v14872_v14, %v7741_v63  ;;  %v14874_v63 = vld [vmem:[#allocation10_spill] sm:$0xff] }
0x10e9   :  { %v3597_v22 = vsel %vm1881_vm1, %v3589_v1, 0.0  ;;  %v3576_v20 = vadd.f32 %v3567_v56, %v14874_v63 }
0x10ea   :  { %v3603_v33 = vsel %vm1881_vm1, %v3591_v32, 0.0 }
0x116f   :  { %v3459_v5 = vpop.xlane.xlu1 %3458 }
0x1170   :  { %vm3460_vm8 = vcmp.eq.f32.partialorder %v3450_v38, %v3459_v5  ;;  %v7743_v38 = vpop.eup %7742 }
0x1171   :  { %v3461_v2 = vsel %vm3460_vm8, %v14870_v9, 128  ;;  %v3593_v5 = vmul.f32 %v14872_v14, %v7743_v38  ;;  %v7745_v17 = vpop.eup %7744  ;;  %v14876_v38 = vld [vmem:[#allocation14_spill] sm:$0xff] }
0x1172   :  { %v3462_v29 = vsel %vm1881_vm1, %v3461_v2, 2147483647  ;;  %v3595_v41 = vmul.f32 %v14872_v14, %v7745_v17 }
0x1173   :  { %v3464_v50 = vshra.s32 %v3462_v29, 16  ;;  %v3609_v2 = vsel %vm1881_vm1, %v3593_v5, 0.0  ;;  %v3463_v42 = vand.u32 65535, %v3462_v29 }
0x1174   :  { %v3615_v13 = vsel %vm1881_vm1, %v3595_v41, 0.0 }
0x1175   :  { %v3466_v16 = vcvt.s32.f32 %v3464_v50  ;;  %v14873_v50 = vld [vmem:[#allocation13_spill] sm:$0xff]  ;;  %v3465_v39 = vcvt.s32.f32 %v3463_v42 }
0x1176   :  { %v3574_v1 = vadd.f32 %v3567_v56, %v14873_v50  ;;  %v14883_v50 = vld [vmem:[#allocation7_spill] sm:$0xff] }
0x1177   :  { %3467 = vmin.xlane.f32.xlu0 %v3466_v16 }
0x1178   :  { %7746 = vtanh.f32 %v3574_v1 }
0x1179   :  { %7748 = vtanh.f32 %v3576_v20 }
0x117b   :  { %3598 = vadd.xlane.f32.xlu0 %v3597_v22  ;;  %v14875_v22 = vld [vmem:[#allocation16_spill] sm:$0xff] }
0x117c   :  { %v3578_v32 = vadd.f32 %v3567_v56, %v14875_v22  ;;  %v14882_v22 = vld [vmem:[#allocation25_spill] sm:$0xff] }
0x117e   :  { %7750 = vtanh.f32 %v3578_v32 }
0x117f   :  { %3604 = vadd.xlane.f32.xlu0 %v3603_v33  ;;  %v3580_v33 = vadd.f32 %v3567_v56, %v14876_v38 }
0x1181   :  { %7752 = vtanh.f32 %v3580_v33 }
0x1182   :  { %v7747_v55 = vpop.eup %7746 }
0x1183   :  { %3610 = vadd.xlane.f32.xlu0 %v3609_v2  ;;  %v3590_v2 = vmul.f32 %v14872_v14, %v7747_v55  ;;  %v7749_v41 = vpop.eup %7748 }
0x1184   :  { %v3592_v20 = vmul.f32 %v14872_v14, %v7749_v41 }
0x1186   :  { %v3606_v29 = vsel %vm1881_vm1, %v3592_v20, 0.0 }
0x1187   :  { %3616 = vadd.xlane.f32.xlu0 %v3615_v13  ;;  %v3600_v13 = vsel %vm1881_vm1, %v3590_v2, 0.0 }
0x1188   :  { %v7751_v1 = vpop.eup %7750 }
0x1189   :  { %v3594_v56 = vmul.f32 %v14872_v14, %v7751_v1 }
0x118b   :  { %v7753_v32 = vpop.eup %7752  ;;  %v3612_v42 = vsel %vm1881_vm1, %v3594_v56, 0.0 }
0x1204   :  { %v3468_v5 = vpop.xlane.xlu0 %3467 }
0x1205   :  { %vm3469_vm9 = vcmp.eq.f32.partialorder %v3466_v16, %v3468_v5  ;;  %v3474_v33 = vcvt.f32.s32 %v3468_v5  ;;  %v14880_v5 = vld [vmem:[#allocation21_spill] sm:$0xff] }
0x1206   :  { %v3470_v17 = vsel %vm3469_vm9, %v3465_v39, inf  ;;  %v3596_v39 = vmul.f32 %v14872_v14, %v7753_v32  ;;  %v14878_v14 = vld [vmem:[#allocation20_spill] sm:$0xff]  ;;  %v14879_v32 = vld [vmem:[#allocation18_spill] sm:$0xff] }
0x1207   :  { %3471 = vmin.xlane.f32.xlu1 %v3470_v17  ;;  %v3475_v41 = vshll.u32 %v3474_v33, 16  ;;  %v14881_v33 = vld [vmem:[#allocation24_spill] sm:$0xff] }
0x1208   :  { %v3618_v55 = vsel %vm1881_vm1, %v3596_v39, 0.0  ;;  %v3599_v16 = vpop.xlane.xlu0 %3598 }
0x120b   :  { %3601 = vadd.xlane.f32.xlu1 %v3600_v13 }
0x120c   :  { %v3605_v17 = vpop.xlane.xlu0 %3604 }
0x120f   :  { %3607 = vadd.xlane.f32.xlu1 %v3606_v29  ;;  %v14877_v29 = vmov 1.0|1.0  }
0x1210   :  { %v3611_v1 = vpop.xlane.xlu0 %3610 }
0x1213   :  { %3613 = vadd.xlane.f32.xlu1 %v3612_v42 }
0x1214   :  { %v3617_v42 = vpop.xlane.xlu0 %3616 }
0x1217   :  { %3619 = vadd.xlane.f32.xlu1 %v3618_v55 }
0x1294   :  { %v3472_v2 = vpop.xlane.xlu1 %3471 }
0x1295   :  { %v3473_v13 = vcvt.f32.s32 %v3472_v2  ;;  %v3625_v2 = vsel %vm1881_vm1, %v3611_v1, -inf }
0x1297   :  { %v3476_v38 = vadd.s32 %v3475_v41, %v3473_v13 }
0x1298   :  { %v3602_v20 = vpop.xlane.xlu1 %3601 }
0x1299   :  { %vm3477_vm10 = vcmp.eq.s32.totalorder %v14870_v9, %v3476_v38  ;;  %v3629_v38 = vsel %vm1881_vm1, %v3617_v42, -inf  ;;  %v3622_v41 = vsel %vm1881_vm1, %v3602_v20, -inf }
0x129a   :  { %vm6325_vm11 = vmpackc.low %vm3477_vm10, %vm3477_vm10 }
0x129b   :  { %6849 = vmatmul.mubr.msk.bf16.vlgmr.msra.gmra.mrb[56].mxu0 %vm6325_vm11, %v14877_v29 }
0x129c   :  { %v3608_v56 = vpop.xlane.xlu1 %3607  ;;  %3709 = vmatpush1.bf16.msra.mxu0 %v14878_v14  ;;  %v3621_v14 = vsel %vm1881_vm1, %v3599_v16, -inf }
0x129d   :  { %3710 = vmatprep.subr.bf16.mxu0 %v14879_v32  ;;  %v3623_v32 = vsel %vm1881_vm1, %v3605_v17, -inf }
0x129e   :  { %v3630_v9 = vmax.f32 %v3623_v32, %v3629_v38  ;;  %v14894_v32 = vld [vmem:[#allocation73_spill] sm:$0xff] }
0x12a0   :  { %v3614_v39 = vpop.xlane.xlu1 %3613  ;;  %3711 = vmatpush1.bf16.msra.mxu0 %v14880_v5  ;;  %v3624_v5 = vsel %vm1881_vm1, %v3608_v56, -inf }
0x12a1   :  { %v3627_v55 = vsel %vm1881_vm1, %v3614_v39, -inf  ;;  %3712 = vmatprep.subr.bf16.mxu0 %v14881_v33  ;;  %v3626_v33 = vmax.f32 %v3621_v14, %v3625_v2 }
0x12a2   :  { %v3628_v13 = vmax.f32 %v3622_v41, %v3627_v55  ;;  %v14884_v55 = vld [vmem:[#allocation12_spill] sm:$0xff] }
0x12a4   :  { %v3620_v29 = vpop.xlane.xlu1 %3619  ;;  %3713 = vmatpush1.bf16.msra.mxu0 %v14882_v22  ;;  %v3633_v26 = vmax.f32 %v3626_v33, %v3628_v13 }
0x12a5   :  { %v3631_v63 = vsel %vm1881_vm1, %v3620_v29, -inf  ;;  %3714 = vmatprep.subr.bf16.mxu0 %v14883_v50 }
0x12a6   :  { %v3632_v30 = vmax.f32 %v3624_v5, %v3631_v63 }
0x12a8   :  { %v3634_v31 = vmax.f32 %v3630_v9, %v3632_v30  ;;  %3715 = vmatpush1.bf16.msra.mxu0 %v10958_v35  ;;  %v14887_v30 = vld [vmem:[#allocation27_spill] sm:$0xff] }
0x12a9   :  { %3716 = vmatprep.subr.bf16.mxu0 %v14884_v55 }
0x12aa   :  { %v3635_v22 = vmax.f32 %v3633_v26, %v3634_v31  ;;  %v14888_v26 = vld [vmem:[#allocation28_spill] sm:$0xff] }
0x12ac   :  { %v3636_v41 = vsub.f32 %v3599_v16, %v3635_v22  ;;  %v3637_v36 = vsub.f32 %v3602_v20, %v3635_v22  ;;  %v3638_v59 = vsub.f32 %v3605_v17, %v3635_v22  ;;  %v3639_v60 = vsub.f32 %v3608_v56, %v3635_v22  ;;  %3717 = vmatpush1.bf16.msra.mxu0 %v14885_v7  ;;  %v14889_v16 = vld [vmem:[#allocation68_spill] sm:$0xff]  ;;  %v14892_v17 = vld [vmem:[#allocation71_spill] sm:$0xff] }
0x12ad   :  { %v3640_v19 = vsub.f32 %v3611_v1, %v3635_v22  ;;  %3718 = vmatprep.subr.bf16.mxu0 %v14886_v0  ;;  %v3641_v63 = vsub.f32 %v3614_v39, %v3635_v22  ;;  %v3642_v35 = vsub.f32 %v3617_v42, %v3635_v22  ;;  %v3643_v9 = vsub.f32 %v3620_v29, %v3635_v22  ;;  %v14893_v42 = vld [vmem:[#allocation72_spill] sm:$0xff] }
0x12ae   :  { %v3644_v50 = vmul.f32 1.442695, %v3636_v41  ;;  %v3646_v2 = vmul.f32 1.442695, %v3637_v36  ;;  %v3648_v38 = vmul.f32 1.442695, %v3638_v59 }
0x12af   :  { %v3650_v13 = vmul.f32 1.442695, %v3639_v60  ;;  %v3652_v31 = vmul.f32 1.442695, %v3640_v19  ;;  %v3654_v7 = vmul.f32 1.442695, %v3641_v63 }
0x12b0   :  { %7754 = vpow2.f32 %v3644_v50  ;;  %3719 = vmatpush1.bf16.msra.mxu0 %v14887_v30  ;;  %v3656_v0 = vmul.f32 1.442695, %v3642_v35  ;;  %v14890_v36 = vld [vmem:[#allocation69_spill] sm:$0xff]  ;;  %v3658_v60 = vmul.f32 1.442695, %v3643_v9  ;;  %v14891_v59 = vld [vmem:[#allocation70_spill] sm:$0xff] }
0x12b1   :  { %7756 = vpow2.f32 %v3646_v2  ;;  %3720 = vmatprep.subr.bf16.mxu0 %v14888_v26  ;;  %v14895_v41 = vld [vmem:[#allocation74_spill] sm:$0xff] }
0x12b2   :  { %7758 = vpow2.f32 %v3648_v38  ;;  %v14896_v38 = vld [vmem:[#allocation75_spill] sm:$0xff] }
0x12b3   :  { %7760 = vpow2.f32 %v3650_v13 }
0x12b4   :  { %3721 = vmatpush1.bf16.msra.mxu0 %v14889_v16  ;;  %7762 = vpow2.f32 %v3652_v31  ;;  %v14897_v31 = vld [vmem:[#allocation76_spill] sm:$0xff] }
0x12b5   :  { %3722 = vmatprep.subr.bf16.mxu0 %v14890_v36  ;;  %7764 = vpow2.f32 %v3654_v7  ;;  %v14898_v7 = vld [vmem:[#allocation77_spill] sm:$0xff] }
0x12b6   :  { %7766 = vpow2.f32 %v3656_v0 }
0x12b7   :  { %7768 = vpow2.f32 %v3658_v60  ;;  %v14899_v60 = vld [vmem:[#allocation78_spill] sm:$0xff] }
0x12b8   :  { %3723 = vmatpush1.bf16.msra.mxu0 %v14891_v59 }
0x12b9   :  { %3724 = vmatprep.subr.bf16.mxu0 %v14892_v17  ;;  %v14900_v17 = vld [vmem:[#allocation79_spill] sm:$0xff] }
0x12ba   :  { %v7755_v19 = vpop.eup %7754 }
0x12bb   :  { %v7757_v20 = vpop.eup %7756  ;;  %v3660_v1 = vsel %vm1881_vm1, %v7755_v19, 0.0 }
0x12bc   :  { %v7759_v29 = vpop.eup %7758  ;;  %v3661_v56 = vsel %vm1881_vm1, %v7757_v20, 0.0  ;;  %3725 = vmatpush1.bf16.msra.mxu0 %v14893_v42  ;;  %v14903_v42 = vld [vmem:[#allocation82_spill] sm:$0xff] }
0x12bd   :  { %v7761_v39 = vpop.eup %7760  ;;  %v3662_v14 = vadd.f32 %v3661_v56, %v3660_v1  ;;  %3726 = vmatprep.subr.bf16.mxu0 %v14894_v32  ;;  %v3663_v5 = vsel %vm1881_vm1, %v7759_v29, 0.0  ;;  %v14901_v1 = vld [vmem:[#allocation80_spill] sm:$0xff]  ;;  %v14902_v56 = vld [vmem:[#allocation81_spill] sm:$0xff] }
0x12be   :  { %v7763_v33 = vpop.eup %7762  ;;  %v3665_v22 = vsel %vm1881_vm1, %v7761_v39, 0.0  ;;  %v14905_v32 = vld [vmem:[#allocation84_spill] sm:$0xff] }
0x12bf   :  { %v3664_v55 = vadd.f32 %v3663_v5, %v3662_v14  ;;  %v7765_v50 = vpop.eup %7764  ;;  %v3667_v63 = vsel %vm1881_vm1, %v7763_v33, 0.0  ;;  %v14904_v14 = vld [vmem:[#allocation83_spill] sm:$0xff] }
0x12c0   :  { %3727 = vmatpush1.bf16.msra.mxu0 %v14895_v41  ;;  %v7767_v13 = vpop.eup %7766  ;;  %v3669_v35 = vsel %vm1881_vm1, %v7765_v50, 0.0 }
0x12c1   :  { %v3666_v2 = vadd.f32 %v3665_v22, %v3664_v55  ;;  %3728 = vmatprep.subr.bf16.mxu0 %v14896_v38  ;;  %v7769_v26 = vpop.eup %7768  ;;  %v3671_v16 = vsel %vm1881_vm1, %v7767_v13, 0.0  ;;  %v14906_v55 = vld [vmem:[#allocation85_spill] sm:$0xff] }
0x12c2   :  { %v3673_v36 = vsel %vm1881_vm1, %v7769_v26, 0.0 }
0x12c3   :  { %v3668_v30 = vadd.f32 %v3667_v63, %v3666_v2 }
0x12c4   :  { %3729 = vmatpush1.bf16.msra.mxu0 %v14897_v31  ;;  %v14908_v31 = vld [vmem:[#allocation87_spill] sm:$0xff] }
0x12c5   :  { %v3670_v9 = vadd.f32 %v3669_v35, %v3668_v30  ;;  %3730 = vmatprep.subr.bf16.mxu0 %v14898_v7  ;;  %v14907_v30 = vld [vmem:[#allocation86_spill] sm:$0xff]  ;;  %v14909_v7 = vld [vmem:[#allocation88_spill] sm:$0xff] }
0x12c7   :  { %v3672_v0 = vadd.f32 %v3671_v16, %v3670_v9 }
0x12c8   :  { %3731 = vmatpush1.bf16.msra.mxu0 %v14899_v60 }
0x12c9   :  { %v3674_v59 = vadd.f32 %v3673_v36, %v3672_v0  ;;  %3732 = vmatprep.subr.bf16.mxu0 %v14900_v17  ;;  %v14910_v0 = vld [vmem:[#allocation89_spill] sm:$0xff]  ;;  %v14911_v36 = vld [vmem:[#allocation90_spill] sm:$0xff] }
0x12cb   :  { %7770 = vrcp.f32 %v3674_v59  ;;  %v14912_v59 = vld [vmem:[#allocation91_spill] sm:$0xff] }
0x12cc   :  { %3733 = vmatpush1.bf16.msra.mxu0 %v14901_v1 }
0x12cd   :  { %3734 = vmatprep.subr.bf16.mxu0 %v14902_v56 }
0x12d0   :  { %3735 = vmatpush1.bf16.msra.mxu0 %v14903_v42 }
0x12d1   :  { %3736 = vmatprep.subr.bf16.mxu0 %v14904_v14 }
0x12d4   :  { %3737 = vmatpush1.bf16.msra.mxu0 %v14905_v32 }
0x12d5   :  { %v7771_v5 = vpop.eup %7770  ;;  %3738 = vmatprep.subr.bf16.mxu0 %v14906_v55 }
0x12d6   :  { %v3676_v22 = vmul.f32 %v7771_v5, %v7755_v19  ;;  %v3677_v41 = vmul.f32 %v7771_v5, %v7757_v20  ;;  %v3678_v2 = vmul.f32 %v7771_v5, %v7759_v29  ;;  %v3679_v38 = vmul.f32 %v7771_v5, %v7761_v39 }
0x12d7   :  { %v3680_v63 = vmul.f32 %v7771_v5, %v7763_v33  ;;  %v3681_v60 = vmul.f32 %v7771_v5, %v7765_v50  ;;  %v3682_v29 = vmul.f32 %v7771_v5, %v7767_v13  ;;  %v3683_v42 = vmul.f32 %v7771_v5, %v7769_v26 }
0x12d8   :  { %v3684_v35 = vmul.f32 %v14907_v30, %v3676_v22  ;;  %v3685_v9 = vmul.f32 %v14908_v31, %v3677_v41  ;;  %v3686_v16 = vmul.f32 %v14909_v7, %v3678_v2  ;;  %3739 = vmatpush1.bf16.msra.mxu0 %v14910_v0  ;;  %v3687_v17 = vmul.f32 %v14912_v59, %v3679_v38  ;;  %v6328_v31 = vld [vmem:[%s14137_s2 + $0x2] sm:$0x1]  ;;  %v11596_v59 = vld [vmem:[%s14145_s10 + $0x208] ss:$16 sps:$4 sm:$0xff]  }
0x12d9   :  { %3749 = vmatprep.subr.bf16.mxu0 %v14911_v36  ;;  %v3688_v39 = vmul.f32 %v11133_v47, %v3680_v63  ;;  %v3689_v14 = vmul.f32 %v11137_v37, %v3681_v60  ;;  %v3690_v50 = vmul.f32 %v11141_v18, %v3682_v29  ;;  %v3691_v2 = vmul.f32 %v11145_v49, %v3683_v42  ;;  %v11590_v60 = vld [vmem:[%s14145_s10 + $0x200] ss:$16 sps:$4 sm:$0xff]   ;;  %v11628_v29 = vld [vmem:[%s14145_s10 + $0x244] ss:$16 sps:$4 sm:$0xff]  }
0x12da   :  { %v3692_v1 = vsel %vm1881_vm1, %v3684_v35, 0.0  ;;  %v3693_v19 = vsel %vm1881_vm1, %v3685_v9, 0.0  ;;  %v3695_v33 = vsel %vm1881_vm1, %v3686_v16, 0.0  ;;  %v3697_v32 = vsel %vm1881_vm1, %v3687_v17, 0.0  ;;  %v11602_v17 = vld [vmem:[%s14145_s10 + $0x224] ss:$16 sps:$4 sm:$0xff]  }
0x12db   :  { %v3694_v20 = vadd.f32 %v3693_v19, %v3692_v1  ;;  %v3699_v22 = vsel %vm1881_vm1, %v3688_v39, 0.0  ;;  %v3701_v13 = vsel %vm1881_vm1, %v3689_v14, 0.0  ;;  %v3703_v47 = vsel %vm1881_vm1, %v3690_v50, 0.0  ;;  %v11608_v1 = vld [vmem:[%s14145_s10 + $0x22c] ss:$16 sps:$4 sm:$0xff]  }
0x12dc   :  { %v3705_v26 = vsel %vm1881_vm1, %v3691_v2, 0.0  ;;  %v3527_v18 = vstv %s3526_s11  ;;  %v11616_v19 = vld [vmem:[%s14145_s10 + $0x220] ss:$16 sps:$4 sm:$0xff]   ;;  %v11634_v39 = vld [vmem:[%s14145_s10 + $0x24c] ss:$16 sps:$4 sm:$0xff]  }
0x12dd   :  { %v3696_v56 = vadd.f32 %v3695_v33, %v3694_v20  ;;  %vm3528_vm12 = vcmp.eq.s32.totalorder %v3527_v18, 1  ;;  %v11622_v20 = vld [vmem:[%s14145_s10 + $0x228] ss:$16 sps:$4 sm:$0xff]   ;;  %v11640_v33 = vld [vmem:[%s14145_s10 + $0x240] ss:$16 sps:$4 sm:$0xff]  }
0x12de   :  { %v3529_v49 = vsel %vm3528_vm12, 1, %v14710_v3  ;;  %v11652_v42 = vld [vmem:[%s14145_s10 + $0x264] ss:$16 sps:$4 sm:$0xff]   ;;  %v11658_v14 = vld [vmem:[%s14145_s10 + $0x26c] ss:$16 sps:$4 sm:$0xff]  }
0x12df   :  { %v3698_v55 = vadd.f32 %v3697_v32, %v3696_v56  ;;  %v3530_v30 = vpack.c.b16 %v3529_v49, %v3529_v49  ;;  %v11646_v56 = vld [vmem:[%s14145_s10 + $0x248] ss:$16 sps:$4 sm:$0xff]   ;;  %v11664_v32 = vld [vmem:[%s14145_s10 + $0x260] ss:$16 sps:$4 sm:$0xff]   ;;  %v11676_v50 = vld [vmem:[%s14145_s10 + $0x284] ss:$16 sps:$4 sm:$0xff]  }
0x12e0   :  { %v11694_v2 = vld [vmem:[%s14145_s10 + $0x288] ss:$16 sps:$4 sm:$0xff]   ;;  %v11736_v18 = vld [vmem:[%s14145_s10 + $0x2c0] ss:$16 sps:$4 sm:$0xff]  }
0x12e1   :  { %v3700_v41 = vadd.f32 %v3699_v22, %v3698_v55  ;;  %vm3531_vm13 = vcmp.ne.s16.totalorder %v3530_v30, 0  ;;  %v11670_v55 = vld [vmem:[%s14145_s10 + $0x268] ss:$16 sps:$4 sm:$0xff]   ;;  %v11682_v22 = vld [vmem:[%s14145_s10 + $0x28c] ss:$16 sps:$4 sm:$0xff]   ;;  %14917 = vst [vmem:[#allocation50_spill] sm:$0xff] %v11736_v18 }
0x12e2   :  { %v11742_v49 = vld [vmem:[%s14145_s10 + $0x2c8] ss:$16 sps:$4 sm:$0xff]   ;;  %v11748_v30 = vld [vmem:[%s14145_s10 + $0x2e4] ss:$16 sps:$4 sm:$0xff]  }
0x12e3   :  { %v3702_v38 = vadd.f32 %v3701_v13, %v3700_v41  ;;  %v11688_v41 = vld [vmem:[%s14145_s10 + $0x280] ss:$16 sps:$4 sm:$0xff]   ;;  %v11700_v13 = vld [vmem:[%s14145_s10 + $0x2a4] ss:$16 sps:$4 sm:$0xff]   ;;  %14918 = vst [vmem:[#allocation52_spill] sm:$0xff] %v11742_v49  ;;  %14919 = vst [vmem:[#allocation38_spill] sm:$0xff] %v11748_v30 }
0x12e5   :  { %v3704_v63 = vadd.f32 %v3703_v47, %v3702_v38  ;;  %v11706_v38 = vld [vmem:[%s14145_s10 + $0x2ac] ss:$16 sps:$4 sm:$0xff]   ;;  %v11712_v47 = vld [vmem:[%s14145_s10 + $0x2a0] ss:$16 sps:$4 sm:$0xff]  }
0x12e6   :  { %14913 = vst [vmem:[#allocation36_spill] sm:$0xff] %v11712_v47 }
0x12e7   :  { %v3706_v5 = vadd.f32 %v3705_v26, %v3704_v63  ;;  %v11718_v63 = vld [vmem:[%s14145_s10 + $0x2a8] ss:$16 sps:$4 sm:$0xff]   ;;  %v11724_v26 = vld [vmem:[%s14145_s10 + $0x2c4] ss:$16 sps:$4 sm:$0xff]  }
0x12e8   :  { %14914 = vst [vmem:[#allocation47_spill] sm:$0xff] %v11718_v63  ;;  %14915 = vst [vmem:[#allocation49_spill] sm:$0xff] %v11724_v26 }
0x12e9   :  { %v11575_v37 = vpack.c.bf16 %v3706_v5, %v3706_v5  ;;  %v11730_v5 = vld [vmem:[%s14145_s10 + $0x2cc] ss:$16 sps:$4 sm:$0xff]  }
0x12ea   :  { %14916 = vst [vmem:[#allocation37_spill] sm:$0xff] %v11730_v5 }
0x12eb   :  { %3740 = vmatprep.mubr.bf16.mxu0 %v11575_v37  ;;  %3822 = vmatprep.mubr.bf16.mxu1 %v11575_v37 }
0x136e   :  { %v3515_v35 = vpop.f32.mrb[56].mxu0 }
0x136f   :  { %v3521_v9 = vpack.c.bf16 %v3515_v35, %v3515_v35  ;;  %v6850_v7 = vpop.f32.mrb[57].mxu0  ;;  %v11754_v35 = vld [vmem:[%s14145_s10 + $0x2ec] ss:$16 sps:$4 sm:$0xff]  }
0x1370   :  { %v3518_v16 = vpop.f32.mrb[58].mxu0  ;;  %14920 = vst [vmem:[#allocation53_spill] sm:$0xff] %v11754_v35  ;;  %v11773_v7 = vld [vmem:[%s14147_s12 + $0x40] sm:$0xff]  }
0x1371   :  { %v6851_v0 = vpop.f32.mrb[59].mxu0  ;;  %v11583_v36 = vsel %vm3531_vm13, %v6328_v31, %v3521_v9  ;;  %v11760_v31 = vld [vmem:[%s14145_s10 + $0x2e0] ss:$16 sps:$4 sm:$0xff]   ;;  %v11766_v9 = vld [vmem:[%s14145_s10 + $0x2e8] ss:$16 sps:$4 sm:$0xff]   ;;  %14923 = vst [vmem:[#allocation56_spill] sm:$0xff] %v11773_v7 }
0x1372   :  { %3741 = vmatmul.mubr.bf16.vlgmr.msra.gmra.mrb[60].mxu0 %v11583_v36  ;;  %3823 = vmatmul.mubr.bf16.vlgmr.msra.gmra.mrb[60].mxu1 %v11583_v36  ;;  %14921 = vst [vmem:[#allocation54_spill] sm:$0xff] %v11760_v31  ;;  %14922 = vst [vmem:[#allocation39_spill] sm:$0xff] %v11766_v9  ;;  %v11782_v16 = vld [vmem:[%s14147_s12 + $0x80] sm:$0xff]  }
0x1373   :  { %3750 = vmatpush1.bf16.msra.mxu0 %v11590_v60  ;;  %3832 = vmatpush1.bf16.msra.mxu1 %v11596_v59  ;;  %14924 = vst [vmem:[#allocation57_spill] sm:$0xff] %v11782_v16  ;;  %v11791_v0 = vld [vmem:[%s14147_s12] sm:$0xff]  }
0x1374   :  { %3751 = vmatprep.subr.bf16.mxu0 %v11602_v17  ;;  %3833 = vmatprep.subr.bf16.mxu1 %v11608_v1  ;;  %14925 = vst [vmem:[#allocation40_spill] sm:$0xff] %v11791_v0 }
0x1375   :  { %3781 = vmatprep.mubr.bf16.mxu0 %v14710_v3  ;;  %3863 = vmatprep.mubr.bf16.mxu1 %v14710_v3 }
0x1377   :  { %3752 = vmatpush1.bf16.msra.mxu0 %v11616_v19  ;;  %3834 = vmatpush1.bf16.msra.mxu1 %v11622_v20 }
0x1378   :  { %3753 = vmatprep.subr.bf16.mxu0 %v11628_v29  ;;  %3835 = vmatprep.subr.bf16.mxu1 %v11634_v39 }
0x137b   :  { %3754 = vmatpush1.bf16.msra.mxu0 %v11640_v33  ;;  %3836 = vmatpush1.bf16.msra.mxu1 %v11646_v56 }
0x137c   :  { %3755 = vmatprep.subr.bf16.mxu0 %v11652_v42  ;;  %3837 = vmatprep.subr.bf16.mxu1 %v11658_v14 }
0x137f   :  { %3756 = vmatpush1.bf16.msra.mxu0 %v11664_v32  ;;  %3838 = vmatpush1.bf16.msra.mxu1 %v11670_v55 }
0x1380   :  { %3757 = vmatprep.subr.bf16.mxu0 %v11676_v50  ;;  %3839 = vmatprep.subr.bf16.mxu1 %v11682_v22 }
0x1383   :  { %3758 = vmatpush1.bf16.msra.mxu0 %v11688_v41  ;;  %3840 = vmatpush1.bf16.msra.mxu1 %v11694_v2 }
0x1384   :  { %3759 = vmatprep.subr.bf16.mxu0 %v11700_v13  ;;  %3841 = vmatprep.subr.bf16.mxu1 %v11706_v38 }
0x1387   :  { %3760 = vmatpush1.bf16.msra.mxu0 %v11712_v47  ;;  %3842 = vmatpush1.bf16.msra.mxu1 %v11718_v63 }
0x1388   :  { %3761 = vmatprep.subr.bf16.mxu0 %v11724_v26  ;;  %3843 = vmatprep.subr.bf16.mxu1 %v11730_v5 }
0x138b   :  { %3762 = vmatpush1.bf16.msra.mxu0 %v11736_v18  ;;  %3844 = vmatpush1.bf16.msra.mxu1 %v11742_v49 }
0x138c   :  { %3763 = vmatprep.subr.bf16.mxu0 %v11748_v30  ;;  %3845 = vmatprep.subr.bf16.mxu1 %v11754_v35 }
0x138f   :  { %3764 = vmatpush1.bf16.msra.mxu0 %v11760_v31  ;;  %3846 = vmatpush1.bf16.msra.mxu1 %v11766_v9 }
0x1390   :  { %6872 = vmatprep.subr.bf16.mxu1 %v14720_v62  ;;  %6485 = vmatprep.subr.bf16.mxu0 %v11773_v7 }
0x1392   :  { %3782 = vmatmul.mubr.bf16.vlgmr.msra.gmra.mrb[60].mxu0 %v11263_v4  ;;  %3864 = vmatmul.mubr.bf16.vlgmr.msra.gmra.mrb[60].mxu1 %v11263_v4  ;;  %v11797_v4 = vld [vmem:[%s14147_s12 + $0x48] sm:$0xff]  }
0x1393   :  { %3929 = vmatprep.mubr.bf16.mxu0 %v11575_v37  ;;  %6873 = vmatpush3.bf16.msra.mxu1 %v11782_v16  ;;  %14926 = vst [vmem:[#allocation59_spill] sm:$0xff] %v11797_v4  ;;  %v11803_v37 = vld [vmem:[%s14147_s12 + $0x88] sm:$0xff]  }
0x1394   :  { %6874 = vmatprep.subr.bf16.mxu1 %v14720_v62  ;;  %6888 = vmatprep.mubr.msk.bf16.mxu1 %vm8499_vm0, %v14720_v62  ;;  %14927 = vst [vmem:[#allocation60_spill] sm:$0xff] %v11803_v37 }
0x1395   :  { %6486 = vmatpush3.bf16.msra.mxu0 %v11791_v0  ;;  %v11810_v0 = vld [vmem:[%s14147_s12 + $0x8] sm:$0xff]  }
0x1396   :  { %6487 = vmatprep.subr.bf16.mxu0 %v11797_v4  ;;  %14928 = vst [vmem:[#allocation41_spill] sm:$0xff] %v11810_v0  ;;  %v11816_v4 = vld [vmem:[%s14147_s12 + $0x50] sm:$0xff]  }
0x1397   :  { %6875 = vmatpush3.bf16.msra.mxu1 %v11803_v37  ;;  %14929 = vst [vmem:[#allocation62_spill] sm:$0xff] %v11816_v4  ;;  %v11822_v37 = vld [vmem:[%s14147_s12 + $0x90] sm:$0xff]  }
0x1398   :  { %6876 = vmatprep.subr.bf16.mxu1 %v14720_v62  ;;  %14930 = vst [vmem:[#allocation63_spill] sm:$0xff] %v11822_v37 }
0x1399   :  { %6488 = vmatpush3.bf16.msra.mxu0 %v11810_v0  ;;  %v11829_v0 = vld [vmem:[%s14147_s12 + $0x10] sm:$0xff]  }
0x139a   :  { %6489 = vmatprep.subr.bf16.mxu0 %v11816_v4  ;;  %14931 = vst [vmem:[#allocation42_spill] sm:$0xff] %v11829_v0  ;;  %v11835_v4 = vld [vmem:[%s14147_s12 + $0x58] sm:$0xff]  }
0x139b   :  { %6877 = vmatpush3.bf16.msra.mxu1 %v11822_v37  ;;  %14932 = vst [vmem:[#allocation65_spill] sm:$0xff] %v11835_v4  ;;  %v11841_v37 = vld [vmem:[%s14147_s12 + $0x98] sm:$0xff]  }
0x139c   :  { %6878 = vmatprep.subr.bf16.mxu1 %v14720_v62  ;;  %14933 = vst [vmem:[#allocation45_spill] sm:$0xff] %v11841_v37 }
0x139d   :  { %6490 = vmatpush3.bf16.msra.mxu0 %v11829_v0  ;;  %v11848_v0 = vld [vmem:[%s14147_s12 + $0x18] sm:$0xff]  }
0x139e   :  { %6491 = vmatprep.subr.bf16.mxu0 %v11835_v4  ;;  %14934 = vst [vmem:[#allocation48_spill] sm:$0xff] %v11848_v0  ;;  %v11854_v4 = vld [vmem:[%s14147_s12 + $0x60] sm:$0xff]  }
0x139f   :  { %6879 = vmatpush3.bf16.msra.mxu1 %v11841_v37  ;;  %14935 = vst [vmem:[#allocation51_spill] sm:$0xff] %v11854_v4  ;;  %v11860_v37 = vld [vmem:[%s14147_s12 + $0xa0] sm:$0xff]  }
0x13a0   :  { %6880 = vmatprep.subr.bf16.mxu1 %v14720_v62  ;;  %14936 = vst [vmem:[#allocation55_spill] sm:$0xff] %v11860_v37 }
0x13a1   :  { %6492 = vmatpush3.bf16.msra.mxu0 %v11848_v0  ;;  %v11867_v0 = vld [vmem:[%s14147_s12 + $0x20] sm:$0xff]  }
0x13a2   :  { %6493 = vmatprep.subr.bf16.mxu0 %v11854_v4  ;;  %14937 = vst [vmem:[#allocation58_spill] sm:$0xff] %v11867_v0  ;;  %v11873_v4 = vld [vmem:[%s14147_s12 + $0x68] sm:$0xff]  }
0x13a3   :  { %6881 = vmatpush3.bf16.msra.mxu1 %v11860_v37  ;;  %14938 = vst [vmem:[#allocation61_spill] sm:$0xff] %v11873_v4  ;;  %v11879_v37 = vld [vmem:[%s14147_s12 + $0xa8] sm:$0xff]  }
0x13a4   :  { %6882 = vmatprep.subr.bf16.mxu1 %v14720_v62  ;;  %14939 = vst [vmem:[#allocation64_spill] sm:$0xff] %v11879_v37 }
0x13a5   :  { %6494 = vmatpush3.bf16.msra.mxu0 %v11867_v0  ;;  %v11886_v0 = vld [vmem:[%s14147_s12 + $0x28] sm:$0xff]  }
0x13a6   :  { %6495 = vmatprep.subr.bf16.mxu0 %v11873_v4  ;;  %14940 = vst [vmem:[#allocation66_spill] sm:$0xff] %v11886_v0  ;;  %v11892_v4 = vld [vmem:[%s14147_s12 + $0x70] sm:$0xff]  }
0x13a7   :  { %6883 = vmatpush3.bf16.msra.mxu1 %v11879_v37  ;;  %14941 = vst [vmem:[#allocation15_spill] sm:$0xff] %v11892_v4  ;;  %v11898_v37 = vld [vmem:[%s14147_s12 + $0xb0] sm:$0xff]  }
0x13a8   :  { %6884 = vmatprep.subr.bf16.mxu1 %v14720_v62  ;;  %14942 = vst [vmem:[#allocation20_spill] sm:$0xff] %v11898_v37 }
0x13a9   :  { %6496 = vmatpush3.bf16.msra.mxu0 %v11886_v0  ;;  %v11905_v0 = vld [vmem:[%s14147_s12 + $0x30] sm:$0xff]  }
0x13aa   :  { %6497 = vmatprep.subr.bf16.mxu0 %v11892_v4  ;;  %14943 = vst [vmem:[#allocation18_spill] sm:$0xff] %v11905_v0  ;;  %v11911_v4 = vld [vmem:[%s14147_s12 + $0x78] sm:$0xff]  }
0x13ab   :  { %6885 = vmatpush3.bf16.msra.mxu1 %v11898_v37  ;;  %14944 = vst [vmem:[#allocation21_spill] sm:$0xff] %v11911_v4  ;;  %v11917_v37 = vld [vmem:[%s14147_s12 + $0xb8] sm:$0xff]  }
0x13ac   :  { %6886 = vmatprep.subr.bf16.mxu1 %v14720_v62  ;;  %14945 = vst [vmem:[#allocation24_spill] sm:$0xff] %v11917_v37 }
0x13ad   :  { %6498 = vmatpush3.bf16.msra.mxu0 %v11905_v0  ;;  %v11924_v0 = vld [vmem:[%s14147_s12 + $0x38] sm:$0xff]  }
0x13ae   :  { %6499 = vmatprep.subr.bf16.mxu0 %v11911_v4  ;;  %14946 = vst [vmem:[#allocation25_spill] sm:$0xff] %v11924_v0  ;;  %v11932_v4 = vld [vmem:[%s14142_s7] sm:$0xff]  }
0x13af   :  { %6887 = vmatpush3.bf16.msra.mxu1 %v11917_v37  ;;  %14947 = vst [vmem:[#allocation7_spill] sm:$0xff] %v11932_v4 }
0x13b0   :  { %6912 = vmatprep.subr.bf16.mxu1 %v14720_v62 }
0x13b1   :  { %6500 = vmatpush3.bf16.msra.mxu0 %v11924_v0  ;;  %v11941_v0 = vld [vmem:[%s14142_s7 + $0x8] sm:$0xff]  }
0x13b2   :  { %6889 = vmatmul.mubr.bf16.vlgmr.msra.gmra.mrb[64].mxu1 %v11583_v36  ;;  %6892 = vmatprep.subr.bf16.mxu0 %v14720_v62  ;;  %14948 = vst [vmem:[#allocation12_spill] sm:$0xff] %v11941_v0  ;;  %v11948_v36 = vld [vmem:[%s14142_s7 + $0x10] sm:$0xff]  }
0x13b3   :  { %6913 = vmatpush3.bf16.msra.mxu1 %v11932_v4  ;;  %6928 = vmatprep.mubr.msk.bf16.mxu1 %vm8499_vm0, %v14720_v62  ;;  %14949 = vst [vmem:[#allocation8_spill] sm:$0xff] %v11948_v36  ;;  %v11955_v4 = vld [vmem:[%s14142_s7 + $0x18] sm:$0xff]  }
0x13b4   :  { %6914 = vmatprep.subr.bf16.mxu1 %v14720_v62  ;;  %14950 = vst [vmem:[#allocation26_spill] sm:$0xff] %v11955_v4 }
0x13b7   :  { %6915 = vmatpush3.bf16.msra.mxu1 %v11941_v0  ;;  %v11962_v0 = vld [vmem:[%s14142_s7 + $0x20] sm:$0xff]  }
0x13b8   :  { %6916 = vmatprep.subr.bf16.mxu1 %v14720_v62  ;;  %14951 = vst [vmem:[#allocation27_spill] sm:$0xff] %v11962_v0 }
0x13bb   :  { %6917 = vmatpush3.bf16.msra.mxu1 %v11948_v36  ;;  %v11969_v36 = vld [vmem:[%s14142_s7 + $0x28] sm:$0xff]  }
0x13bc   :  { %6918 = vmatprep.subr.bf16.mxu1 %v14720_v62  ;;  %14952 = vst [vmem:[#allocation28_spill] sm:$0xff] %v11969_v36 }
0x13bf   :  { %6919 = vmatpush3.bf16.msra.mxu1 %v11955_v4  ;;  %v11976_v4 = vld [vmem:[%s14142_s7 + $0x30] sm:$0xff]  }
0x13c0   :  { %6920 = vmatprep.subr.bf16.mxu1 %v14720_v62  ;;  %14953 = vst [vmem:[#allocation68_spill] sm:$0xff] %v11976_v4 }
0x13c3   :  { %6921 = vmatpush3.bf16.msra.mxu1 %v11962_v0  ;;  %v11983_v0 = vld [vmem:[%s14142_s7 + $0x38] sm:$0xff]  }
0x13c4   :  { %6922 = vmatprep.subr.bf16.mxu1 %v14720_v62  ;;  %14954 = vst [vmem:[#allocation69_spill] sm:$0xff] %v11983_v0 }
0x13c7   :  { %6923 = vmatpush3.bf16.msra.mxu1 %v11969_v36 }
0x13c8   :  { %6924 = vmatprep.subr.bf16.mxu1 %v14720_v62 }
0x13cb   :  { %6925 = vmatpush3.bf16.msra.mxu1 %v11976_v4 }
0x13cc   :  { %6926 = vmatprep.subr.bf16.mxu1 %v14720_v62 }
0x13cf   :  { %6927 = vmatpush3.bf16.msra.mxu1 %v11983_v0 }
0x13d0   :  { %4312 = vmatprep.subr.bf16.mxu1 %v11250_v58 }
0x1465   :  { %v3783_v36 = vpop.f32.mrb[60].mxu0  ;;  %v3865_v37 = vpop.f32.mrb[60].mxu1 }
0x1466   :  { %v7140_v16 = vadd.f32 %v3783_v36, %v14856_v53  ;;  %v3785_v7 = vpop.f32.mrb[61].mxu0  ;;  %v3867_v9 = vpop.f32.mrb[61].mxu1  ;;  %v7142_v58 = vadd.f32 %v3865_v37, %v10749_v15 }
0x1467   :  { %v7141_v31 = vadd.f32 %v3785_v7, %v10738_v24  ;;  %v3787_v4 = vpop.f32.mrb[62].mxu0  ;;  %v3869_v35 = vpop.f32.mrb[62].mxu1  ;;  %v7143_v0 = vadd.f32 %v3867_v9, %v10744_v52 }
0x1468   :  { %v6329_v30 = vmul.f32 -1.442695, %v7140_v16  ;;  %v3788_v49 = vpop.f32.mrb[63].mxu0  ;;  %v3870_v18 = vpop.f32.mrb[63].mxu1 }
0x1469   :  { %v6330_v5 = vmul.f32 -1.442695, %v7141_v31  ;;  %v6331_v26 = vmul.f32 -1.442695, %v7143_v0 }
0x146a   :  { %7772 = vpow2.f32 %v6329_v30 }
0x146b   :  { %7774 = vpow2.f32 %v6330_v5 }
0x146c   :  { %7776 = vpow2.f32 %v6331_v26 }
0x146d   :  { %7778 = vtanh.f32 %v7142_v58  ;;  %v12015_v58 = vld [vmem:[%s14138_s3 + $0x8] sm:$0xff]  }
0x1474   :  { %v7773_v63 = vpop.eup %7772 }
0x1475   :  { %v7775_v47 = vpop.eup %7774  ;;  %v3875_v36 = vadd.f32 1.0, %v7773_v63 }
0x1476   :  { %v3881_v53 = vadd.f32 1.0, %v7775_v47  ;;  %v7777_v35 = vpop.eup %7776 }
0x1477   :  { %7780 = vrcp.f32 %v3875_v36  ;;  %v7779_v7 = vpop.eup %7778  ;;  %v3888_v30 = vadd.f32 1.0, %v7777_v35  ;;  %v12024_v36 = vld [vmem:[%s14138_s3 + $0x10] sm:$0xff]  }
0x1478   :  { %7782 = vrcp.f32 %v3881_v53 }
0x1479   :  { %7784 = vrcp.f32 %v3888_v30 }
0x1481   :  { %v7781_v49 = vpop.eup %7780 }
0x1482   :  { %v7783_v18 = vpop.eup %7782  ;;  %v3892_v31 = vmul.f32 %v7781_v49, %v7779_v7 }
0x1483   :  { %v3891_v5 = vmul.f32 %v7783_v18, %v11258_v43  ;;  %v7785_v26 = vpop.eup %7784  ;;  %v12004_v43 = vld [vmem:[%s14138_s3] sm:$0xff]  }
0x1485   :  { %v11992_v9 = vadd.f32 %v3892_v31, %v3891_v5  ;;  %v11994_v16 = vpop.f32.mrb[64].mxu1 }
0x1486   :  { %v6890_v0 = vpop.f32.mrb[65].mxu1 }
0x1487   :  { %v3974_v63 = vpop.f32.mrb[66].mxu1  ;;  %7786 = vtanh.f32 %v11992_v9  ;;  %v12099_v0 = vld [vmem:[%s14148_s13] ss:$0 sm:$0xff] }
0x1488   :  { %v6891_v47 = vpop.f32.mrb[67].mxu1 }
0x1491   :  { %v7787_v53 = vpop.eup %7786 }
0x1492   :  { %v3895_v4 = vmul.f32 %v7787_v53, %v7785_v26  ;;  %v14967_v53 = vld [vmem:[#allocation6_spill] sm:$0xff] }
0x1494   :  { %v11997_v37 = vpack.c.bf16 %v3895_v4, %v3895_v4 }
0x1496   :  { %3930 = vmatmul.mubr.bf16.vlgmr.msra.gmra.mrb[64].mxu0 %v11997_v37  ;;  %6929 = vmatmul.mubr.bf16.vlgmr.msra.gmra.mrb[68].mxu1 %v11997_v37 }
0x1497   :  { %6893 = vmatpush3.bf16.msra.mxu0 %v12004_v43  ;;  %6908 = vmatprep.mubr.msk.bf16.mxu0 %vm8499_vm0, %v14720_v62 }
0x1498   :  { %6894 = vmatprep.subr.bf16.mxu0 %v14720_v62  ;;  %4313 = vmatpush1.bf16.msra.mxu1 %v11274_v8  ;;  %v12033_v8 = vld [vmem:[%s14138_s3 + $0x18] sm:$0xff]  }
0x1499   :  { %4314 = vmatprep.subr.bf16.mxu1 %v11280_v34  ;;  %v12042_v34 = vld [vmem:[%s14138_s3 + $0x20] sm:$0xff]  }
0x149b   :  { %6895 = vmatpush3.bf16.msra.mxu0 %v12015_v58 }
0x149c   :  { %6896 = vmatprep.subr.bf16.mxu0 %v14720_v62  ;;  %4315 = vmatpush1.bf16.msra.mxu1 %v11288_v48  ;;  %v12051_v48 = vld [vmem:[%s14138_s3 + $0x28] sm:$0xff]  }
0x149d   :  { %4316 = vmatprep.subr.bf16.mxu1 %v11294_v25  ;;  %v12060_v25 = vld [vmem:[%s14138_s3 + $0x30] sm:$0xff]  }
0x149f   :  { %6897 = vmatpush3.bf16.msra.mxu0 %v12024_v36 }
0x14a0   :  { %6898 = vmatprep.subr.bf16.mxu0 %v14720_v62  ;;  %4317 = vmatpush1.bf16.msra.mxu1 %v11302_v11  ;;  %v12069_v11 = vld [vmem:[%s14138_s3 + $0x38] sm:$0xff]  }
0x14a1   :  { %4318 = vmatprep.subr.bf16.mxu1 %v11308_v10  ;;  %v12075_v10 = vld [vmem:[%s14145_s10 + $0x4] ss:$16 sps:$4 sm:$0xff]  }
0x14a3   :  { %6899 = vmatpush3.bf16.msra.mxu0 %v12033_v8 }
0x14a4   :  { %6900 = vmatprep.subr.bf16.mxu0 %v14720_v62  ;;  %4319 = vmatpush1.bf16.msra.mxu1 %v11316_v12  ;;  %v14955_v12 = vld [vmem:[#allocation29_spill] sm:$0xff] }
0x14a5   :  { %4320 = vmatprep.subr.bf16.mxu1 %v11322_v27  ;;  %v14956_v27 = vld [vmem:[#allocation23_spill] sm:$0xff] }
0x14a7   :  { %6901 = vmatpush3.bf16.msra.mxu0 %v12042_v34 }
0x14a8   :  { %6902 = vmatprep.subr.bf16.mxu0 %v14720_v62  ;;  %4321 = vmatpush1.bf16.msra.mxu1 %v11330_v6  ;;  %v14957_v6 = vld [vmem:[#allocation22_spill] sm:$0xff] }
0x14a9   :  { %4322 = vmatprep.subr.bf16.mxu1 %v11336_v51  ;;  %v14958_v51 = vld [vmem:[#allocation30_spill] sm:$0xff] }
0x14ab   :  { %6903 = vmatpush3.bf16.msra.mxu0 %v12051_v48 }
0x14ac   :  { %6904 = vmatprep.subr.bf16.mxu0 %v14720_v62  ;;  %4323 = vmatpush1.bf16.msra.mxu1 %v11344_v23  ;;  %v14959_v23 = vld [vmem:[#allocation31_spill] sm:$0xff] }
0x14ad   :  { %4324 = vmatprep.subr.bf16.mxu1 %v11350_v46  ;;  %v14960_v46 = vld [vmem:[#allocation32_spill] sm:$0xff] }
0x14af   :  { %6905 = vmatpush3.bf16.msra.mxu0 %v12060_v25 }
0x14b0   :  { %6906 = vmatprep.subr.bf16.mxu0 %v14720_v62  ;;  %4325 = vmatpush1.bf16.msra.mxu1 %v11358_v61  ;;  %v14961_v61 = vld [vmem:[#allocation33_spill] sm:$0xff] }
0x14b1   :  { %4326 = vmatprep.subr.bf16.mxu1 %v11364_v21  ;;  %v14962_v21 = vld [vmem:[#allocation34_spill] sm:$0xff] }
0x14b3   :  { %6907 = vmatpush3.bf16.msra.mxu0 %v12069_v11 }
0x14b4   :  { %4230 = vmatprep.subr.bf16.mxu0 %v12075_v10  ;;  %4327 = vmatpush1.bf16.msra.mxu1 %v11372_v45  ;;  %v14963_v45 = vld [vmem:[#allocation43_spill] sm:$0xff] }
0x14b5   :  { %4328 = vmatprep.subr.bf16.mxu1 %v11378_v28  ;;  %v14964_v28 = vld [vmem:[#allocation35_spill] sm:$0xff] }
0x14b8   :  { %4329 = vmatpush1.bf16.msra.mxu1 %v11384_v57  ;;  %v14965_v57 = vld [vmem:[#allocation44_spill] sm:$0xff] }
0x14b9   :  { %4330 = vmatprep.subr.bf16.mxu1 %v11390_v54  ;;  %v14966_v54 = vld [vmem:[#allocation46_spill] sm:$0xff] }
0x14bc   :  { %4331 = vmatpush1.bf16.msra.mxu1 %v11396_v40 }
0x14bd   :  { %4332 = vmatprep.subr.bf16.mxu1 %v11402_v44 }
0x14c0   :  { %4333 = vmatpush1.bf16.msra.mxu1 %v14955_v12  ;;  %v14968_v12 = vld [vmem:[#allocation9_spill] sm:$0xff] }
0x14c1   :  { %4334 = vmatprep.subr.bf16.mxu1 %v14956_v27 }
0x14c4   :  { %4335 = vmatpush1.bf16.msra.mxu1 %v14957_v6  ;;  %v14969_v6 = vld [vmem:[#allocation11_spill] sm:$0xff] }
0x14c5   :  { %4336 = vmatprep.subr.bf16.mxu1 %v14958_v51 }
0x14c8   :  { %4337 = vmatpush1.bf16.msra.mxu1 %v14959_v23 }
0x14c9   :  { %4338 = vmatprep.subr.bf16.mxu1 %v14960_v46  ;;  %v14970_v46 = vld [vmem:[#allocation19_spill] sm:$0xff] }
0x14cc   :  { %4339 = vmatpush1.bf16.msra.mxu1 %v14961_v61 }
0x14cd   :  { %4340 = vmatprep.subr.bf16.mxu1 %v14962_v21 }
0x14d0   :  { %4341 = vmatpush1.bf16.msra.mxu1 %v14963_v45 }
0x14d1   :  { %4342 = vmatprep.subr.bf16.mxu1 %v14964_v28 }
0x14d4   :  { %4343 = vmatpush1.bf16.msra.mxu1 %v14965_v57 }
0x14d5   :  { %4353 = vmatprep.subr.bf16.mxu1 %v14966_v54 }
0x1569   :  { %v6501_v40 = vpop.f32.mrb[64].mxu0  ;;  %v4089_v44 = vpop.f32.mrb[68].mxu1 }
0x156a   :  { %v6502_v35 = vpop.f32.mrb[65].mxu0  ;;  %v6930_v7 = vpop.f32.mrb[69].mxu1  ;;  %v4095_v4 = vadd.f32 %v4089_v44, %v14967_v53  ;;  %v4097_v27 = vadd.f32 %v4089_v44, %v14968_v12  ;;  %v4099_v51 = vadd.f32 %v4089_v44, %v14969_v6 }
0x156b   :  { %v6503_v49 = vadd.f32 %v6502_v35, %v6501_v40  ;;  %v6504_v18 = vpop.f32.mrb[66].mxu0  ;;  %v4092_v31 = vpop.f32.mrb[70].mxu1  ;;  %v12116_v40 = vld [vmem:[%s14144_s9] ss:$0 sm:$0xff] }
0x156c   :  { %v6505_v30 = vpop.f32.mrb[67].mxu0  ;;  %v6931_v5 = vpop.f32.mrb[71].mxu1  ;;  %7788 = vtanh.f32 %v4095_v4  ;;  %14972 = vst [vmem:[#allocation70_spill] sm:$0xff] %v12116_v40 }
0x156d   :  { %v3932_v63 = vadd.f32 %v12099_v0, %v6503_v49  ;;  %7790 = vtanh.f32 %v4097_v27  ;;  %v14973_v27 = vld [vmem:[#allocation13_spill] sm:$0xff] }
0x156e   :  { %7792 = vtanh.f32 %v4099_v51  ;;  %v4096_v51 = vadd.f32 %v4089_v44, %v14973_v27 }
0x156f   :  { %v3972_v47 = vadd.f32 %v11994_v16, %v3932_v63  ;;  %v14971_v16 = vld [vmem:[#allocation17_spill] sm:$0xff] }
0x1570   :  { %v4101_v21 = vadd.f32 %v4089_v44, %v14971_v16  ;;  %v12193_v16 = vld [vmem:[%s14145_s10 + $0x84] ss:$16 sps:$4 sm:$0xff]  }
0x1571   :  { %6332 = vst [vmem:[%s14149_s14 + $0x4] sm:$0x3] %v3972_v47  ;;  %v3979_v26 = vsel %vm1881_vm1, %v3972_v47, -inf  ;;  %14984 = vst [vmem:[#allocation77_spill] sm:$0xff] %v12193_v16 }
0x1572   :  { %3980 = vmax.xlane.f32.xlu0 %v3979_v26  ;;  %7794 = vtanh.f32 %v4101_v21  ;;  %v14975_v21 = vld [vmem:[#allocation16_spill] sm:$0xff] }
0x1573   :  { %7796 = vtanh.f32 %v4096_v51 }
0x1576   :  { %v7789_v28 = vpop.eup %7788 }
0x1577   :  { %v4111_v35 = vmul.f32 %v12116_v40, %v7789_v28  ;;  %v7791_v7 = vpop.eup %7790  ;;  %v4100_v28 = vadd.f32 %v4089_v44, %v14975_v21 }
0x1578   :  { %v4113_v18 = vmul.f32 %v12116_v40, %v7791_v7  ;;  %v7793_v31 = vpop.eup %7792 }
0x1579   :  { %v4119_v49 = vsel %vm1881_vm1, %v4111_v35, 0.0  ;;  %v4115_v5 = vmul.f32 %v12116_v40, %v7793_v31  ;;  %v14976_v35 = vld [vmem:[#allocation14_spill] sm:$0xff] }
0x157a   :  { %v4125_v30 = vsel %vm1881_vm1, %v4113_v18, 0.0  ;;  %v4102_v7 = vadd.f32 %v4089_v44, %v14976_v35 }
0x157c   :  { %v7795_v63 = vpop.eup %7794 }
0x157d   :  { %v4117_v26 = vmul.f32 %v12116_v40, %v7795_v63 }
0x157f   :  { %v4137_v4 = vsel %vm1881_vm1, %v4117_v26, 0.0 }
0x15ff   :  { %v3981_v23 = vpop.xlane.xlu0 %3980 }
0x1600   :  { %vm3982_vm14 = vcmp.eq.f32.partialorder %v3972_v47, %v3981_v23  ;;  %v4131_v47 = vsel %vm1881_vm1, %v4115_v5, 0.0  ;;  %v14974_v23 = vld [vmem:[#allocation10_spill] sm:$0xff] }
0x1601   :  { %v3983_v61 = vsel %vm3982_vm14, %v14970_v46, 128 }
0x1602   :  { %v3984_v45 = vsel %vm1881_vm1, %v3983_v61, 2147483647  ;;  %v4098_v61 = vadd.f32 %v4089_v44, %v14974_v23 }
0x1603   :  { %v3986_v57 = vshra.s32 %v3984_v45, 16 }
0x1604   :  { %7798 = vtanh.f32 %v4098_v61 }
0x1605   :  { %v3988_v54 = vcvt.s32.f32 %v3986_v57  ;;  %v3985_v57 = vand.u32 65535, %v3984_v45  ;;  %7800 = vtanh.f32 %v4100_v28 }
0x1606   :  { %7802 = vtanh.f32 %v4102_v7 }
0x1607   :  { %3989 = vmin.xlane.f32.xlu1 %v3988_v54  ;;  %v3987_v31 = vcvt.s32.f32 %v3985_v57 }
0x160b   :  { %4120 = vadd.xlane.f32.xlu1 %v4119_v49  ;;  %v7797_v49 = vpop.eup %7796 }
0x160c   :  { %v4112_v5 = vmul.f32 %v12116_v40, %v7797_v49 }
0x160e   :  { %v7799_v63 = vpop.eup %7798 }
0x160f   :  { %4126 = vadd.xlane.f32.xlu1 %v4125_v30  ;;  %v4114_v26 = vmul.f32 %v12116_v40, %v7799_v63 }
0x1611   :  { %v4128_v45 = vsel %vm1881_vm1, %v4114_v26, 0.0 }
0x1613   :  { %4132 = vadd.xlane.f32.xlu1 %v4131_v47  ;;  %v4122_v47 = vsel %vm1881_vm1, %v4112_v5, 0.0 }
0x1617   :  { %4138 = vadd.xlane.f32.xlu1 %v4137_v4  ;;  %v7801_v4 = vpop.eup %7800 }
0x1618   :  { %v4116_v44 = vmul.f32 %v12116_v40, %v7801_v4  ;;  %v7803_v51 = vpop.eup %7802  ;;  %v14977_v4 = vmov 1.0|1.0  }
0x1619   :  { %v4118_v61 = vmul.f32 %v12116_v40, %v7803_v51  ;;  %v12187_v40 = vld [vmem:[%s14145_s10 + $0x60] ss:$16 sps:$4 sm:$0xff]  }
0x161b   :  { %v4140_v28 = vsel %vm1881_vm1, %v4118_v61, 0.0  ;;  %v12155_v61 = vld [vmem:[%s14145_s10 + $0x20] ss:$16 sps:$4 sm:$0xff]  }
0x161c   :  { %14980 = vst [vmem:[#allocation73_spill] sm:$0xff] %v12155_v61 }
0x1694   :  { %v3990_v18 = vpop.xlane.xlu1 %3989 }
0x1695   :  { %vm3991_vm15 = vcmp.eq.f32.partialorder %v3988_v54, %v3990_v18  ;;  %v4134_v54 = vsel %vm1881_vm1, %v4116_v44, 0.0  ;;  %v3996_v7 = vcvt.f32.s32 %v3990_v18  ;;  %v12143_v44 = vld [vmem:[%s14145_s10] ss:$16 sps:$4 sm:$0xff]   ;;  %v12149_v18 = vld [vmem:[%s14145_s10 + $0x24] ss:$16 sps:$4 sm:$0xff]  }
0x1696   :  { %v3992_v30 = vsel %vm3991_vm15, %v3987_v31, inf  ;;  %14978 = vst [vmem:[#allocation71_spill] sm:$0xff] %v12143_v44  ;;  %14979 = vst [vmem:[#allocation72_spill] sm:$0xff] %v12149_v18 }
0x1697   :  { %3993 = vmin.xlane.f32.xlu0 %v3992_v30  ;;  %v3997_v30 = vshll.u32 %v3996_v7, 16  ;;  %v12162_v7 = vld [vmem:[%s14145_s10 + $0x44] ss:$16 sps:$4 sm:$0xff]  }
0x1698   :  { %v4121_v57 = vpop.xlane.xlu1 %4120  ;;  %14981 = vst [vmem:[#allocation74_spill] sm:$0xff] %v12162_v7 }
0x169b   :  { %4123 = vadd.xlane.f32.xlu0 %v4122_v47 }
0x169c   :  { %v4127_v49 = vpop.xlane.xlu1 %4126 }
0x169f   :  { %4129 = vadd.xlane.f32.xlu0 %v4128_v45 }
0x16a0   :  { %v4133_v26 = vpop.xlane.xlu1 %4132 }
0x16a3   :  { %4135 = vadd.xlane.f32.xlu0 %v4134_v54 }
0x16a4   :  { %v4139_v51 = vpop.xlane.xlu1 %4138 }
0x16a7   :  { %4141 = vadd.xlane.f32.xlu0 %v4140_v28 }
0x1724   :  { %v3994_v31 = vpop.xlane.xlu0 %3993 }
0x1725   :  { %v3995_v5 = vcvt.f32.s32 %v3994_v31  ;;  %v4147_v31 = vsel %vm1881_vm1, %v4133_v26, -inf }
0x1727   :  { %v3998_v63 = vadd.s32 %v3997_v30, %v3995_v5  ;;  %v4151_v30 = vsel %vm1881_vm1, %v4139_v51, -inf }
0x1728   :  { %v4124_v47 = vpop.xlane.xlu0 %4123 }
0x1729   :  { %vm3999_vm2 = vcmp.eq.s32.totalorder %v14970_v46, %v3998_v63  ;;  %v4144_v5 = vsel %vm1881_vm1, %v4124_v47, -inf }
0x172a   :  { %vm6334_vm3 = vmpackc.low %vm3999_vm2, %vm3999_vm2 }
0x172b   :  { %6909 = vmatmul.mubr.msk.bf16.vlgmr.msra.gmra.mrb[68].mxu0 %vm6334_vm3, %v14977_v4  ;;  %v4145_v4 = vsel %vm1881_vm1, %v4127_v49, -inf }
0x172c   :  { %v4130_v45 = vpop.xlane.xlu0 %4129  ;;  %4231 = vmatpush1.bf16.msra.mxu0 %v12143_v44  ;;  %v4143_v44 = vsel %vm1881_vm1, %v4121_v57, -inf  ;;  %v4152_v21 = vmax.f32 %v4145_v4, %v4151_v30 }
0x172d   :  { %4232 = vmatprep.subr.bf16.mxu0 %v12149_v18 }
0x1730   :  { %v4136_v54 = vpop.xlane.xlu0 %4135  ;;  %4233 = vmatpush1.bf16.msra.mxu0 %v12155_v61  ;;  %v12171_v61 = vld [vmem:[%s14145_s10 + $0x40] ss:$16 sps:$4 sm:$0xff]  }
0x1731   :  { %v4149_v28 = vsel %vm1881_vm1, %v4136_v54, -inf  ;;  %4234 = vmatprep.subr.bf16.mxu0 %v12162_v7  ;;  %14982 = vst [vmem:[#allocation75_spill] sm:$0xff] %v12171_v61  ;;  %v4146_v7 = vsel %vm1881_vm1, %v4130_v45, -inf }
0x1732   :  { %v4150_v63 = vmax.f32 %v4144_v5, %v4149_v28  ;;  %v12181_v28 = vld [vmem:[%s14145_s10 + $0x64] ss:$16 sps:$4 sm:$0xff]   ;;  %v4148_v5 = vmax.f32 %v4143_v44, %v4147_v31 }
0x1733   :  { %14983 = vst [vmem:[#allocation76_spill] sm:$0xff] %v12181_v28  ;;  %v12205_v31 = vld [vmem:[%s14145_s10 + $0xa4] ss:$16 sps:$4 sm:$0xff]  }
0x1734   :  { %v4142_v18 = vpop.xlane.xlu0 %4141  ;;  %4235 = vmatpush1.bf16.msra.mxu0 %v12171_v61  ;;  %v4155_v27 = vmax.f32 %v4148_v5, %v4150_v63  ;;  %14986 = vst [vmem:[#allocation79_spill] sm:$0xff] %v12205_v31  ;;  %v12217_v63 = vld [vmem:[%s14145_s10 + $0xc4] ss:$16 sps:$4 sm:$0xff]  }
0x1735   :  { %v4153_v35 = vsel %vm1881_vm1, %v4142_v18, -inf  ;;  %4236 = vmatprep.subr.bf16.mxu0 %v12181_v28  ;;  %14988 = vst [vmem:[#allocation81_spill] sm:$0xff] %v12217_v63 }
0x1736   :  { %v4154_v23 = vmax.f32 %v4146_v7, %v4153_v35 }
0x1738   :  { %v4156_v61 = vmax.f32 %v4152_v21, %v4154_v23  ;;  %4237 = vmatpush1.bf16.msra.mxu0 %v12187_v40  ;;  %v12199_v23 = vld [vmem:[%s14145_s10 + $0x80] ss:$16 sps:$4 sm:$0xff]  }
0x1739   :  { %4238 = vmatprep.subr.bf16.mxu0 %v12193_v16  ;;  %14985 = vst [vmem:[#allocation78_spill] sm:$0xff] %v12199_v23 }
0x173a   :  { %v4157_v28 = vmax.f32 %v4155_v27, %v4156_v61  ;;  %v12211_v61 = vld [vmem:[%s14145_s10 + $0xa0] ss:$16 sps:$4 sm:$0xff]  }
0x173b   :  { %14987 = vst [vmem:[#allocation80_spill] sm:$0xff] %v12211_v61 }
0x173c   :  { %v4158_v44 = vsub.f32 %v4121_v57, %v4157_v28  ;;  %v4159_v4 = vsub.f32 %v4124_v47, %v4157_v28  ;;  %v4160_v35 = vsub.f32 %v4127_v49, %v4157_v28  ;;  %v4161_v7 = vsub.f32 %v4130_v45, %v4157_v28  ;;  %4239 = vmatpush1.bf16.msra.mxu0 %v12199_v23 }
0x173d   :  { %v4162_v21 = vsub.f32 %v4133_v26, %v4157_v28  ;;  %4240 = vmatprep.subr.bf16.mxu0 %v12205_v31  ;;  %v4163_v49 = vsub.f32 %v4136_v54, %v4157_v28  ;;  %v4164_v26 = vsub.f32 %v4139_v51, %v4157_v28  ;;  %v4165_v54 = vsub.f32 %v4142_v18, %v4157_v28  ;;  %v12235_v28 = vld [vmem:[%s14145_s10 + $0xe0] ss:$16 sps:$4 sm:$0xff]   ;;  %v12342_v31 = vld [vmem:[#allocation2 + $0x4] sm:$0x3] }
0x173e   :  { %v4166_v27 = vmul.f32 1.442695, %v4158_v44  ;;  %v4168_v57 = vmul.f32 1.442695, %v4159_v4  ;;  %v4170_v47 = vmul.f32 1.442695, %v4160_v35 }
0x173f   :  { %v4172_v45 = vmul.f32 1.442695, %v4161_v7  ;;  %v4174_v30 = vmul.f32 1.442695, %v4162_v21  ;;  %v4176_v5 = vmul.f32 1.442695, %v4163_v49 }
0x1740   :  { %7804 = vpow2.f32 %v4166_v27  ;;  %4241 = vmatpush1.bf16.msra.mxu0 %v12211_v61  ;;  %v12223_v44 = vld [vmem:[%s14145_s10 + $0xc0] ss:$16 sps:$4 sm:$0xff]   ;;  %v4178_v51 = vmul.f32 1.442695, %v4164_v26  ;;  %v12229_v4 = vld [vmem:[%s14145_s10 + $0xe4] ss:$16 sps:$4 sm:$0xff]  }
0x1741   :  { %7806 = vpow2.f32 %v4168_v57  ;;  %4242 = vmatprep.subr.bf16.mxu0 %v12217_v63  ;;  %14989 = vst [vmem:[#allocation82_spill] sm:$0xff] %v12223_v44  ;;  %14990 = vst [vmem:[#allocation83_spill] sm:$0xff] %v12229_v4  ;;  %v4180_v18 = vmul.f32 1.442695, %v4165_v54  ;;  %v12241_v35 = vld [vmem:[%s14145_s10 + $0x104] ss:$16 sps:$4 sm:$0xff]  }
0x1742   :  { %7808 = vpow2.f32 %v4170_v47  ;;  %14991 = vst [vmem:[#allocation84_spill] sm:$0xff] %v12235_v28  ;;  %14992 = vst [vmem:[#allocation85_spill] sm:$0xff] %v12241_v35  ;;  %v12249_v49 = vld [vmem:[%s14145_s10 + $0x100] ss:$16 sps:$4 sm:$0xff]  }
0x1743   :  { %7810 = vpow2.f32 %v4172_v45  ;;  %14993 = vst [vmem:[#allocation86_spill] sm:$0xff] %v12249_v49  ;;  %v12339_v61 = vld [vmem:[#allocation2 + $0x2] sm:$0x3]  ;;  %15009 = vst [vmem:[#allocation44_spill] sm:$0xff] %v12342_v31 }
0x1744   :  { %4243 = vmatpush1.bf16.msra.mxu0 %v12223_v44  ;;  %7812 = vpow2.f32 %v4174_v30  ;;  %v12255_v30 = vld [vmem:[%s14145_s10 + $0x124] ss:$16 sps:$4 sm:$0xff]   ;;  %v12291_v44 = vld [vmem:[%s14145_s10 + $0x160] ss:$16 sps:$4 sm:$0xff]   ;;  %15008 = vst [vmem:[#allocation35_spill] sm:$0xff] %v12339_v61 }
0x1745   :  { %4244 = vmatprep.subr.bf16.mxu0 %v12229_v4  ;;  %7814 = vpow2.f32 %v4176_v5  ;;  %14994 = vst [vmem:[#allocation87_spill] sm:$0xff] %v12255_v30  ;;  %v12277_v4 = vld [vmem:[%s14145_s10 + $0x140] ss:$16 sps:$4 sm:$0xff]   ;;  %14999 = vst [vmem:[#allocation29_spill] sm:$0xff] %v12291_v44 }
0x1746   :  { %7816 = vpow2.f32 %v4178_v51  ;;  %14997 = vst [vmem:[#allocation90_spill] sm:$0xff] %v12277_v4 }
0x1747   :  { %7818 = vpow2.f32 %v4180_v18 }
0x1748   :  { %4245 = vmatpush1.bf16.msra.mxu0 %v12235_v28 }
0x1749   :  { %4246 = vmatprep.subr.bf16.mxu0 %v12241_v35  ;;  %v12263_v35 = vld [vmem:[%s14145_s10 + $0x120] ss:$16 sps:$4 sm:$0xff]  }
0x174a   :  { %v7805_v7 = vpop.eup %7804  ;;  %14995 = vst [vmem:[#allocation88_spill] sm:$0xff] %v12263_v35 }
0x174b   :  { %v7807_v21 = vpop.eup %7806  ;;  %v4182_v27 = vsel %vm1881_vm1, %v7805_v7, 0.0 }
0x174c   :  { %v7809_v57 = vpop.eup %7808  ;;  %v4183_v47 = vsel %vm1881_vm1, %v7807_v21, 0.0  ;;  %4247 = vmatpush1.bf16.msra.mxu0 %v12249_v49  ;;  %v12269_v49 = vld [vmem:[%s14145_s10 + $0x144] ss:$16 sps:$4 sm:$0xff]  }
0x174d   :  { %v7811_v45 = vpop.eup %7810  ;;  %v4184_v26 = vadd.f32 %v4183_v47, %v4182_v27  ;;  %4248 = vmatprep.subr.bf16.mxu0 %v12255_v30  ;;  %v4185_v54 = vsel %vm1881_vm1, %v7809_v57, 0.0  ;;  %14996 = vst [vmem:[#allocation89_spill] sm:$0xff] %v12269_v49 }
0x174e   :  { %v7813_v5 = vpop.eup %7812  ;;  %v4187_v18 = vsel %vm1881_vm1, %v7811_v45, 0.0 }
0x174f   :  { %v4186_v51 = vadd.f32 %v4185_v54, %v4184_v26  ;;  %v7815_v27 = vpop.eup %7814  ;;  %v4189_v26 = vsel %vm1881_vm1, %v7813_v5, 0.0 }
0x1750   :  { %4249 = vmatpush1.bf16.msra.mxu0 %v12263_v35  ;;  %v7817_v54 = vpop.eup %7816  ;;  %v4191_v28 = vsel %vm1881_vm1, %v7815_v27, 0.0  ;;  %v12283_v35 = vld [vmem:[%s14145_s10 + $0x164] ss:$16 sps:$4 sm:$0xff]  }
0x1751   :  { %v4188_v47 = vadd.f32 %v4187_v18, %v4186_v51  ;;  %4250 = vmatprep.subr.bf16.mxu0 %v12269_v49  ;;  %v7819_v51 = vpop.eup %7818  ;;  %14998 = vst [vmem:[#allocation91_spill] sm:$0xff] %v12283_v35 }
0x1752   :  { %v4195_v49 = vsel %vm1881_vm1, %v7819_v51, 0.0 }
0x1753   :  { %v4190_v30 = vadd.f32 %v4189_v26, %v4188_v47  ;;  %v4193_v47 = vsel %vm1881_vm1, %v7817_v54, 0.0 }
0x1754   :  { %4251 = vmatpush1.bf16.msra.mxu0 %v12277_v4  ;;  %v12336_v4 = vld [vmem:[#allocation2] sm:$0x3] }
0x1755   :  { %v4192_v18 = vadd.f32 %v4191_v28, %v4190_v30  ;;  %4252 = vmatprep.subr.bf16.mxu0 %v12283_v35  ;;  %v12297_v30 = vld [vmem:[%s14145_s10 + $0x184] ss:$16 sps:$4 sm:$0xff]   ;;  %15007 = vst [vmem:[#allocation43_spill] sm:$0xff] %v12336_v4 }
0x1756   :  { %15000 = vst [vmem:[#allocation23_spill] sm:$0xff] %v12297_v30 }
0x1757   :  { %v4194_v26 = vadd.f32 %v4193_v47, %v4192_v18  ;;  %v12303_v18 = vld [vmem:[%s14145_s10 + $0x180] ss:$16 sps:$4 sm:$0xff]   ;;  %v12309_v47 = vld [vmem:[%s14145_s10 + $0x1a4] ss:$16 sps:$4 sm:$0xff]  }
0x1758   :  { %4253 = vmatpush1.bf16.msra.mxu0 %v12291_v44  ;;  %15001 = vst [vmem:[#allocation22_spill] sm:$0xff] %v12303_v18  ;;  %15002 = vst [vmem:[#allocation30_spill] sm:$0xff] %v12309_v47 }
0x1759   :  { %v4196_v28 = vadd.f32 %v4195_v49, %v4194_v26  ;;  %4254 = vmatprep.subr.bf16.mxu0 %v12297_v30  ;;  %v12315_v49 = vld [vmem:[%s14145_s10 + $0x1a0] ss:$16 sps:$4 sm:$0xff]   ;;  %v12321_v26 = vld [vmem:[%s14145_s10 + $0x1c4] ss:$16 sps:$4 sm:$0xff]  }
0x175a   :  { %15003 = vst [vmem:[#allocation31_spill] sm:$0xff] %v12315_v49  ;;  %15004 = vst [vmem:[#allocation32_spill] sm:$0xff] %v12321_v26 }
0x175b   :  { %7820 = vrcp.f32 %v4196_v28  ;;  %v12327_v28 = vld [vmem:[%s14145_s10 + $0x1c0] ss:$16 sps:$4 sm:$0xff]  }
0x175c   :  { %4255 = vmatpush1.bf16.msra.mxu0 %v12303_v18  ;;  %15005 = vst [vmem:[#allocation33_spill] sm:$0xff] %v12327_v28  ;;  %v12333_v18 = vld [vmem:[%s14145_s10 + $0x1e4] ss:$16 sps:$4 sm:$0xff]  }
0x175d   :  { %4256 = vmatprep.subr.bf16.mxu0 %v12309_v47  ;;  %15006 = vst [vmem:[#allocation34_spill] sm:$0xff] %v12333_v18 }
0x1760   :  { %4257 = vmatpush1.bf16.msra.mxu0 %v12315_v49 }
0x1761   :  { %4258 = vmatprep.subr.bf16.mxu0 %v12321_v26 }
0x1764   :  { %4259 = vmatpush1.bf16.msra.mxu0 %v12327_v28 }
0x1765   :  { %v7821_v47 = vpop.eup %7820  ;;  %4260 = vmatprep.subr.bf16.mxu0 %v12333_v18 }
0x1766   :  { %v4198_v49 = vmul.f32 %v7821_v47, %v7805_v7  ;;  %v4199_v30 = vmul.f32 %v7821_v47, %v7807_v21  ;;  %v4200_v44 = vmul.f32 %v7821_v47, %v7809_v57  ;;  %v4201_v35 = vmul.f32 %v7821_v47, %v7811_v45  ;;  %v12348_v7 = vld [vmem:[%s14145_s10 + $0x1e0] ss:$16 sps:$4 sm:$0xff]   ;;  %v12354_v21 = vld [vmem:[%s14145_s10 + $0x204] ss:$16 sps:$4 sm:$0xff]  }
0x1767   :  { %v4202_v26 = vmul.f32 %v7821_v47, %v7813_v5  ;;  %15010 = vst [vmem:[#allocation46_spill] sm:$0xff] %v12348_v7  ;;  %15011 = vst [vmem:[#allocation92_spill] sm:$0xff] %v12354_v21  ;;  %v4203_v57 = vmul.f32 %v7821_v47, %v7815_v27  ;;  %v12357_v45 = vld [vmem:[#allocation2 + $0x6] sm:$0x3]  ;;  %v4205_v16 = vmul.f32 %v7821_v47, %v7819_v51 }
0x1768   :  { %v4206_v63 = vmul.f32 %v12336_v4, %v4198_v49  ;;  %v4207_v28 = vmul.f32 %v12339_v61, %v4199_v30  ;;  %v4208_v23 = vmul.f32 %v12342_v31, %v4200_v44  ;;  %4261 = vmatpush1.bf16.msra.mxu0 %v12348_v7  ;;  %15012 = vst [vmem:[#allocation93_spill] sm:$0xff] %v12357_v45  ;;  %v12362_v61 = vld [vmem:[#allocation2 + $0x8] sm:$0x3] }
0x1769   :  { %4271 = vmatprep.subr.bf16.mxu0 %v12354_v21  ;;  %v4209_v5 = vmul.f32 %v12357_v45, %v4201_v35  ;;  %v4204_v31 = vmul.f32 %v7821_v47, %v7817_v54  ;;  %v4210_v7 = vmul.f32 %v12362_v61, %v4202_v26  ;;  %v12366_v21 = vld [vmem:[#allocation2 + $0xa] sm:$0x3] }
0x176a   :  { %v4214_v44 = vsel %vm1881_vm1, %v4206_v63, 0.0  ;;  %v4215_v30 = vsel %vm1881_vm1, %v4207_v28, 0.0  ;;  %v4217_v4 = vsel %vm1881_vm1, %v4208_v23, 0.0  ;;  %v4211_v27 = vmul.f32 %v12366_v21, %v4203_v57  ;;  %v12370_v63 = vld [vmem:[#allocation2 + $0xc] sm:$0x3] }
0x176b   :  { %v4216_v49 = vadd.f32 %v4215_v30, %v4214_v44  ;;  %v4219_v35 = vsel %vm1881_vm1, %v4209_v5, 0.0  ;;  %v4212_v28 = vmul.f32 %v12370_v63, %v4204_v31  ;;  %v4221_v54 = vsel %vm1881_vm1, %v4210_v7, 0.0  ;;  %v12374_v30 = vld [vmem:[#allocation2 + $0xe] sm:$0x3] }
0x176c   :  { %v4213_v23 = vmul.f32 %v12374_v30, %v4205_v16  ;;  %v4049_v31 = vstv %s4048_s25 }
0x176d   :  { %v4218_v18 = vadd.f32 %v4217_v4, %v4216_v49  ;;  %v4223_v4 = vsel %vm1881_vm1, %v4211_v27, 0.0  ;;  %v4225_v47 = vsel %vm1881_vm1, %v4212_v28, 0.0  ;;  %vm4050_vm4 = vcmp.eq.s32.totalorder %v4049_v31, 1  ;;  %v6337_v49 = vld [vmem:[%s14137_s2 + $0x3] sm:$0x1] }
0x176e   :  { %v4227_v57 = vsel %vm1881_vm1, %v4213_v23, 0.0  ;;  %v4051_v7 = vsel %vm4050_vm4, 1, %v14710_v3  ;;  %v15034_v23 = vld [vmem:[#allocation48_spill] sm:$0xff] }
0x176f   :  { %v4220_v45 = vadd.f32 %v4219_v35, %v4218_v18  ;;  %v4052_v16 = vpack.c.b16 %v4051_v7, %v4051_v7  ;;  %v15042_v31 = vld [vmem:[#allocation20_spill] sm:$0xff]  ;;  %v15043_v7 = vld [vmem:[#allocation18_spill] sm:$0xff] }
0x1771   :  { %v4222_v44 = vadd.f32 %v4221_v54, %v4220_v45  ;;  %vm4053_vm5 = vcmp.ne.s16.totalorder %v4052_v16, 0  ;;  %v15044_v16 = vld [vmem:[#allocation21_spill] sm:$0xff] }
0x1773   :  { %v4224_v51 = vadd.f32 %v4223_v4, %v4222_v44  ;;  %v15035_v4 = vld [vmem:[#allocation51_spill] sm:$0xff] }
0x1775   :  { %v4226_v26 = vadd.f32 %v4225_v47, %v4224_v51  ;;  %v15036_v51 = vld [vmem:[#allocation55_spill] sm:$0xff]  ;;  %v15037_v47 = vld [vmem:[#allocation58_spill] sm:$0xff] }
0x1777   :  { %v4228_v18 = vadd.f32 %v4227_v57, %v4226_v26  ;;  %v15038_v26 = vld [vmem:[#allocation61_spill] sm:$0xff]  ;;  %v15039_v57 = vld [vmem:[#allocation64_spill] sm:$0xff] }
0x1779   :  { %v4229_v5 = vpack.c.bf16 %v4228_v18, %v4228_v18  ;;  %v15040_v18 = vld [vmem:[#allocation66_spill] sm:$0xff] }
0x177b   :  { %4262 = vmatprep.mubr.bf16.mxu0 %v4229_v5  ;;  %4344 = vmatprep.mubr.bf16.mxu1 %v4229_v5 }
0x17fe   :  { %v4037_v45 = vpop.f32.mrb[68].mxu0 }
0x17ff   :  { %v4043_v27 = vpack.c.bf16 %v4037_v45, %v4037_v45  ;;  %v6910_v35 = vpop.f32.mrb[69].mxu0  ;;  %v15045_v45 = vld [vmem:[#allocation24_spill] sm:$0xff] }
0x1800   :  { %v4040_v28 = vpop.f32.mrb[70].mxu0  ;;  %v15048_v35 = vld [vmem:[#allocation12_spill] sm:$0xff] }
0x1801   :  { %v6911_v54 = vpop.f32.mrb[71].mxu0  ;;  %v12384_v44 = vsel %vm4053_vm5, %v6337_v49, %v4043_v27  ;;  %v15046_v49 = vld [vmem:[#allocation25_spill] sm:$0xff]  ;;  %v15047_v27 = vld [vmem:[#allocation7_spill] sm:$0xff]  ;;  %v15049_v28 = vld [vmem:[#allocation8_spill] sm:$0xff] }
0x1802   :  { %4263 = vmatmul.mubr.bf16.vlgmr.msra.gmra.mrb[72].mxu0 %v12384_v44  ;;  %4345 = vmatmul.mubr.bf16.vlgmr.msra.gmra.mrb[72].mxu1 %v12384_v44  ;;  %v15050_v54 = vld [vmem:[#allocation26_spill] sm:$0xff] }
0x1803   :  { %4272 = vmatpush1.bf16.msra.mxu0 %v11590_v60  ;;  %4354 = vmatpush1.bf16.msra.mxu1 %v11596_v59  ;;  %v15013_v60 = vld [vmem:[#allocation36_spill] sm:$0xff]  ;;  %v15014_v59 = vld [vmem:[#allocation47_spill] sm:$0xff] }
0x1804   :  { %4273 = vmatprep.subr.bf16.mxu0 %v11602_v17  ;;  %4355 = vmatprep.subr.bf16.mxu1 %v11608_v1  ;;  %v15015_v17 = vld [vmem:[#allocation49_spill] sm:$0xff] }
0x1805   :  { %4303 = vmatprep.mubr.bf16.mxu0 %v14710_v3  ;;  %4385 = vmatprep.mubr.bf16.mxu1 %v14710_v3  ;;  %v15016_v1 = vld [vmem:[#allocation37_spill] sm:$0xff] }
0x1807   :  { %4274 = vmatpush1.bf16.msra.mxu0 %v11616_v19  ;;  %4356 = vmatpush1.bf16.msra.mxu1 %v11622_v20  ;;  %v15017_v19 = vld [vmem:[#allocation50_spill] sm:$0xff]  ;;  %v15018_v20 = vld [vmem:[#allocation52_spill] sm:$0xff] }
0x1808   :  { %4275 = vmatprep.subr.bf16.mxu0 %v11628_v29  ;;  %4357 = vmatprep.subr.bf16.mxu1 %v11634_v39  ;;  %v15019_v29 = vld [vmem:[#allocation38_spill] sm:$0xff]  ;;  %v15020_v39 = vld [vmem:[#allocation53_spill] sm:$0xff] }
0x180b   :  { %4276 = vmatpush1.bf16.msra.mxu0 %v11640_v33  ;;  %4358 = vmatpush1.bf16.msra.mxu1 %v11646_v56  ;;  %v15021_v33 = vld [vmem:[#allocation54_spill] sm:$0xff]  ;;  %v15022_v56 = vld [vmem:[#allocation39_spill] sm:$0xff] }
0x180c   :  { %4277 = vmatprep.subr.bf16.mxu0 %v11652_v42  ;;  %4359 = vmatprep.subr.bf16.mxu1 %v11658_v14  ;;  %v15023_v42 = vld [vmem:[#allocation56_spill] sm:$0xff]  ;;  %v15024_v14 = vld [vmem:[#allocation57_spill] sm:$0xff] }
0x180f   :  { %4278 = vmatpush1.bf16.msra.mxu0 %v11664_v32  ;;  %4360 = vmatpush1.bf16.msra.mxu1 %v11670_v55  ;;  %v15025_v32 = vld [vmem:[#allocation40_spill] sm:$0xff]  ;;  %v15026_v55 = vld [vmem:[#allocation59_spill] sm:$0xff] }
0x1810   :  { %4279 = vmatprep.subr.bf16.mxu0 %v11676_v50  ;;  %4361 = vmatprep.subr.bf16.mxu1 %v11682_v22  ;;  %v15027_v50 = vld [vmem:[#allocation60_spill] sm:$0xff]  ;;  %v15028_v22 = vld [vmem:[#allocation41_spill] sm:$0xff] }
0x1813   :  { %4280 = vmatpush1.bf16.msra.mxu0 %v11688_v41  ;;  %4362 = vmatpush1.bf16.msra.mxu1 %v11694_v2  ;;  %v15029_v41 = vld [vmem:[#allocation62_spill] sm:$0xff]  ;;  %v15030_v2 = vld [vmem:[#allocation63_spill] sm:$0xff] }
0x1814   :  { %4281 = vmatprep.subr.bf16.mxu0 %v11700_v13  ;;  %4363 = vmatprep.subr.bf16.mxu1 %v11706_v38  ;;  %v15031_v13 = vld [vmem:[#allocation42_spill] sm:$0xff]  ;;  %v15032_v38 = vld [vmem:[#allocation65_spill] sm:$0xff] }
0x1817   :  { %4282 = vmatpush1.bf16.msra.mxu0 %v15013_v60  ;;  %4364 = vmatpush1.bf16.msra.mxu1 %v15014_v59  ;;  %v15052_v60 = vld [vmem:[#allocation28_spill] sm:$0xff] }
0x1818   :  { %4283 = vmatprep.subr.bf16.mxu0 %v15015_v17  ;;  %4365 = vmatprep.subr.bf16.mxu1 %v15016_v1  ;;  %v15053_v59 = vld [vmem:[#allocation68_spill] sm:$0xff]  ;;  %v15054_v17 = vld [vmem:[#allocation69_spill] sm:$0xff] }
0x1819   :  { %v12479_v1 = vld [vmem:[%s14145_s10 + $0xc] ss:$16 sps:$4 sm:$0xff]  }
0x181b   :  { %4284 = vmatpush1.bf16.msra.mxu0 %v15017_v19  ;;  %4366 = vmatpush1.bf16.msra.mxu1 %v15018_v20 }
0x181c   :  { %4285 = vmatprep.subr.bf16.mxu0 %v15019_v29  ;;  %4367 = vmatprep.subr.bf16.mxu1 %v15020_v39  ;;  %v15055_v29 = vld [vmem:[#allocation67_spill] sm:$0xff] }
0x181f   :  { %4286 = vmatpush1.bf16.msra.mxu0 %v15021_v33  ;;  %4368 = vmatpush1.bf16.msra.mxu1 %v15022_v56 }
0x1820   :  { %6932 = vmatprep.subr.bf16.mxu1 %v14720_v62  ;;  %6534 = vmatprep.subr.bf16.mxu0 %v15023_v42 }
0x1822   :  { %4304 = vmatmul.mubr.bf16.vlgmr.msra.gmra.mrb[72].mxu0 %v11997_v37  ;;  %4386 = vmatmul.mubr.bf16.vlgmr.msra.gmra.mrb[72].mxu1 %v11997_v37  ;;  %v15033_v37 = vld [vmem:[#allocation45_spill] sm:$0xff] }
0x1823   :  { %4451 = vmatprep.mubr.bf16.mxu0 %v4229_v5  ;;  %6933 = vmatpush3.bf16.msra.mxu1 %v15024_v14  ;;  %v15041_v5 = vld [vmem:[#allocation15_spill] sm:$0xff] }
0x1824   :  { %6934 = vmatprep.subr.bf16.mxu1 %v14720_v62  ;;  %6948 = vmatprep.mubr.msk.bf16.mxu1 %vm8499_vm0, %v14720_v62 }
0x1825   :  { %6535 = vmatpush3.bf16.msra.mxu0 %v15025_v32 }
0x1826   :  { %6536 = vmatprep.subr.bf16.mxu0 %v15026_v55 }
0x1827   :  { %6935 = vmatpush3.bf16.msra.mxu1 %v15027_v50 }
0x1828   :  { %6936 = vmatprep.subr.bf16.mxu1 %v14720_v62 }
0x1829   :  { %6537 = vmatpush3.bf16.msra.mxu0 %v15028_v22 }
0x182a   :  { %6538 = vmatprep.subr.bf16.mxu0 %v15029_v41 }
0x182b   :  { %6937 = vmatpush3.bf16.msra.mxu1 %v15030_v2 }
0x182c   :  { %6938 = vmatprep.subr.bf16.mxu1 %v14720_v62 }
0x182d   :  { %6539 = vmatpush3.bf16.msra.mxu0 %v15031_v13 }
0x182e   :  { %6540 = vmatprep.subr.bf16.mxu0 %v15032_v38 }
0x182f   :  { %6939 = vmatpush3.bf16.msra.mxu1 %v15033_v37 }
0x1830   :  { %6940 = vmatprep.subr.bf16.mxu1 %v14720_v62 }
0x1831   :  { %6541 = vmatpush3.bf16.msra.mxu0 %v15034_v23 }
0x1832   :  { %6542 = vmatprep.subr.bf16.mxu0 %v15035_v4 }
0x1833   :  { %6941 = vmatpush3.bf16.msra.mxu1 %v15036_v51 }
0x1834   :  { %6942 = vmatprep.subr.bf16.mxu1 %v14720_v62 }
0x1835   :  { %6543 = vmatpush3.bf16.msra.mxu0 %v15037_v47 }
0x1836   :  { %6544 = vmatprep.subr.bf16.mxu0 %v15038_v26 }
0x1837   :  { %6943 = vmatpush3.bf16.msra.mxu1 %v15039_v57 }
0x1838   :  { %6944 = vmatprep.subr.bf16.mxu1 %v14720_v62 }
0x1839   :  { %6545 = vmatpush3.bf16.msra.mxu0 %v15040_v18 }
0x183a   :  { %6546 = vmatprep.subr.bf16.mxu0 %v15041_v5 }
0x183b   :  { %6945 = vmatpush3.bf16.msra.mxu1 %v15042_v31 }
0x183c   :  { %6946 = vmatprep.subr.bf16.mxu1 %v14720_v62 }
0x183d   :  { %6547 = vmatpush3.bf16.msra.mxu0 %v15043_v7 }
0x183e   :  { %6548 = vmatprep.subr.bf16.mxu0 %v15044_v16 }
0x183f   :  { %6947 = vmatpush3.bf16.msra.mxu1 %v15045_v45 }
0x1840   :  { %6972 = vmatprep.subr.bf16.mxu1 %v14720_v62 }
0x1841   :  { %6549 = vmatpush3.bf16.msra.mxu0 %v15046_v49 }
0x1842   :  { %6949 = vmatmul.mubr.bf16.vlgmr.msra.gmra.mrb[76].mxu1 %v12384_v44  ;;  %6952 = vmatprep.subr.bf16.mxu0 %v14720_v62  ;;  %v15051_v44 = vld [vmem:[#allocation27_spill] sm:$0xff] }
0x1843   :  { %6973 = vmatpush3.bf16.msra.mxu1 %v15047_v27  ;;  %6988 = vmatprep.mubr.msk.bf16.mxu1 %vm8499_vm0, %v14720_v62 }
0x1844   :  { %6974 = vmatprep.subr.bf16.mxu1 %v14720_v62 }
0x1847   :  { %6975 = vmatpush3.bf16.msra.mxu1 %v15048_v35 }
0x1848   :  { %6976 = vmatprep.subr.bf16.mxu1 %v14720_v62 }
0x184b   :  { %6977 = vmatpush3.bf16.msra.mxu1 %v15049_v28 }
0x184c   :  { %6978 = vmatprep.subr.bf16.mxu1 %v14720_v62 }
0x184f   :  { %6979 = vmatpush3.bf16.msra.mxu1 %v15050_v54 }
0x1850   :  { %6980 = vmatprep.subr.bf16.mxu1 %v14720_v62 }
0x1853   :  { %6981 = vmatpush3.bf16.msra.mxu1 %v15051_v44 }
0x1854   :  { %6982 = vmatprep.subr.bf16.mxu1 %v14720_v62 }
0x1857   :  { %6983 = vmatpush3.bf16.msra.mxu1 %v15052_v60 }
0x1858   :  { %6984 = vmatprep.subr.bf16.mxu1 %v14720_v62 }
0x185b   :  { %6985 = vmatpush3.bf16.msra.mxu1 %v15053_v59  ;;  %v12509_v59 = vld [vmem:[%s14145_s10 + $0x2c] ss:$16 sps:$4 sm:$0xff]  }
0x185c   :  { %6986 = vmatprep.subr.bf16.mxu1 %v14720_v62 }
0x185f   :  { %6987 = vmatpush3.bf16.msra.mxu1 %v15054_v17  ;;  %v12523_v17 = vld [vmem:[%s14145_s10 + $0x4c] ss:$16 sps:$4 sm:$0xff]  }
0x1860   :  { %4834 = vmatprep.subr.bf16.mxu1 %v12479_v1 }
0x18f5   :  { %v4305_v19 = vpop.f32.mrb[72].mxu0  ;;  %v4387_v20 = vpop.f32.mrb[72].mxu1 }
0x18f6   :  { %v7144_v39 = vadd.f32 %v4305_v19, %v15055_v29  ;;  %v4307_v33 = vpop.f32.mrb[73].mxu0  ;;  %v4389_v56 = vpop.f32.mrb[73].mxu1  ;;  %v7146_v38 = vadd.f32 %v4387_v20, %v10749_v15  ;;  %v12537_v19 = vld [vmem:[%s14145_s10 + $0x6c] ss:$16 sps:$4 sm:$0xff]  }
0x18f7   :  { %v7145_v42 = vadd.f32 %v4307_v33, %v10738_v24  ;;  %v4309_v14 = vpop.f32.mrb[74].mxu0  ;;  %v4391_v32 = vpop.f32.mrb[74].mxu1  ;;  %v7147_v2 = vadd.f32 %v4389_v56, %v10744_v52  ;;  %v12551_v20 = vld [vmem:[%s14145_s10 + $0x8c] ss:$16 sps:$4 sm:$0xff]  }
0x18f8   :  { %v6338_v55 = vmul.f32 -1.442695, %v7144_v39  ;;  %v4310_v50 = vpop.f32.mrb[75].mxu0  ;;  %v4392_v22 = vpop.f32.mrb[75].mxu1  ;;  %v12565_v39 = vld [vmem:[%s14145_s10 + $0xac] ss:$16 sps:$4 sm:$0xff]  }
0x18f9   :  { %v6339_v41 = vmul.f32 -1.442695, %v7145_v42  ;;  %v6340_v13 = vmul.f32 -1.442695, %v7147_v2  ;;  %v12579_v33 = vld [vmem:[%s14145_s10 + $0xcc] ss:$16 sps:$4 sm:$0xff]  }
0x18fa   :  { %7822 = vpow2.f32 %v6338_v55  ;;  %v12593_v56 = vld [vmem:[%s14145_s10 + $0xec] ss:$16 sps:$4 sm:$0xff]   ;;  %v12625_v14 = vld [vmem:[%s14145_s10 + $0x128] ss:$16 sps:$4 sm:$0xff]  }
0x18fb   :  { %7824 = vpow2.f32 %v6339_v41  ;;  %v12607_v42 = vld [vmem:[%s14145_s10 + $0x10c] ss:$16 sps:$4 sm:$0xff]   ;;  %v12637_v55 = vld [vmem:[%s14145_s10 + $0x148] ss:$16 sps:$4 sm:$0xff]  }
0x18fc   :  { %7826 = vpow2.f32 %v6340_v13  ;;  %v12631_v32 = vld [vmem:[%s14145_s10 + $0x14c] ss:$16 sps:$4 sm:$0xff]   ;;  %15056 = vst [vmem:[#allocation36_spill] sm:$0xff] %v12637_v55  ;;  %v12649_v22 = vld [vmem:[%s14145_s10 + $0x168] ss:$16 sps:$4 sm:$0xff]  }
0x18fd   :  { %7828 = vtanh.f32 %v7146_v38  ;;  %v12643_v50 = vld [vmem:[%s14145_s10 + $0x16c] ss:$16 sps:$4 sm:$0xff]   ;;  %15058 = vst [vmem:[#allocation49_spill] sm:$0xff] %v12649_v22  ;;  %v12661_v2 = vld [vmem:[%s14145_s10 + $0x188] ss:$16 sps:$4 sm:$0xff]  }
0x18fe   :  { %15057 = vst [vmem:[#allocation47_spill] sm:$0xff] %v12643_v50  ;;  %v12655_v41 = vld [vmem:[%s14145_s10 + $0x18c] ss:$16 sps:$4 sm:$0xff]   ;;  %15060 = vst [vmem:[#allocation50_spill] sm:$0xff] %v12661_v2  ;;  %v12673_v38 = vld [vmem:[%s14145_s10 + $0x1a8] ss:$16 sps:$4 sm:$0xff]  }
0x18ff   :  { %15059 = vst [vmem:[#allocation37_spill] sm:$0xff] %v12655_v41  ;;  %v12667_v13 = vld [vmem:[%s14145_s10 + $0x1ac] ss:$16 sps:$4 sm:$0xff]   ;;  %15062 = vst [vmem:[#allocation38_spill] sm:$0xff] %v12673_v38 }
0x1900   :  { %15061 = vst [vmem:[#allocation52_spill] sm:$0xff] %v12667_v13 }
0x1904   :  { %v7823_v37 = vpop.eup %7822 }
0x1905   :  { %v7825_v23 = vpop.eup %7824  ;;  %v4397_v4 = vadd.f32 1.0, %v7823_v37  ;;  %v12679_v37 = vld [vmem:[%s14145_s10 + $0x1cc] ss:$16 sps:$4 sm:$0xff]  }
0x1906   :  { %v4403_v51 = vadd.f32 1.0, %v7825_v23  ;;  %v7827_v47 = vpop.eup %7826  ;;  %15063 = vst [vmem:[#allocation53_spill] sm:$0xff] %v12679_v37  ;;  %v12685_v23 = vld [vmem:[%s14145_s10 + $0x1c8] ss:$16 sps:$4 sm:$0xff]  }
0x1907   :  { %7830 = vrcp.f32 %v4397_v4  ;;  %v7829_v26 = vpop.eup %7828  ;;  %v4410_v31 = vadd.f32 1.0, %v7827_v47  ;;  %15064 = vst [vmem:[#allocation54_spill] sm:$0xff] %v12685_v23  ;;  %v12691_v4 = vld [vmem:[%s14145_s10 + $0x1ec] ss:$16 sps:$4 sm:$0xff]  }
0x1908   :  { %7832 = vrcp.f32 %v4403_v51  ;;  %15065 = vst [vmem:[#allocation39_spill] sm:$0xff] %v12691_v4  ;;  %v12697_v51 = vld [vmem:[%s14145_s10 + $0x1e8] ss:$16 sps:$4 sm:$0xff]   ;;  %v12703_v47 = vld [vmem:[%s14145_s10 + $0x20c] ss:$16 sps:$4 sm:$0xff]  }
0x1909   :  { %7834 = vrcp.f32 %v4410_v31  ;;  %15066 = vst [vmem:[#allocation56_spill] sm:$0xff] %v12697_v51  ;;  %15067 = vst [vmem:[#allocation57_spill] sm:$0xff] %v12703_v47 }
0x1911   :  { %v7831_v57 = vpop.eup %7830 }
0x1912   :  { %v7833_v18 = vpop.eup %7832  ;;  %v4414_v5 = vmul.f32 %v7831_v57, %v7829_v26 }
0x1913   :  { %v4413_v7 = vmul.f32 %v7833_v18, %v11992_v9  ;;  %v7835_v28 = vpop.eup %7834  ;;  %v12503_v9 = vld [vmem:[%s14145_s10 + $0x8] ss:$16 sps:$4 sm:$0xff]  }
0x1915   :  { %v12487_v16 = vadd.f32 %v4414_v5, %v4413_v7  ;;  %v12489_v45 = vpop.f32.mrb[76].mxu1 }
0x1916   :  { %v6950_v49 = vpop.f32.mrb[77].mxu1 }
0x1917   :  { %v4496_v27 = vpop.f32.mrb[78].mxu1  ;;  %7836 = vtanh.f32 %v12487_v16 }
0x1918   :  { %v6951_v35 = vpop.f32.mrb[79].mxu1 }
0x1921   :  { %v7837_v54 = vpop.eup %7836 }
0x1922   :  { %v4417_v44 = vmul.f32 %v7837_v54, %v7835_v28 }
0x1924   :  { %v12492_v60 = vpack.c.bf16 %v4417_v44, %v4417_v44 }
0x1926   :  { %4452 = vmatmul.mubr.bf16.vlgmr.msra.gmra.mrb[76].mxu0 %v12492_v60  ;;  %6989 = vmatmul.mubr.bf16.vlgmr.msra.gmra.mrb[80].mxu1 %v12492_v60 }
0x1927   :  { %6953 = vmatpush3.bf16.msra.mxu0 %v12004_v43  ;;  %6968 = vmatprep.mubr.msk.bf16.mxu0 %vm8499_vm0, %v14720_v62  ;;  %v12517_v43 = vld [vmem:[%s14145_s10 + $0x28] ss:$16 sps:$4 sm:$0xff]  }
0x1928   :  { %6954 = vmatprep.subr.bf16.mxu0 %v14720_v62  ;;  %4835 = vmatpush1.bf16.msra.mxu1 %v12503_v9 }
0x1929   :  { %4836 = vmatprep.subr.bf16.mxu1 %v12509_v59 }
0x192b   :  { %6955 = vmatpush3.bf16.msra.mxu0 %v12015_v58  ;;  %v12531_v58 = vld [vmem:[%s14145_s10 + $0x48] ss:$16 sps:$4 sm:$0xff]  }
0x192c   :  { %6956 = vmatprep.subr.bf16.mxu0 %v14720_v62  ;;  %4837 = vmatpush1.bf16.msra.mxu1 %v12517_v43 }
0x192d   :  { %4838 = vmatprep.subr.bf16.mxu1 %v12523_v17 }
0x192f   :  { %6957 = vmatpush3.bf16.msra.mxu0 %v12024_v36  ;;  %v12545_v36 = vld [vmem:[%s14145_s10 + $0x68] ss:$16 sps:$4 sm:$0xff]  }
0x1930   :  { %6958 = vmatprep.subr.bf16.mxu0 %v14720_v62  ;;  %4839 = vmatpush1.bf16.msra.mxu1 %v12531_v58 }
0x1931   :  { %4840 = vmatprep.subr.bf16.mxu1 %v12537_v19 }
0x1933   :  { %6959 = vmatpush3.bf16.msra.mxu0 %v12033_v8  ;;  %v12559_v8 = vld [vmem:[%s14145_s10 + $0x88] ss:$16 sps:$4 sm:$0xff]  }
0x1934   :  { %6960 = vmatprep.subr.bf16.mxu0 %v14720_v62  ;;  %4841 = vmatpush1.bf16.msra.mxu1 %v12545_v36 }
0x1935   :  { %4842 = vmatprep.subr.bf16.mxu1 %v12551_v20 }
0x1937   :  { %6961 = vmatpush3.bf16.msra.mxu0 %v12042_v34  ;;  %v12573_v34 = vld [vmem:[%s14145_s10 + $0xa8] ss:$16 sps:$4 sm:$0xff]  }
0x1938   :  { %6962 = vmatprep.subr.bf16.mxu0 %v14720_v62  ;;  %4843 = vmatpush1.bf16.msra.mxu1 %v12559_v8 }
0x1939   :  { %4844 = vmatprep.subr.bf16.mxu1 %v12565_v39 }
0x193b   :  { %6963 = vmatpush3.bf16.msra.mxu0 %v12051_v48  ;;  %v12587_v48 = vld [vmem:[%s14145_s10 + $0xc8] ss:$16 sps:$4 sm:$0xff]  }
0x193c   :  { %6964 = vmatprep.subr.bf16.mxu0 %v14720_v62  ;;  %4845 = vmatpush1.bf16.msra.mxu1 %v12573_v34 }
0x193d   :  { %4846 = vmatprep.subr.bf16.mxu1 %v12579_v33 }
0x193f   :  { %6965 = vmatpush3.bf16.msra.mxu0 %v12060_v25  ;;  %v12601_v25 = vld [vmem:[%s14145_s10 + $0xe8] ss:$16 sps:$4 sm:$0xff]  }
0x1940   :  { %6966 = vmatprep.subr.bf16.mxu0 %v14720_v62  ;;  %4847 = vmatpush1.bf16.msra.mxu1 %v12587_v48 }
0x1941   :  { %4848 = vmatprep.subr.bf16.mxu1 %v12593_v56 }
0x1943   :  { %6967 = vmatpush3.bf16.msra.mxu0 %v12069_v11  ;;  %v12613_v11 = vld [vmem:[%s14145_s10 + $0x108] ss:$16 sps:$4 sm:$0xff]  }
0x1944   :  { %4752 = vmatprep.subr.bf16.mxu0 %v12075_v10  ;;  %4849 = vmatpush1.bf16.msra.mxu1 %v12601_v25  ;;  %v12619_v10 = vld [vmem:[%s14145_s10 + $0x12c] ss:$16 sps:$4 sm:$0xff]  }
0x1945   :  { %4850 = vmatprep.subr.bf16.mxu1 %v12607_v42 }
0x1948   :  { %4851 = vmatpush1.bf16.msra.mxu1 %v12613_v11 }
0x1949   :  { %4852 = vmatprep.subr.bf16.mxu1 %v12619_v10 }
0x194c   :  { %4853 = vmatpush1.bf16.msra.mxu1 %v12625_v14 }
0x194d   :  { %4854 = vmatprep.subr.bf16.mxu1 %v12631_v32 }
0x1950   :  { %4855 = vmatpush1.bf16.msra.mxu1 %v12637_v55  ;;  %v15083_v55 = vld [vmem:[#allocation79_spill] sm:$0xff] }
0x1951   :  { %4856 = vmatprep.subr.bf16.mxu1 %v12643_v50 }
0x1954   :  { %4857 = vmatpush1.bf16.msra.mxu1 %v12649_v22  ;;  %v15082_v22 = vld [vmem:[#allocation78_spill] sm:$0xff] }
0x1955   :  { %4858 = vmatprep.subr.bf16.mxu1 %v12655_v41 }
0x1958   :  { %4859 = vmatpush1.bf16.msra.mxu1 %v12661_v2 }
0x1959   :  { %4860 = vmatprep.subr.bf16.mxu1 %v12667_v13 }
0x195c   :  { %4861 = vmatpush1.bf16.msra.mxu1 %v12673_v38 }
0x195d   :  { %4862 = vmatprep.subr.bf16.mxu1 %v12679_v37 }
0x1960   :  { %4863 = vmatpush1.bf16.msra.mxu1 %v12685_v23 }
0x1961   :  { %4864 = vmatprep.subr.bf16.mxu1 %v12691_v4 }
0x1964   :  { %4865 = vmatpush1.bf16.msra.mxu1 %v12697_v51 }
0x1965   :  { %4875 = vmatprep.subr.bf16.mxu1 %v12703_v47 }
0x19f9   :  { %v6550_v26 = vpop.f32.mrb[76].mxu0  ;;  %v4611_v57 = vpop.f32.mrb[80].mxu1 }
0x19fa   :  { %v6551_v18 = vpop.f32.mrb[77].mxu0  ;;  %v6990_v5 = vpop.f32.mrb[81].mxu1  ;;  %v4617_v47 = vadd.f32 %v4611_v57, %v14967_v53 }
0x19fb   :  { %v6552_v31 = vadd.f32 %v6551_v18, %v6550_v26  ;;  %v6553_v7 = vpop.f32.mrb[78].mxu0  ;;  %v4614_v49 = vpop.f32.mrb[82].mxu1  ;;  %v4619_v26 = vadd.f32 %v4611_v57, %v14968_v12  ;;  %v4621_v18 = vadd.f32 %v4611_v57, %v14969_v6 }
0x19fc   :  { %v6554_v27 = vpop.f32.mrb[79].mxu0  ;;  %v6991_v35 = vpop.f32.mrb[83].mxu1  ;;  %7838 = vtanh.f32 %v4617_v47 }
0x19fd   :  { %v4454_v28 = vadd.f32 %v12099_v0, %v6552_v31  ;;  %7840 = vtanh.f32 %v4619_v26 }
0x19fe   :  { %7842 = vtanh.f32 %v4621_v18 }
0x19ff   :  { %v4494_v54 = vadd.f32 %v12489_v45, %v4454_v28  ;;  %v15068_v45 = vld [vmem:[#allocation17_spill] sm:$0xff]  ;;  %v15069_v28 = vld [vmem:[#allocation70_spill] sm:$0xff] }
0x1a00   :  { %v4623_v31 = vadd.f32 %v4611_v57, %v15068_v45 }
0x1a01   :  { %6341 = vst [vmem:[%s14149_s14 + $0x6] sm:$0x3] %v4494_v54  ;;  %v4501_v44 = vsel %vm1881_vm1, %v4494_v54, -inf }
0x1a02   :  { %4502 = vmax.xlane.f32.xlu1 %v4501_v44  ;;  %7844 = vtanh.f32 %v4623_v31 }
0x1a06   :  { %v7839_v49 = vpop.eup %7838 }
0x1a07   :  { %v4633_v47 = vmul.f32 %v15069_v28, %v7839_v49  ;;  %v7841_v44 = vpop.eup %7840 }
0x1a08   :  { %v4635_v6 = vmul.f32 %v15069_v28, %v7841_v44  ;;  %v15071_v44 = vld [vmem:[#allocation10_spill] sm:$0xff] }
0x1a09   :  { %v4641_v26 = vsel %vm1881_vm1, %v4633_v47, 0.0  ;;  %v4620_v12 = vadd.f32 %v4611_v57, %v15071_v44 }
0x1a0a   :  { %v4647_v18 = vsel %vm1881_vm1, %v4635_v6, 0.0 }
0x1a8f   :  { %v4503_v5 = vpop.xlane.xlu1 %4502 }
0x1a90   :  { %vm4504_vm6 = vcmp.eq.f32.partialorder %v4494_v54, %v4503_v5  ;;  %v7843_v54 = vpop.eup %7842 }
0x1a91   :  { %v4505_v0 = vsel %vm4504_vm6, %v14970_v46, 128  ;;  %v4637_v5 = vmul.f32 %v15069_v28, %v7843_v54  ;;  %v7845_v45 = vpop.eup %7844  ;;  %v15073_v54 = vld [vmem:[#allocation14_spill] sm:$0xff] }
0x1a92   :  { %v4506_v7 = vsel %vm1881_vm1, %v4505_v0, 2147483647  ;;  %v4639_v31 = vmul.f32 %v15069_v28, %v7845_v45 }
0x1a93   :  { %v4508_v27 = vshra.s32 %v4506_v7, 16  ;;  %v4653_v0 = vsel %vm1881_vm1, %v4637_v5, 0.0  ;;  %v4507_v53 = vand.u32 65535, %v4506_v7 }
0x1a94   :  { %v4659_v49 = vsel %vm1881_vm1, %v4639_v31, 0.0 }
0x1a95   :  { %v4510_v35 = vcvt.s32.f32 %v4508_v27  ;;  %v15070_v27 = vld [vmem:[#allocation13_spill] sm:$0xff]  ;;  %v4509_v4 = vcvt.s32.f32 %v4507_v53 }
0x1a96   :  { %v4618_v47 = vadd.f32 %v4611_v57, %v15070_v27  ;;  %v15080_v27 = vld [vmem:[#allocation76_spill] sm:$0xff] }
0x1a97   :  { %4511 = vmin.xlane.f32.xlu0 %v4510_v35 }
0x1a98   :  { %7846 = vtanh.f32 %v4618_v47 }
0x1a99   :  { %7848 = vtanh.f32 %v4620_v12 }
0x1a9b   :  { %4642 = vadd.xlane.f32.xlu0 %v4641_v26  ;;  %v15072_v26 = vld [vmem:[#allocation16_spill] sm:$0xff] }
0x1a9c   :  { %v4622_v6 = vadd.f32 %v4611_v57, %v15072_v26  ;;  %v15079_v26 = vld [vmem:[#allocation75_spill] sm:$0xff] }
0x1a9e   :  { %7850 = vtanh.f32 %v4622_v6 }
0x1a9f   :  { %4648 = vadd.xlane.f32.xlu0 %v4647_v18  ;;  %v4624_v18 = vadd.f32 %v4611_v57, %v15073_v54 }
0x1aa1   :  { %7852 = vtanh.f32 %v4624_v18 }
0x1aa2   :  { %v7847_v51 = vpop.eup %7846 }
0x1aa3   :  { %4654 = vadd.xlane.f32.xlu0 %v4653_v0  ;;  %v4634_v0 = vmul.f32 %v15069_v28, %v7847_v51  ;;  %v7849_v31 = vpop.eup %7848 }
0x1aa4   :  { %v4636_v12 = vmul.f32 %v15069_v28, %v7849_v31 }
0x1aa6   :  { %v4650_v7 = vsel %vm1881_vm1, %v4636_v12, 0.0 }
0x1aa7   :  { %4660 = vadd.xlane.f32.xlu0 %v4659_v49  ;;  %v4644_v49 = vsel %vm1881_vm1, %v4634_v0, 0.0 }
0x1aa8   :  { %v7851_v47 = vpop.eup %7850 }
0x1aa9   :  { %v4638_v57 = vmul.f32 %v15069_v28, %v7851_v47 }
0x1aab   :  { %v7853_v6 = vpop.eup %7852  ;;  %v4656_v53 = vsel %vm1881_vm1, %v4638_v57, 0.0 }
0x1b24   :  { %v4512_v5 = vpop.xlane.xlu0 %4511 }
0x1b25   :  { %vm4513_vm7 = vcmp.eq.f32.partialorder %v4510_v35, %v4512_v5  ;;  %v4518_v18 = vcvt.f32.s32 %v4512_v5  ;;  %v15077_v5 = vld [vmem:[#allocation73_spill] sm:$0xff] }
0x1b26   :  { %v4514_v45 = vsel %vm4513_vm7, %v4509_v4, inf  ;;  %v4640_v4 = vmul.f32 %v15069_v28, %v7853_v6  ;;  %v15075_v28 = vld [vmem:[#allocation71_spill] sm:$0xff]  ;;  %v15076_v6 = vld [vmem:[#allocation72_spill] sm:$0xff] }
0x1b27   :  { %4515 = vmin.xlane.f32.xlu1 %v4514_v45  ;;  %v4519_v31 = vshll.u32 %v4518_v18, 16  ;;  %v15078_v18 = vld [vmem:[#allocation74_spill] sm:$0xff] }
0x1b28   :  { %v4662_v51 = vsel %vm1881_vm1, %v4640_v4, 0.0  ;;  %v4643_v35 = vpop.xlane.xlu0 %4642 }
0x1b2b   :  { %4645 = vadd.xlane.f32.xlu1 %v4644_v49 }
0x1b2c   :  { %v4649_v45 = vpop.xlane.xlu0 %4648 }
0x1b2f   :  { %4651 = vadd.xlane.f32.xlu1 %v4650_v7  ;;  %v15074_v7 = vmov 1.0|1.0  }
0x1b30   :  { %v4655_v47 = vpop.xlane.xlu0 %4654 }
0x1b33   :  { %4657 = vadd.xlane.f32.xlu1 %v4656_v53 }
0x1b34   :  { %v4661_v53 = vpop.xlane.xlu0 %4660 }
0x1b37   :  { %4663 = vadd.xlane.f32.xlu1 %v4662_v51 }
0x1bb4   :  { %v4516_v0 = vpop.xlane.xlu1 %4515 }
0x1bb5   :  { %v4517_v49 = vcvt.f32.s32 %v4516_v0  ;;  %v4669_v0 = vsel %vm1881_vm1, %v4655_v47, -inf }
0x1bb7   :  { %v4520_v54 = vadd.s32 %v4519_v31, %v4517_v49 }
0x1bb8   :  { %v4646_v12 = vpop.xlane.xlu1 %4645 }
0x1bb9   :  { %vm4521_vm8 = vcmp.eq.s32.totalorder %v14970_v46, %v4520_v54  ;;  %v4673_v54 = vsel %vm1881_vm1, %v4661_v53, -inf  ;;  %v4666_v31 = vsel %vm1881_vm1, %v4646_v12, -inf }
0x1bba   :  { %vm6343_vm9 = vmpackc.low %vm4521_vm8, %vm4521_vm8 }
0x1bbb   :  { %6969 = vmatmul.mubr.msk.bf16.vlgmr.msra.gmra.mrb[80].mxu0 %vm6343_vm9, %v15074_v7 }
0x1bbc   :  { %v4652_v57 = vpop.xlane.xlu1 %4651  ;;  %4753 = vmatpush1.bf16.msra.mxu0 %v15075_v28  ;;  %v4665_v28 = vsel %vm1881_vm1, %v4643_v35, -inf }
0x1bbd   :  { %4754 = vmatprep.subr.bf16.mxu0 %v15076_v6  ;;  %v4667_v6 = vsel %vm1881_vm1, %v4649_v45, -inf }
0x1bbe   :  { %v4674_v46 = vmax.f32 %v4667_v6, %v4673_v54  ;;  %v15091_v6 = vld [vmem:[#allocation87_spill] sm:$0xff] }
0x1bc0   :  { %v4658_v4 = vpop.xlane.xlu1 %4657  ;;  %4755 = vmatpush1.bf16.msra.mxu0 %v15077_v5  ;;  %v4668_v5 = vsel %vm1881_vm1, %v4652_v57, -inf }
0x1bc1   :  { %v4671_v51 = vsel %vm1881_vm1, %v4658_v4, -inf  ;;  %4756 = vmatprep.subr.bf16.mxu0 %v15078_v18  ;;  %v4670_v18 = vmax.f32 %v4665_v28, %v4669_v0 }
0x1bc2   :  { %v4672_v49 = vmax.f32 %v4666_v31, %v4671_v51  ;;  %v15081_v51 = vld [vmem:[#allocation77_spill] sm:$0xff] }
0x1bc4   :  { %v4664_v7 = vpop.xlane.xlu1 %4663  ;;  %4757 = vmatpush1.bf16.msra.mxu0 %v15079_v26  ;;  %v4677_v37 = vmax.f32 %v4670_v18, %v4672_v49 }
0x1bc5   :  { %v4675_v44 = vsel %vm1881_vm1, %v4664_v7, -inf  ;;  %4758 = vmatprep.subr.bf16.mxu0 %v15080_v27 }
0x1bc6   :  { %v4676_v23 = vmax.f32 %v4668_v5, %v4675_v44 }
0x1bc8   :  { %v4678_v38 = vmax.f32 %v4674_v46, %v4676_v23  ;;  %4759 = vmatpush1.bf16.msra.mxu0 %v12187_v40  ;;  %v15084_v46 = vld [vmem:[#allocation80_spill] sm:$0xff] }
0x1bc9   :  { %4760 = vmatprep.subr.bf16.mxu0 %v15081_v51 }
0x1bca   :  { %v4679_v26 = vmax.f32 %v4677_v37, %v4678_v38  ;;  %v15085_v37 = vld [vmem:[#allocation81_spill] sm:$0xff] }
0x1bcc   :  { %v4680_v31 = vsub.f32 %v4643_v35, %v4679_v26  ;;  %v4681_v13 = vsub.f32 %v4646_v12, %v4679_v26  ;;  %v4682_v2 = vsub.f32 %v4649_v45, %v4679_v26  ;;  %v4683_v41 = vsub.f32 %v4652_v57, %v4679_v26  ;;  %4761 = vmatpush1.bf16.msra.mxu0 %v15082_v22  ;;  %v15086_v35 = vld [vmem:[#allocation82_spill] sm:$0xff]  ;;  %v15089_v45 = vld [vmem:[#allocation85_spill] sm:$0xff] }
0x1bcd   :  { %v4684_v50 = vsub.f32 %v4655_v47, %v4679_v26  ;;  %4762 = vmatprep.subr.bf16.mxu0 %v15083_v55  ;;  %v4685_v44 = vsub.f32 %v4658_v4, %v4679_v26  ;;  %v4686_v40 = vsub.f32 %v4661_v53, %v4679_v26  ;;  %v4687_v23 = vsub.f32 %v4664_v7, %v4679_v26  ;;  %v15090_v53 = vld [vmem:[#allocation86_spill] sm:$0xff] }
0x1bce   :  { %v4688_v27 = vmul.f32 1.442695, %v4680_v31  ;;  %v4690_v0 = vmul.f32 1.442695, %v4681_v13  ;;  %v4692_v54 = vmul.f32 1.442695, %v4682_v2 }
0x1bcf   :  { %v4694_v49 = vmul.f32 1.442695, %v4683_v41  ;;  %v4696_v38 = vmul.f32 1.442695, %v4684_v50  ;;  %v4698_v22 = vmul.f32 1.442695, %v4685_v44 }
0x1bd0   :  { %7854 = vpow2.f32 %v4688_v27  ;;  %4763 = vmatpush1.bf16.msra.mxu0 %v15084_v46  ;;  %v4700_v55 = vmul.f32 1.442695, %v4686_v40  ;;  %v15087_v13 = vld [vmem:[#allocation83_spill] sm:$0xff]  ;;  %v4702_v41 = vmul.f32 1.442695, %v4687_v23  ;;  %v15088_v2 = vld [vmem:[#allocation84_spill] sm:$0xff] }
0x1bd1   :  { %7856 = vpow2.f32 %v4690_v0  ;;  %4764 = vmatprep.subr.bf16.mxu0 %v15085_v37  ;;  %v15092_v31 = vld [vmem:[#allocation88_spill] sm:$0xff] }
0x1bd2   :  { %7858 = vpow2.f32 %v4692_v54  ;;  %v15093_v54 = vld [vmem:[#allocation89_spill] sm:$0xff] }
0x1bd3   :  { %7860 = vpow2.f32 %v4694_v49 }
0x1bd4   :  { %4765 = vmatpush1.bf16.msra.mxu0 %v15086_v35  ;;  %7862 = vpow2.f32 %v4696_v38  ;;  %v15094_v38 = vld [vmem:[#allocation90_spill] sm:$0xff] }
0x1bd5   :  { %4766 = vmatprep.subr.bf16.mxu0 %v15087_v13  ;;  %7864 = vpow2.f32 %v4698_v22  ;;  %v15095_v22 = vld [vmem:[#allocation91_spill] sm:$0xff] }
0x1bd6   :  { %7866 = vpow2.f32 %v4700_v55 }
0x1bd7   :  { %7868 = vpow2.f32 %v4702_v41  ;;  %v15096_v41 = vld [vmem:[#allocation29_spill] sm:$0xff] }
0x1bd8   :  { %4767 = vmatpush1.bf16.msra.mxu0 %v15088_v2 }
0x1bd9   :  { %4768 = vmatprep.subr.bf16.mxu0 %v15089_v45  ;;  %v15097_v45 = vld [vmem:[#allocation23_spill] sm:$0xff] }
0x1bda   :  { %v7855_v50 = vpop.eup %7854 }
0x1bdb   :  { %v7857_v12 = vpop.eup %7856  ;;  %v4704_v47 = vsel %vm1881_vm1, %v7855_v50, 0.0 }
0x1bdc   :  { %v7859_v7 = vpop.eup %7858  ;;  %v4705_v57 = vsel %vm1881_vm1, %v7857_v12, 0.0  ;;  %4769 = vmatpush1.bf16.msra.mxu0 %v15090_v53  ;;  %v15100_v53 = vld [vmem:[#allocation31_spill] sm:$0xff] }
0x1bdd   :  { %v7861_v4 = vpop.eup %7860  ;;  %v4706_v28 = vadd.f32 %v4705_v57, %v4704_v47  ;;  %4770 = vmatprep.subr.bf16.mxu0 %v15091_v6  ;;  %v4707_v5 = vsel %vm1881_vm1, %v7859_v7, 0.0  ;;  %v15098_v47 = vld [vmem:[#allocation22_spill] sm:$0xff]  ;;  %v15102_v6 = vld [vmem:[#allocation33_spill] sm:$0xff] }
0x1bde   :  { %v7863_v18 = vpop.eup %7862  ;;  %v4709_v26 = vsel %vm1881_vm1, %v7861_v4, 0.0  ;;  %v15099_v57 = vld [vmem:[#allocation30_spill] sm:$0xff] }
0x1bdf   :  { %v4708_v51 = vadd.f32 %v4707_v5, %v4706_v28  ;;  %v7865_v27 = vpop.eup %7864  ;;  %v4711_v44 = vsel %vm1881_vm1, %v7863_v18, 0.0  ;;  %v15101_v28 = vld [vmem:[#allocation32_spill] sm:$0xff] }
0x1be0   :  { %4771 = vmatpush1.bf16.msra.mxu0 %v15092_v31  ;;  %v7867_v49 = vpop.eup %7866  ;;  %v4713_v40 = vsel %vm1881_vm1, %v7865_v27, 0.0 }
0x1be1   :  { %v4710_v0 = vadd.f32 %v4709_v26, %v4708_v51  ;;  %4772 = vmatprep.subr.bf16.mxu0 %v15093_v54  ;;  %v7869_v37 = vpop.eup %7868  ;;  %v4715_v35 = vsel %vm1881_vm1, %v7867_v49, 0.0  ;;  %v15103_v51 = vld [vmem:[#allocation34_spill] sm:$0xff] }
0x1be2   :  { %v4717_v13 = vsel %vm1881_vm1, %v7869_v37, 0.0 }
0x1be3   :  { %v4712_v46 = vadd.f32 %v4711_v44, %v4710_v0 }
0x1be4   :  { %4773 = vmatpush1.bf16.msra.mxu0 %v15094_v38  ;;  %v15105_v38 = vld [vmem:[#allocation35_spill] sm:$0xff] }
0x1be5   :  { %v4714_v23 = vadd.f32 %v4713_v40, %v4712_v46  ;;  %4774 = vmatprep.subr.bf16.mxu0 %v15095_v22  ;;  %v15104_v46 = vld [vmem:[#allocation43_spill] sm:$0xff]  ;;  %v15106_v22 = vld [vmem:[#allocation44_spill] sm:$0xff] }
0x1be7   :  { %v4716_v55 = vadd.f32 %v4715_v35, %v4714_v23 }
0x1be8   :  { %4775 = vmatpush1.bf16.msra.mxu0 %v15096_v41 }
0x1be9   :  { %v4718_v2 = vadd.f32 %v4717_v13, %v4716_v55  ;;  %4776 = vmatprep.subr.bf16.mxu0 %v15097_v45  ;;  %v15107_v55 = vld [vmem:[#allocation46_spill] sm:$0xff]  ;;  %v15108_v13 = vld [vmem:[#allocation92_spill] sm:$0xff] }
0x1beb   :  { %7870 = vrcp.f32 %v4718_v2  ;;  %v15109_v2 = vld [vmem:[#allocation93_spill] sm:$0xff] }
0x1bec   :  { %4777 = vmatpush1.bf16.msra.mxu0 %v15098_v47 }
0x1bed   :  { %4778 = vmatprep.subr.bf16.mxu0 %v15099_v57 }
0x1bf0   :  { %4779 = vmatpush1.bf16.msra.mxu0 %v15100_v53 }
0x1bf1   :  { %4780 = vmatprep.subr.bf16.mxu0 %v15101_v28 }
0x1bf4   :  { %4781 = vmatpush1.bf16.msra.mxu0 %v15102_v6 }
0x1bf5   :  { %v7871_v5 = vpop.eup %7870  ;;  %4782 = vmatprep.subr.bf16.mxu0 %v15103_v51 }
0x1bf6   :  { %v4720_v26 = vmul.f32 %v7871_v5, %v7855_v50  ;;  %v4721_v31 = vmul.f32 %v7871_v5, %v7857_v12  ;;  %v4722_v0 = vmul.f32 %v7871_v5, %v7859_v7  ;;  %v4723_v54 = vmul.f32 %v7871_v5, %v7861_v4 }
0x1bf7   :  { %v4724_v44 = vmul.f32 %v7871_v5, %v7863_v18  ;;  %v4725_v41 = vmul.f32 %v7871_v5, %v7865_v27  ;;  %v4726_v7 = vmul.f32 %v7871_v5, %v7867_v49  ;;  %v4727_v53 = vmul.f32 %v7871_v5, %v7869_v37 }
0x1bf8   :  { %v4728_v40 = vmul.f32 %v15104_v46, %v4720_v26  ;;  %v4729_v23 = vmul.f32 %v15105_v38, %v4721_v31  ;;  %v4730_v35 = vmul.f32 %v15106_v22, %v4722_v0  ;;  %4783 = vmatpush1.bf16.msra.mxu0 %v15107_v55  ;;  %v4731_v45 = vmul.f32 %v15109_v2, %v4723_v54  ;;  %v6346_v38 = vld [vmem:[%s14137_s2 + $0x4] sm:$0x1]  ;;  %v12825_v2 = vld [vmem:[%s14145_s10 + $0x208] ss:$16 sps:$4 sm:$0xff]  }
0x1bf9   :  { %4793 = vmatprep.subr.bf16.mxu0 %v15108_v13  ;;  %v4732_v4 = vmul.f32 %v12362_v61, %v4724_v44  ;;  %v4733_v28 = vmul.f32 %v12366_v21, %v4725_v41  ;;  %v4734_v27 = vmul.f32 %v12370_v63, %v4726_v7  ;;  %v4735_v0 = vmul.f32 %v12374_v30, %v4727_v53  ;;  %v12819_v41 = vld [vmem:[%s14145_s10 + $0x200] ss:$16 sps:$4 sm:$0xff]   ;;  %v12857_v7 = vld [vmem:[%s14145_s10 + $0x244] ss:$16 sps:$4 sm:$0xff]  }
0x1bfa   :  { %v4736_v47 = vsel %vm1881_vm1, %v4728_v40, 0.0  ;;  %v4737_v50 = vsel %vm1881_vm1, %v4729_v23, 0.0  ;;  %v4739_v18 = vsel %vm1881_vm1, %v4730_v35, 0.0  ;;  %v4741_v6 = vsel %vm1881_vm1, %v4731_v45, 0.0  ;;  %v12831_v45 = vld [vmem:[%s14145_s10 + $0x224] ss:$16 sps:$4 sm:$0xff]  }
0x1bfb   :  { %v4738_v12 = vadd.f32 %v4737_v50, %v4736_v47  ;;  %v4743_v26 = vsel %vm1881_vm1, %v4732_v4, 0.0  ;;  %v4745_v49 = vsel %vm1881_vm1, %v4733_v28, 0.0  ;;  %v4747_v61 = vsel %vm1881_vm1, %v4734_v27, 0.0  ;;  %v12837_v47 = vld [vmem:[%s14145_s10 + $0x22c] ss:$16 sps:$4 sm:$0xff]  }
0x1bfc   :  { %v4749_v37 = vsel %vm1881_vm1, %v4735_v0, 0.0  ;;  %v4571_v63 = vstv %s4570_s28  ;;  %v12845_v50 = vld [vmem:[%s14145_s10 + $0x220] ss:$16 sps:$4 sm:$0xff]   ;;  %v12863_v4 = vld [vmem:[%s14145_s10 + $0x24c] ss:$16 sps:$4 sm:$0xff]  }
0x1bfd   :  { %v4740_v57 = vadd.f32 %v4739_v18, %v4738_v12  ;;  %vm4572_vm10 = vcmp.eq.s32.totalorder %v4571_v63, 1  ;;  %v12851_v12 = vld [vmem:[%s14145_s10 + $0x228] ss:$16 sps:$4 sm:$0xff]   ;;  %v12869_v18 = vld [vmem:[%s14145_s10 + $0x240] ss:$16 sps:$4 sm:$0xff]  }
0x1bfe   :  { %v4573_v30 = vsel %vm4572_vm10, 1, %v14710_v3  ;;  %v12881_v53 = vld [vmem:[%s14145_s10 + $0x264] ss:$16 sps:$4 sm:$0xff]   ;;  %v12887_v28 = vld [vmem:[%s14145_s10 + $0x26c] ss:$16 sps:$4 sm:$0xff]  }
0x1bff   :  { %v4742_v51 = vadd.f32 %v4741_v6, %v4740_v57  ;;  %v4574_v46 = vpack.c.b16 %v4573_v30, %v4573_v30  ;;  %v12875_v57 = vld [vmem:[%s14145_s10 + $0x248] ss:$16 sps:$4 sm:$0xff]   ;;  %v12893_v6 = vld [vmem:[%s14145_s10 + $0x260] ss:$16 sps:$4 sm:$0xff]   ;;  %v12905_v27 = vld [vmem:[%s14145_s10 + $0x284] ss:$16 sps:$4 sm:$0xff]  }
0x1c00   :  { %v12923_v0 = vld [vmem:[%s14145_s10 + $0x288] ss:$16 sps:$4 sm:$0xff]   ;;  %v12965_v63 = vld [vmem:[%s14145_s10 + $0x2c0] ss:$16 sps:$4 sm:$0xff]  }
0x1c01   :  { %v4744_v31 = vadd.f32 %v4743_v26, %v4742_v51  ;;  %vm4575_vm11 = vcmp.ne.s16.totalorder %v4574_v46, 0  ;;  %v12899_v51 = vld [vmem:[%s14145_s10 + $0x268] ss:$16 sps:$4 sm:$0xff]   ;;  %v12911_v26 = vld [vmem:[%s14145_s10 + $0x28c] ss:$16 sps:$4 sm:$0xff]   ;;  %15114 = vst [vmem:[#allocation62_spill] sm:$0xff] %v12965_v63 }
0x1c02   :  { %v12971_v30 = vld [vmem:[%s14145_s10 + $0x2c8] ss:$16 sps:$4 sm:$0xff]   ;;  %v12977_v46 = vld [vmem:[%s14145_s10 + $0x2e4] ss:$16 sps:$4 sm:$0xff]  }
0x1c03   :  { %v4746_v54 = vadd.f32 %v4745_v49, %v4744_v31  ;;  %v12917_v31 = vld [vmem:[%s14145_s10 + $0x280] ss:$16 sps:$4 sm:$0xff]   ;;  %v12929_v49 = vld [vmem:[%s14145_s10 + $0x2a4] ss:$16 sps:$4 sm:$0xff]   ;;  %15115 = vst [vmem:[#allocation63_spill] sm:$0xff] %v12971_v30  ;;  %15116 = vst [vmem:[#allocation42_spill] sm:$0xff] %v12977_v46 }
0x1c05   :  { %v4748_v44 = vadd.f32 %v4747_v61, %v4746_v54  ;;  %v12935_v54 = vld [vmem:[%s14145_s10 + $0x2ac] ss:$16 sps:$4 sm:$0xff]   ;;  %v12941_v61 = vld [vmem:[%s14145_s10 + $0x2a0] ss:$16 sps:$4 sm:$0xff]  }
0x1c06   :  { %15110 = vst [vmem:[#allocation40_spill] sm:$0xff] %v12941_v61 }
0x1c07   :  { %v4750_v5 = vadd.f32 %v4749_v37, %v4748_v44  ;;  %v12947_v44 = vld [vmem:[%s14145_s10 + $0x2a8] ss:$16 sps:$4 sm:$0xff]   ;;  %v12953_v37 = vld [vmem:[%s14145_s10 + $0x2c4] ss:$16 sps:$4 sm:$0xff]  }
0x1c08   :  { %15111 = vst [vmem:[#allocation59_spill] sm:$0xff] %v12947_v44  ;;  %15112 = vst [vmem:[#allocation60_spill] sm:$0xff] %v12953_v37 }
0x1c09   :  { %v12804_v21 = vpack.c.bf16 %v4750_v5, %v4750_v5  ;;  %v12959_v5 = vld [vmem:[%s14145_s10 + $0x2cc] ss:$16 sps:$4 sm:$0xff]  }
0x1c0a   :  { %15113 = vst [vmem:[#allocation41_spill] sm:$0xff] %v12959_v5 }
0x1c0b   :  { %4784 = vmatprep.mubr.bf16.mxu0 %v12804_v21  ;;  %4866 = vmatprep.mubr.bf16.mxu1 %v12804_v21 }
0x1c8e   :  { %v4559_v40 = vpop.f32.mrb[80].mxu0 }
0x1c8f   :  { %v4565_v23 = vpack.c.bf16 %v4559_v40, %v4559_v40  ;;  %v6970_v22 = vpop.f32.mrb[81].mxu0  ;;  %v12983_v40 = vld [vmem:[%s14145_s10 + $0x2ec] ss:$16 sps:$4 sm:$0xff]  }
0x1c90   :  { %v4562_v35 = vpop.f32.mrb[82].mxu0  ;;  %15117 = vst [vmem:[#allocation65_spill] sm:$0xff] %v12983_v40  ;;  %v13002_v22 = vld [vmem:[%s14147_s12 + $0x40] sm:$0xff]  }
0x1c91   :  { %v6971_v55 = vpop.f32.mrb[83].mxu0  ;;  %v12812_v13 = vsel %vm4575_vm11, %v6346_v38, %v4565_v23  ;;  %v12989_v38 = vld [vmem:[%s14145_s10 + $0x2e0] ss:$16 sps:$4 sm:$0xff]   ;;  %v12995_v23 = vld [vmem:[%s14145_s10 + $0x2e8] ss:$16 sps:$4 sm:$0xff]   ;;  %15120 = vst [vmem:[#allocation51_spill] sm:$0xff] %v13002_v22 }
0x1c92   :  { %4785 = vmatmul.mubr.bf16.vlgmr.msra.gmra.mrb[84].mxu0 %v12812_v13  ;;  %4867 = vmatmul.mubr.bf16.vlgmr.msra.gmra.mrb[84].mxu1 %v12812_v13  ;;  %15118 = vst [vmem:[#allocation45_spill] sm:$0xff] %v12989_v38  ;;  %15119 = vst [vmem:[#allocation48_spill] sm:$0xff] %v12995_v23  ;;  %v13011_v35 = vld [vmem:[%s14147_s12 + $0x80] sm:$0xff]  }
0x1c93   :  { %4794 = vmatpush1.bf16.msra.mxu0 %v12819_v41  ;;  %4876 = vmatpush1.bf16.msra.mxu1 %v12825_v2  ;;  %15121 = vst [vmem:[#allocation55_spill] sm:$0xff] %v13011_v35  ;;  %v13020_v55 = vld [vmem:[%s14147_s12] sm:$0xff]  }
0x1c94   :  { %4795 = vmatprep.subr.bf16.mxu0 %v12831_v45  ;;  %4877 = vmatprep.subr.bf16.mxu1 %v12837_v47  ;;  %15122 = vst [vmem:[#allocation58_spill] sm:$0xff] %v13020_v55 }
0x1c95   :  { %4825 = vmatprep.mubr.bf16.mxu0 %v14710_v3  ;;  %4907 = vmatprep.mubr.bf16.mxu1 %v14710_v3 }
0x1c97   :  { %4796 = vmatpush1.bf16.msra.mxu0 %v12845_v50  ;;  %4878 = vmatpush1.bf16.msra.mxu1 %v12851_v12 }
0x1c98   :  { %4797 = vmatprep.subr.bf16.mxu0 %v12857_v7  ;;  %4879 = vmatprep.subr.bf16.mxu1 %v12863_v4 }
0x1c9b   :  { %4798 = vmatpush1.bf16.msra.mxu0 %v12869_v18  ;;  %4880 = vmatpush1.bf16.msra.mxu1 %v12875_v57 }
0x1c9c   :  { %4799 = vmatprep.subr.bf16.mxu0 %v12881_v53  ;;  %4881 = vmatprep.subr.bf16.mxu1 %v12887_v28 }
0x1c9f   :  { %4800 = vmatpush1.bf16.msra.mxu0 %v12893_v6  ;;  %4882 = vmatpush1.bf16.msra.mxu1 %v12899_v51 }
0x1ca0   :  { %4801 = vmatprep.subr.bf16.mxu0 %v12905_v27  ;;  %4883 = vmatprep.subr.bf16.mxu1 %v12911_v26 }
0x1ca3   :  { %4802 = vmatpush1.bf16.msra.mxu0 %v12917_v31  ;;  %4884 = vmatpush1.bf16.msra.mxu1 %v12923_v0 }
0x1ca4   :  { %4803 = vmatprep.subr.bf16.mxu0 %v12929_v49  ;;  %4885 = vmatprep.subr.bf16.mxu1 %v12935_v54 }
0x1ca7   :  { %4804 = vmatpush1.bf16.msra.mxu0 %v12941_v61  ;;  %4886 = vmatpush1.bf16.msra.mxu1 %v12947_v44 }
0x1ca8   :  { %4805 = vmatprep.subr.bf16.mxu0 %v12953_v37  ;;  %4887 = vmatprep.subr.bf16.mxu1 %v12959_v5 }
0x1cab   :  { %4806 = vmatpush1.bf16.msra.mxu0 %v12965_v63  ;;  %4888 = vmatpush1.bf16.msra.mxu1 %v12971_v30 }
0x1cac   :  { %4807 = vmatprep.subr.bf16.mxu0 %v12977_v46  ;;  %4889 = vmatprep.subr.bf16.mxu1 %v12983_v40 }
0x1caf   :  { %4808 = vmatpush1.bf16.msra.mxu0 %v12989_v38  ;;  %4890 = vmatpush1.bf16.msra.mxu1 %v12995_v23 }
0x1cb0   :  { %6992 = vmatprep.subr.bf16.mxu1 %v14720_v62  ;;  %6583 = vmatprep.subr.bf16.mxu0 %v13002_v22 }
0x1cb2   :  { %4826 = vmatmul.mubr.bf16.vlgmr.msra.gmra.mrb[84].mxu0 %v12492_v60  ;;  %4908 = vmatmul.mubr.bf16.vlgmr.msra.gmra.mrb[84].mxu1 %v12492_v60  ;;  %v13026_v60 = vld [vmem:[%s14147_s12 + $0x48] sm:$0xff]  }
0x1cb3   :  { %4973 = vmatprep.mubr.bf16.mxu0 %v12804_v21  ;;  %6993 = vmatpush3.bf16.msra.mxu1 %v13011_v35  ;;  %15123 = vst [vmem:[#allocation61_spill] sm:$0xff] %v13026_v60  ;;  %v13032_v21 = vld [vmem:[%s14147_s12 + $0x88] sm:$0xff]  }
0x1cb4   :  { %6994 = vmatprep.subr.bf16.mxu1 %v14720_v62  ;;  %7008 = vmatprep.mubr.msk.bf16.mxu1 %vm8499_vm0, %v14720_v62  ;;  %15124 = vst [vmem:[#allocation64_spill] sm:$0xff] %v13032_v21 }
0x1cb5   :  { %6584 = vmatpush3.bf16.msra.mxu0 %v13020_v55  ;;  %v13039_v55 = vld [vmem:[%s14147_s12 + $0x8] sm:$0xff]  }
0x1cb6   :  { %6585 = vmatprep.subr.bf16.mxu0 %v13026_v60  ;;  %15125 = vst [vmem:[#allocation66_spill] sm:$0xff] %v13039_v55  ;;  %v13045_v60 = vld [vmem:[%s14147_s12 + $0x50] sm:$0xff]  }
0x1cb7   :  { %6995 = vmatpush3.bf16.msra.mxu1 %v13032_v21  ;;  %15126 = vst [vmem:[#allocation15_spill] sm:$0xff] %v13045_v60  ;;  %v13051_v21 = vld [vmem:[%s14147_s12 + $0x90] sm:$0xff]  }
0x1cb8   :  { %6996 = vmatprep.subr.bf16.mxu1 %v14720_v62  ;;  %15127 = vst [vmem:[#allocation20_spill] sm:$0xff] %v13051_v21 }
0x1cb9   :  { %6586 = vmatpush3.bf16.msra.mxu0 %v13039_v55  ;;  %v13058_v55 = vld [vmem:[%s14147_s12 + $0x10] sm:$0xff]  }
0x1cba   :  { %6587 = vmatprep.subr.bf16.mxu0 %v13045_v60  ;;  %15128 = vst [vmem:[#allocation18_spill] sm:$0xff] %v13058_v55  ;;  %v13064_v60 = vld [vmem:[%s14147_s12 + $0x58] sm:$0xff]  }
0x1cbb   :  { %6997 = vmatpush3.bf16.msra.mxu1 %v13051_v21  ;;  %15129 = vst [vmem:[#allocation21_spill] sm:$0xff] %v13064_v60  ;;  %v13070_v21 = vld [vmem:[%s14147_s12 + $0x98] sm:$0xff]  }
0x1cbc   :  { %6998 = vmatprep.subr.bf16.mxu1 %v14720_v62  ;;  %15130 = vst [vmem:[#allocation24_spill] sm:$0xff] %v13070_v21 }
0x1cbd   :  { %6588 = vmatpush3.bf16.msra.mxu0 %v13058_v55  ;;  %v13077_v55 = vld [vmem:[%s14147_s12 + $0x18] sm:$0xff]  }
0x1cbe   :  { %6589 = vmatprep.subr.bf16.mxu0 %v13064_v60  ;;  %15131 = vst [vmem:[#allocation25_spill] sm:$0xff] %v13077_v55  ;;  %v13083_v60 = vld [vmem:[%s14147_s12 + $0x60] sm:$0xff]  }
0x1cbf   :  { %6999 = vmatpush3.bf16.msra.mxu1 %v13070_v21  ;;  %15132 = vst [vmem:[#allocation7_spill] sm:$0xff] %v13083_v60  ;;  %v13089_v21 = vld [vmem:[%s14147_s12 + $0xa0] sm:$0xff]  }
0x1cc0   :  { %7000 = vmatprep.subr.bf16.mxu1 %v14720_v62  ;;  %15133 = vst [vmem:[#allocation12_spill] sm:$0xff] %v13089_v21 }
0x1cc1   :  { %6590 = vmatpush3.bf16.msra.mxu0 %v13077_v55  ;;  %v13096_v55 = vld [vmem:[%s14147_s12 + $0x20] sm:$0xff]  }
0x1cc2   :  { %6591 = vmatprep.subr.bf16.mxu0 %v13083_v60  ;;  %15134 = vst [vmem:[#allocation8_spill] sm:$0xff] %v13096_v55  ;;  %v13102_v60 = vld [vmem:[%s14147_s12 + $0x68] sm:$0xff]  }
0x1cc3   :  { %7001 = vmatpush3.bf16.msra.mxu1 %v13089_v21  ;;  %15135 = vst [vmem:[#allocation26_spill] sm:$0xff] %v13102_v60  ;;  %v13108_v21 = vld [vmem:[%s14147_s12 + $0xa8] sm:$0xff]  }
0x1cc4   :  { %7002 = vmatprep.subr.bf16.mxu1 %v14720_v62  ;;  %15136 = vst [vmem:[#allocation27_spill] sm:$0xff] %v13108_v21 }
0x1cc5   :  { %6592 = vmatpush3.bf16.msra.mxu0 %v13096_v55  ;;  %v13115_v55 = vld [vmem:[%s14147_s12 + $0x28] sm:$0xff]  }
0x1cc6   :  { %6593 = vmatprep.subr.bf16.mxu0 %v13102_v60  ;;  %15137 = vst [vmem:[#allocation28_spill] sm:$0xff] %v13115_v55  ;;  %v13121_v60 = vld [vmem:[%s14147_s12 + $0x70] sm:$0xff]  }
0x1cc7   :  { %7003 = vmatpush3.bf16.msra.mxu1 %v13108_v21  ;;  %15138 = vst [vmem:[#allocation68_spill] sm:$0xff] %v13121_v60  ;;  %v13127_v21 = vld [vmem:[%s14147_s12 + $0xb0] sm:$0xff]  }
0x1cc8   :  { %7004 = vmatprep.subr.bf16.mxu1 %v14720_v62  ;;  %15139 = vst [vmem:[#allocation69_spill] sm:$0xff] %v13127_v21 }
0x1cc9   :  { %6594 = vmatpush3.bf16.msra.mxu0 %v13115_v55  ;;  %v13134_v55 = vld [vmem:[%s14147_s12 + $0x30] sm:$0xff]  }
0x1cca   :  { %6595 = vmatprep.subr.bf16.mxu0 %v13121_v60  ;;  %15140 = vst [vmem:[#allocation70_spill] sm:$0xff] %v13134_v55  ;;  %v13140_v60 = vld [vmem:[%s14147_s12 + $0x78] sm:$0xff]  }
0x1ccb   :  { %7005 = vmatpush3.bf16.msra.mxu1 %v13127_v21  ;;  %15141 = vst [vmem:[#allocation71_spill] sm:$0xff] %v13140_v60  ;;  %v13146_v21 = vld [vmem:[%s14147_s12 + $0xb8] sm:$0xff]  }
0x1ccc   :  { %7006 = vmatprep.subr.bf16.mxu1 %v14720_v62  ;;  %15142 = vst [vmem:[#allocation72_spill] sm:$0xff] %v13146_v21 }
0x1ccd   :  { %6596 = vmatpush3.bf16.msra.mxu0 %v13134_v55  ;;  %v13153_v55 = vld [vmem:[%s14147_s12 + $0x38] sm:$0xff]  }
0x1cce   :  { %6597 = vmatprep.subr.bf16.mxu0 %v13140_v60  ;;  %15143 = vst [vmem:[#allocation73_spill] sm:$0xff] %v13153_v55  ;;  %v13161_v60 = vld [vmem:[%s14142_s7] sm:$0xff]  }
0x1ccf   :  { %7007 = vmatpush3.bf16.msra.mxu1 %v13146_v21  ;;  %15144 = vst [vmem:[#allocation74_spill] sm:$0xff] %v13161_v60 }
0x1cd0   :  { %7032 = vmatprep.subr.bf16.mxu1 %v14720_v62 }
0x1cd1   :  { %6598 = vmatpush3.bf16.msra.mxu0 %v13153_v55  ;;  %v13170_v55 = vld [vmem:[%s14142_s7 + $0x8] sm:$0xff]  }
0x1cd2   :  { %7009 = vmatmul.mubr.bf16.vlgmr.msra.gmra.mrb[88].mxu1 %v12812_v13  ;;  %7012 = vmatprep.subr.bf16.mxu0 %v14720_v62  ;;  %15145 = vst [vmem:[#allocation75_spill] sm:$0xff] %v13170_v55  ;;  %v13177_v13 = vld [vmem:[%s14142_s7 + $0x10] sm:$0xff]  }
0x1cd3   :  { %7033 = vmatpush3.bf16.msra.mxu1 %v13161_v60  ;;  %7048 = vmatprep.mubr.msk.bf16.mxu1 %vm8499_vm0, %v14720_v62  ;;  %15146 = vst [vmem:[#allocation76_spill] sm:$0xff] %v13177_v13  ;;  %v13184_v60 = vld [vmem:[%s14142_s7 + $0x18] sm:$0xff]  }
0x1cd4   :  { %7034 = vmatprep.subr.bf16.mxu1 %v14720_v62  ;;  %15147 = vst [vmem:[#allocation77_spill] sm:$0xff] %v13184_v60 }
0x1cd7   :  { %7035 = vmatpush3.bf16.msra.mxu1 %v13170_v55  ;;  %v13191_v55 = vld [vmem:[%s14142_s7 + $0x20] sm:$0xff]  }
0x1cd8   :  { %7036 = vmatprep.subr.bf16.mxu1 %v14720_v62  ;;  %15148 = vst [vmem:[#allocation78_spill] sm:$0xff] %v13191_v55 }
0x1cdb   :  { %7037 = vmatpush3.bf16.msra.mxu1 %v13177_v13  ;;  %v13198_v13 = vld [vmem:[%s14142_s7 + $0x28] sm:$0xff]  }
0x1cdc   :  { %7038 = vmatprep.subr.bf16.mxu1 %v14720_v62  ;;  %15149 = vst [vmem:[#allocation79_spill] sm:$0xff] %v13198_v13 }
0x1cdf   :  { %7039 = vmatpush3.bf16.msra.mxu1 %v13184_v60  ;;  %v13205_v60 = vld [vmem:[%s14142_s7 + $0x30] sm:$0xff]  }
0x1ce0   :  { %7040 = vmatprep.subr.bf16.mxu1 %v14720_v62  ;;  %15150 = vst [vmem:[#allocation80_spill] sm:$0xff] %v13205_v60 }
0x1ce3   :  { %7041 = vmatpush3.bf16.msra.mxu1 %v13191_v55  ;;  %v13212_v55 = vld [vmem:[%s14142_s7 + $0x38] sm:$0xff]  }
0x1ce4   :  { %7042 = vmatprep.subr.bf16.mxu1 %v14720_v62  ;;  %15151 = vst [vmem:[#allocation81_spill] sm:$0xff] %v13212_v55 }
0x1ce7   :  { %7043 = vmatpush3.bf16.msra.mxu1 %v13198_v13 }
0x1ce8   :  { %7044 = vmatprep.subr.bf16.mxu1 %v14720_v62 }
0x1ceb   :  { %7045 = vmatpush3.bf16.msra.mxu1 %v13205_v60 }
0x1cec   :  { %7046 = vmatprep.subr.bf16.mxu1 %v14720_v62 }
0x1cef   :  { %7047 = vmatpush3.bf16.msra.mxu1 %v13212_v55 }
0x1cf0   :  { %5356 = vmatprep.subr.bf16.mxu1 %v12479_v1 }
0x1d85   :  { %v4827_v13 = vpop.f32.mrb[84].mxu0  ;;  %v4909_v21 = vpop.f32.mrb[84].mxu1 }
0x1d86   :  { %v7148_v35 = vadd.f32 %v4827_v13, %v15055_v29  ;;  %v4829_v22 = vpop.f32.mrb[85].mxu0  ;;  %v4911_v23 = vpop.f32.mrb[85].mxu1  ;;  %v7150_v1 = vadd.f32 %v4909_v21, %v10749_v15 }
0x1d87   :  { %v7149_v38 = vadd.f32 %v4829_v22, %v10738_v24  ;;  %v4831_v60 = vpop.f32.mrb[86].mxu0  ;;  %v4913_v40 = vpop.f32.mrb[86].mxu1  ;;  %v7151_v55 = vadd.f32 %v4911_v23, %v10744_v52 }
0x1d88   :  { %v6347_v46 = vmul.f32 -1.442695, %v7148_v35  ;;  %v4832_v30 = vpop.f32.mrb[87].mxu0  ;;  %v4914_v63 = vpop.f32.mrb[87].mxu1 }
0x1d89   :  { %v6348_v5 = vmul.f32 -1.442695, %v7149_v38  ;;  %v6349_v37 = vmul.f32 -1.442695, %v7151_v55 }
0x1d8a   :  { %7872 = vpow2.f32 %v6347_v46 }
0x1d8b   :  { %7874 = vpow2.f32 %v6348_v5 }
0x1d8c   :  { %7876 = vpow2.f32 %v6349_v37 }
0x1d8d   :  { %7878 = vtanh.f32 %v7150_v1  ;;  %v13244_v1 = vld [vmem:[%s14138_s3 + $0x8] sm:$0xff]  }
0x1d94   :  { %v7873_v44 = vpop.eup %7872 }
0x1d95   :  { %v7875_v61 = vpop.eup %7874  ;;  %v4919_v13 = vadd.f32 1.0, %v7873_v44 }
0x1d96   :  { %v4925_v29 = vadd.f32 1.0, %v7875_v61  ;;  %v7877_v40 = vpop.eup %7876 }
0x1d97   :  { %7880 = vrcp.f32 %v4919_v13  ;;  %v7879_v22 = vpop.eup %7878  ;;  %v4932_v46 = vadd.f32 1.0, %v7877_v40  ;;  %v13253_v13 = vld [vmem:[%s14138_s3 + $0x10] sm:$0xff]  }
0x1d98   :  { %7882 = vrcp.f32 %v4925_v29 }
0x1d99   :  { %7884 = vrcp.f32 %v4932_v46 }
0x1da1   :  { %v7881_v30 = vpop.eup %7880 }
0x1da2   :  { %v7883_v63 = vpop.eup %7882  ;;  %v4936_v38 = vmul.f32 %v7881_v30, %v7879_v22 }
0x1da3   :  { %v4935_v5 = vmul.f32 %v7883_v63, %v12487_v16  ;;  %v7885_v37 = vpop.eup %7884  ;;  %v13233_v16 = vld [vmem:[%s14138_s3] sm:$0xff]  }
0x1da5   :  { %v13221_v23 = vadd.f32 %v4936_v38, %v4935_v5  ;;  %v13223_v35 = vpop.f32.mrb[88].mxu1 }
0x1da6   :  { %v7010_v55 = vpop.f32.mrb[89].mxu1 }
0x1da7   :  { %v5018_v44 = vpop.f32.mrb[90].mxu1  ;;  %7886 = vtanh.f32 %v13221_v23  ;;  %v13328_v55 = vld [vmem:[%s14148_s13] ss:$0 sm:$0xff] }
0x1da8   :  { %v7011_v61 = vpop.f32.mrb[91].mxu1 }
0x1db1   :  { %v7887_v29 = vpop.eup %7886 }
0x1db2   :  { %v4939_v60 = vmul.f32 %v7887_v29, %v7885_v37  ;;  %v15164_v29 = vld [vmem:[#allocation6_spill] sm:$0xff] }
0x1db4   :  { %v13226_v21 = vpack.c.bf16 %v4939_v60, %v4939_v60 }
0x1db6   :  { %4974 = vmatmul.mubr.bf16.vlgmr.msra.gmra.mrb[88].mxu0 %v13226_v21  ;;  %7049 = vmatmul.mubr.bf16.vlgmr.msra.gmra.mrb[92].mxu1 %v13226_v21 }
0x1db7   :  { %7013 = vmatpush3.bf16.msra.mxu0 %v13233_v16  ;;  %7028 = vmatprep.mubr.msk.bf16.mxu0 %vm8499_vm0, %v14720_v62 }
0x1db8   :  { %7014 = vmatprep.subr.bf16.mxu0 %v14720_v62  ;;  %5357 = vmatpush1.bf16.msra.mxu1 %v12503_v9  ;;  %v13262_v9 = vld [vmem:[%s14138_s3 + $0x18] sm:$0xff]  }
0x1db9   :  { %5358 = vmatprep.subr.bf16.mxu1 %v12509_v59  ;;  %v13271_v59 = vld [vmem:[%s14138_s3 + $0x20] sm:$0xff]  }
0x1dbb   :  { %7015 = vmatpush3.bf16.msra.mxu0 %v13244_v1 }
0x1dbc   :  { %7016 = vmatprep.subr.bf16.mxu0 %v14720_v62  ;;  %5359 = vmatpush1.bf16.msra.mxu1 %v12517_v43  ;;  %v13280_v43 = vld [vmem:[%s14138_s3 + $0x28] sm:$0xff]  }
0x1dbd   :  { %5360 = vmatprep.subr.bf16.mxu1 %v12523_v17  ;;  %v13289_v17 = vld [vmem:[%s14138_s3 + $0x30] sm:$0xff]  }
0x1dbf   :  { %7017 = vmatpush3.bf16.msra.mxu0 %v13253_v13 }
0x1dc0   :  { %7018 = vmatprep.subr.bf16.mxu0 %v14720_v62  ;;  %5361 = vmatpush1.bf16.msra.mxu1 %v12531_v58  ;;  %v13298_v58 = vld [vmem:[%s14138_s3 + $0x38] sm:$0xff]  }
0x1dc1   :  { %5362 = vmatprep.subr.bf16.mxu1 %v12537_v19  ;;  %v13304_v19 = vld [vmem:[%s14145_s10 + $0x4] ss:$16 sps:$4 sm:$0xff]  }
0x1dc3   :  { %7019 = vmatpush3.bf16.msra.mxu0 %v13262_v9 }
0x1dc4   :  { %7020 = vmatprep.subr.bf16.mxu0 %v14720_v62  ;;  %5363 = vmatpush1.bf16.msra.mxu1 %v12545_v36  ;;  %v15152_v36 = vld [vmem:[#allocation36_spill] sm:$0xff] }
0x1dc5   :  { %5364 = vmatprep.subr.bf16.mxu1 %v12551_v20  ;;  %v15153_v20 = vld [vmem:[#allocation47_spill] sm:$0xff] }
0x1dc7   :  { %7021 = vmatpush3.bf16.msra.mxu0 %v13271_v59 }
0x1dc8   :  { %7022 = vmatprep.subr.bf16.mxu0 %v14720_v62  ;;  %5365 = vmatpush1.bf16.msra.mxu1 %v12559_v8  ;;  %v15154_v8 = vld [vmem:[#allocation49_spill] sm:$0xff] }
0x1dc9   :  { %5366 = vmatprep.subr.bf16.mxu1 %v12565_v39  ;;  %v15155_v39 = vld [vmem:[#allocation37_spill] sm:$0xff] }
0x1dcb   :  { %7023 = vmatpush3.bf16.msra.mxu0 %v13280_v43 }
0x1dcc   :  { %7024 = vmatprep.subr.bf16.mxu0 %v14720_v62  ;;  %5367 = vmatpush1.bf16.msra.mxu1 %v12573_v34  ;;  %v15156_v34 = vld [vmem:[#allocation50_spill] sm:$0xff] }
0x1dcd   :  { %5368 = vmatprep.subr.bf16.mxu1 %v12579_v33  ;;  %v15157_v33 = vld [vmem:[#allocation52_spill] sm:$0xff] }
0x1dcf   :  { %7025 = vmatpush3.bf16.msra.mxu0 %v13289_v17 }
0x1dd0   :  { %7026 = vmatprep.subr.bf16.mxu0 %v14720_v62  ;;  %5369 = vmatpush1.bf16.msra.mxu1 %v12587_v48  ;;  %v15158_v48 = vld [vmem:[#allocation38_spill] sm:$0xff] }
0x1dd1   :  { %5370 = vmatprep.subr.bf16.mxu1 %v12593_v56  ;;  %v15159_v56 = vld [vmem:[#allocation53_spill] sm:$0xff] }
0x1dd3   :  { %7027 = vmatpush3.bf16.msra.mxu0 %v13298_v58 }
0x1dd4   :  { %5274 = vmatprep.subr.bf16.mxu0 %v13304_v19  ;;  %5371 = vmatpush1.bf16.msra.mxu1 %v12601_v25  ;;  %v15160_v25 = vld [vmem:[#allocation54_spill] sm:$0xff] }
0x1dd5   :  { %5372 = vmatprep.subr.bf16.mxu1 %v12607_v42  ;;  %v15161_v42 = vld [vmem:[#allocation39_spill] sm:$0xff] }
0x1dd8   :  { %5373 = vmatpush1.bf16.msra.mxu1 %v12613_v11  ;;  %v15162_v11 = vld [vmem:[#allocation56_spill] sm:$0xff] }
0x1dd9   :  { %5374 = vmatprep.subr.bf16.mxu1 %v12619_v10  ;;  %v15163_v10 = vld [vmem:[#allocation57_spill] sm:$0xff] }
0x1ddc   :  { %5375 = vmatpush1.bf16.msra.mxu1 %v12625_v14 }
0x1ddd   :  { %5376 = vmatprep.subr.bf16.mxu1 %v12631_v32 }
0x1de0   :  { %5377 = vmatpush1.bf16.msra.mxu1 %v15152_v36  ;;  %v15165_v36 = vld [vmem:[#allocation9_spill] sm:$0xff] }
0x1de1   :  { %5378 = vmatprep.subr.bf16.mxu1 %v15153_v20 }
0x1de4   :  { %5379 = vmatpush1.bf16.msra.mxu1 %v15154_v8  ;;  %v15166_v8 = vld [vmem:[#allocation11_spill] sm:$0xff] }
0x1de5   :  { %5380 = vmatprep.subr.bf16.mxu1 %v15155_v39 }
0x1de8   :  { %5381 = vmatpush1.bf16.msra.mxu1 %v15156_v34 }
0x1de9   :  { %5382 = vmatprep.subr.bf16.mxu1 %v15157_v33  ;;  %v15167_v33 = vld [vmem:[#allocation19_spill] sm:$0xff] }
0x1dec   :  { %5383 = vmatpush1.bf16.msra.mxu1 %v15158_v48 }
0x1ded   :  { %5384 = vmatprep.subr.bf16.mxu1 %v15159_v56 }
0x1df0   :  { %5385 = vmatpush1.bf16.msra.mxu1 %v15160_v25 }
0x1df1   :  { %5386 = vmatprep.subr.bf16.mxu1 %v15161_v42 }
0x1df4   :  { %5387 = vmatpush1.bf16.msra.mxu1 %v15162_v11 }
0x1df5   :  { %5397 = vmatprep.subr.bf16.mxu1 %v15163_v10 }
0x1e89   :  { %v6599_v14 = vpop.f32.mrb[88].mxu0  ;;  %v5133_v32 = vpop.f32.mrb[92].mxu1 }
0x1e8a   :  { %v6600_v40 = vpop.f32.mrb[89].mxu0  ;;  %v7050_v22 = vpop.f32.mrb[93].mxu1  ;;  %v5139_v60 = vadd.f32 %v5133_v32, %v15164_v29  ;;  %v5141_v20 = vadd.f32 %v5133_v32, %v15165_v36  ;;  %v5143_v39 = vadd.f32 %v5133_v32, %v15166_v8 }
0x1e8b   :  { %v6601_v30 = vadd.f32 %v6600_v40, %v6599_v14  ;;  %v6602_v63 = vpop.f32.mrb[90].mxu0  ;;  %v5136_v38 = vpop.f32.mrb[94].mxu1  ;;  %v13345_v14 = vld [vmem:[%s14144_s9] ss:$0 sm:$0xff] }
0x1e8c   :  { %v6603_v46 = vpop.f32.mrb[91].mxu0  ;;  %v7051_v5 = vpop.f32.mrb[95].mxu1  ;;  %7888 = vtanh.f32 %v5139_v60  ;;  %15169 = vst [vmem:[#allocation82_spill] sm:$0xff] %v13345_v14 }
0x1e8d   :  { %v4976_v44 = vadd.f32 %v13328_v55, %v6601_v30  ;;  %7890 = vtanh.f32 %v5141_v20  ;;  %v15170_v20 = vld [vmem:[#allocation13_spill] sm:$0xff] }
0x1e8e   :  { %7892 = vtanh.f32 %v5143_v39  ;;  %v5140_v39 = vadd.f32 %v5133_v32, %v15170_v20 }
0x1e8f   :  { %v5016_v61 = vadd.f32 %v13223_v35, %v4976_v44  ;;  %v15168_v35 = vld [vmem:[#allocation17_spill] sm:$0xff] }
0x1e90   :  { %v5145_v56 = vadd.f32 %v5133_v32, %v15168_v35  ;;  %v13422_v35 = vld [vmem:[%s14145_s10 + $0x84] ss:$16 sps:$4 sm:$0xff]  }
0x1e91   :  { %6350 = vst [vmem:[%s14149_s14 + $0x8] sm:$0x3] %v5016_v61  ;;  %v5023_v37 = vsel %vm1881_vm1, %v5016_v61, -inf  ;;  %15181 = vst [vmem:[#allocation89_spill] sm:$0xff] %v13422_v35 }
0x1e92   :  { %5024 = vmax.xlane.f32.xlu0 %v5023_v37  ;;  %7894 = vtanh.f32 %v5145_v56  ;;  %v15172_v56 = vld [vmem:[#allocation16_spill] sm:$0xff] }
0x1e93   :  { %7896 = vtanh.f32 %v5140_v39 }
0x1e96   :  { %v7889_v42 = vpop.eup %7888 }
0x1e97   :  { %v5155_v40 = vmul.f32 %v13345_v14, %v7889_v42  ;;  %v7891_v22 = vpop.eup %7890  ;;  %v5144_v42 = vadd.f32 %v5133_v32, %v15172_v56 }
0x1e98   :  { %v5157_v63 = vmul.f32 %v13345_v14, %v7891_v22  ;;  %v7893_v38 = vpop.eup %7892 }
0x1e99   :  { %v5163_v30 = vsel %vm1881_vm1, %v5155_v40, 0.0  ;;  %v5159_v5 = vmul.f32 %v13345_v14, %v7893_v38  ;;  %v15173_v40 = vld [vmem:[#allocation14_spill] sm:$0xff] }
0x1e9a   :  { %v5169_v46 = vsel %vm1881_vm1, %v5157_v63, 0.0  ;;  %v5146_v22 = vadd.f32 %v5133_v32, %v15173_v40 }
0x1e9c   :  { %v7895_v44 = vpop.eup %7894 }
0x1e9d   :  { %v5161_v37 = vmul.f32 %v13345_v14, %v7895_v44 }
0x1e9f   :  { %v5181_v60 = vsel %vm1881_vm1, %v5161_v37, 0.0 }
0x1f1f   :  { %v5025_v34 = vpop.xlane.xlu0 %5024 }
0x1f20   :  { %vm5026_vm12 = vcmp.eq.f32.partialorder %v5016_v61, %v5025_v34  ;;  %v5175_v61 = vsel %vm1881_vm1, %v5159_v5, 0.0  ;;  %v15171_v34 = vld [vmem:[#allocation10_spill] sm:$0xff] }
0x1f21   :  { %v5027_v48 = vsel %vm5026_vm12, %v15167_v33, 128 }
0x1f22   :  { %v5028_v25 = vsel %vm1881_vm1, %v5027_v48, 2147483647  ;;  %v5142_v48 = vadd.f32 %v5133_v32, %v15171_v34 }
0x1f23   :  { %v5030_v11 = vshra.s32 %v5028_v25, 16 }
0x1f24   :  { %7898 = vtanh.f32 %v5142_v48 }
0x1f25   :  { %v5032_v10 = vcvt.s32.f32 %v5030_v11  ;;  %v5029_v11 = vand.u32 65535, %v5028_v25  ;;  %7900 = vtanh.f32 %v5144_v42 }
0x1f26   :  { %7902 = vtanh.f32 %v5146_v22 }
0x1f27   :  { %5033 = vmin.xlane.f32.xlu1 %v5032_v10  ;;  %v5031_v38 = vcvt.s32.f32 %v5029_v11 }
0x1f2b   :  { %5164 = vadd.xlane.f32.xlu1 %v5163_v30  ;;  %v7897_v30 = vpop.eup %7896 }
0x1f2c   :  { %v5156_v5 = vmul.f32 %v13345_v14, %v7897_v30 }
0x1f2e   :  { %v7899_v44 = vpop.eup %7898 }
0x1f2f   :  { %5170 = vadd.xlane.f32.xlu1 %v5169_v46  ;;  %v5158_v37 = vmul.f32 %v13345_v14, %v7899_v44 }
0x1f31   :  { %v5172_v25 = vsel %vm1881_vm1, %v5158_v37, 0.0 }
0x1f33   :  { %5176 = vadd.xlane.f32.xlu1 %v5175_v61  ;;  %v5166_v61 = vsel %vm1881_vm1, %v5156_v5, 0.0 }
0x1f37   :  { %5182 = vadd.xlane.f32.xlu1 %v5181_v60  ;;  %v7901_v60 = vpop.eup %7900 }
0x1f38   :  { %v5160_v32 = vmul.f32 %v13345_v14, %v7901_v60  ;;  %v7903_v39 = vpop.eup %7902  ;;  %v15174_v60 = vmov 1.0|1.0  }
0x1f39   :  { %v5162_v48 = vmul.f32 %v13345_v14, %v7903_v39  ;;  %v13416_v14 = vld [vmem:[%s14145_s10 + $0x60] ss:$16 sps:$4 sm:$0xff]  }
0x1f3b   :  { %v5184_v42 = vsel %vm1881_vm1, %v5162_v48, 0.0  ;;  %v13384_v48 = vld [vmem:[%s14145_s10 + $0x20] ss:$16 sps:$4 sm:$0xff]  }
0x1f3c   :  { %15177 = vst [vmem:[#allocation85_spill] sm:$0xff] %v13384_v48 }
0x1fb4   :  { %v5034_v63 = vpop.xlane.xlu1 %5033 }
0x1fb5   :  { %vm5035_vm13 = vcmp.eq.f32.partialorder %v5032_v10, %v5034_v63  ;;  %v5178_v10 = vsel %vm1881_vm1, %v5160_v32, 0.0  ;;  %v5040_v22 = vcvt.f32.s32 %v5034_v63  ;;  %v13372_v32 = vld [vmem:[%s14145_s10] ss:$16 sps:$4 sm:$0xff]   ;;  %v13378_v63 = vld [vmem:[%s14145_s10 + $0x24] ss:$16 sps:$4 sm:$0xff]  }
0x1fb6   :  { %v5036_v46 = vsel %vm5035_vm13, %v5031_v38, inf  ;;  %15175 = vst [vmem:[#allocation83_spill] sm:$0xff] %v13372_v32  ;;  %15176 = vst [vmem:[#allocation84_spill] sm:$0xff] %v13378_v63 }
0x1fb7   :  { %5037 = vmin.xlane.f32.xlu0 %v5036_v46  ;;  %v5041_v46 = vshll.u32 %v5040_v22, 16  ;;  %v13391_v22 = vld [vmem:[%s14145_s10 + $0x44] ss:$16 sps:$4 sm:$0xff]  }
0x1fb8   :  { %v5165_v11 = vpop.xlane.xlu1 %5164  ;;  %15178 = vst [vmem:[#allocation86_spill] sm:$0xff] %v13391_v22 }
0x1fbb   :  { %5167 = vadd.xlane.f32.xlu0 %v5166_v61 }
0x1fbc   :  { %v5171_v30 = vpop.xlane.xlu1 %5170 }
0x1fbf   :  { %5173 = vadd.xlane.f32.xlu0 %v5172_v25 }
0x1fc0   :  { %v5177_v37 = vpop.xlane.xlu1 %5176 }
0x1fc3   :  { %5179 = vadd.xlane.f32.xlu0 %v5178_v10 }
0x1fc4   :  { %v5183_v39 = vpop.xlane.xlu1 %5182 }
0x1fc7   :  { %5185 = vadd.xlane.f32.xlu0 %v5184_v42 }
0x2044   :  { %v5038_v38 = vpop.xlane.xlu0 %5037 }
0x2045   :  { %v5039_v5 = vcvt.f32.s32 %v5038_v38  ;;  %v5191_v38 = vsel %vm1881_vm1, %v5177_v37, -inf }
0x2047   :  { %v5042_v44 = vadd.s32 %v5041_v46, %v5039_v5  ;;  %v5195_v46 = vsel %vm1881_vm1, %v5183_v39, -inf }
0x2048   :  { %v5168_v61 = vpop.xlane.xlu0 %5167 }
0x2049   :  { %vm5043_vm14 = vcmp.eq.s32.totalorder %v15167_v33, %v5042_v44  ;;  %v5188_v5 = vsel %vm1881_vm1, %v5168_v61, -inf }
0x204a   :  { %vm6352_vm15 = vmpackc.low %vm5043_vm14, %vm5043_vm14 }
0x204b   :  { %7029 = vmatmul.mubr.msk.bf16.vlgmr.msra.gmra.mrb[92].mxu0 %vm6352_vm15, %v15174_v60  ;;  %v5189_v60 = vsel %vm1881_vm1, %v5171_v30, -inf }
0x204c   :  { %v5174_v25 = vpop.xlane.xlu0 %5173  ;;  %5275 = vmatpush1.bf16.msra.mxu0 %v13372_v32  ;;  %v5187_v32 = vsel %vm1881_vm1, %v5165_v11, -inf  ;;  %v5196_v56 = vmax.f32 %v5189_v60, %v5195_v46 }
0x204d   :  { %5276 = vmatprep.subr.bf16.mxu0 %v13378_v63 }
0x2050   :  { %v5180_v10 = vpop.xlane.xlu0 %5179  ;;  %5277 = vmatpush1.bf16.msra.mxu0 %v13384_v48  ;;  %v13400_v48 = vld [vmem:[%s14145_s10 + $0x40] ss:$16 sps:$4 sm:$0xff]  }
0x2051   :  { %v5193_v42 = vsel %vm1881_vm1, %v5180_v10, -inf  ;;  %5278 = vmatprep.subr.bf16.mxu0 %v13391_v22  ;;  %15179 = vst [vmem:[#allocation87_spill] sm:$0xff] %v13400_v48  ;;  %v5190_v22 = vsel %vm1881_vm1, %v5174_v25, -inf }
0x2052   :  { %v5194_v44 = vmax.f32 %v5188_v5, %v5193_v42  ;;  %v13410_v42 = vld [vmem:[%s14145_s10 + $0x64] ss:$16 sps:$4 sm:$0xff]   ;;  %v5192_v5 = vmax.f32 %v5187_v32, %v5191_v38 }
0x2053   :  { %15180 = vst [vmem:[#allocation88_spill] sm:$0xff] %v13410_v42  ;;  %v13434_v38 = vld [vmem:[%s14145_s10 + $0xa4] ss:$16 sps:$4 sm:$0xff]  }
0x2054   :  { %v5186_v63 = vpop.xlane.xlu0 %5185  ;;  %5279 = vmatpush1.bf16.msra.mxu0 %v13400_v48  ;;  %v5199_v20 = vmax.f32 %v5192_v5, %v5194_v44  ;;  %15183 = vst [vmem:[#allocation91_spill] sm:$0xff] %v13434_v38  ;;  %v13446_v44 = vld [vmem:[%s14145_s10 + $0xc4] ss:$16 sps:$4 sm:$0xff]  }
0x2055   :  { %v5197_v40 = vsel %vm1881_vm1, %v5186_v63, -inf  ;;  %5280 = vmatprep.subr.bf16.mxu0 %v13410_v42  ;;  %15185 = vst [vmem:[#allocation23_spill] sm:$0xff] %v13446_v44 }
0x2056   :  { %v5198_v34 = vmax.f32 %v5190_v22, %v5197_v40 }
0x2058   :  { %v5200_v48 = vmax.f32 %v5196_v56, %v5198_v34  ;;  %5281 = vmatpush1.bf16.msra.mxu0 %v13416_v14  ;;  %v13428_v34 = vld [vmem:[%s14145_s10 + $0x80] ss:$16 sps:$4 sm:$0xff]  }
0x2059   :  { %5282 = vmatprep.subr.bf16.mxu0 %v13422_v35  ;;  %15182 = vst [vmem:[#allocation90_spill] sm:$0xff] %v13428_v34 }
0x205a   :  { %v5201_v42 = vmax.f32 %v5199_v20, %v5200_v48  ;;  %v13440_v48 = vld [vmem:[%s14145_s10 + $0xa0] ss:$16 sps:$4 sm:$0xff]  }
0x205b   :  { %15184 = vst [vmem:[#allocation29_spill] sm:$0xff] %v13440_v48 }
0x205c   :  { %v5202_v32 = vsub.f32 %v5165_v11, %v5201_v42  ;;  %v5203_v60 = vsub.f32 %v5168_v61, %v5201_v42  ;;  %v5204_v40 = vsub.f32 %v5171_v30, %v5201_v42  ;;  %v5205_v22 = vsub.f32 %v5174_v25, %v5201_v42  ;;  %5283 = vmatpush1.bf16.msra.mxu0 %v13428_v34 }
0x205d   :  { %v5206_v56 = vsub.f32 %v5177_v37, %v5201_v42  ;;  %5284 = vmatprep.subr.bf16.mxu0 %v13434_v38  ;;  %v5207_v30 = vsub.f32 %v5180_v10, %v5201_v42  ;;  %v5208_v37 = vsub.f32 %v5183_v39, %v5201_v42  ;;  %v5209_v10 = vsub.f32 %v5186_v63, %v5201_v42  ;;  %v13464_v42 = vld [vmem:[%s14145_s10 + $0xe0] ss:$16 sps:$4 sm:$0xff]   ;;  %v13571_v38 = vld [vmem:[#allocation2 + $0x4] sm:$0x3] }
0x205e   :  { %v5210_v20 = vmul.f32 1.442695, %v5202_v32  ;;  %v5212_v11 = vmul.f32 1.442695, %v5203_v60  ;;  %v5214_v61 = vmul.f32 1.442695, %v5204_v40 }
0x205f   :  { %v5216_v25 = vmul.f32 1.442695, %v5205_v22  ;;  %v5218_v46 = vmul.f32 1.442695, %v5206_v56  ;;  %v5220_v5 = vmul.f32 1.442695, %v5207_v30 }
0x2060   :  { %7904 = vpow2.f32 %v5210_v20  ;;  %5285 = vmatpush1.bf16.msra.mxu0 %v13440_v48  ;;  %v13452_v32 = vld [vmem:[%s14145_s10 + $0xc0] ss:$16 sps:$4 sm:$0xff]   ;;  %v5222_v39 = vmul.f32 1.442695, %v5208_v37  ;;  %v13458_v60 = vld [vmem:[%s14145_s10 + $0xe4] ss:$16 sps:$4 sm:$0xff]  }
0x2061   :  { %7906 = vpow2.f32 %v5212_v11  ;;  %5286 = vmatprep.subr.bf16.mxu0 %v13446_v44  ;;  %15186 = vst [vmem:[#allocation22_spill] sm:$0xff] %v13452_v32  ;;  %15187 = vst [vmem:[#allocation30_spill] sm:$0xff] %v13458_v60  ;;  %v5224_v63 = vmul.f32 1.442695, %v5209_v10  ;;  %v13470_v40 = vld [vmem:[%s14145_s10 + $0x104] ss:$16 sps:$4 sm:$0xff]  }
0x2062   :  { %7908 = vpow2.f32 %v5214_v61  ;;  %15188 = vst [vmem:[#allocation31_spill] sm:$0xff] %v13464_v42  ;;  %15189 = vst [vmem:[#allocation32_spill] sm:$0xff] %v13470_v40  ;;  %v13478_v30 = vld [vmem:[%s14145_s10 + $0x100] ss:$16 sps:$4 sm:$0xff]  }
0x2063   :  { %7910 = vpow2.f32 %v5216_v25  ;;  %15190 = vst [vmem:[#allocation33_spill] sm:$0xff] %v13478_v30  ;;  %v13568_v48 = vld [vmem:[#allocation2 + $0x2] sm:$0x3]  ;;  %15206 = vst [vmem:[#allocation54_spill] sm:$0xff] %v13571_v38 }
0x2064   :  { %5287 = vmatpush1.bf16.msra.mxu0 %v13452_v32  ;;  %7912 = vpow2.f32 %v5218_v46  ;;  %v13484_v46 = vld [vmem:[%s14145_s10 + $0x124] ss:$16 sps:$4 sm:$0xff]   ;;  %v13520_v32 = vld [vmem:[%s14145_s10 + $0x160] ss:$16 sps:$4 sm:$0xff]   ;;  %15205 = vst [vmem:[#allocation53_spill] sm:$0xff] %v13568_v48 }
0x2065   :  { %5288 = vmatprep.subr.bf16.mxu0 %v13458_v60  ;;  %7914 = vpow2.f32 %v5220_v5  ;;  %15191 = vst [vmem:[#allocation34_spill] sm:$0xff] %v13484_v46  ;;  %v13506_v60 = vld [vmem:[%s14145_s10 + $0x140] ss:$16 sps:$4 sm:$0xff]   ;;  %15196 = vst [vmem:[#allocation92_spill] sm:$0xff] %v13520_v32 }
0x2066   :  { %7916 = vpow2.f32 %v5222_v39  ;;  %15194 = vst [vmem:[#allocation44_spill] sm:$0xff] %v13506_v60 }
0x2067   :  { %7918 = vpow2.f32 %v5224_v63 }
0x2068   :  { %5289 = vmatpush1.bf16.msra.mxu0 %v13464_v42 }
0x2069   :  { %5290 = vmatprep.subr.bf16.mxu0 %v13470_v40  ;;  %v13492_v40 = vld [vmem:[%s14145_s10 + $0x120] ss:$16 sps:$4 sm:$0xff]  }
0x206a   :  { %v7905_v22 = vpop.eup %7904  ;;  %15192 = vst [vmem:[#allocation43_spill] sm:$0xff] %v13492_v40 }
0x206b   :  { %v7907_v56 = vpop.eup %7906  ;;  %v5226_v20 = vsel %vm1881_vm1, %v7905_v22, 0.0 }
0x206c   :  { %v7909_v11 = vpop.eup %7908  ;;  %v5227_v61 = vsel %vm1881_vm1, %v7907_v56, 0.0  ;;  %5291 = vmatpush1.bf16.msra.mxu0 %v13478_v30  ;;  %v13498_v30 = vld [vmem:[%s14145_s10 + $0x144] ss:$16 sps:$4 sm:$0xff]  }
0x206d   :  { %v7911_v25 = vpop.eup %7910  ;;  %v5228_v37 = vadd.f32 %v5227_v61, %v5226_v20  ;;  %5292 = vmatprep.subr.bf16.mxu0 %v13484_v46  ;;  %v5229_v10 = vsel %vm1881_vm1, %v7909_v11, 0.0  ;;  %15193 = vst [vmem:[#allocation35_spill] sm:$0xff] %v13498_v30 }
0x206e   :  { %v7913_v5 = vpop.eup %7912  ;;  %v5231_v63 = vsel %vm1881_vm1, %v7911_v25, 0.0 }
0x206f   :  { %v5230_v39 = vadd.f32 %v5229_v10, %v5228_v37  ;;  %v7915_v20 = vpop.eup %7914  ;;  %v5233_v37 = vsel %vm1881_vm1, %v7913_v5, 0.0 }
0x2070   :  { %5293 = vmatpush1.bf16.msra.mxu0 %v13492_v40  ;;  %v7917_v10 = vpop.eup %7916  ;;  %v5235_v42 = vsel %vm1881_vm1, %v7915_v20, 0.0  ;;  %v13512_v40 = vld [vmem:[%s14145_s10 + $0x164] ss:$16 sps:$4 sm:$0xff]  }
0x2071   :  { %v5232_v61 = vadd.f32 %v5231_v63, %v5230_v39  ;;  %5294 = vmatprep.subr.bf16.mxu0 %v13498_v30  ;;  %v7919_v39 = vpop.eup %7918  ;;  %15195 = vst [vmem:[#allocation46_spill] sm:$0xff] %v13512_v40 }
0x2072   :  { %v5239_v30 = vsel %vm1881_vm1, %v7919_v39, 0.0 }
0x2073   :  { %v5234_v46 = vadd.f32 %v5233_v37, %v5232_v61  ;;  %v5237_v61 = vsel %vm1881_vm1, %v7917_v10, 0.0 }
0x2074   :  { %5295 = vmatpush1.bf16.msra.mxu0 %v13506_v60  ;;  %v13565_v60 = vld [vmem:[#allocation2] sm:$0x3] }
0x2075   :  { %v5236_v63 = vadd.f32 %v5235_v42, %v5234_v46  ;;  %5296 = vmatprep.subr.bf16.mxu0 %v13512_v40  ;;  %v13526_v46 = vld [vmem:[%s14145_s10 + $0x184] ss:$16 sps:$4 sm:$0xff]   ;;  %15204 = vst [vmem:[#allocation38_spill] sm:$0xff] %v13565_v60 }
0x2076   :  { %15197 = vst [vmem:[#allocation93_spill] sm:$0xff] %v13526_v46 }
0x2077   :  { %v5238_v37 = vadd.f32 %v5237_v61, %v5236_v63  ;;  %v13532_v63 = vld [vmem:[%s14145_s10 + $0x180] ss:$16 sps:$4 sm:$0xff]   ;;  %v13538_v61 = vld [vmem:[%s14145_s10 + $0x1a4] ss:$16 sps:$4 sm:$0xff]  }
0x2078   :  { %5297 = vmatpush1.bf16.msra.mxu0 %v13520_v32  ;;  %15198 = vst [vmem:[#allocation36_spill] sm:$0xff] %v13532_v63  ;;  %15199 = vst [vmem:[#allocation47_spill] sm:$0xff] %v13538_v61 }
0x2079   :  { %v5240_v42 = vadd.f32 %v5239_v30, %v5238_v37  ;;  %5298 = vmatprep.subr.bf16.mxu0 %v13526_v46  ;;  %v13544_v30 = vld [vmem:[%s14145_s10 + $0x1a0] ss:$16 sps:$4 sm:$0xff]   ;;  %v13550_v37 = vld [vmem:[%s14145_s10 + $0x1c4] ss:$16 sps:$4 sm:$0xff]  }
0x207a   :  { %15200 = vst [vmem:[#allocation49_spill] sm:$0xff] %v13544_v30  ;;  %15201 = vst [vmem:[#allocation37_spill] sm:$0xff] %v13550_v37 }
0x207b   :  { %7920 = vrcp.f32 %v5240_v42  ;;  %v13556_v42 = vld [vmem:[%s14145_s10 + $0x1c0] ss:$16 sps:$4 sm:$0xff]  }
0x207c   :  { %5299 = vmatpush1.bf16.msra.mxu0 %v13532_v63  ;;  %15202 = vst [vmem:[#allocation50_spill] sm:$0xff] %v13556_v42  ;;  %v13562_v63 = vld [vmem:[%s14145_s10 + $0x1e4] ss:$16 sps:$4 sm:$0xff]  }
0x207d   :  { %5300 = vmatprep.subr.bf16.mxu0 %v13538_v61  ;;  %15203 = vst [vmem:[#allocation52_spill] sm:$0xff] %v13562_v63 }
0x2080   :  { %5301 = vmatpush1.bf16.msra.mxu0 %v13544_v30 }
0x2081   :  { %5302 = vmatprep.subr.bf16.mxu0 %v13550_v37 }
0x2084   :  { %5303 = vmatpush1.bf16.msra.mxu0 %v13556_v42 }
0x2085   :  { %v7921_v61 = vpop.eup %7920  ;;  %5304 = vmatprep.subr.bf16.mxu0 %v13562_v63 }
0x2086   :  { %v5242_v30 = vmul.f32 %v7921_v61, %v7905_v22  ;;  %v5243_v46 = vmul.f32 %v7921_v61, %v7907_v56  ;;  %v5244_v32 = vmul.f32 %v7921_v61, %v7909_v11  ;;  %v5245_v40 = vmul.f32 %v7921_v61, %v7911_v25  ;;  %v13577_v22 = vld [vmem:[%s14145_s10 + $0x1e0] ss:$16 sps:$4 sm:$0xff]   ;;  %v13583_v56 = vld [vmem:[%s14145_s10 + $0x204] ss:$16 sps:$4 sm:$0xff]  }
0x2087   :  { %v5246_v37 = vmul.f32 %v7921_v61, %v7913_v5  ;;  %15207 = vst [vmem:[#allocation39_spill] sm:$0xff] %v13577_v22  ;;  %15208 = vst [vmem:[#allocation56_spill] sm:$0xff] %v13583_v56  ;;  %v5247_v11 = vmul.f32 %v7921_v61, %v7915_v20  ;;  %v13586_v25 = vld [vmem:[#allocation2 + $0x6] sm:$0x3]  ;;  %v5249_v35 = vmul.f32 %v7921_v61, %v7919_v39 }
0x2088   :  { %v5250_v44 = vmul.f32 %v13565_v60, %v5242_v30  ;;  %v5251_v42 = vmul.f32 %v13568_v48, %v5243_v46  ;;  %v5252_v34 = vmul.f32 %v13571_v38, %v5244_v32  ;;  %5305 = vmatpush1.bf16.msra.mxu0 %v13577_v22  ;;  %15209 = vst [vmem:[#allocation57_spill] sm:$0xff] %v13586_v25  ;;  %v13591_v48 = vld [vmem:[#allocation2 + $0x8] sm:$0x3] }
0x2089   :  { %5315 = vmatprep.subr.bf16.mxu0 %v13583_v56  ;;  %v5253_v5 = vmul.f32 %v13586_v25, %v5245_v40  ;;  %v5248_v38 = vmul.f32 %v7921_v61, %v7917_v10  ;;  %v5254_v22 = vmul.f32 %v13591_v48, %v5246_v37  ;;  %v13595_v56 = vld [vmem:[#allocation2 + $0xa] sm:$0x3] }
0x208a   :  { %v5258_v32 = vsel %vm1881_vm1, %v5250_v44, 0.0  ;;  %v5259_v46 = vsel %vm1881_vm1, %v5251_v42, 0.0  ;;  %v5261_v60 = vsel %vm1881_vm1, %v5252_v34, 0.0  ;;  %v5255_v20 = vmul.f32 %v13595_v56, %v5247_v11  ;;  %v13599_v44 = vld [vmem:[#allocation2 + $0xc] sm:$0x3] }
0x208b   :  { %v5260_v30 = vadd.f32 %v5259_v46, %v5258_v32  ;;  %v5263_v40 = vsel %vm1881_vm1, %v5253_v5, 0.0  ;;  %v5256_v42 = vmul.f32 %v13599_v44, %v5248_v38  ;;  %v5265_v10 = vsel %vm1881_vm1, %v5254_v22, 0.0  ;;  %v13603_v46 = vld [vmem:[#allocation2 + $0xe] sm:$0x3] }
0x208c   :  { %v5257_v34 = vmul.f32 %v13603_v46, %v5249_v35  ;;  %v5093_v38 = vstv %s5092_s27 }
0x208d   :  { %v5262_v63 = vadd.f32 %v5261_v60, %v5260_v30  ;;  %v5267_v60 = vsel %vm1881_vm1, %v5255_v20, 0.0  ;;  %v5269_v61 = vsel %vm1881_vm1, %v5256_v42, 0.0  ;;  %vm5094_vm2 = vcmp.eq.s32.totalorder %v5093_v38, 1  ;;  %v6355_v30 = vld [vmem:[%s14137_s2 + $0x5] sm:$0x1]  ;;  %v15239_v38 = vld [vmem:[#allocation69_spill] sm:$0xff] }
0x208e   :  { %v5271_v11 = vsel %vm1881_vm1, %v5257_v34, 0.0  ;;  %v5095_v22 = vsel %vm5094_vm2, 1, %v14710_v3  ;;  %v15231_v34 = vld [vmem:[#allocation25_spill] sm:$0xff] }
0x208f   :  { %v5264_v25 = vadd.f32 %v5263_v40, %v5262_v63  ;;  %v5096_v35 = vpack.c.b16 %v5095_v22, %v5095_v22  ;;  %v15240_v22 = vld [vmem:[#allocation70_spill] sm:$0xff] }
0x2091   :  { %v5266_v32 = vadd.f32 %v5265_v10, %v5264_v25  ;;  %vm5097_vm3 = vcmp.ne.s16.totalorder %v5096_v35, 0  ;;  %v15241_v35 = vld [vmem:[#allocation71_spill] sm:$0xff] }
0x2093   :  { %v5268_v39 = vadd.f32 %v5267_v60, %v5266_v32  ;;  %v15232_v60 = vld [vmem:[#allocation7_spill] sm:$0xff] }
0x2095   :  { %v5270_v37 = vadd.f32 %v5269_v61, %v5268_v39  ;;  %v15233_v39 = vld [vmem:[#allocation12_spill] sm:$0xff] }
0x2096   :  { %v15234_v61 = vld [vmem:[#allocation8_spill] sm:$0xff] }
0x2097   :  { %v5272_v63 = vadd.f32 %v5271_v11, %v5270_v37  ;;  %v15235_v37 = vld [vmem:[#allocation26_spill] sm:$0xff]  ;;  %v15236_v11 = vld [vmem:[#allocation27_spill] sm:$0xff] }
0x2099   :  { %v5273_v5 = vpack.c.bf16 %v5272_v63, %v5272_v63  ;;  %v15237_v63 = vld [vmem:[#allocation28_spill] sm:$0xff] }
0x209b   :  { %5306 = vmatprep.mubr.bf16.mxu0 %v5273_v5  ;;  %5388 = vmatprep.mubr.bf16.mxu1 %v5273_v5 }
0x211e   :  { %v5081_v25 = vpop.f32.mrb[92].mxu0 }
0x211f   :  { %v5087_v20 = vpack.c.bf16 %v5081_v25, %v5081_v25  ;;  %v7030_v40 = vpop.f32.mrb[93].mxu0  ;;  %v15242_v25 = vld [vmem:[#allocation72_spill] sm:$0xff] }
0x2120   :  { %v5084_v42 = vpop.f32.mrb[94].mxu0  ;;  %v15245_v40 = vld [vmem:[#allocation75_spill] sm:$0xff] }
0x2121   :  { %v7031_v10 = vpop.f32.mrb[95].mxu0  ;;  %v13613_v32 = vsel %vm5097_vm3, %v6355_v30, %v5087_v20  ;;  %v15243_v30 = vld [vmem:[#allocation73_spill] sm:$0xff]  ;;  %v15244_v20 = vld [vmem:[#allocation74_spill] sm:$0xff]  ;;  %v15246_v42 = vld [vmem:[#allocation76_spill] sm:$0xff] }
0x2122   :  { %5307 = vmatmul.mubr.bf16.vlgmr.msra.gmra.mrb[96].mxu0 %v13613_v32  ;;  %5389 = vmatmul.mubr.bf16.vlgmr.msra.gmra.mrb[96].mxu1 %v13613_v32  ;;  %v15247_v10 = vld [vmem:[#allocation77_spill] sm:$0xff] }
0x2123   :  { %5316 = vmatpush1.bf16.msra.mxu0 %v12819_v41  ;;  %5398 = vmatpush1.bf16.msra.mxu1 %v12825_v2  ;;  %v15210_v41 = vld [vmem:[#allocation40_spill] sm:$0xff]  ;;  %v15211_v2 = vld [vmem:[#allocation59_spill] sm:$0xff] }
0x2124   :  { %5317 = vmatprep.subr.bf16.mxu0 %v12831_v45  ;;  %5399 = vmatprep.subr.bf16.mxu1 %v12837_v47  ;;  %v15212_v45 = vld [vmem:[#allocation60_spill] sm:$0xff]  ;;  %v15213_v47 = vld [vmem:[#allocation41_spill] sm:$0xff] }
0x2125   :  { %5347 = vmatprep.mubr.bf16.mxu0 %v14710_v3  ;;  %5429 = vmatprep.mubr.bf16.mxu1 %v14710_v3 }
0x2127   :  { %5318 = vmatpush1.bf16.msra.mxu0 %v12845_v50  ;;  %5400 = vmatpush1.bf16.msra.mxu1 %v12851_v12  ;;  %v15214_v50 = vld [vmem:[#allocation62_spill] sm:$0xff]  ;;  %v15215_v12 = vld [vmem:[#allocation63_spill] sm:$0xff] }
0x2128   :  { %5319 = vmatprep.subr.bf16.mxu0 %v12857_v7  ;;  %5401 = vmatprep.subr.bf16.mxu1 %v12863_v4  ;;  %v15216_v7 = vld [vmem:[#allocation42_spill] sm:$0xff]  ;;  %v15217_v4 = vld [vmem:[#allocation65_spill] sm:$0xff] }
0x212b   :  { %5320 = vmatpush1.bf16.msra.mxu0 %v12869_v18  ;;  %5402 = vmatpush1.bf16.msra.mxu1 %v12875_v57  ;;  %v15218_v18 = vld [vmem:[#allocation45_spill] sm:$0xff]  ;;  %v15219_v57 = vld [vmem:[#allocation48_spill] sm:$0xff] }
0x212c   :  { %5321 = vmatprep.subr.bf16.mxu0 %v12881_v53  ;;  %5403 = vmatprep.subr.bf16.mxu1 %v12887_v28  ;;  %v15220_v53 = vld [vmem:[#allocation51_spill] sm:$0xff] }
0x212d   :  { %v15221_v28 = vld [vmem:[#allocation55_spill] sm:$0xff] }
0x212f   :  { %5322 = vmatpush1.bf16.msra.mxu0 %v12893_v6  ;;  %5404 = vmatpush1.bf16.msra.mxu1 %v12899_v51  ;;  %v15222_v6 = vld [vmem:[#allocation58_spill] sm:$0xff]  ;;  %v15223_v51 = vld [vmem:[#allocation61_spill] sm:$0xff] }
0x2130   :  { %5323 = vmatprep.subr.bf16.mxu0 %v12905_v27  ;;  %5405 = vmatprep.subr.bf16.mxu1 %v12911_v26  ;;  %v15224_v27 = vld [vmem:[#allocation64_spill] sm:$0xff]  ;;  %v15225_v26 = vld [vmem:[#allocation66_spill] sm:$0xff] }
0x2133   :  { %5324 = vmatpush1.bf16.msra.mxu0 %v12917_v31  ;;  %5406 = vmatpush1.bf16.msra.mxu1 %v12923_v0  ;;  %v15226_v31 = vld [vmem:[#allocation15_spill] sm:$0xff]  ;;  %v15227_v0 = vld [vmem:[#allocation20_spill] sm:$0xff] }
0x2134   :  { %5325 = vmatprep.subr.bf16.mxu0 %v12929_v49  ;;  %5407 = vmatprep.subr.bf16.mxu1 %v12935_v54  ;;  %v15228_v49 = vld [vmem:[#allocation18_spill] sm:$0xff]  ;;  %v15229_v54 = vld [vmem:[#allocation21_spill] sm:$0xff] }
0x2137   :  { %5326 = vmatpush1.bf16.msra.mxu0 %v15210_v41  ;;  %5408 = vmatpush1.bf16.msra.mxu1 %v15211_v2  ;;  %v15249_v41 = vld [vmem:[#allocation79_spill] sm:$0xff]  ;;  %v15250_v2 = vld [vmem:[#allocation80_spill] sm:$0xff] }
0x2138   :  { %5327 = vmatprep.subr.bf16.mxu0 %v15212_v45  ;;  %5409 = vmatprep.subr.bf16.mxu1 %v15213_v47  ;;  %v15251_v45 = vld [vmem:[#allocation81_spill] sm:$0xff] }
0x2139   :  { %v8394_v47 = vld [vmem:[%s14145_s10 + $0xc] ss:$16 sps:$4 sm:$0xff]  }
0x213b   :  { %5328 = vmatpush1.bf16.msra.mxu0 %v15214_v50  ;;  %5410 = vmatpush1.bf16.msra.mxu1 %v15215_v12 }
0x213c   :  { %5329 = vmatprep.subr.bf16.mxu0 %v15216_v7  ;;  %5411 = vmatprep.subr.bf16.mxu1 %v15217_v4  ;;  %v15252_v7 = vld [vmem:[#allocation67_spill] sm:$0xff] }
0x213f   :  { %5330 = vmatpush1.bf16.msra.mxu0 %v15218_v18  ;;  %5412 = vmatpush1.bf16.msra.mxu1 %v15219_v57 }
0x2140   :  { %7052 = vmatprep.subr.bf16.mxu1 %v14720_v62  ;;  %6632 = vmatprep.subr.bf16.mxu0 %v15220_v53 }
0x2142   :  { %5348 = vmatmul.mubr.bf16.vlgmr.msra.gmra.mrb[96].mxu0 %v13226_v21  ;;  %5430 = vmatmul.mubr.bf16.vlgmr.msra.gmra.mrb[96].mxu1 %v13226_v21  ;;  %v15230_v21 = vld [vmem:[#allocation24_spill] sm:$0xff] }
0x2143   :  { %5495 = vmatprep.mubr.bf16.mxu0 %v5273_v5  ;;  %7053 = vmatpush3.bf16.msra.mxu1 %v15221_v28  ;;  %v15238_v5 = vld [vmem:[#allocation68_spill] sm:$0xff] }
0x2144   :  { %7054 = vmatprep.subr.bf16.mxu1 %v14720_v62  ;;  %7068 = vmatprep.mubr.msk.bf16.mxu1 %vm8499_vm0, %v14720_v62 }
0x2145   :  { %6633 = vmatpush3.bf16.msra.mxu0 %v15222_v6 }
0x2146   :  { %6634 = vmatprep.subr.bf16.mxu0 %v15223_v51 }
0x2147   :  { %7055 = vmatpush3.bf16.msra.mxu1 %v15224_v27 }
0x2148   :  { %7056 = vmatprep.subr.bf16.mxu1 %v14720_v62 }
0x2149   :  { %6635 = vmatpush3.bf16.msra.mxu0 %v15225_v26 }
0x214a   :  { %6636 = vmatprep.subr.bf16.mxu0 %v15226_v31 }
0x214b   :  { %7057 = vmatpush3.bf16.msra.mxu1 %v15227_v0 }
0x214c   :  { %7058 = vmatprep.subr.bf16.mxu1 %v14720_v62 }
0x214d   :  { %6637 = vmatpush3.bf16.msra.mxu0 %v15228_v49 }
0x214e   :  { %6638 = vmatprep.subr.bf16.mxu0 %v15229_v54 }
0x214f   :  { %7059 = vmatpush3.bf16.msra.mxu1 %v15230_v21 }
0x2150   :  { %7060 = vmatprep.subr.bf16.mxu1 %v14720_v62 }
0x2151   :  { %6639 = vmatpush3.bf16.msra.mxu0 %v15231_v34 }
0x2152   :  { %6640 = vmatprep.subr.bf16.mxu0 %v15232_v60 }
0x2153   :  { %7061 = vmatpush3.bf16.msra.mxu1 %v15233_v39 }
0x2154   :  { %7062 = vmatprep.subr.bf16.mxu1 %v14720_v62 }
0x2155   :  { %6641 = vmatpush3.bf16.msra.mxu0 %v15234_v61 }
0x2156   :  { %6642 = vmatprep.subr.bf16.mxu0 %v15235_v37 }
0x2157   :  { %7063 = vmatpush3.bf16.msra.mxu1 %v15236_v11 }
0x2158   :  { %7064 = vmatprep.subr.bf16.mxu1 %v14720_v62 }
0x2159   :  { %6643 = vmatpush3.bf16.msra.mxu0 %v15237_v63 }
0x215a   :  { %6644 = vmatprep.subr.bf16.mxu0 %v15238_v5 }
0x215b   :  { %7065 = vmatpush3.bf16.msra.mxu1 %v15239_v38 }
0x215c   :  { %7066 = vmatprep.subr.bf16.mxu1 %v14720_v62 }
0x215d   :  { %6645 = vmatpush3.bf16.msra.mxu0 %v15240_v22 }
0x215e   :  { %6646 = vmatprep.subr.bf16.mxu0 %v15241_v35 }
0x215f   :  { %7067 = vmatpush3.bf16.msra.mxu1 %v15242_v25 }
0x2160   :  { %7092 = vmatprep.subr.bf16.mxu1 %v14720_v62 }
0x2161   :  { %6647 = vmatpush3.bf16.msra.mxu0 %v15243_v30 }
0x2162   :  { %7069 = vmatmul.mubr.bf16.vlgmr.msra.gmra.mrb[100].mxu1 %v13613_v32  ;;  %7072 = vmatprep.subr.bf16.mxu0 %v14720_v62  ;;  %v15248_v32 = vld [vmem:[#allocation78_spill] sm:$0xff] }
0x2163   :  { %7093 = vmatpush3.bf16.msra.mxu1 %v15244_v20  ;;  %7108 = vmatprep.mubr.msk.bf16.mxu1 %vm8499_vm0, %v14720_v62 }
0x2164   :  { %7094 = vmatprep.subr.bf16.mxu1 %v14720_v62 }
0x2167   :  { %7095 = vmatpush3.bf16.msra.mxu1 %v15245_v40 }
0x2168   :  { %7096 = vmatprep.subr.bf16.mxu1 %v14720_v62 }
0x216b   :  { %7097 = vmatpush3.bf16.msra.mxu1 %v15246_v42 }
0x216c   :  { %7098 = vmatprep.subr.bf16.mxu1 %v14720_v62 }
0x216f   :  { %7099 = vmatpush3.bf16.msra.mxu1 %v15247_v10 }
0x2170   :  { %7100 = vmatprep.subr.bf16.mxu1 %v14720_v62 }
0x2173   :  { %7101 = vmatpush3.bf16.msra.mxu1 %v15248_v32 }
0x2174   :  { %7102 = vmatprep.subr.bf16.mxu1 %v14720_v62 }
0x2177   :  { %7103 = vmatpush3.bf16.msra.mxu1 %v15249_v41 }
0x2178   :  { %7104 = vmatprep.subr.bf16.mxu1 %v14720_v62 }
0x217b   :  { %7105 = vmatpush3.bf16.msra.mxu1 %v15250_v2  ;;  %v8396_v2 = vld [vmem:[%s14145_s10 + $0x2c] ss:$16 sps:$4 sm:$0xff]  }
0x217c   :  { %7106 = vmatprep.subr.bf16.mxu1 %v14720_v62 }
0x217f   :  { %7107 = vmatpush3.bf16.msra.mxu1 %v15251_v45  ;;  %v8398_v45 = vld [vmem:[%s14145_s10 + $0x4c] ss:$16 sps:$4 sm:$0xff]  }
0x2180   :  { %5878 = vmatprep.subr.bf16.mxu1 %v8394_v47  ;;  %v8400_v47 = vld [vmem:[%s14145_s10 + $0x6c] ss:$16 sps:$4 sm:$0xff]  }
0x2215   :  { %v5349_v50 = vpop.f32.mrb[96].mxu0  ;;  %v5431_v12 = vpop.f32.mrb[96].mxu1 }
0x2216   :  { %v7152_v4 = vadd.f32 %v5349_v50, %v15252_v7  ;;  %v5351_v18 = vpop.f32.mrb[97].mxu0  ;;  %v5433_v57 = vpop.f32.mrb[97].mxu1  ;;  %v7154_v54 = vadd.f32 %v5431_v12, %v10749_v15  ;;  %v8402_v50 = vld [vmem:[%s14145_s10 + $0x8c] ss:$16 sps:$4 sm:$0xff]  }
0x2217   :  { %v7153_v53 = vadd.f32 %v5351_v18, %v10738_v24  ;;  %v5353_v28 = vpop.f32.mrb[98].mxu0  ;;  %v5435_v6 = vpop.f32.mrb[98].mxu1  ;;  %v7155_v0 = vadd.f32 %v5433_v57, %v10744_v52  ;;  %v8404_v12 = vld [vmem:[%s14145_s10 + $0xac] ss:$16 sps:$4 sm:$0xff]  }
0x2218   :  { %v6356_v51 = vmul.f32 -1.442695, %v7152_v4  ;;  %v5354_v27 = vpop.f32.mrb[99].mxu0  ;;  %v5436_v26 = vpop.f32.mrb[99].mxu1  ;;  %v8406_v4 = vld [vmem:[%s14145_s10 + $0xcc] ss:$16 sps:$4 sm:$0xff]  }
0x2219   :  { %v6357_v31 = vmul.f32 -1.442695, %v7153_v53  ;;  %v6358_v49 = vmul.f32 -1.442695, %v7155_v0  ;;  %v8408_v18 = vld [vmem:[%s14145_s10 + $0xec] ss:$16 sps:$4 sm:$0xff]  }
0x221a   :  { %7922 = vpow2.f32 %v6356_v51  ;;  %v8410_v57 = vld [vmem:[%s14145_s10 + $0x10c] ss:$16 sps:$4 sm:$0xff]   ;;  %v8411_v53 = vld [vmem:[%s14145_s10 + $0x108] ss:$16 sps:$4 sm:$0xff]  }
0x221b   :  { %7924 = vpow2.f32 %v6357_v31  ;;  %v8414_v28 = vld [vmem:[%s14145_s10 + $0x14c] ss:$16 sps:$4 sm:$0xff]   ;;  %v8415_v6 = vld [vmem:[%s14145_s10 + $0x148] ss:$16 sps:$4 sm:$0xff]  }
0x221c   :  { %7926 = vpow2.f32 %v6358_v49  ;;  %v8416_v51 = vld [vmem:[%s14145_s10 + $0x16c] ss:$16 sps:$4 sm:$0xff]   ;;  %v8417_v27 = vld [vmem:[%s14145_s10 + $0x168] ss:$16 sps:$4 sm:$0xff]  }
0x221d   :  { %7928 = vtanh.f32 %v7154_v54  ;;  %v8418_v26 = vld [vmem:[%s14145_s10 + $0x18c] ss:$16 sps:$4 sm:$0xff]   ;;  %v8419_v31 = vld [vmem:[%s14145_s10 + $0x188] ss:$16 sps:$4 sm:$0xff]  }
0x221e   :  { %v8420_v0 = vld [vmem:[%s14145_s10 + $0x1ac] ss:$16 sps:$4 sm:$0xff]   ;;  %v8421_v49 = vld [vmem:[%s14145_s10 + $0x1a8] ss:$16 sps:$4 sm:$0xff]  }
0x221f   :  { %v8422_v54 = vld [vmem:[%s14145_s10 + $0x1cc] ss:$16 sps:$4 sm:$0xff]  }
0x2224   :  { %v7923_v21 = vpop.eup %7922 }
0x2225   :  { %v7925_v34 = vpop.eup %7924  ;;  %v5441_v60 = vadd.f32 1.0, %v7923_v21  ;;  %v8423_v21 = vld [vmem:[%s14145_s10 + $0x1c8] ss:$16 sps:$4 sm:$0xff]  }
0x2226   :  { %v5447_v39 = vadd.f32 1.0, %v7925_v34  ;;  %v7927_v61 = vpop.eup %7926  ;;  %v8424_v34 = vld [vmem:[%s14145_s10 + $0x1ec] ss:$16 sps:$4 sm:$0xff]  }
0x2227   :  { %7930 = vrcp.f32 %v5441_v60  ;;  %v7929_v37 = vpop.eup %7928  ;;  %v5454_v38 = vadd.f32 1.0, %v7927_v61  ;;  %v8425_v60 = vld [vmem:[%s14145_s10 + $0x1e8] ss:$16 sps:$4 sm:$0xff]  }
0x2228   :  { %7932 = vrcp.f32 %v5447_v39  ;;  %v8426_v39 = vld [vmem:[%s14145_s10 + $0x20c] ss:$16 sps:$4 sm:$0xff]  }
0x2229   :  { %7934 = vrcp.f32 %v5454_v38 }
0x2231   :  { %v7931_v11 = vpop.eup %7930 }
0x2232   :  { %v7933_v63 = vpop.eup %7932  ;;  %v5458_v5 = vmul.f32 %v7931_v11, %v7929_v37 }
0x2233   :  { %v5457_v22 = vmul.f32 %v7933_v63, %v13221_v23  ;;  %v7935_v42 = vpop.eup %7934  ;;  %v8395_v23 = vld [vmem:[%s14145_s10 + $0x8] ss:$16 sps:$4 sm:$0xff]  }
0x2235   :  { %v13713_v35 = vadd.f32 %v5458_v5, %v5457_v22  ;;  %v13715_v25 = vpop.f32.mrb[100].mxu1 }
0x2236   :  { %v7070_v30 = vpop.f32.mrb[101].mxu1 }
0x2237   :  { %v5540_v20 = vpop.f32.mrb[102].mxu1  ;;  %7936 = vtanh.f32 %v13713_v35 }
0x2238   :  { %v7071_v40 = vpop.f32.mrb[103].mxu1 }
0x2241   :  { %v7937_v10 = vpop.eup %7936 }
0x2242   :  { %v5461_v32 = vmul.f32 %v7937_v10, %v7935_v42 }
0x2244   :  { %v13718_v41 = vpack.c.bf16 %v5461_v32, %v5461_v32 }
0x2246   :  { %5496 = vmatmul.mubr.bf16.vlgmr.msra.gmra.mrb[100].mxu0 %v13718_v41  ;;  %7109 = vmatmul.mubr.bf16.vlgmr.msra.gmra.mrb[104].mxu1 %v13718_v41 }
0x2247   :  { %7073 = vmatpush3.bf16.msra.mxu0 %v13233_v16  ;;  %7088 = vmatprep.mubr.msk.bf16.mxu0 %vm8499_vm0, %v14720_v62  ;;  %v8397_v16 = vld [vmem:[%s14145_s10 + $0x28] ss:$16 sps:$4 sm:$0xff]  }
0x2248   :  { %7074 = vmatprep.subr.bf16.mxu0 %v14720_v62  ;;  %5879 = vmatpush1.bf16.msra.mxu1 %v8395_v23 }
0x2249   :  { %5880 = vmatprep.subr.bf16.mxu1 %v8396_v2 }
0x224b   :  { %7075 = vmatpush3.bf16.msra.mxu0 %v13244_v1  ;;  %v8399_v1 = vld [vmem:[%s14145_s10 + $0x48] ss:$16 sps:$4 sm:$0xff]  }
0x224c   :  { %7076 = vmatprep.subr.bf16.mxu0 %v14720_v62  ;;  %5881 = vmatpush1.bf16.msra.mxu1 %v8397_v16 }
0x224d   :  { %5882 = vmatprep.subr.bf16.mxu1 %v8398_v45 }
0x224f   :  { %7077 = vmatpush3.bf16.msra.mxu0 %v13253_v13  ;;  %v8401_v13 = vld [vmem:[%s14145_s10 + $0x68] ss:$16 sps:$4 sm:$0xff]  }
0x2250   :  { %7078 = vmatprep.subr.bf16.mxu0 %v14720_v62  ;;  %5883 = vmatpush1.bf16.msra.mxu1 %v8399_v1 }
0x2251   :  { %5884 = vmatprep.subr.bf16.mxu1 %v8400_v47 }
0x2253   :  { %7079 = vmatpush3.bf16.msra.mxu0 %v13262_v9  ;;  %v8403_v9 = vld [vmem:[%s14145_s10 + $0x88] ss:$16 sps:$4 sm:$0xff]  }
0x2254   :  { %7080 = vmatprep.subr.bf16.mxu0 %v14720_v62  ;;  %5885 = vmatpush1.bf16.msra.mxu1 %v8401_v13 }
0x2255   :  { %5886 = vmatprep.subr.bf16.mxu1 %v8402_v50 }
0x2257   :  { %7081 = vmatpush3.bf16.msra.mxu0 %v13271_v59  ;;  %v8405_v59 = vld [vmem:[%s14145_s10 + $0xa8] ss:$16 sps:$4 sm:$0xff]  }
0x2258   :  { %7082 = vmatprep.subr.bf16.mxu0 %v14720_v62  ;;  %5887 = vmatpush1.bf16.msra.mxu1 %v8403_v9 }
0x2259   :  { %5888 = vmatprep.subr.bf16.mxu1 %v8404_v12 }
0x225b   :  { %7083 = vmatpush3.bf16.msra.mxu0 %v13280_v43  ;;  %v8407_v43 = vld [vmem:[%s14145_s10 + $0xc8] ss:$16 sps:$4 sm:$0xff]  }
0x225c   :  { %7084 = vmatprep.subr.bf16.mxu0 %v14720_v62  ;;  %5889 = vmatpush1.bf16.msra.mxu1 %v8405_v59 }
0x225d   :  { %5890 = vmatprep.subr.bf16.mxu1 %v8406_v4 }
0x225f   :  { %7085 = vmatpush3.bf16.msra.mxu0 %v13289_v17  ;;  %v8409_v17 = vld [vmem:[%s14145_s10 + $0xe8] ss:$16 sps:$4 sm:$0xff]  }
0x2260   :  { %7086 = vmatprep.subr.bf16.mxu0 %v14720_v62  ;;  %5891 = vmatpush1.bf16.msra.mxu1 %v8407_v43 }
0x2261   :  { %5892 = vmatprep.subr.bf16.mxu1 %v8408_v18 }
0x2263   :  { %7087 = vmatpush3.bf16.msra.mxu0 %v13298_v58  ;;  %v8412_v58 = vld [vmem:[%s14145_s10 + $0x12c] ss:$16 sps:$4 sm:$0xff]  }
0x2264   :  { %5796 = vmatprep.subr.bf16.mxu0 %v13304_v19  ;;  %5893 = vmatpush1.bf16.msra.mxu1 %v8409_v17  ;;  %v8413_v19 = vld [vmem:[%s14145_s10 + $0x128] ss:$16 sps:$4 sm:$0xff]  }
0x2265   :  { %5894 = vmatprep.subr.bf16.mxu1 %v8410_v57 }
0x2268   :  { %5895 = vmatpush1.bf16.msra.mxu1 %v8411_v53 }
0x2269   :  { %5896 = vmatprep.subr.bf16.mxu1 %v8412_v58  ;;  %v15255_v58 = vld [vmem:[#allocation13_spill] sm:$0xff] }
0x226c   :  { %5897 = vmatpush1.bf16.msra.mxu1 %v8413_v19 }
0x226d   :  { %5898 = vmatprep.subr.bf16.mxu1 %v8414_v28  ;;  %v15256_v28 = vld [vmem:[#allocation10_spill] sm:$0xff] }
0x2270   :  { %5899 = vmatpush1.bf16.msra.mxu1 %v8415_v6 }
0x2271   :  { %5900 = vmatprep.subr.bf16.mxu1 %v8416_v51  ;;  %v15257_v51 = vld [vmem:[#allocation16_spill] sm:$0xff] }
0x2274   :  { %5901 = vmatpush1.bf16.msra.mxu1 %v8417_v27 }
0x2275   :  { %5902 = vmatprep.subr.bf16.mxu1 %v8418_v26 }
0x2278   :  { %5903 = vmatpush1.bf16.msra.mxu1 %v8419_v31  ;;  %v15258_v31 = vld [vmem:[#allocation14_spill] sm:$0xff] }
0x2279   :  { %5904 = vmatprep.subr.bf16.mxu1 %v8420_v0 }
0x227c   :  { %5905 = vmatpush1.bf16.msra.mxu1 %v8421_v49 }
0x227d   :  { %5906 = vmatprep.subr.bf16.mxu1 %v8422_v54 }
0x2280   :  { %5907 = vmatpush1.bf16.msra.mxu1 %v8423_v21 }
0x2281   :  { %5908 = vmatprep.subr.bf16.mxu1 %v8424_v34 }
0x2284   :  { %5909 = vmatpush1.bf16.msra.mxu1 %v8425_v60 }
0x2285   :  { %5919 = vmatprep.subr.bf16.mxu1 %v8426_v39 }
0x2319   :  { %v6648_v61 = vpop.f32.mrb[100].mxu0  ;;  %v5655_v37 = vpop.f32.mrb[104].mxu1 }
0x231a   :  { %v6649_v11 = vpop.f32.mrb[101].mxu0  ;;  %v7110_v63 = vpop.f32.mrb[105].mxu1  ;;  %v5661_v32 = vadd.f32 %v5655_v37, %v15164_v29  ;;  %v5663_v23 = vadd.f32 %v5655_v37, %v15165_v36  ;;  %v5665_v2 = vadd.f32 %v5655_v37, %v15166_v8  ;;  %v15254_v29 = vld [vmem:[#allocation82_spill] sm:$0xff]  ;;  %v5662_v19 = vadd.f32 %v5655_v37, %v15255_v58 }
0x231b   :  { %v6650_v5 = vadd.f32 %v6649_v11, %v6648_v61  ;;  %v6651_v38 = vpop.f32.mrb[102].mxu0  ;;  %v5658_v22 = vpop.f32.mrb[106].mxu1  ;;  %v5664_v6 = vadd.f32 %v5655_v37, %v15256_v28  ;;  %v5666_v27 = vadd.f32 %v5655_v37, %v15257_v51  ;;  %v5668_v0 = vadd.f32 %v5655_v37, %v15258_v31  ;;  %v15266_v31 = vld [vmem:[#allocation89_spill] sm:$0xff] }
0x231c   :  { %v6652_v30 = vpop.f32.mrb[103].mxu0  ;;  %v7111_v20 = vpop.f32.mrb[107].mxu1  ;;  %7938 = vtanh.f32 %v5661_v32 }
0x231d   :  { %v5498_v40 = vadd.f32 %v13328_v55, %v6650_v5  ;;  %7940 = vtanh.f32 %v5663_v23 }
0x231e   :  { %7942 = vtanh.f32 %v5665_v2 }
0x231f   :  { %v5538_v42 = vadd.f32 %v13715_v25, %v5498_v40  ;;  %v15253_v25 = vld [vmem:[#allocation17_spill] sm:$0xff] }
0x2320   :  { %v5667_v45 = vadd.f32 %v5655_v37, %v15253_v25 }
0x2321   :  { %6359 = vst [vmem:[%s14149_s14 + $0xa] sm:$0x3] %v5538_v42  ;;  %v5545_v10 = vsel %vm1881_vm1, %v5538_v42, -inf }
0x2322   :  { %5546 = vmax.xlane.f32.xlu1 %v5545_v10  ;;  %7944 = vtanh.f32 %v5667_v45  ;;  %v15259_v45 = vmov 1.0|1.0  }
0x2323   :  { %7946 = vtanh.f32 %v5662_v19  ;;  %v15265_v19 = vld [vmem:[#allocation88_spill] sm:$0xff] }
0x2324   :  { %7948 = vtanh.f32 %v5664_v6 }
0x2325   :  { %7950 = vtanh.f32 %v5666_v27 }
0x2326   :  { %v7939_v47 = vpop.eup %7938  ;;  %7952 = vtanh.f32 %v5668_v0 }
0x2327   :  { %v5677_v9 = vmul.f32 %v15254_v29, %v7939_v47  ;;  %v7941_v12 = vpop.eup %7940  ;;  %v15260_v47 = vld [vmem:[#allocation83_spill] sm:$0xff] }
0x2328   :  { %v5679_v8 = vmul.f32 %v15254_v29, %v7941_v12  ;;  %v7943_v59 = vpop.eup %7942 }
0x2329   :  { %v5685_v36 = vsel %vm1881_vm1, %v5677_v9, 0.0  ;;  %v5681_v43 = vmul.f32 %v15254_v29, %v7943_v59  ;;  %v15262_v9 = vld [vmem:[#allocation85_spill] sm:$0xff] }
0x232a   :  { %v5691_v4 = vsel %vm1881_vm1, %v5679_v8, 0.0 }
0x232b   :  { %v5697_v17 = vsel %vm1881_vm1, %v5681_v43, 0.0 }
0x232c   :  { %v7945_v18 = vpop.eup %7944 }
0x232d   :  { %v5683_v57 = vmul.f32 %v15254_v29, %v7945_v18  ;;  %v7947_v49 = vpop.eup %7946  ;;  %v15264_v18 = vld [vmem:[#allocation87_spill] sm:$0xff] }
0x232e   :  { %v5678_v60 = vmul.f32 %v15254_v29, %v7947_v49  ;;  %v7949_v39 = vpop.eup %7948 }
0x232f   :  { %v5703_v53 = vsel %vm1881_vm1, %v5683_v57, 0.0  ;;  %v5680_v11 = vmul.f32 %v15254_v29, %v7949_v39  ;;  %v7951_v63 = vpop.eup %7950 }
0x2330   :  { %v5688_v61 = vsel %vm1881_vm1, %v5678_v60, 0.0  ;;  %v5682_v37 = vmul.f32 %v15254_v29, %v7951_v63  ;;  %v7953_v38 = vpop.eup %7952  ;;  %v15267_v60 = vld [vmem:[#allocation90_spill] sm:$0xff] }
0x2331   :  { %v5694_v5 = vsel %vm1881_vm1, %v5680_v11, 0.0  ;;  %v5684_v30 = vmul.f32 %v15254_v29, %v7953_v38 }
0x2332   :  { %v5700_v22 = vsel %vm1881_vm1, %v5682_v37, 0.0 }
0x2333   :  { %v5706_v20 = vsel %vm1881_vm1, %v5684_v30, 0.0 }
0x23af   :  { %v5547_v16 = vpop.xlane.xlu1 %5546 }
0x23b0   :  { %vm5548_vm4 = vcmp.eq.f32.partialorder %v5538_v42, %v5547_v16 }
0x23b1   :  { %v5549_v55 = vsel %vm5548_vm4, %v15167_v33, 128 }
0x23b2   :  { %v5550_v1 = vsel %vm1881_vm1, %v5549_v55, 2147483647 }
0x23b3   :  { %v5552_v13 = vshra.s32 %v5550_v1, 16  ;;  %v5551_v26 = vand.u32 65535, %v5550_v1 }
0x23b5   :  { %v5554_v50 = vcvt.s32.f32 %v5552_v13  ;;  %v5553_v21 = vcvt.s32.f32 %v5551_v26  ;;  %v15261_v13 = vld [vmem:[#allocation84_spill] sm:$0xff] }
0x23b7   :  { %5555 = vmin.xlane.f32.xlu0 %v5554_v50 }
0x23bb   :  { %5686 = vadd.xlane.f32.xlu0 %v5685_v36  ;;  %v15263_v36 = vld [vmem:[#allocation86_spill] sm:$0xff] }
0x23bf   :  { %5692 = vadd.xlane.f32.xlu0 %v5691_v4 }
0x23c3   :  { %5698 = vadd.xlane.f32.xlu0 %v5697_v17 }
0x23c7   :  { %5704 = vadd.xlane.f32.xlu0 %v5703_v53 }
0x2444   :  { %v5556_v54 = vpop.xlane.xlu0 %5555 }
0x2445   :  { %vm5557_vm5 = vcmp.eq.f32.partialorder %v5554_v50, %v5556_v54  ;;  %v5562_v42 = vcvt.f32.s32 %v5556_v54 }
0x2446   :  { %v5558_v34 = vsel %vm5557_vm5, %v5553_v21, inf }
0x2447   :  { %5559 = vmin.xlane.f32.xlu1 %v5558_v34  ;;  %v5563_v23 = vshll.u32 %v5562_v42, 16 }
0x2448   :  { %v5687_v40 = vpop.xlane.xlu0 %5686 }
0x2449   :  { %v5709_v17 = vsel %vm1881_vm1, %v5687_v40, -inf }
0x244b   :  { %5689 = vadd.xlane.f32.xlu1 %v5688_v61  ;;  %v15268_v61 = vld [vmem:[#allocation91_spill] sm:$0xff] }
0x244c   :  { %v5693_v10 = vpop.xlane.xlu0 %5692 }
0x244d   :  { %v5711_v57 = vsel %vm1881_vm1, %v5693_v10, -inf }
0x244f   :  { %5695 = vadd.xlane.f32.xlu1 %v5694_v5 }
0x2450   :  { %v5699_v25 = vpop.xlane.xlu0 %5698 }
0x2451   :  { %v5713_v8 = vsel %vm1881_vm1, %v5699_v25, -inf }
0x2452   :  { %v5714_v28 = vmax.f32 %v5709_v17, %v5713_v8  ;;  %v15278_v17 = vld [vmem:[#allocation35_spill] sm:$0xff] }
0x2453   :  { %5701 = vadd.xlane.f32.xlu1 %v5700_v22  ;;  %v15269_v22 = vld [vmem:[#allocation29_spill] sm:$0xff] }
0x2454   :  { %v5705_v50 = vpop.xlane.xlu0 %5704 }
0x2457   :  { %5707 = vadd.xlane.f32.xlu1 %v5706_v20  ;;  %v15270_v20 = vld [vmem:[#allocation23_spill] sm:$0xff] }
0x24d4   :  { %v5560_v32 = vpop.xlane.xlu1 %5559 }
0x24d5   :  { %v5561_v2 = vcvt.f32.s32 %v5560_v32 }
0x24d7   :  { %v5564_v16 = vadd.s32 %v5563_v23, %v5561_v2  ;;  %v15272_v23 = vld [vmem:[#allocation30_spill] sm:$0xff] }
0x24d8   :  { %v5690_v55 = vpop.xlane.xlu1 %5689 }
0x24d9   :  { %vm5565_vm6 = vcmp.eq.s32.totalorder %v15167_v33, %v5564_v16  ;;  %v5717_v33 = vsel %vm1881_vm1, %v5705_v50, -inf  ;;  %v5710_v59 = vsel %vm1881_vm1, %v5690_v55, -inf  ;;  %v15273_v16 = vld [vmem:[#allocation31_spill] sm:$0xff] }
0x24da   :  { %vm6361_vm7 = vmpackc.low %vm5565_vm6, %vm5565_vm6  ;;  %v5718_v6 = vmax.f32 %v5711_v57, %v5717_v33 }
0x24db   :  { %7089 = vmatmul.mubr.msk.bf16.vlgmr.msra.gmra.mrb[104].mxu0 %vm6361_vm7, %v15259_v45 }
0x24dc   :  { %v5696_v1 = vpop.xlane.xlu1 %5695  ;;  %5797 = vmatpush1.bf16.msra.mxu0 %v15260_v47 }
0x24dd   :  { %5798 = vmatprep.subr.bf16.mxu0 %v15261_v13  ;;  %v5712_v53 = vsel %vm1881_vm1, %v5696_v1, -inf }
0x24e0   :  { %v5702_v29 = vpop.xlane.xlu1 %5701  ;;  %5799 = vmatpush1.bf16.msra.mxu0 %v15262_v9 }
0x24e1   :  { %v5715_v12 = vsel %vm1881_vm1, %v5702_v29, -inf  ;;  %5800 = vmatprep.subr.bf16.mxu0 %v15263_v36 }
0x24e2   :  { %v5716_v4 = vmax.f32 %v5710_v59, %v5715_v12  ;;  %v15276_v12 = vld [vmem:[#allocation34_spill] sm:$0xff] }
0x24e4   :  { %v5708_v43 = vpop.xlane.xlu1 %5707  ;;  %5801 = vmatpush1.bf16.msra.mxu0 %v15264_v18  ;;  %v5721_v27 = vmax.f32 %v5714_v28, %v5716_v4  ;;  %v15277_v4 = vld [vmem:[#allocation43_spill] sm:$0xff]  ;;  %v15279_v28 = vld [vmem:[#allocation44_spill] sm:$0xff] }
0x24e5   :  { %v5719_v58 = vsel %vm1881_vm1, %v5708_v43, -inf  ;;  %5802 = vmatprep.subr.bf16.mxu0 %v15265_v19 }
0x24e6   :  { %v5720_v51 = vmax.f32 %v5712_v53, %v5719_v58 }
0x24e8   :  { %v5722_v26 = vmax.f32 %v5718_v6, %v5720_v51  ;;  %5803 = vmatpush1.bf16.msra.mxu0 %v13416_v14 }
0x24e9   :  { %5804 = vmatprep.subr.bf16.mxu0 %v15266_v31 }
0x24ea   :  { %v5723_v0 = vmax.f32 %v5721_v27, %v5722_v26  ;;  %v15280_v27 = vld [vmem:[#allocation46_spill] sm:$0xff] }
0x24ec   :  { %v5724_v49 = vsub.f32 %v5687_v40, %v5723_v0  ;;  %v5725_v54 = vsub.f32 %v5690_v55, %v5723_v0  ;;  %v5726_v21 = vsub.f32 %v5693_v10, %v5723_v0  ;;  %v5727_v34 = vsub.f32 %v5696_v1, %v5723_v0  ;;  %5805 = vmatpush1.bf16.msra.mxu0 %v15267_v60  ;;  %v15271_v10 = vld [vmem:[#allocation22_spill] sm:$0xff]  ;;  %v15274_v55 = vld [vmem:[#allocation32_spill] sm:$0xff]  ;;  %v15284_v60 = vld [vmem:[#allocation47_spill] sm:$0xff] }
0x24ed   :  { %v5728_v39 = vsub.f32 %v5699_v25, %v5723_v0  ;;  %5806 = vmatprep.subr.bf16.mxu0 %v15268_v61  ;;  %v5729_v37 = vsub.f32 %v5702_v29, %v5723_v0  ;;  %v5730_v14 = vsub.f32 %v5705_v50, %v5723_v0  ;;  %v5731_v40 = vsub.f32 %v5708_v43, %v5723_v0  ;;  %v15275_v50 = vld [vmem:[#allocation33_spill] sm:$0xff] }
0x24ee   :  { %v5732_v11 = vmul.f32 1.442695, %v5724_v49  ;;  %v5734_v63 = vmul.f32 1.442695, %v5725_v54  ;;  %v5736_v5 = vmul.f32 1.442695, %v5726_v21 }
0x24ef   :  { %v5738_v38 = vmul.f32 1.442695, %v5727_v34  ;;  %v5740_v30 = vmul.f32 1.442695, %v5728_v39  ;;  %v5742_v42 = vmul.f32 1.442695, %v5729_v37 }
0x24f0   :  { %7954 = vpow2.f32 %v5732_v11  ;;  %5807 = vmatpush1.bf16.msra.mxu0 %v15269_v22  ;;  %v5744_v32 = vmul.f32 1.442695, %v5730_v14  ;;  %v5746_v2 = vmul.f32 1.442695, %v5731_v40  ;;  %v15281_v49 = vld [vmem:[#allocation92_spill] sm:$0xff]  ;;  %v15282_v21 = vld [vmem:[#allocation93_spill] sm:$0xff] }
0x24f1   :  { %7956 = vpow2.f32 %v5734_v63  ;;  %5808 = vmatprep.subr.bf16.mxu0 %v15270_v20  ;;  %v15283_v34 = vld [vmem:[#allocation36_spill] sm:$0xff]  ;;  %v15285_v39 = vld [vmem:[#allocation49_spill] sm:$0xff]  ;;  %v15287_v11 = vld [vmem:[#allocation50_spill] sm:$0xff] }
0x24f2   :  { %7958 = vpow2.f32 %v5736_v5  ;;  %v15286_v61 = vld [vmem:[#allocation37_spill] sm:$0xff]  ;;  %v15288_v5 = vld [vmem:[#allocation52_spill] sm:$0xff]  ;;  %v15289_v20 = vld [vmem:[#allocation38_spill] sm:$0xff] }
0x24f3   :  { %7960 = vpow2.f32 %v5738_v38 }
0x24f4   :  { %5809 = vmatpush1.bf16.msra.mxu0 %v15271_v10  ;;  %7962 = vpow2.f32 %v5740_v30 }
0x24f5   :  { %5810 = vmatprep.subr.bf16.mxu0 %v15272_v23  ;;  %7964 = vpow2.f32 %v5742_v42  ;;  %v15290_v42 = vld [vmem:[#allocation53_spill] sm:$0xff] }
0x24f6   :  { %7966 = vpow2.f32 %v5744_v32  ;;  %v15291_v32 = vld [vmem:[#allocation54_spill] sm:$0xff] }
0x24f7   :  { %7968 = vpow2.f32 %v5746_v2  ;;  %v15292_v2 = vld [vmem:[#allocation39_spill] sm:$0xff] }
0x24f8   :  { %5811 = vmatpush1.bf16.msra.mxu0 %v15273_v16  ;;  %v15293_v16 = vld [vmem:[#allocation56_spill] sm:$0xff] }
0x24f9   :  { %5812 = vmatprep.subr.bf16.mxu0 %v15274_v55 }
0x24fa   :  { %v7955_v25 = vpop.eup %7954 }
0x24fb   :  { %v7957_v45 = vpop.eup %7956  ;;  %v5748_v1 = vsel %vm1881_vm1, %v7955_v25, 0.0 }
0x24fc   :  { %v7959_v47 = vpop.eup %7958  ;;  %v5749_v13 = vsel %vm1881_vm1, %v7957_v45, 0.0  ;;  %5813 = vmatpush1.bf16.msra.mxu0 %v15275_v50 }
0x24fd   :  { %v7961_v29 = vpop.eup %7960  ;;  %v5750_v9 = vadd.f32 %v5749_v13, %v5748_v1  ;;  %5814 = vmatprep.subr.bf16.mxu0 %v15276_v12  ;;  %v5751_v36 = vsel %vm1881_vm1, %v7959_v47, 0.0  ;;  %v15294_v1 = vld [vmem:[#allocation57_spill] sm:$0xff] }
0x24fe   :  { %v7963_v8 = vpop.eup %7962  ;;  %v5753_v59 = vsel %vm1881_vm1, %v7961_v29, 0.0 }
0x24ff   :  { %v5752_v33 = vadd.f32 %v5751_v36, %v5750_v9  ;;  %v7965_v43 = vpop.eup %7964  ;;  %v5755_v57 = vsel %vm1881_vm1, %v7963_v8, 0.0 }
0x2500   :  { %5815 = vmatpush1.bf16.msra.mxu0 %v15277_v4  ;;  %v7967_v53 = vpop.eup %7966  ;;  %v5757_v19 = vsel %vm1881_vm1, %v7965_v43, 0.0 }
0x2501   :  { %v5754_v18 = vadd.f32 %v5753_v59, %v5752_v33  ;;  %5816 = vmatprep.subr.bf16.mxu0 %v15278_v17  ;;  %v7969_v6 = vpop.eup %7968  ;;  %v5759_v26 = vsel %vm1881_vm1, %v7967_v53, 0.0 }
0x2502   :  { %v5761_v0 = vsel %vm1881_vm1, %v7969_v6, 0.0 }
0x2503   :  { %v5756_v58 = vadd.f32 %v5755_v57, %v5754_v18 }
0x2504   :  { %5817 = vmatpush1.bf16.msra.mxu0 %v15279_v28 }
0x2505   :  { %v5758_v51 = vadd.f32 %v5757_v19, %v5756_v58  ;;  %5818 = vmatprep.subr.bf16.mxu0 %v15280_v27  ;;  %v6364_v27 = vld [vmem:[%s14137_s2 + $0x6] sm:$0x1] }
0x2507   :  { %v5760_v31 = vadd.f32 %v5759_v26, %v5758_v51 }
0x2508   :  { %5819 = vmatpush1.bf16.msra.mxu0 %v15281_v49 }
0x2509   :  { %v5762_v54 = vadd.f32 %v5761_v0, %v5760_v31  ;;  %5820 = vmatprep.subr.bf16.mxu0 %v15282_v21  ;;  %v8427_v21 = vld [vmem:[%s14145_s10 + $0x200] ss:$16 sps:$4 sm:$0xff]  }
0x250b   :  { %7970 = vrcp.f32 %v5762_v54 }
0x250c   :  { %5821 = vmatpush1.bf16.msra.mxu0 %v15283_v34  ;;  %v8428_v34 = vld [vmem:[%s14145_s10 + $0x208] ss:$16 sps:$4 sm:$0xff]  }
0x250d   :  { %5822 = vmatprep.subr.bf16.mxu0 %v15284_v60  ;;  %v8429_v60 = vld [vmem:[%s14145_s10 + $0x224] ss:$16 sps:$4 sm:$0xff]  }
0x2510   :  { %5823 = vmatpush1.bf16.msra.mxu0 %v15285_v39  ;;  %v8430_v39 = vld [vmem:[%s14145_s10 + $0x22c] ss:$16 sps:$4 sm:$0xff]  }
0x2511   :  { %5824 = vmatprep.subr.bf16.mxu0 %v15286_v61  ;;  %v8431_v61 = vld [vmem:[%s14145_s10 + $0x220] ss:$16 sps:$4 sm:$0xff]  }
0x2514   :  { %5825 = vmatpush1.bf16.msra.mxu0 %v15287_v11  ;;  %v8432_v11 = vld [vmem:[%s14145_s10 + $0x228] ss:$16 sps:$4 sm:$0xff]  }
0x2515   :  { %v7971_v63 = vpop.eup %7970  ;;  %5826 = vmatprep.subr.bf16.mxu0 %v15288_v5  ;;  %v8434_v5 = vld [vmem:[%s14145_s10 + $0x24c] ss:$16 sps:$4 sm:$0xff]  }
0x2516   :  { %v5764_v37 = vmul.f32 %v7971_v63, %v7955_v25  ;;  %v5765_v38 = vmul.f32 %v7971_v63, %v7957_v45  ;;  %v5766_v22 = vmul.f32 %v7971_v63, %v7959_v47  ;;  %v5767_v14 = vmul.f32 %v7971_v63, %v7961_v29 }
0x2517   :  { %v5768_v30 = vmul.f32 %v7971_v63, %v7963_v8  ;;  %v5769_v55 = vmul.f32 %v7971_v63, %v7965_v43  ;;  %v5770_v47 = vmul.f32 %v7971_v63, %v7967_v53  ;;  %v5771_v36 = vmul.f32 %v7971_v63, %v7969_v6  ;;  %v8433_v63 = vld [vmem:[%s14145_s10 + $0x244] ss:$16 sps:$4 sm:$0xff]  }
0x2518   :  { %v5772_v40 = vmul.f32 %v15289_v20, %v5764_v37  ;;  %v5773_v10 = vmul.f32 %v15290_v42, %v5765_v38  ;;  %v5774_v23 = vmul.f32 %v15291_v32, %v5766_v22  ;;  %5827 = vmatpush1.bf16.msra.mxu0 %v15292_v2  ;;  %v5775_v13 = vmul.f32 %v15294_v1, %v5767_v14  ;;  %v8436_v37 = vld [vmem:[%s14145_s10 + $0x248] ss:$16 sps:$4 sm:$0xff]   ;;  %v8437_v38 = vld [vmem:[%s14145_s10 + $0x264] ss:$16 sps:$4 sm:$0xff]   ;;  %v8438_v22 = vld [vmem:[%s14145_s10 + $0x26c] ss:$16 sps:$4 sm:$0xff]  }
0x2519   :  { %5837 = vmatprep.subr.bf16.mxu0 %v15293_v16  ;;  %v5776_v29 = vmul.f32 %v13591_v48, %v5768_v30  ;;  %v5777_v8 = vmul.f32 %v13595_v56, %v5769_v55  ;;  %v5778_v4 = vmul.f32 %v13599_v44, %v5770_v47  ;;  %v5779_v17 = vmul.f32 %v13603_v46, %v5771_v36  ;;  %v8439_v14 = vld [vmem:[%s14145_s10 + $0x260] ss:$16 sps:$4 sm:$0xff]   ;;  %v8440_v30 = vld [vmem:[%s14145_s10 + $0x268] ss:$16 sps:$4 sm:$0xff]   ;;  %v8441_v20 = vld [vmem:[%s14145_s10 + $0x284] ss:$16 sps:$4 sm:$0xff]  }
0x251a   :  { %v5780_v50 = vsel %vm1881_vm1, %v5772_v40, 0.0  ;;  %v5781_v25 = vsel %vm1881_vm1, %v5773_v10, 0.0  ;;  %v5783_v9 = vsel %vm1881_vm1, %v5774_v23, 0.0  ;;  %v5785_v33 = vsel %vm1881_vm1, %v5775_v13, 0.0  ;;  %v8442_v40 = vld [vmem:[%s14145_s10 + $0x28c] ss:$16 sps:$4 sm:$0xff]  }
0x251b   :  { %v5782_v45 = vadd.f32 %v5781_v25, %v5780_v50  ;;  %v5787_v43 = vsel %vm1881_vm1, %v5776_v29, 0.0  ;;  %v5789_v57 = vsel %vm1881_vm1, %v5777_v8, 0.0  ;;  %v5791_v48 = vsel %vm1881_vm1, %v5778_v4, 0.0  ;;  %v8443_v42 = vld [vmem:[%s14145_s10 + $0x280] ss:$16 sps:$4 sm:$0xff]   ;;  %v8461_v8 = vld [vmem:[%s14147_s12 + $0x88] sm:$0xff]  }
0x251c   :  { %v5793_v19 = vsel %vm1881_vm1, %v5779_v17, 0.0  ;;  %v5615_v44 = vstv %s5614_s21  ;;  %v8444_v10 = vld [vmem:[%s14145_s10 + $0x288] ss:$16 sps:$4 sm:$0xff]   ;;  %v8445_v32 = vld [vmem:[%s14145_s10 + $0x2a4] ss:$16 sps:$4 sm:$0xff]  }
0x251d   :  { %v5784_v12 = vadd.f32 %v5783_v9, %v5782_v45  ;;  %vm5616_vm8 = vcmp.eq.s32.totalorder %v5615_v44, 1  ;;  %v8446_v23 = vld [vmem:[%s14145_s10 + $0x2ac] ss:$16 sps:$4 sm:$0xff]   ;;  %v8447_v2 = vld [vmem:[%s14145_s10 + $0x2a0] ss:$16 sps:$4 sm:$0xff]  }
0x251e   :  { %v5617_v46 = vsel %vm5616_vm8, 1, %v14710_v3  ;;  %v8448_v16 = vld [vmem:[%s14145_s10 + $0x2a8] ss:$16 sps:$4 sm:$0xff]   ;;  %v8449_v55 = vld [vmem:[%s14145_s10 + $0x2c4] ss:$16 sps:$4 sm:$0xff]  }
0x251f   :  { %v5786_v59 = vadd.f32 %v5785_v33, %v5784_v12  ;;  %v5618_v6 = vpack.c.b16 %v5617_v46, %v5617_v46  ;;  %v8450_v1 = vld [vmem:[%s14145_s10 + $0x2cc] ss:$16 sps:$4 sm:$0xff]   ;;  %v8451_v13 = vld [vmem:[%s14145_s10 + $0x2c0] ss:$16 sps:$4 sm:$0xff]   ;;  %v8452_v50 = vld [vmem:[%s14145_s10 + $0x2c8] ss:$16 sps:$4 sm:$0xff]  }
0x2520   :  { %v8453_v25 = vld [vmem:[%s14145_s10 + $0x2e4] ss:$16 sps:$4 sm:$0xff]   ;;  %v8454_v45 = vld [vmem:[%s14145_s10 + $0x2ec] ss:$16 sps:$4 sm:$0xff]   ;;  %v8455_v47 = vld [vmem:[%s14145_s10 + $0x2e0] ss:$16 sps:$4 sm:$0xff]  }
0x2521   :  { %v5788_v18 = vadd.f32 %v5787_v43, %v5786_v59  ;;  %vm5619_vm1 = vcmp.ne.s16.totalorder %v5618_v6, 0  ;;  %v8456_v29 = vld [vmem:[%s14145_s10 + $0x2e8] ss:$16 sps:$4 sm:$0xff]   ;;  %v8457_v9 = vld [vmem:[%s14147_s12 + $0x40] sm:$0xff]   ;;  %v8463_v59 = vld [vmem:[%s14147_s12 + $0x50] sm:$0xff]  }
0x2522   :  { %v8458_v12 = vld [vmem:[%s14147_s12 + $0x80] sm:$0xff]   ;;  %v8462_v33 = vld [vmem:[%s14147_s12 + $0x8] sm:$0xff]   ;;  %v8464_v4 = vld [vmem:[%s14147_s12 + $0x90] sm:$0xff]  }
0x2523   :  { %v5790_v53 = vadd.f32 %v5789_v57, %v5788_v18  ;;  %v8459_v36 = vld [vmem:[%s14147_s12] sm:$0xff]   ;;  %v8465_v43 = vld [vmem:[%s14147_s12 + $0x10] sm:$0xff]   ;;  %v8466_v18 = vld [vmem:[%s14147_s12 + $0x58] sm:$0xff]  }
0x2524   :  { %v8467_v17 = vld [vmem:[%s14147_s12 + $0x98] sm:$0xff]   ;;  %v8475_v44 = vld [vmem:[%s14147_s12 + $0x70] sm:$0xff]  }
0x2525   :  { %v5792_v58 = vadd.f32 %v5791_v48, %v5790_v53  ;;  %v8468_v57 = vld [vmem:[%s14147_s12 + $0x18] sm:$0xff]   ;;  %v8469_v53 = vld [vmem:[%s14147_s12 + $0x60] sm:$0xff]   ;;  %v8476_v46 = vld [vmem:[%s14147_s12 + $0xb0] sm:$0xff]  }
0x2526   :  { %v8470_v48 = vld [vmem:[%s14147_s12 + $0xa0] sm:$0xff]   ;;  %v8477_v6 = vld [vmem:[%s14147_s12 + $0x30] sm:$0xff]  }
0x2527   :  { %v5794_v28 = vadd.f32 %v5793_v19, %v5792_v58  ;;  %v8471_v58 = vld [vmem:[%s14147_s12 + $0x20] sm:$0xff]   ;;  %v8472_v19 = vld [vmem:[%s14147_s12 + $0x68] sm:$0xff]  }
0x2529   :  { %v13934_v56 = vpack.c.bf16 %v5794_v28, %v5794_v28  ;;  %v8473_v28 = vld [vmem:[%s14147_s12 + $0xa8] sm:$0xff]  }
0x252b   :  { %5828 = vmatprep.mubr.bf16.mxu0 %v13934_v56  ;;  %5910 = vmatprep.mubr.bf16.mxu1 %v13934_v56 }
0x25ae   :  { %v5603_v51 = vpop.f32.mrb[104].mxu0 }
0x25af   :  { %v5609_v26 = vpack.c.bf16 %v5603_v51, %v5603_v51  ;;  %v7090_v31 = vpop.f32.mrb[105].mxu0  ;;  %v8478_v51 = vld [vmem:[%s14147_s12 + $0x78] sm:$0xff]  }
0x25b0   :  { %v5606_v0 = vpop.f32.mrb[106].mxu0 }
0x25b1   :  { %v7091_v49 = vpop.f32.mrb[107].mxu0  ;;  %v13942_v54 = vsel %vm5619_vm1, %v6364_v27, %v5609_v26  ;;  %v8479_v27 = vld [vmem:[%s14147_s12 + $0xb8] sm:$0xff]  }
0x25b2   :  { %5829 = vmatmul.mubr.bf16.vlgmr.msra.gmra.mrb[108].mxu0 %v13942_v54  ;;  %5911 = vmatmul.mubr.bf16.vlgmr.msra.gmra.mrb[108].mxu1 %v13942_v54  ;;  %v8480_v26 = vld [vmem:[%s14147_s12 + $0x38] sm:$0xff]  }
0x25b3   :  { %5838 = vmatpush1.bf16.msra.mxu0 %v8427_v21  ;;  %5920 = vmatpush1.bf16.msra.mxu1 %v8428_v34 }
0x25b4   :  { %5839 = vmatprep.subr.bf16.mxu0 %v8429_v60  ;;  %5921 = vmatprep.subr.bf16.mxu1 %v8430_v39 }
0x25b5   :  { %5869 = vmatprep.mubr.bf16.mxu0 %v14710_v3  ;;  %5951 = vmatprep.mubr.bf16.mxu1 %v14710_v3  ;;  %v8435_v3 = vld [vmem:[%s14145_s10 + $0x240] ss:$16 sps:$4 sm:$0xff]  }
0x25b7   :  { %5840 = vmatpush1.bf16.msra.mxu0 %v8431_v61  ;;  %5922 = vmatpush1.bf16.msra.mxu1 %v8432_v11 }
0x25b8   :  { %5841 = vmatprep.subr.bf16.mxu0 %v8433_v63  ;;  %5923 = vmatprep.subr.bf16.mxu1 %v8434_v5 }
0x25bb   :  { %5842 = vmatpush1.bf16.msra.mxu0 %v8435_v3  ;;  %5924 = vmatpush1.bf16.msra.mxu1 %v8436_v37 }
0x25bc   :  { %5843 = vmatprep.subr.bf16.mxu0 %v8437_v38  ;;  %5925 = vmatprep.subr.bf16.mxu1 %v8438_v22 }
0x25bf   :  { %5844 = vmatpush1.bf16.msra.mxu0 %v8439_v14  ;;  %5926 = vmatpush1.bf16.msra.mxu1 %v8440_v30 }
0x25c0   :  { %5845 = vmatprep.subr.bf16.mxu0 %v8441_v20  ;;  %5927 = vmatprep.subr.bf16.mxu1 %v8442_v40 }
0x25c3   :  { %5846 = vmatpush1.bf16.msra.mxu0 %v8443_v42  ;;  %5928 = vmatpush1.bf16.msra.mxu1 %v8444_v10 }
0x25c4   :  { %5847 = vmatprep.subr.bf16.mxu0 %v8445_v32  ;;  %5929 = vmatprep.subr.bf16.mxu1 %v8446_v23 }
0x25c7   :  { %5848 = vmatpush1.bf16.msra.mxu0 %v8447_v2  ;;  %5930 = vmatpush1.bf16.msra.mxu1 %v8448_v16 }
0x25c8   :  { %5849 = vmatprep.subr.bf16.mxu0 %v8449_v55  ;;  %5931 = vmatprep.subr.bf16.mxu1 %v8450_v1 }
0x25cb   :  { %5850 = vmatpush1.bf16.msra.mxu0 %v8451_v13  ;;  %5932 = vmatpush1.bf16.msra.mxu1 %v8452_v50 }
0x25cc   :  { %5851 = vmatprep.subr.bf16.mxu0 %v8453_v25  ;;  %5933 = vmatprep.subr.bf16.mxu1 %v8454_v45 }
0x25cf   :  { %5852 = vmatpush1.bf16.msra.mxu0 %v8455_v47  ;;  %5934 = vmatpush1.bf16.msra.mxu1 %v8456_v29 }
0x25d0   :  { %7112 = vmatprep.subr.bf16.mxu1 %v14720_v62  ;;  %6681 = vmatprep.subr.bf16.mxu0 %v8457_v9 }
0x25d2   :  { %5870 = vmatmul.mubr.bf16.vlgmr.msra.gmra.mrb[108].mxu0 %v13718_v41  ;;  %5952 = vmatmul.mubr.bf16.vlgmr.msra.gmra.mrb[108].mxu1 %v13718_v41  ;;  %v8460_v41 = vld [vmem:[%s14147_s12 + $0x48] sm:$0xff]  }
0x25d3   :  { %6017 = vmatprep.mubr.bf16.mxu0 %v13934_v56  ;;  %7113 = vmatpush3.bf16.msra.mxu1 %v8458_v12  ;;  %v8474_v56 = vld [vmem:[%s14147_s12 + $0x28] sm:$0xff]  }
0x25d4   :  { %7114 = vmatprep.subr.bf16.mxu1 %v14720_v62  ;;  %7128 = vmatprep.mubr.msk.bf16.mxu1 %vm8499_vm0, %v14720_v62 }
0x25d5   :  { %6682 = vmatpush3.bf16.msra.mxu0 %v8459_v36 }
0x25d6   :  { %6683 = vmatprep.subr.bf16.mxu0 %v8460_v41 }
0x25d7   :  { %7115 = vmatpush3.bf16.msra.mxu1 %v8461_v8 }
0x25d8   :  { %7116 = vmatprep.subr.bf16.mxu1 %v14720_v62 }
0x25d9   :  { %6684 = vmatpush3.bf16.msra.mxu0 %v8462_v33 }
0x25da   :  { %6685 = vmatprep.subr.bf16.mxu0 %v8463_v59 }
0x25db   :  { %7117 = vmatpush3.bf16.msra.mxu1 %v8464_v4 }
0x25dc   :  { %7118 = vmatprep.subr.bf16.mxu1 %v14720_v62 }
0x25dd   :  { %6686 = vmatpush3.bf16.msra.mxu0 %v8465_v43 }
0x25de   :  { %6687 = vmatprep.subr.bf16.mxu0 %v8466_v18 }
0x25df   :  { %7119 = vmatpush3.bf16.msra.mxu1 %v8467_v17 }
0x25e0   :  { %7120 = vmatprep.subr.bf16.mxu1 %v14720_v62 }
0x25e1   :  { %6688 = vmatpush3.bf16.msra.mxu0 %v8468_v57 }
0x25e2   :  { %6689 = vmatprep.subr.bf16.mxu0 %v8469_v53 }
0x25e3   :  { %7121 = vmatpush3.bf16.msra.mxu1 %v8470_v48 }
0x25e4   :  { %7122 = vmatprep.subr.bf16.mxu1 %v14720_v62 }
0x25e5   :  { %6690 = vmatpush3.bf16.msra.mxu0 %v8471_v58 }
0x25e6   :  { %6691 = vmatprep.subr.bf16.mxu0 %v8472_v19 }
0x25e7   :  { %7123 = vmatpush3.bf16.msra.mxu1 %v8473_v28 }
0x25e8   :  { %7124 = vmatprep.subr.bf16.mxu1 %v14720_v62 }
0x25e9   :  { %6692 = vmatpush3.bf16.msra.mxu0 %v8474_v56 }
0x25ea   :  { %6693 = vmatprep.subr.bf16.mxu0 %v8475_v44 }
0x25eb   :  { %7125 = vmatpush3.bf16.msra.mxu1 %v8476_v46 }
0x25ec   :  { %7126 = vmatprep.subr.bf16.mxu1 %v14720_v62 }
0x25ed   :  { %6694 = vmatpush3.bf16.msra.mxu0 %v8477_v6 }
0x25ee   :  { %6695 = vmatprep.subr.bf16.mxu0 %v8478_v51 }
0x25ef   :  { %7127 = vmatpush3.bf16.msra.mxu1 %v8479_v27 }
0x25f1   :  { %6696 = vmatpush3.bf16.msra.mxu0 %v8480_v26 }
0x25f2   :  { %7129 = vmatmul.mubr.bf16.vlgmr.msra.gmra.mrb[112].mxu1 %v13942_v54 }
0x26a5   :  { %v5871_v62 = vpop.f32.mrb[108].mxu0  ;;  %v5953_v31 = vpop.f32.mrb[108].mxu1 }
0x26a6   :  { %v7156_v0 = vadd.f32 %v5871_v62, %v15252_v7  ;;  %v5873_v49 = vpop.f32.mrb[109].mxu0  ;;  %v5955_v21 = vpop.f32.mrb[109].mxu1  ;;  %v7158_v54 = vadd.f32 %v5953_v31, %v10749_v15 }
0x26a7   :  { %v7157_v34 = vadd.f32 %v5873_v49, %v10738_v24  ;;  %v5875_v60 = vpop.f32.mrb[110].mxu0  ;;  %v5957_v39 = vpop.f32.mrb[110].mxu1  ;;  %v7159_v3 = vadd.f32 %v5955_v21, %v10744_v52 }
0x26a8   :  { %v6365_v61 = vmul.f32 -1.442695, %v7156_v0  ;;  %v5876_v11 = vpop.f32.mrb[111].mxu0  ;;  %v5958_v63 = vpop.f32.mrb[111].mxu1 }
0x26a9   :  { %v6366_v5 = vmul.f32 -1.442695, %v7157_v34  ;;  %v6367_v37 = vmul.f32 -1.442695, %v7159_v3 }
0x26aa   :  { %7972 = vpow2.f32 %v6365_v61 }
0x26ab   :  { %7974 = vpow2.f32 %v6366_v5 }
0x26ac   :  { %7976 = vpow2.f32 %v6367_v37 }
0x26ad   :  { %7978 = vtanh.f32 %v7158_v54 }
0x26b4   :  { %v7973_v38 = vpop.eup %7972 }
0x26b5   :  { %v7975_v22 = vpop.eup %7974  ;;  %v5963_v7 = vadd.f32 1.0, %v7973_v38 }
0x26b6   :  { %v5969_v14 = vadd.f32 1.0, %v7975_v22  ;;  %v7977_v24 = vpop.eup %7976 }
0x26b7   :  { %7980 = vrcp.f32 %v5963_v7  ;;  %v7979_v30 = vpop.eup %7978  ;;  %v5976_v10 = vadd.f32 1.0, %v7977_v24 }
0x26b8   :  { %7982 = vrcp.f32 %v5969_v14 }
0x26b9   :  { %7984 = vrcp.f32 %v5976_v10 }
0x26c1   :  { %v7981_v20 = vpop.eup %7980 }
0x26c2   :  { %v7983_v40 = vpop.eup %7982  ;;  %v5980_v42 = vmul.f32 %v7981_v20, %v7979_v30 }
0x26c3   :  { %v5979_v32 = vmul.f32 %v7983_v40, %v13713_v35  ;;  %v7985_v55 = vpop.eup %7984  ;;  %v8481_v35 = vld [vmem:[%s14148_s13] ss:$0 sm:$0xff] }
0x26c5   :  { %v5981_v52 = vadd.f32 %v5980_v42, %v5979_v32  ;;  %v6059_v23 = vpop.f32.mrb[112].mxu1 }
0x26c6   :  { %v7130_v15 = vpop.f32.mrb[113].mxu1 }
0x26c7   :  { %7986 = vtanh.f32 %v5981_v52  ;;  %v6062_v2 = vpop.f32.mrb[114].mxu1 }
0x26c8   :  { %v7131_v16 = vpop.f32.mrb[115].mxu1 }
0x26d1   :  { %v7987_v1 = vpop.eup %7986 }
0x26d2   :  { %v5983_v13 = vmul.f32 %v7987_v1, %v7985_v55 }
0x26d4   :  { %v5984_v50 = vpack.c.bf16 %v5983_v13, %v5983_v13 }
0x26d6   :  { %6018 = vmatmul.mubr.bf16.vlgmr.msra.gmra.mrb[112].mxu0 %v5984_v50 }
0x27a9   :  { %v6697_v25 = vpop.f32.mrb[112].mxu0 }
0x27aa   :  { %v6698_v45 = vpop.f32.mrb[113].mxu0 }
0x27ab   :  { %v6699_v47 = vadd.f32 %v6698_v45, %v6697_v25  ;;  %v6700_v29 = vpop.f32.mrb[114].mxu0 }
0x27ac   :  { %v6701_v9 = vpop.f32.mrb[115].mxu0 }
0x27ad   :  { %v6020_v12 = vadd.f32 %v8481_v35, %v6699_v47 }
0x27af   :  { %v6060_v36 = vadd.f32 %v6059_v23, %v6020_v12 }
0x27b1   :  { %6368 = vst [vmem:[%s14149_s14 + $0xc] sm:$0x3] %v6060_v36 }

</bundles_post_ra>
